<compile_context>
chip_gen: v6e
topology: v6e:2x2x1
jax: 0.10.0
libtpu: 0.0.40
codegen_flags: <defaults>
</compile_context>

<pallas_src>
import jax
import jax.numpy as jnp
from jax import lax
from jax.experimental import pallas as pl
from jax.experimental.pallas import tpu as pltpu


def lstm_kernel(emb_ref,
                wih0f_ref, whh0f_ref, b0f_ref,
                wih0b_ref, whh0b_ref, b0b_ref,
                wih1f_ref, whh1f_ref, b1f_ref,
                wih1b_ref, whh1b_ref, b1b_ref,
                fc1w_ref, fc1b_ref, fc2w_ref, fc2b_ref,
                out_ref,
                xg_ref, h0f_ref, h0b_ref):
    """One batch tile: 2-layer bidirectional LSTM + (fc1 -> relu -> fc2) head.

    emb_ref : (L, TB, Ep) bf16  time-major embedded inputs
    wih*    : (D, 4H)     bf16  input-to-hidden weights (D = Ep for layer 0, 2H for layer 1)
    whh*    : (H, 4H)     bf16  hidden-to-hidden weights
    b*      : (1, 4H)     f32   combined bias (b_ih + b_hh), gate order (i, f, g, o)
    fc1w (2H, INT) bf16, fc1b (1, INT) f32, fc2w (INT, OUT) bf16, fc2b (1, OUT) f32
    out_ref : (TB, OUT)   f32
    scratch : xg_ref (L, TB, 4H) f32   hoisted input projections for the active pass
              h0f_ref / h0b_ref (L, TB, H) bf16  layer-0 forward / backward output sequences
    """
    L, TB, Ep = emb_ref.shape
    H = whh0f_ref.shape[0]
    GH = 4 * H

    def scan_direction(w_hh_ref, reverse, h_out_ref=None):
        """LSTM cell recurrence over xg_ref; returns the final hidden state (f32)."""
        w_hh = w_hh_ref[...]                                   # hoisted out of the loop

        def step(i, carry):
            h, c = carry
            t = (L - 1 - i) if reverse else i                  # static choice of direction
            gates = xg_ref[t] + jnp.dot(h.astype(w_hh.dtype), w_hh,
                                        preferred_element_type=jnp.float32)
            i_g = jax.nn.sigmoid(gates[:, 0 * H:1 * H])        # 128-aligned lane slices
            f_g = jax.nn.sigmoid(gates[:, 1 * H:2 * H])
            g_g = jnp.tanh(gates[:, 2 * H:3 * H])
            o_g = jax.nn.sigmoid(gates[:, 3 * H:4 * H])
            c = f_g * c + i_g * g_g
            h = o_g * jnp.tanh(c)
            if h_out_ref is not None:
                h_out_ref[t] = h.astype(h_out_ref.dtype)
            return h, c

        init = (jnp.zeros((TB, H), jnp.float32), jnp.zeros((TB, H), jnp.float32))
        h_fin, _ = lax.fori_loop(0, L, step, init)
        return h_fin

    # ---------------- layer 0 (input = embeddings) ----------------
    x0 = emb_ref[...].reshape(L * TB, Ep)                      # tile-aligned merge, bf16

    xg_ref[...] = (jnp.dot(x0, wih0f_ref[...], preferred_element_type=jnp.float32)
                   + b0f_ref[...]).reshape(L, TB, GH)
    scan_direction(whh0f_ref, reverse=False, h_out_ref=h0f_ref)

    xg_ref[...] = (jnp.dot(x0, wih0b_ref[...], preferred_element_type=jnp.float32)
                   + b0b_ref[...]).reshape(L, TB, GH)
    scan_direction(whh0b_ref, reverse=True, h_out_ref=h0b_ref)

    # ------- layer 1 (input = [h0_fwd || h0_bwd]; inter-layer dropout = identity) -------
    h0f = h0f_ref[...].reshape(L * TB, H)                      # bf16
    h0b = h0b_ref[...].reshape(L * TB, H)

    wih1f = wih1f_ref[...]                                     # (2H, 4H) bf16
    xg_ref[...] = ((jnp.dot(h0f, wih1f[:H, :], preferred_element_type=jnp.float32)
                    + jnp.dot(h0b, wih1f[H:, :], preferred_element_type=jnp.float32))
                   + b1f_ref[...]).reshape(L, TB, GH)
    h_last_f = scan_direction(whh1f_ref, reverse=False)        # == h_n[-2]

    wih1b = wih1b_ref[...]
    xg_ref[...] = ((jnp.dot(h0f, wih1b[:H, :], preferred_element_type=jnp.float32)
                    + jnp.dot(h0b, wih1b[H:, :], preferred_element_type=jnp.float32))
                   + b1b_ref[...]).reshape(L, TB, GH)
    h_last_b = scan_direction(whh1b_ref, reverse=True)         # == h_n[-1]

    # ---- head: cat(f,b) @ fc1 done as two half-dots (no lane concat) -> relu -> fc2 ----
    fc1w = fc1w_ref[...]
    z = (jnp.dot(h_last_f.astype(fc1w.dtype), fc1w[:H, :], preferred_element_type=jnp.float32)
         + jnp.dot(h_last_b.astype(fc1w.dtype), fc1w[H:, :], preferred_element_type=jnp.float32)
         + fc1b_ref[...])
    z = jnp.maximum(z, 0.0)                                    # relu; dropout = identity
    fc2w = fc2w_ref[...]
    out_ref[...] = (jnp.dot(z.astype(fc2w.dtype), fc2w, preferred_element_type=jnp.float32)
                    + fc2b_ref[...])


def rnn_lstm_forward(emb_tm, lstm_params, fc1_w, fc1_b, fc2_w, fc2_b, *, batch_tile=16):
    """emb_tm: (L, B, Ep) bf16 time-major embedded input (Ep padded to a multiple of 8).
    lstm_params: [(w_ih, w_hh, b)] for [layer0-fwd, layer0-bwd, layer1-fwd, layer1-bwd].
    Returns (B, OUT) f32 logits."""
    L, B, Ep = emb_tm.shape
    H = lstm_params[0][1].shape[0]
    GH = 4 * H
    INT = fc1_w.shape[1]
    OUT = fc2_w.shape[1]
    TB = batch_tile
    assert B % TB == 0, "batch must be a multiple of the batch tile"
    assert TB % 16 == 0, "batch tile should be a multiple of 16 (bf16 sublane tile)"

    def rep(x):  # full-array block, same index every grid step -> kept resident in VMEM
        return pl.BlockSpec(x.shape, lambda b, _nd=x.ndim: (0,) * _nd)

    flat_inputs = [emb_tm]
    in_specs = [pl.BlockSpec((L, TB, Ep), lambda b: (0, b, 0))]
    for (w_ih, w_hh, bias) in lstm_params:
        flat_inputs += [w_ih, w_hh, bias]
        in_specs += [rep(w_ih), rep(w_hh), rep(bias)]
    flat_inputs += [fc1_w, fc1_b, fc2_w, fc2_b]
    in_specs += [rep(fc1_w), rep(fc1_b), rep(fc2_w), rep(fc2_b)]

    grid_spec = pltpu.PrefetchScalarGridSpec(
        num_scalar_prefetch=0,
        grid=(B // TB,),
        in_specs=in_specs,
        out_specs=pl.BlockSpec((TB, OUT), lambda b: (b, 0)),
        scratch_shapes=[
            pltpu.VMEM((L, TB, GH), jnp.float32),   # hoisted input projections (active pass)
            pltpu.VMEM((L, TB, H), jnp.bfloat16),   # layer-0 forward output sequence
            pltpu.VMEM((L, TB, H), jnp.bfloat16),   # layer-0 backward output sequence
        ],
    )

    # advisory cost estimate so XLA schedules the surrounding graph sensibly
    flops = (2 * (2 * L * B * Ep * GH + 2 * L * B * H * GH)           # layer 0 fwd+bwd
             + 2 * (2 * L * B * (2 * H) * GH + 2 * L * B * H * GH)    # layer 1 fwd+bwd
             + 2 * B * (2 * H) * INT + 2 * B * INT * OUT)             # head
    transcendentals = 4 * L * B * 5 * H                               # 3 sigmoid + 2 tanh / step
    bytes_accessed = (sum(int(x.size) * x.dtype.itemsize for x in flat_inputs) + B * OUT * 4)

    return pl.pallas_call(
        lstm_kernel,
        out_shape=jax.ShapeDtypeStruct((B, OUT), jnp.float32),
        grid_spec=grid_spec,
        compiler_params=pltpu.CompilerParams(
            dimension_semantics=("parallel",),      # shard batch tiles across cores (v7x)
            vmem_limit_bytes=32 * 1024 * 1024,      # well within v5e/v6e/v7x budgets
        ),
        cost_estimate=pl.CostEstimate(flops=int(flops),
                                      transcendentals=int(transcendentals),
                                      bytes_accessed=int(bytes_accessed)),
    )(*flat_inputs)


def lstm_ref_f32(emb_tm, lstm_params, fc1_w, fc1_b, fc2_w, fc2_b, H):
    """Pure-JAX f32 reference with PyTorch LSTM semantics (inference: dropout = identity)."""
    L, B, _ = emb_tm.shape

    def run_dir(x_seq, w_ih, w_hh, b, reverse):
        h = jnp.zeros((B, H), jnp.float32)
        c = jnp.zeros((B, H), jnp.float32)
        outs = [None] * L
        order = range(L - 1, -1, -1) if reverse else range(L)
        for t in order:
            g = x_seq[t] @ w_ih + h @ w_hh + b
            i_g = jax.nn.sigmoid(g[:, :H])
            f_g = jax.nn.sigmoid(g[:, H:2 * H])
            g_g = jnp.tanh(g[:, 2 * H:3 * H])
            o_g = jax.nn.sigmoid(g[:, 3 * H:])
            c = f_g * c + i_g * g_g
            h = o_g * jnp.tanh(c)
            outs[t] = h
        return jnp.stack(outs, axis=0), h

    y0f, _ = run_dir(emb_tm, *lstm_params[0], False)
    y0b, _ = run_dir(emb_tm, *lstm_params[1], True)
    x1 = jnp.concatenate([y0f, y0b], axis=-1)
    _, h_f = run_dir(x1, *lstm_params[2], False)
    _, h_b = run_dir(x1, *lstm_params[3], True)
    feat = jnp.concatenate([h_f, h_b], axis=-1)
    z = jnp.maximum(feat @ fc1_w + fc1_b, 0.0)
    return z @ fc2_w + fc2_b


if __name__ == "__main__":
    # small shapes consistent with the module (E=50, H=128, 2 layers, bidir, internal=32, out=2)
    B, L = 32, 16
    VOCAB, E, H = 512, 50, 128          # vocab reduced from 59290 for the in-script demo table
    INTERNAL, OUT = 32, 2
    E_PAD = 64                          # pad E 50 -> 64 (8-aligned sublane dim for W_ih^0)
    TB = 16                             # batch tile -> grid = (2,)

    key = jax.random.PRNGKey(0)
    keys = iter(jax.random.split(key, 24))

    def rand(shape, scale):
        return jax.random.uniform(next(keys), shape, jnp.float32, -1.0, 1.0) * scale

    embed_table = rand((VOCAB, E), 1.0)
    tokens = jax.random.randint(next(keys), (B, L), 0, VOCAB)

    w_scale = 1.0 / (H ** 0.5)          # PyTorch LSTM default init range
    in_sizes = [E, E, 2 * H, 2 * H]     # [layer0-fwd, layer0-bwd, layer1-fwd, layer1-bwd]
    lstm_params_f32 = []
    for d in range(4):
        w_ih = rand((in_sizes[d], 4 * H), w_scale)    # (in, 4H) == PyTorch weight transposed
        w_hh = rand((H, 4 * H), w_scale)
        bias = rand((1, 4 * H), w_scale) + rand((1, 4 * H), w_scale)   # b_ih + b_hh combined
        lstm_params_f32.append((w_ih, w_hh, bias))
    fc1_w = rand((2 * H, INTERNAL), 0.1)
    fc1_b = rand((1, INTERNAL), 0.1)
    fc2_w = rand((INTERNAL, OUT), 0.3)
    fc2_b = rand((1, OUT), 0.1)

    # glue: embedding lookup (data-dependent gather) + time-major transpose in plain JAX
    # TODO(synk): fuse this gather into the kernel via scalar-prefetched ids + DMA gather.
    emb_tm = jnp.transpose(embed_table[tokens], (1, 0, 2))              # (L, B, E) f32

    # kernel operands: bf16 matmul weights/activations, f32 biases, E zero-padded to 64
    emb_tm_k = jnp.pad(emb_tm, ((0, 0), (0, 0), (0, E_PAD - E))).astype(jnp.bfloat16)
    lstm_params_k = []
    for d, (w_ih, w_hh, bias) in enumerate(lstm_params_f32):
        if d < 2:
            w_ih = jnp.pad(w_ih, ((0, E_PAD - E), (0, 0)))
        lstm_params_k.append((w_ih.astype(jnp.bfloat16), w_hh.astype(jnp.bfloat16), bias))

    out = rnn_lstm_forward(emb_tm_k, lstm_params_k,
                           fc1_w.astype(jnp.bfloat16), fc1_b,
                           fc2_w.astype(jnp.bfloat16), fc2_b,
                           batch_tile=TB)
    out = jax.block_until_ready(out)

    ref = lstm_ref_f32(emb_tm, lstm_params_f32, fc1_w, fc1_b, fc2_w, fc2_b, H)
    assert out.shape == (B, OUT)
    max_err = float(jnp.max(jnp.abs(out - ref)))
    assert max_err < 3e-2, f"mismatch vs f32 reference: max abs err = {max_err}"

    print("KERNEL_OK")
</pallas_src>

<mosaic_0001>
module attributes {stable_mosaic.version = 11 : i64} {
  func.func @lstm_kernel(%arg0: i32, %arg1: memref<16x16x64xbf16, #tpu.memory_space<vmem>>, %arg2: memref<64x512xbf16, #tpu.memory_space<vmem>>, %arg3: memref<128x512xbf16, #tpu.memory_space<vmem>>, %arg4: memref<1x512xf32, #tpu.memory_space<vmem>>, %arg5: memref<64x512xbf16, #tpu.memory_space<vmem>>, %arg6: memref<128x512xbf16, #tpu.memory_space<vmem>>, %arg7: memref<1x512xf32, #tpu.memory_space<vmem>>, %arg8: memref<256x512xbf16, #tpu.memory_space<vmem>>, %arg9: memref<128x512xbf16, #tpu.memory_space<vmem>>, %arg10: memref<1x512xf32, #tpu.memory_space<vmem>>, %arg11: memref<256x512xbf16, #tpu.memory_space<vmem>>, %arg12: memref<128x512xbf16, #tpu.memory_space<vmem>>, %arg13: memref<1x512xf32, #tpu.memory_space<vmem>>, %arg14: memref<256x32xbf16, #tpu.memory_space<vmem>>, %arg15: memref<1x32xf32, #tpu.memory_space<vmem>>, %arg16: memref<32x2xbf16, #tpu.memory_space<vmem>>, %arg17: memref<1x2xf32, #tpu.memory_space<vmem>>, %arg18: memref<16x2xf32, #tpu.memory_space<vmem>>, %arg19: memref<16x16x512xf32, #tpu.memory_space<vmem>>, %arg20: memref<16x16x128xbf16, #tpu.memory_space<vmem>>, %arg21: memref<16x16x128xbf16, #tpu.memory_space<vmem>>) attributes {dimension_semantics = [#tpu.dimension_semantics<parallel>], iteration_bounds = array<i64: 2>, scalar_prefetch = 0 : i64, scratch_operands = 3 : i64, tpu.core_type = #tpu.core_type<tc>, window_params = [{transform_indices = @transform_0, window_bounds = array<i64: 16, 16, 64>}, {pipeline_mode = #tpu.pipeline_mode<synchronous>, transform_indices = @transform_1, window_bounds = array<i64: 64, 512>}, {pipeline_mode = #tpu.pipeline_mode<synchronous>, transform_indices = @transform_2, window_bounds = array<i64: 128, 512>}, {pipeline_mode = #tpu.pipeline_mode<synchronous>, transform_indices = @transform_3, window_bounds = array<i64: 1, 512>}, {pipeline_mode = #tpu.pipeline_mode<synchronous>, transform_indices = @transform_4, window_bounds = array<i64: 64, 512>}, {pipeline_mode = #tpu.pipeline_mode<synchronous>, transform_indices = @transform_5, window_bounds = array<i64: 128, 512>}, {pipeline_mode = #tpu.pipeline_mode<synchronous>, transform_indices = @transform_6, window_bounds = array<i64: 1, 512>}, {pipeline_mode = #tpu.pipeline_mode<synchronous>, transform_indices = @transform_7, window_bounds = array<i64: 256, 512>}, {pipeline_mode = #tpu.pipeline_mode<synchronous>, transform_indices = @transform_8, window_bounds = array<i64: 128, 512>}, {pipeline_mode = #tpu.pipeline_mode<synchronous>, transform_indices = @transform_9, window_bounds = array<i64: 1, 512>}, {pipeline_mode = #tpu.pipeline_mode<synchronous>, transform_indices = @transform_10, window_bounds = array<i64: 256, 512>}, {pipeline_mode = #tpu.pipeline_mode<synchronous>, transform_indices = @transform_11, window_bounds = array<i64: 128, 512>}, {pipeline_mode = #tpu.pipeline_mode<synchronous>, transform_indices = @transform_12, window_bounds = array<i64: 1, 512>}, {pipeline_mode = #tpu.pipeline_mode<synchronous>, transform_indices = @transform_13, window_bounds = array<i64: 256, 32>}, {pipeline_mode = #tpu.pipeline_mode<synchronous>, transform_indices = @transform_14, window_bounds = array<i64: 1, 32>}, {pipeline_mode = #tpu.pipeline_mode<synchronous>, transform_indices = @transform_15, window_bounds = array<i64: 32, 2>}, {pipeline_mode = #tpu.pipeline_mode<synchronous>, transform_indices = @transform_16, window_bounds = array<i64: 1, 2>}, {transform_indices = @transform_17, window_bounds = array<i64: 16, 2>}]} {
    %c0 = arith.constant 0 : index
    %c0_0 = arith.constant 0 : index
    %c0_1 = arith.constant 0 : index
    %0 = vector.load %arg1[%c0, %c0_0, %c0_1] : memref<16x16x64xbf16, #tpu.memory_space<vmem>>, vector<16x16x64xbf16>
    %1 = vector.shape_cast %0 : vector<16x16x64xbf16> to vector<256x64xbf16>
    %c0_2 = arith.constant 0 : index
    %c0_3 = arith.constant 0 : index
    %2 = vector.load %arg2[%c0_2, %c0_3] : memref<64x512xbf16, #tpu.memory_space<vmem>>, vector<64x512xbf16>
    %cst = arith.constant dense<0.000000e+00> : vector<256x512xf32>
    %3 = tpu.matmul %1, %2, %cst {dimension_numbers = #tpu.dot_dimension_numbers<[1], [0], [0], [1], [0, 0, 1, 1], [], []>} : vector<256x64xbf16>, vector<64x512xbf16>, vector<256x512xf32> -> vector<256x512xf32>
    %c0_4 = arith.constant 0 : index
    %c0_5 = arith.constant 0 : index
    %4 = vector.load %arg4[%c0_4, %c0_5] : memref<1x512xf32, #tpu.memory_space<vmem>>, vector<1x512xf32>
    %5 = vector.broadcast %4 : vector<1x512xf32> to vector<256x512xf32>
    %6 = arith.addf %3, %5 : vector<256x512xf32>
    %7 = vector.shape_cast %6 : vector<256x512xf32> to vector<16x16x512xf32>
    %c0_6 = arith.constant 0 : index
    %c0_7 = arith.constant 0 : index
    %c0_8 = arith.constant 0 : index
    %8 = vector.load %arg19[%c0_6, %c0_7, %c0_8] : memref<16x16x512xf32, #tpu.memory_space<vmem>>, vector<16x16x512xf32>
    tpu.vector_store %arg19[%c0_6, %c0_7, %c0_8], %7 {strides = array<i32>} : memref<16x16x512xf32, #tpu.memory_space<vmem>>, vector<16x16x512xf32>,
    %c0_9 = arith.constant 0 : index
    %c0_10 = arith.constant 0 : index
    %9 = vector.load %arg3[%c0_9, %c0_10] : memref<128x512xbf16, #tpu.memory_space<vmem>>, vector<128x512xbf16>
    %cst_11 = arith.constant 0.000000e+00 : f32
    %10 = vector.broadcast %cst_11 : f32 to vector<16x128xf32>
    %cst_12 = arith.constant 0.000000e+00 : f32
    %11 = vector.broadcast %cst_12 : f32 to vector<16x128xf32>
    %c0_i32 = arith.constant 0 : i32
    %c16_i32 = arith.constant 16 : i32
    %12 = arith.addi %c0_i32, %c16_i32 : i32
    %c1_i32 = arith.constant 1 : i32
    %13:2 = scf.for %arg22 = %c0_i32 to %12 step %c1_i32 iter_args(%arg23 = %10, %arg24 = %11) -> (vector<16x128xf32>, vector<16x128xf32>)  : i32 {
      %82 = arith.index_cast %arg22 : i32 to index
      %c0_84 = arith.constant 0 : index
      %c0_85 = arith.constant 0 : index
      %83 = vector.load %arg19[%82, %c0_84, %c0_85] : memref<16x16x512xf32, #tpu.memory_space<vmem>>, vector<1x16x512xf32>
      %84 = vector.shape_cast %83 : vector<1x16x512xf32> to vector<16x512xf32>
      %85 = arith.truncf %arg23 : vector<16x128xf32> to vector<16x128xbf16>
      %cst_86 = arith.constant dense<0.000000e+00> : vector<16x512xf32>
      %86 = tpu.matmul %85, %9, %cst_86 {dimension_numbers = #tpu.dot_dimension_numbers<[1], [0], [0], [1], [0, 0, 1, 1], [], []>} : vector<16x128xbf16>, vector<128x512xbf16>, vector<16x512xf32> -> vector<16x512xf32>
      %87 = arith.addf %84, %86 : vector<16x512xf32>
      %88 = vector.extract_strided_slice %87 {offsets = [0, 0], sizes = [16, 128], strides = [1, 1]} : vector<16x512xf32> to vector<16x128xf32>
      %89 = arith.negf %88 : vector<16x128xf32>
      %90 = math.exp %89 : vector<16x128xf32>
      %cst_87 = arith.constant 1.000000e+00 : f32
      %91 = vector.broadcast %cst_87 : f32 to vector<16x128xf32>
      %92 = arith.addf %91, %90 : vector<16x128xf32>
      %93 = arith.divf %91, %92 : vector<16x128xf32>
      %94 = vector.extract_strided_slice %87 {offsets = [0, 128], sizes = [16, 128], strides = [1, 1]} : vector<16x512xf32> to vector<16x128xf32>
      %95 = arith.negf %94 : vector<16x128xf32>
      %96 = math.exp %95 : vector<16x128xf32>
      %cst_88 = arith.constant 1.000000e+00 : f32
      %97 = vector.broadcast %cst_88 : f32 to vector<16x128xf32>
      %98 = arith.addf %97, %96 : vector<16x128xf32>
      %99 = arith.divf %97, %98 : vector<16x128xf32>
      %100 = vector.extract_strided_slice %87 {offsets = [0, 256], sizes = [16, 128], strides = [1, 1]} : vector<16x512xf32> to vector<16x128xf32>
      %101 = math.tanh %100 : vector<16x128xf32>
      %102 = vector.extract_strided_slice %87 {offsets = [0, 384], sizes = [16, 128], strides = [1, 1]} : vector<16x512xf32> to vector<16x128xf32>
      %103 = arith.negf %102 : vector<16x128xf32>
      %104 = math.exp %103 : vector<16x128xf32>
      %cst_89 = arith.constant 1.000000e+00 : f32
      %105 = vector.broadcast %cst_89 : f32 to vector<16x128xf32>
      %106 = arith.addf %105, %104 : vector<16x128xf32>
      %107 = arith.divf %105, %106 : vector<16x128xf32>
      %108 = arith.mulf %99, %arg24 : vector<16x128xf32>
      %109 = arith.mulf %93, %101 : vector<16x128xf32>
      %110 = arith.addf %108, %109 : vector<16x128xf32>
      %111 = math.tanh %110 : vector<16x128xf32>
      %112 = arith.mulf %107, %111 : vector<16x128xf32>
      %113 = arith.truncf %112 : vector<16x128xf32> to vector<16x128xbf16>
      %114 = arith.index_cast %arg22 : i32 to index
      %c0_90 = arith.constant 0 : index
      %c0_91 = arith.constant 0 : index
      %115 = vector.load %arg20[%114, %c0_90, %c0_91] : memref<16x16x128xbf16, #tpu.memory_space<vmem>>, vector<1x16x128xbf16>
      %116 = vector.shape_cast %115 : vector<1x16x128xbf16> to vector<16x128xbf16>
      %117 = vector.shape_cast %113 : vector<16x128xbf16> to vector<1x16x128xbf16>
      tpu.vector_store %arg20[%114, %c0_90, %c0_91], %117 {strides = array<i32>} : memref<16x16x128xbf16, #tpu.memory_space<vmem>>, vector<1x16x128xbf16>,
      scf.yield %112, %110 : vector<16x128xf32>, vector<16x128xf32>
    }
    %c16_i32_13 = arith.constant 16 : i32
    %c0_14 = arith.constant 0 : index
    %c0_15 = arith.constant 0 : index
    %14 = vector.load %arg5[%c0_14, %c0_15] : memref<64x512xbf16, #tpu.memory_space<vmem>>, vector<64x512xbf16>
    %cst_16 = arith.constant dense<0.000000e+00> : vector<256x512xf32>
    %15 = tpu.matmul %1, %14, %cst_16 {dimension_numbers = #tpu.dot_dimension_numbers<[1], [0], [0], [1], [0, 0, 1, 1], [], []>} : vector<256x64xbf16>, vector<64x512xbf16>, vector<256x512xf32> -> vector<256x512xf32>
    %c0_17 = arith.constant 0 : index
    %c0_18 = arith.constant 0 : index
    %16 = vector.load %arg7[%c0_17, %c0_18] : memref<1x512xf32, #tpu.memory_space<vmem>>, vector<1x512xf32>
    %17 = vector.broadcast %16 : vector<1x512xf32> to vector<256x512xf32>
    %18 = arith.addf %15, %17 : vector<256x512xf32>
    %19 = vector.shape_cast %18 : vector<256x512xf32> to vector<16x16x512xf32>
    %c0_19 = arith.constant 0 : index
    %c0_20 = arith.constant 0 : index
    %c0_21 = arith.constant 0 : index
    %20 = vector.load %arg19[%c0_19, %c0_20, %c0_21] : memref<16x16x512xf32, #tpu.memory_space<vmem>>, vector<16x16x512xf32>
    tpu.vector_store %arg19[%c0_19, %c0_20, %c0_21], %19 {strides = array<i32>} : memref<16x16x512xf32, #tpu.memory_space<vmem>>, vector<16x16x512xf32>,
    %c0_22 = arith.constant 0 : index
    %c0_23 = arith.constant 0 : index
    %21 = vector.load %arg6[%c0_22, %c0_23] : memref<128x512xbf16, #tpu.memory_space<vmem>>, vector<128x512xbf16>
    %cst_24 = arith.constant 0.000000e+00 : f32
    %22 = vector.broadcast %cst_24 : f32 to vector<16x128xf32>
    %cst_25 = arith.constant 0.000000e+00 : f32
    %23 = vector.broadcast %cst_25 : f32 to vector<16x128xf32>
    %c0_i32_26 = arith.constant 0 : i32
    %c16_i32_27 = arith.constant 16 : i32
    %24 = arith.addi %c0_i32_26, %c16_i32_27 : i32
    %c1_i32_28 = arith.constant 1 : i32
    %25:2 = scf.for %arg22 = %c0_i32_26 to %24 step %c1_i32_28 iter_args(%arg23 = %22, %arg24 = %23) -> (vector<16x128xf32>, vector<16x128xf32>)  : i32 {
      %c15_i32 = arith.constant 15 : i32
      %82 = arith.subi %c15_i32, %arg22 : i32
      %83 = arith.index_cast %82 : i32 to index
      %c0_84 = arith.constant 0 : index
      %c0_85 = arith.constant 0 : index
      %84 = vector.load %arg19[%83, %c0_84, %c0_85] : memref<16x16x512xf32, #tpu.memory_space<vmem>>, vector<1x16x512xf32>
      %85 = vector.shape_cast %84 : vector<1x16x512xf32> to vector<16x512xf32>
      %86 = arith.truncf %arg23 : vector<16x128xf32> to vector<16x128xbf16>
      %cst_86 = arith.constant dense<0.000000e+00> : vector<16x512xf32>
      %87 = tpu.matmul %86, %21, %cst_86 {dimension_numbers = #tpu.dot_dimension_numbers<[1], [0], [0], [1], [0, 0, 1, 1], [], []>} : vector<16x128xbf16>, vector<128x512xbf16>, vector<16x512xf32> -> vector<16x512xf32>
      %88 = arith.addf %85, %87 : vector<16x512xf32>
      %89 = vector.extract_strided_slice %88 {offsets = [0, 0], sizes = [16, 128], strides = [1, 1]} : vector<16x512xf32> to vector<16x128xf32>
      %90 = arith.negf %89 : vector<16x128xf32>
      %91 = math.exp %90 : vector<16x128xf32>
      %cst_87 = arith.constant 1.000000e+00 : f32
      %92 = vector.broadcast %cst_87 : f32 to vector<16x128xf32>
      %93 = arith.addf %92, %91 : vector<16x128xf32>
      %94 = arith.divf %92, %93 : vector<16x128xf32>
      %95 = vector.extract_strided_slice %88 {offsets = [0, 128], sizes = [16, 128], strides = [1, 1]} : vector<16x512xf32> to vector<16x128xf32>
      %96 = arith.negf %95 : vector<16x128xf32>
      %97 = math.exp %96 : vector<16x128xf32>
      %cst_88 = arith.constant 1.000000e+00 : f32
      %98 = vector.broadcast %cst_88 : f32 to vector<16x128xf32>
      %99 = arith.addf %98, %97 : vector<16x128xf32>
      %100 = arith.divf %98, %99 : vector<16x128xf32>
      %101 = vector.extract_strided_slice %88 {offsets = [0, 256], sizes = [16, 128], strides = [1, 1]} : vector<16x512xf32> to vector<16x128xf32>
      %102 = math.tanh %101 : vector<16x128xf32>
      %103 = vector.extract_strided_slice %88 {offsets = [0, 384], sizes = [16, 128], strides = [1, 1]} : vector<16x512xf32> to vector<16x128xf32>
      %104 = arith.negf %103 : vector<16x128xf32>
      %105 = math.exp %104 : vector<16x128xf32>
      %cst_89 = arith.constant 1.000000e+00 : f32
      %106 = vector.broadcast %cst_89 : f32 to vector<16x128xf32>
      %107 = arith.addf %106, %105 : vector<16x128xf32>
      %108 = arith.divf %106, %107 : vector<16x128xf32>
      %109 = arith.mulf %100, %arg24 : vector<16x128xf32>
      %110 = arith.mulf %94, %102 : vector<16x128xf32>
      %111 = arith.addf %109, %110 : vector<16x128xf32>
      %112 = math.tanh %111 : vector<16x128xf32>
      %113 = arith.mulf %108, %112 : vector<16x128xf32>
      %114 = arith.truncf %113 : vector<16x128xf32> to vector<16x128xbf16>
      %115 = arith.index_cast %82 : i32 to index
      %c0_90 = arith.constant 0 : index
      %c0_91 = arith.constant 0 : index
      %116 = vector.load %arg21[%115, %c0_90, %c0_91] : memref<16x16x128xbf16, #tpu.memory_space<vmem>>, vector<1x16x128xbf16>
      %117 = vector.shape_cast %116 : vector<1x16x128xbf16> to vector<16x128xbf16>
      %118 = vector.shape_cast %114 : vector<16x128xbf16> to vector<1x16x128xbf16>
      tpu.vector_store %arg21[%115, %c0_90, %c0_91], %118 {strides = array<i32>} : memref<16x16x128xbf16, #tpu.memory_space<vmem>>, vector<1x16x128xbf16>,
      scf.yield %113, %111 : vector<16x128xf32>, vector<16x128xf32>
    }
    %c16_i32_29 = arith.constant 16 : i32
    %c0_30 = arith.constant 0 : index
    %c0_31 = arith.constant 0 : index
    %c0_32 = arith.constant 0 : index
    %26 = vector.load %arg20[%c0_30, %c0_31, %c0_32] : memref<16x16x128xbf16, #tpu.memory_space<vmem>>, vector<16x16x128xbf16>
    %27 = vector.shape_cast %26 : vector<16x16x128xbf16> to vector<256x128xbf16>
    %c0_33 = arith.constant 0 : index
    %c0_34 = arith.constant 0 : index
    %c0_35 = arith.constant 0 : index
    %28 = vector.load %arg21[%c0_33, %c0_34, %c0_35] : memref<16x16x128xbf16, #tpu.memory_space<vmem>>, vector<16x16x128xbf16>
    %29 = vector.shape_cast %28 : vector<16x16x128xbf16> to vector<256x128xbf16>
    %c0_36 = arith.constant 0 : index
    %c0_37 = arith.constant 0 : index
    %30 = vector.load %arg8[%c0_36, %c0_37] : memref<256x512xbf16, #tpu.memory_space<vmem>>, vector<256x512xbf16>
    %31 = vector.extract_strided_slice %30 {offsets = [0, 0], sizes = [128, 512], strides = [1, 1]} : vector<256x512xbf16> to vector<128x512xbf16>
    %cst_38 = arith.constant dense<0.000000e+00> : vector<256x512xf32>
    %32 = tpu.matmul %27, %31, %cst_38 {dimension_numbers = #tpu.dot_dimension_numbers<[1], [0], [0], [1], [0, 0, 1, 1], [], []>} : vector<256x128xbf16>, vector<128x512xbf16>, vector<256x512xf32> -> vector<256x512xf32>
    %33 = vector.extract_strided_slice %30 {offsets = [128, 0], sizes = [128, 512], strides = [1, 1]} : vector<256x512xbf16> to vector<128x512xbf16>
    %cst_39 = arith.constant dense<0.000000e+00> : vector<256x512xf32>
    %34 = tpu.matmul %29, %33, %cst_39 {dimension_numbers = #tpu.dot_dimension_numbers<[1], [0], [0], [1], [0, 0, 1, 1], [], []>} : vector<256x128xbf16>, vector<128x512xbf16>, vector<256x512xf32> -> vector<256x512xf32>
    %35 = arith.addf %32, %34 : vector<256x512xf32>
    %c0_40 = arith.constant 0 : index
    %c0_41 = arith.constant 0 : index
    %36 = vector.load %arg10[%c0_40, %c0_41] : memref<1x512xf32, #tpu.memory_space<vmem>>, vector<1x512xf32>
    %37 = vector.broadcast %36 : vector<1x512xf32> to vector<256x512xf32>
    %38 = arith.addf %35, %37 : vector<256x512xf32>
    %39 = vector.shape_cast %38 : vector<256x512xf32> to vector<16x16x512xf32>
    %c0_42 = arith.constant 0 : index
    %c0_43 = arith.constant 0 : index
    %c0_44 = arith.constant 0 : index
    %40 = vector.load %arg19[%c0_42, %c0_43, %c0_44] : memref<16x16x512xf32, #tpu.memory_space<vmem>>, vector<16x16x512xf32>
    tpu.vector_store %arg19[%c0_42, %c0_43, %c0_44], %39 {strides = array<i32>} : memref<16x16x512xf32, #tpu.memory_space<vmem>>, vector<16x16x512xf32>,
    %c0_45 = arith.constant 0 : index
    %c0_46 = arith.constant 0 : index
    %41 = vector.load %arg9[%c0_45, %c0_46] : memref<128x512xbf16, #tpu.memory_space<vmem>>, vector<128x512xbf16>
    %cst_47 = arith.constant 0.000000e+00 : f32
    %42 = vector.broadcast %cst_47 : f32 to vector<16x128xf32>
    %cst_48 = arith.constant 0.000000e+00 : f32
    %43 = vector.broadcast %cst_48 : f32 to vector<16x128xf32>
    %c0_i32_49 = arith.constant 0 : i32
    %c16_i32_50 = arith.constant 16 : i32
    %44 = arith.addi %c0_i32_49, %c16_i32_50 : i32
    %c1_i32_51 = arith.constant 1 : i32
    %45:2 = scf.for %arg22 = %c0_i32_49 to %44 step %c1_i32_51 iter_args(%arg23 = %42, %arg24 = %43) -> (vector<16x128xf32>, vector<16x128xf32>)  : i32 {
      %82 = arith.index_cast %arg22 : i32 to index
      %c0_84 = arith.constant 0 : index
      %c0_85 = arith.constant 0 : index
      %83 = vector.load %arg19[%82, %c0_84, %c0_85] : memref<16x16x512xf32, #tpu.memory_space<vmem>>, vector<1x16x512xf32>
      %84 = vector.shape_cast %83 : vector<1x16x512xf32> to vector<16x512xf32>
      %85 = arith.truncf %arg23 : vector<16x128xf32> to vector<16x128xbf16>
      %cst_86 = arith.constant dense<0.000000e+00> : vector<16x512xf32>
      %86 = tpu.matmul %85, %41, %cst_86 {dimension_numbers = #tpu.dot_dimension_numbers<[1], [0], [0], [1], [0, 0, 1, 1], [], []>} : vector<16x128xbf16>, vector<128x512xbf16>, vector<16x512xf32> -> vector<16x512xf32>
      %87 = arith.addf %84, %86 : vector<16x512xf32>
      %88 = vector.extract_strided_slice %87 {offsets = [0, 0], sizes = [16, 128], strides = [1, 1]} : vector<16x512xf32> to vector<16x128xf32>
      %89 = arith.negf %88 : vector<16x128xf32>
      %90 = math.exp %89 : vector<16x128xf32>
      %cst_87 = arith.constant 1.000000e+00 : f32
      %91 = vector.broadcast %cst_87 : f32 to vector<16x128xf32>
      %92 = arith.addf %91, %90 : vector<16x128xf32>
      %93 = arith.divf %91, %92 : vector<16x128xf32>
      %94 = vector.extract_strided_slice %87 {offsets = [0, 128], sizes = [16, 128], strides = [1, 1]} : vector<16x512xf32> to vector<16x128xf32>
      %95 = arith.negf %94 : vector<16x128xf32>
      %96 = math.exp %95 : vector<16x128xf32>
      %cst_88 = arith.constant 1.000000e+00 : f32
      %97 = vector.broadcast %cst_88 : f32 to vector<16x128xf32>
      %98 = arith.addf %97, %96 : vector<16x128xf32>
      %99 = arith.divf %97, %98 : vector<16x128xf32>
      %100 = vector.extract_strided_slice %87 {offsets = [0, 256], sizes = [16, 128], strides = [1, 1]} : vector<16x512xf32> to vector<16x128xf32>
      %101 = math.tanh %100 : vector<16x128xf32>
      %102 = vector.extract_strided_slice %87 {offsets = [0, 384], sizes = [16, 128], strides = [1, 1]} : vector<16x512xf32> to vector<16x128xf32>
      %103 = arith.negf %102 : vector<16x128xf32>
      %104 = math.exp %103 : vector<16x128xf32>
      %cst_89 = arith.constant 1.000000e+00 : f32
      %105 = vector.broadcast %cst_89 : f32 to vector<16x128xf32>
      %106 = arith.addf %105, %104 : vector<16x128xf32>
      %107 = arith.divf %105, %106 : vector<16x128xf32>
      %108 = arith.mulf %99, %arg24 : vector<16x128xf32>
      %109 = arith.mulf %93, %101 : vector<16x128xf32>
      %110 = arith.addf %108, %109 : vector<16x128xf32>
      %111 = math.tanh %110 : vector<16x128xf32>
      %112 = arith.mulf %107, %111 : vector<16x128xf32>
      scf.yield %112, %110 : vector<16x128xf32>, vector<16x128xf32>
    }
    %c16_i32_52 = arith.constant 16 : i32
    %c0_53 = arith.constant 0 : index
    %c0_54 = arith.constant 0 : index
    %46 = vector.load %arg11[%c0_53, %c0_54] : memref<256x512xbf16, #tpu.memory_space<vmem>>, vector<256x512xbf16>
    %47 = vector.extract_strided_slice %46 {offsets = [0, 0], sizes = [128, 512], strides = [1, 1]} : vector<256x512xbf16> to vector<128x512xbf16>
    %cst_55 = arith.constant dense<0.000000e+00> : vector<256x512xf32>
    %48 = tpu.matmul %27, %47, %cst_55 {dimension_numbers = #tpu.dot_dimension_numbers<[1], [0], [0], [1], [0, 0, 1, 1], [], []>} : vector<256x128xbf16>, vector<128x512xbf16>, vector<256x512xf32> -> vector<256x512xf32>
    %49 = vector.extract_strided_slice %46 {offsets = [128, 0], sizes = [128, 512], strides = [1, 1]} : vector<256x512xbf16> to vector<128x512xbf16>
    %cst_56 = arith.constant dense<0.000000e+00> : vector<256x512xf32>
    %50 = tpu.matmul %29, %49, %cst_56 {dimension_numbers = #tpu.dot_dimension_numbers<[1], [0], [0], [1], [0, 0, 1, 1], [], []>} : vector<256x128xbf16>, vector<128x512xbf16>, vector<256x512xf32> -> vector<256x512xf32>
    %51 = arith.addf %48, %50 : vector<256x512xf32>
    %c0_57 = arith.constant 0 : index
    %c0_58 = arith.constant 0 : index
    %52 = vector.load %arg13[%c0_57, %c0_58] : memref<1x512xf32, #tpu.memory_space<vmem>>, vector<1x512xf32>
    %53 = vector.broadcast %52 : vector<1x512xf32> to vector<256x512xf32>
    %54 = arith.addf %51, %53 : vector<256x512xf32>
    %55 = vector.shape_cast %54 : vector<256x512xf32> to vector<16x16x512xf32>
    %c0_59 = arith.constant 0 : index
    %c0_60 = arith.constant 0 : index
    %c0_61 = arith.constant 0 : index
    %56 = vector.load %arg19[%c0_59, %c0_60, %c0_61] : memref<16x16x512xf32, #tpu.memory_space<vmem>>, vector<16x16x512xf32>
    tpu.vector_store %arg19[%c0_59, %c0_60, %c0_61], %55 {strides = array<i32>} : memref<16x16x512xf32, #tpu.memory_space<vmem>>, vector<16x16x512xf32>,
    %c0_62 = arith.constant 0 : index
    %c0_63 = arith.constant 0 : index
    %57 = vector.load %arg12[%c0_62, %c0_63] : memref<128x512xbf16, #tpu.memory_space<vmem>>, vector<128x512xbf16>
    %cst_64 = arith.constant 0.000000e+00 : f32
    %58 = vector.broadcast %cst_64 : f32 to vector<16x128xf32>
    %cst_65 = arith.constant 0.000000e+00 : f32
    %59 = vector.broadcast %cst_65 : f32 to vector<16x128xf32>
    %c0_i32_66 = arith.constant 0 : i32
    %c16_i32_67 = arith.constant 16 : i32
    %60 = arith.addi %c0_i32_66, %c16_i32_67 : i32
    %c1_i32_68 = arith.constant 1 : i32
    %61:2 = scf.for %arg22 = %c0_i32_66 to %60 step %c1_i32_68 iter_args(%arg23 = %58, %arg24 = %59) -> (vector<16x128xf32>, vector<16x128xf32>)  : i32 {
      %c15_i32 = arith.constant 15 : i32
      %82 = arith.subi %c15_i32, %arg22 : i32
      %83 = arith.index_cast %82 : i32 to index
      %c0_84 = arith.constant 0 : index
      %c0_85 = arith.constant 0 : index
      %84 = vector.load %arg19[%83, %c0_84, %c0_85] : memref<16x16x512xf32, #tpu.memory_space<vmem>>, vector<1x16x512xf32>
      %85 = vector.shape_cast %84 : vector<1x16x512xf32> to vector<16x512xf32>
      %86 = arith.truncf %arg23 : vector<16x128xf32> to vector<16x128xbf16>
      %cst_86 = arith.constant dense<0.000000e+00> : vector<16x512xf32>
      %87 = tpu.matmul %86, %57, %cst_86 {dimension_numbers = #tpu.dot_dimension_numbers<[1], [0], [0], [1], [0, 0, 1, 1], [], []>} : vector<16x128xbf16>, vector<128x512xbf16>, vector<16x512xf32> -> vector<16x512xf32>
      %88 = arith.addf %85, %87 : vector<16x512xf32>
      %89 = vector.extract_strided_slice %88 {offsets = [0, 0], sizes = [16, 128], strides = [1, 1]} : vector<16x512xf32> to vector<16x128xf32>
      %90 = arith.negf %89 : vector<16x128xf32>
      %91 = math.exp %90 : vector<16x128xf32>
      %cst_87 = arith.constant 1.000000e+00 : f32
      %92 = vector.broadcast %cst_87 : f32 to vector<16x128xf32>
      %93 = arith.addf %92, %91 : vector<16x128xf32>
      %94 = arith.divf %92, %93 : vector<16x128xf32>
      %95 = vector.extract_strided_slice %88 {offsets = [0, 128], sizes = [16, 128], strides = [1, 1]} : vector<16x512xf32> to vector<16x128xf32>
      %96 = arith.negf %95 : vector<16x128xf32>
      %97 = math.exp %96 : vector<16x128xf32>
      %cst_88 = arith.constant 1.000000e+00 : f32
      %98 = vector.broadcast %cst_88 : f32 to vector<16x128xf32>
      %99 = arith.addf %98, %97 : vector<16x128xf32>
      %100 = arith.divf %98, %99 : vector<16x128xf32>
      %101 = vector.extract_strided_slice %88 {offsets = [0, 256], sizes = [16, 128], strides = [1, 1]} : vector<16x512xf32> to vector<16x128xf32>
      %102 = math.tanh %101 : vector<16x128xf32>
      %103 = vector.extract_strided_slice %88 {offsets = [0, 384], sizes = [16, 128], strides = [1, 1]} : vector<16x512xf32> to vector<16x128xf32>
      %104 = arith.negf %103 : vector<16x128xf32>
      %105 = math.exp %104 : vector<16x128xf32>
      %cst_89 = arith.constant 1.000000e+00 : f32
      %106 = vector.broadcast %cst_89 : f32 to vector<16x128xf32>
      %107 = arith.addf %106, %105 : vector<16x128xf32>
      %108 = arith.divf %106, %107 : vector<16x128xf32>
      %109 = arith.mulf %100, %arg24 : vector<16x128xf32>
      %110 = arith.mulf %94, %102 : vector<16x128xf32>
      %111 = arith.addf %109, %110 : vector<16x128xf32>
      %112 = math.tanh %111 : vector<16x128xf32>
      %113 = arith.mulf %108, %112 : vector<16x128xf32>
      scf.yield %113, %111 : vector<16x128xf32>, vector<16x128xf32>
    }
    %c16_i32_69 = arith.constant 16 : i32
    %c0_70 = arith.constant 0 : index
    %c0_71 = arith.constant 0 : index
    %62 = vector.load %arg14[%c0_70, %c0_71] : memref<256x32xbf16, #tpu.memory_space<vmem>>, vector<256x32xbf16>
    %63 = arith.truncf %45#0 : vector<16x128xf32> to vector<16x128xbf16>
    %64 = vector.extract_strided_slice %62 {offsets = [0, 0], sizes = [128, 32], strides = [1, 1]} : vector<256x32xbf16> to vector<128x32xbf16>
    %cst_72 = arith.constant dense<0.000000e+00> : vector<16x32xf32>
    %65 = tpu.matmul %63, %64, %cst_72 {dimension_numbers = #tpu.dot_dimension_numbers<[1], [0], [0], [1], [0, 0, 1, 1], [], []>} : vector<16x128xbf16>, vector<128x32xbf16>, vector<16x32xf32> -> vector<16x32xf32>
    %66 = arith.truncf %61#0 : vector<16x128xf32> to vector<16x128xbf16>
    %67 = vector.extract_strided_slice %62 {offsets = [128, 0], sizes = [128, 32], strides = [1, 1]} : vector<256x32xbf16> to vector<128x32xbf16>
    %cst_73 = arith.constant dense<0.000000e+00> : vector<16x32xf32>
    %68 = tpu.matmul %66, %67, %cst_73 {dimension_numbers = #tpu.dot_dimension_numbers<[1], [0], [0], [1], [0, 0, 1, 1], [], []>} : vector<16x128xbf16>, vector<128x32xbf16>, vector<16x32xf32> -> vector<16x32xf32>
    %69 = arith.addf %65, %68 : vector<16x32xf32>
    %c0_74 = arith.constant 0 : index
    %c0_75 = arith.constant 0 : index
    %70 = vector.load %arg15[%c0_74, %c0_75] : memref<1x32xf32, #tpu.memory_space<vmem>>, vector<1x32xf32>
    %71 = vector.broadcast %70 : vector<1x32xf32> to vector<16x32xf32>
    %72 = arith.addf %69, %71 : vector<16x32xf32>
    %cst_76 = arith.constant 0.000000e+00 : f32
    %73 = vector.broadcast %cst_76 : f32 to vector<16x32xf32>
    %74 = arith.maximumf %72, %73 : vector<16x32xf32>
    %c0_77 = arith.constant 0 : index
    %c0_78 = arith.constant 0 : index
    %75 = vector.load %arg16[%c0_77, %c0_78] : memref<32x2xbf16, #tpu.memory_space<vmem>>, vector<32x2xbf16>
    %76 = arith.truncf %74 : vector<16x32xf32> to vector<16x32xbf16>
    %cst_79 = arith.constant dense<0.000000e+00> : vector<16x2xf32>
    %77 = tpu.matmul %76, %75, %cst_79 {dimension_numbers = #tpu.dot_dimension_numbers<[1], [0], [0], [1], [0, 0, 1, 1], [], []>} : vector<16x32xbf16>, vector<32x2xbf16>, vector<16x2xf32> -> vector<16x2xf32>
    %c0_80 = arith.constant 0 : index
    %c0_81 = arith.constant 0 : index
    %78 = vector.load %arg17[%c0_80, %c0_81] : memref<1x2xf32, #tpu.memory_space<vmem>>, vector<1x2xf32>
    %79 = vector.broadcast %78 : vector<1x2xf32> to vector<16x2xf32>
    %80 = arith.addf %77, %79 : vector<16x2xf32>
    %c0_82 = arith.constant 0 : index
    %c0_83 = arith.constant 0 : index
    %81 = vector.load %arg18[%c0_82, %c0_83] : memref<16x2xf32, #tpu.memory_space<vmem>>, vector<16x2xf32>
    tpu.vector_store %arg18[%c0_82, %c0_83], %80 {strides = array<i32>} : memref<16x2xf32, #tpu.memory_space<vmem>>, vector<16x2xf32>,
    return
  }
  func.func @transform_0(%arg0: i32) -> (i32, i32, i32) {
    %c0_i32 = arith.constant 0 : i32
    %c0_i32_0 = arith.constant 0 : i32
    %c0_i32_1 = arith.constant 0 : i32
    return %c0_i32, %arg0, %c0_i32_0 : i32, i32, i32
  }
  func.func @transform_1(%arg0: i32) -> (i32, i32) {
    %c0_i32 = arith.constant 0 : i32
    %c0_i32_0 = arith.constant 0 : i32
    %c0_i32_1 = arith.constant 0 : i32
    return %c0_i32, %c0_i32_0 : i32, i32
  }
  func.func @transform_2(%arg0: i32) -> (i32, i32) {
    %c0_i32 = arith.constant 0 : i32
    %c0_i32_0 = arith.constant 0 : i32
    %c0_i32_1 = arith.constant 0 : i32
    return %c0_i32, %c0_i32_0 : i32, i32
  }
  func.func @transform_3(%arg0: i32) -> (i32, i32) {
    %c0_i32 = arith.constant 0 : i32
    %c0_i32_0 = arith.constant 0 : i32
    %c0_i32_1 = arith.constant 0 : i32
    return %c0_i32, %c0_i32_0 : i32, i32
  }
  func.func @transform_4(%arg0: i32) -> (i32, i32) {
    %c0_i32 = arith.constant 0 : i32
    %c0_i32_0 = arith.constant 0 : i32
    %c0_i32_1 = arith.constant 0 : i32
    return %c0_i32, %c0_i32_0 : i32, i32
  }
  func.func @transform_5(%arg0: i32) -> (i32, i32) {
    %c0_i32 = arith.constant 0 : i32
    %c0_i32_0 = arith.constant 0 : i32
    %c0_i32_1 = arith.constant 0 : i32
    return %c0_i32, %c0_i32_0 : i32, i32
  }
  func.func @transform_6(%arg0: i32) -> (i32, i32) {
    %c0_i32 = arith.constant 0 : i32
    %c0_i32_0 = arith.constant 0 : i32
    %c0_i32_1 = arith.constant 0 : i32
    return %c0_i32, %c0_i32_0 : i32, i32
  }
  func.func @transform_7(%arg0: i32) -> (i32, i32) {
    %c0_i32 = arith.constant 0 : i32
    %c0_i32_0 = arith.constant 0 : i32
    %c0_i32_1 = arith.constant 0 : i32
    return %c0_i32, %c0_i32_0 : i32, i32
  }
  func.func @transform_8(%arg0: i32) -> (i32, i32) {
    %c0_i32 = arith.constant 0 : i32
    %c0_i32_0 = arith.constant 0 : i32
    %c0_i32_1 = arith.constant 0 : i32
    return %c0_i32, %c0_i32_0 : i32, i32
  }
  func.func @transform_9(%arg0: i32) -> (i32, i32) {
    %c0_i32 = arith.constant 0 : i32
    %c0_i32_0 = arith.constant 0 : i32
    %c0_i32_1 = arith.constant 0 : i32
    return %c0_i32, %c0_i32_0 : i32, i32
  }
  func.func @transform_10(%arg0: i32) -> (i32, i32) {
    %c0_i32 = arith.constant 0 : i32
    %c0_i32_0 = arith.constant 0 : i32
    %c0_i32_1 = arith.constant 0 : i32
    return %c0_i32, %c0_i32_0 : i32, i32
  }
  func.func @transform_11(%arg0: i32) -> (i32, i32) {
    %c0_i32 = arith.constant 0 : i32
    %c0_i32_0 = arith.constant 0 : i32
    %c0_i32_1 = arith.constant 0 : i32
    return %c0_i32, %c0_i32_0 : i32, i32
  }
  func.func @transform_12(%arg0: i32) -> (i32, i32) {
    %c0_i32 = arith.constant 0 : i32
    %c0_i32_0 = arith.constant 0 : i32
    %c0_i32_1 = arith.constant 0 : i32
    return %c0_i32, %c0_i32_0 : i32, i32
  }
  func.func @transform_13(%arg0: i32) -> (i32, i32) {
    %c0_i32 = arith.constant 0 : i32
    %c0_i32_0 = arith.constant 0 : i32
    %c0_i32_1 = arith.constant 0 : i32
    return %c0_i32, %c0_i32_0 : i32, i32
  }
  func.func @transform_14(%arg0: i32) -> (i32, i32) {
    %c0_i32 = arith.constant 0 : i32
    %c0_i32_0 = arith.constant 0 : i32
    %c0_i32_1 = arith.constant 0 : i32
    return %c0_i32, %c0_i32_0 : i32, i32
  }
  func.func @transform_15(%arg0: i32) -> (i32, i32) {
    %c0_i32 = arith.constant 0 : i32
    %c0_i32_0 = arith.constant 0 : i32
    %c0_i32_1 = arith.constant 0 : i32
    return %c0_i32, %c0_i32_0 : i32, i32
  }
  func.func @transform_16(%arg0: i32) -> (i32, i32) {
    %c0_i32 = arith.constant 0 : i32
    %c0_i32_0 = arith.constant 0 : i32
    %c0_i32_1 = arith.constant 0 : i32
    return %c0_i32, %c0_i32_0 : i32, i32
  }
  func.func @transform_17(%arg0: i32) -> (i32, i32) {
    %c0_i32 = arith.constant 0 : i32
    %c0_i32_0 = arith.constant 0 : i32
    return %arg0, %c0_i32 : i32, i32
  }
}

</mosaic_0001>

<bundles_post_ra>
// kernel: tpu_custom_call.1
= control target key start
LH: loop header
LB: loop body
LE: loop exit
PB: predicated region body
PF: predicated region fallthrough
CT: control target
= control target key end

     0   :  { %s11979_s0 = inlined_call_operand.hbm [shape: bf16[16,32,64], index: 0, kind: input, shape index: {}]   ;;  %s11980_s1 = inlined_call_operand.vmem [shape: bf16[64,512], index: 1, kind: input, shape index: {}]   ;;  %s11981_s2 = inlined_call_operand.hbm [shape: bf16[128,512], index: 2, kind: input, shape index: {}]   ;;  %s11982_s3 = inlined_call_operand.vmem [shape: f32[1,512], index: 3, kind: input, shape index: {}]   ;;  %s11983_s4 = inlined_call_operand.hbm [shape: bf16[64,512], index: 4, kind: input, shape index: {}]   ;;  %s11984_s5 = inlined_call_operand.hbm [shape: bf16[128,512], index: 5, kind: input, shape index: {}]   ;;  %s11985_s6 = inlined_call_operand.vmem [shape: f32[1,512], index: 6, kind: input, shape index: {}]   ;;  %s11986_s7 = inlined_call_operand.hbm [shape: bf16[256,512], index: 7, kind: input, shape index: {}]   ;;  %s11987_s8 = inlined_call_operand.hbm [shape: bf16[128,512], index: 8, kind: input, shape index: {}]   ;;  %s11988_s9 = inlined_call_operand.vmem [shape: f32[1,512], index: 9, kind: input, shape index: {}]   ;;  %s11989_s10 = inlined_call_operand.hbm [shape: bf16[256,512], index: 10, kind: input, shape index: {}]   ;;  %s11990_s11 = inlined_call_operand.hbm [shape: bf16[128,512], index: 11, kind: input, shape index: {}]   ;;  %s11991_s12 = inlined_call_operand.vmem [shape: f32[1,512], index: 12, kind: input, shape index: {}]   ;;  %s11992_s13 = inlined_call_operand.vmem [shape: bf16[256,32], index: 13, kind: input, shape index: {}]   ;;  %s11993_s14 = inlined_call_operand.vmem [shape: f32[1,32], index: 14, kind: input, shape index: {}]   ;;  %s11994_s15 = inlined_call_operand.vmem [shape: bf16[32,2], index: 15, kind: input, shape index: {}]   ;;  %s11995_s16 = inlined_call_operand.vmem [shape: f32[1,2], index: 16, kind: input, shape index: {}]   ;;  %s11996_s17 = inlined_call_operand.vmem [shape: f32[32,2], index: 17, kind: output, shape index: {}]  }
   0x1   :  { %12126 = sst [smem:[#allocation165_spill]] %s11979_s0 }
   0x2   :  { %12127 = sst [smem:[#allocation166_spill]] %s11980_s1 }
   0x3   :  { %12128 = sst [smem:[#allocation167_spill]] %s11981_s2 }
   0x4   :  { %12129 = sst [smem:[#allocation168_spill]] %s11983_s4 }
   0x5   :  { %12130 = sst [smem:[#allocation169_spill]] %s11984_s5 }
   0x6   :  { %12131 = sst [smem:[#allocation170_spill]] %s11992_s13 }
   0x7   :  { %12132 = sst [smem:[#allocation171_spill]] %s11993_s14 }
   0x8   :  { %12133 = sst [smem:[#allocation172_spill]] %s11994_s15 }
   0x9   :  { %12134 = sst [smem:[#allocation173_spill]] %s11995_s16 }
   0xa   :  { %22 = vsyncpa [#allocation6], 0 }
   0xb   :  { %24 = vsyncpa [#allocation6 + $0x1], 0 }
   0xc   :  { %25 = vsyncpa [#allocation8], 0 }
   0xd   :  { %26 = vsyncpa [#allocation11], 0 }
   0xe   :  { %27 = vsyncpa [#allocation14], 0 }
   0xf   :  { %28 = vsyncpa [#allocation17], 0  ;;  %s9016_s24 = smov 0   ;;  %s9018_s25 = smov 0  }
  0x10   :  { %s9020_s26 = smov 0   ;;  %s9022_s27 = smov 0  }
  0x11 LB: > { %s11998_s28 = sadd.s32 4294967295, %s8822_s27   ;;  %s9036_s29 = sadd.s32 1, %s8822_s27   ;;  %s8822_s27 = sphi %s9022_s27, %s12670_s27   ;;  %s8818_s26 = sphi %s9020_s26, %s12674_s26   ;;  %s8814_s25 = sphi %s9018_s25, %s12673_s25   ;;  %s8810_s24 = sphi %s9016_s24, %s12672_s24  }
  0x12   : > { %12135 = sst [smem:[#allocation26_spill]] %s9036_s29  ;;  %s38_s0 = ssub.s32 %s8822_s27, %s9036_s29 }
  0x13   : > { %s41_s30 = sadd.s32 1, %s8818_s26  ;;  %p39_p0 = scmp.eq.s32.totalorder %s38_s0, 0 }
  0x14   : > { %p48_p1 = scmp.ne.s32.totalorder %s8818_s26, %s8814_s25  ;;  %p49_p2 = scmp.eq.s32.totalorder %s8822_s27, 0 }
  0x15   : > { %p54_p3 = scmp.ne.s32.totalorder %s8814_s25, %s8810_s24  ;;  %p9054_p5 = scmp.eq.s32.totalorder %s11998_s28, 0 }
  0x16   : > { %s9046_s18 = scalar_select %p39_p0, %s8818_s26, %s41_s30  }
  0x17   : > { %p9048_p4 = por %p49_p2, %p48_p1  ;;  %p7211_p6 = scmp.ge.s32.totalorder %s8822_s27, 1 }
  0x18   : > { %12136 = sst [smem:[#allocation27_spill]] %s9046_s18  ;;  %p427_p7 = scmp.lt.s32.totalorder %s8822_s27, 3 }
  0x19   : > { %s12138_s1 = scalar_select %p9054_p5, 1, 0 }
  0x1a   : > { %p9062_p8 = por %p9054_p5, %p54_p3  ;;  %p9066_p9 = pnand %p7211_p6, %p427_p7 }
  0x1b   : > { %s8904_s22 = smov [#allocation7]   ;;  %s8905_s0 = smov [#allocation10]  }
  0x1c   : > { %s442_s23 = sshll.u32 %s8904_s22, 4  ;;  %p7826_p10 = pneg %p9066_p9  ;;  %s443_s23 = int_to_ptr.vmem [resolvable:$true] %s442_s23 }
  0x1d   : > { %s471_s30 = sshll.u32 %s8905_s0, 4  ;;  %s8906_s28 = smov [#allocation13]   ;;  %s472_s30 = int_to_ptr.vmem [resolvable:$true] %s471_s30 }
  0x1e   : > { %p9074_p11 = pnand %p7826_p10, %p9054_p5  ;;  %s500_s18 = sshll.u32 %s8906_s28, 4  ;;  %s501_s18 = int_to_ptr.vmem [resolvable:$true] %s500_s18 }
  0x1f   : > { %s8521_s22 = scalar_lea.vmem %s443_s23, 4096  ;;  %p8529_p2 = scmp.lt.s32.totalorder %s443_s23, %s443_s23 }
  0x20   : > { %p9080_p12 = pneg %p9074_p11  ;;  %p8522_p13 = scmp.ne.s32.totalorder %s443_s23, %s8521_s22 }
  0x21   : > { %p8530_p3 = scmp.lt.s32.totalorder %s8521_s22, %s8521_s22 }
  0x22   : > { %p8524_p0 = pnand %p8522_p13, %p9080_p12 }
  0x23   : > { %p8531_p6 = por %p8530_p3, %p8529_p2 }
  0x24   : > { %p8525_p1 = pneg %p8524_p0 }
  0x26   : > { %p8532_p7 = pnand %p8531_p6, %p8525_p1 }
  0x28   : > { %8535 = shalt.err (!%p8532_p7)
}
  0x29   : > { %s8907_s0 = smov 256   ;;  %s8908_s28 = smov 16  }
  0x2a   : > { %s12143_s2 = sld [smem:[#allocation167_spill]]  ;;  %s8547_s15 = scalar_lea.vmem %s472_s30, 4096 }
  0x2b   : > { %p8548_p10 = scmp.ne.s32.totalorder %s472_s30, %s8547_s15  ;;  %p8555_p2 = scmp.lt.s32.totalorder %s472_s30, %s472_s30 }
  0x2c   : > { %p8556_p1 = scmp.lt.s32.totalorder %s8547_s15, %s8547_s15 }
  0x2d   : > { %p8550_p13 = pnand %p8548_p10, %p9080_p12 }
  0x2e   : > { %p8557_p3 = por %p8556_p1, %p8555_p2 }
  0x2f   : > { %p8551_p0 = pneg %p8550_p13 }
  0x30   : > { %7829 = dma.hbm_to_vmem [thread:$0]  (!%p9074_p11), %s12143_s2, 4096, %s443_s23, [#allocation8], %s8907_s0, %s8907_s0, %s8908_s28  }
  0x31   : > { %p8558_p6 = pnand %p8557_p3, %p8551_p0 }
  0x33   : > { %8561 = shalt.err (!%p8558_p6)
}
  0x34   : > { %s12144_s5 = sld [smem:[#allocation169_spill]]  ;;  %s8573_s14 = scalar_lea.vmem %s501_s18, 4096 }
  0x35   : > { %p8574_p7 = scmp.ne.s32.totalorder %s501_s18, %s8573_s14  ;;  %p8581_p5 = scmp.lt.s32.totalorder %s501_s18, %s501_s18 }
  0x36   : > { %p8582_p2 = scmp.lt.s32.totalorder %s8573_s14, %s8573_s14 }
  0x37   : > { %p8576_p10 = pnand %p8574_p7, %p9080_p12 }
  0x38   : > { %p8583_p0 = por %p8582_p2, %p8581_p5 }
  0x39   : > { %p8577_p13 = pneg %p8576_p10 }
  0x3a   : > { %7835 = dma.hbm_to_vmem [thread:$0]  (!%p9074_p11), %s12144_s5, 4096, %s472_s30, [#allocation11], %s8907_s0, %s8907_s0, %s8908_s28  }
  0x3b   : > { %p8584_p1 = pnand %p8583_p0, %p8577_p13 }
  0x3d   : > { %8587 = shalt.err (!%p8584_p1)
}
  0x3e   : > { %7841 = dma.hbm_to_vmem [thread:$0]  (!%p9074_p11), %s11987_s8, 4096, %s501_s18, [#allocation14], %s8907_s0, %s8907_s0, %s8908_s28  }
  0x3f   : > { %s8909_s16 = smov [#allocation9]   ;;  %s8910_s30 = smov [#allocation12]  }
  0x40   : > { %s458_s23 = sshll.u32 %s8909_s16, 4  ;;  %s487_s22 = sshll.u32 %s8910_s30, 4  ;;  %s459_s23 = int_to_ptr.vmem [resolvable:$true] %s458_s23  ;;  %s488_s22 = int_to_ptr.vmem [resolvable:$true] %s487_s22 }
  0x41   : > { %s8599_s2 = scalar_lea.vmem %s459_s23, 2048  ;;  %p8607_p7 = scmp.lt.s32.totalorder %s459_s23, %s459_s23 }
  0x42   : > { %p8600_p3 = scmp.ne.s32.totalorder %s459_s23, %s8599_s2  ;;  %p8608_p10 = scmp.lt.s32.totalorder %s8599_s2, %s8599_s2 }
  0x44   : > { %p8602_p5 = pnand %p8600_p3, %p9080_p12  ;;  %p8609_p13 = por %p8608_p10, %p8607_p7 }
  0x46   : > { %p8603_p6 = pneg %p8602_p5 }
  0x48   : > { %p8610_p2 = pnand %p8609_p13, %p8603_p6 }
  0x4a   : > { %8613 = shalt.err (!%p8610_p2)
}
  0x4b   : > { %s12145_s4 = sld [smem:[#allocation168_spill]]  ;;  %s8625_s15 = scalar_lea.vmem %s488_s22, 8192 }
  0x4c   : > { %p8626_p0 = scmp.ne.s32.totalorder %s488_s22, %s8625_s15  ;;  %p8633_p5 = scmp.lt.s32.totalorder %s488_s22, %s488_s22 }
  0x4d   : > { %p8634_p7 = scmp.lt.s32.totalorder %s8625_s15, %s8625_s15 }
  0x4e   : > { %p8628_p1 = pnand %p8626_p0, %p9080_p12 }
  0x4f   : > { %p8635_p6 = por %p8634_p7, %p8633_p5 }
  0x50   : > { %p8629_p3 = pneg %p8628_p1 }
  0x51   : > { %7832 = dma.hbm_to_vmem [thread:$0]  (!%p9074_p11), %s12145_s4, 2048, %s459_s23, [#allocation8], %s8907_s0, %s8907_s0, %s8908_s28  }
  0x52   : > { %p8636_p10 = pnand %p8635_p6, %p8629_p3 }
  0x54   : > { %8639 = shalt.err (!%p8636_p10)
}
  0x55   : > { %7838 = dma.hbm_to_vmem [thread:$0]  (!%p9074_p11), %s11986_s7, 8192, %s488_s22, [#allocation11], %s8907_s0, %s8907_s0, %s8908_s28  }
  0x56   : > { %s8911_s16 = smov [#allocation15]   ;;  %s8912_s30 = smov [#allocation16]  }
  0x57   : > { %s516_s23 = sshll.u32 %s8911_s16, 4  ;;  %s529_s18 = sshll.u32 %s8912_s30, 4  ;;  %s517_s23 = int_to_ptr.vmem [resolvable:$true] %s516_s23  ;;  %s530_s18 = int_to_ptr.vmem [resolvable:$true] %s529_s18 }
  0x58   : > { %s8651_s14 = scalar_lea.vmem %s517_s23, 8192  ;;  %p8659_p1 = scmp.lt.s32.totalorder %s517_s23, %s517_s23 }
  0x59   : > { %p8652_p13 = scmp.ne.s32.totalorder %s517_s23, %s8651_s14  ;;  %p8660_p3 = scmp.lt.s32.totalorder %s8651_s14, %s8651_s14 }
  0x5b   : > { %p8654_p2 = pnand %p8652_p13, %p9080_p12  ;;  %p8661_p5 = por %p8660_p3, %p8659_p1 }
  0x5d   : > { %p8655_p0 = pneg %p8654_p2 }
  0x5f   : > { %p8662_p7 = pnand %p8661_p5, %p8655_p0 }
  0x61   : > { %8665 = shalt.err (!%p8662_p7)
}
  0x62   : > { %7844 = dma.hbm_to_vmem [thread:$0]  (!%p9074_p11), %s11989_s10, 8192, %s517_s23, [#allocation14], %s8907_s0, %s8907_s0, %s8908_s28  }
  0x63   : > { %s8677_s2 = scalar_lea.vmem %s530_s18, 4096  ;;  %p8685_p2 = scmp.lt.s32.totalorder %s530_s18, %s530_s18 }
  0x64   : > { %p8678_p6 = scmp.ne.s32.totalorder %s530_s18, %s8677_s2  ;;  %p8686_p1 = scmp.lt.s32.totalorder %s8677_s2, %s8677_s2 }
  0x66   : > { %p8680_p10 = pnand %p8678_p6, %p9080_p12  ;;  %p8687_p0 = por %p8686_p1, %p8685_p2 }
  0x68   : > { %p8681_p13 = pneg %p8680_p10 }
  0x6a   : > { %p8688_p3 = pnand %p8687_p0, %p8681_p13 }
  0x6c   : > { %8691 = shalt.err (!%p8688_p3)
}
  0x6d   : > { %7847 = dma.hbm_to_vmem [thread:$0]  (!%p9074_p11), %s11990_s11, 4096, %s530_s18, [#allocation17], %s8907_s0, %s8907_s0, %s8908_s28  }
  0x6e   : > { %p7219_p5 = scmp.ge.s32.totalorder %s8822_s27, 2 }
  0x70   : > { %554 = sbr.rel (%p7219_p5) target bundleno = 131 (0x83), region = 80 }
  0x75   : > { %s558_s29 = sand.u32 1, %s8818_s26   ;;  %s7699_s23 = sshll.u32 %s8822_s27, 7 }
  0x76   : > { %s7220_s24 = sshll.u32 %s558_s29, 7  ;;  %s12146_s22 = sld [smem:[#allocation165_spill]] }
  0x77   : > { %s7803_s0 = scalar_select %p9048_p4, [#allocation0], [#allocation20] }
  0x78   : > { %s562_s28 = scalar_lea.vmem [#allocation5], %s7220_s24  ;;  %s8913_s13 = smov 256  }
  0x79   : > { %s581_s18 = sshll.u32 %s562_s28, 4  ;;  %s573_s2 = sld [smem:[%s7803_s0]]   ;;  %s582_s18 = int_to_ptr.vmem [resolvable:$true] %s581_s18 }
  0x7a   : > { %7804 = sst [smem:[#allocation19]] (%p9048_p4), %s8913_s13  ;;  %s8914_s16 = smov 128  }
  0x7b   : > { %7805 = sst [smem:[#allocation19 + $0x1]] (%p9048_p4), %s8914_s16  ;;  %s8915_s4 = smov 2  }
  0x7c   : > { %s568_s15 = scalar_lea.hbm %s12146_s22, %s7699_s23  ;;  %7806 = sst [smem:[#allocation19 + $0x2]] (%p9048_p4), %s8915_s4 }
  0x7d   : > { %s8916_s5 = smov 64   ;;  %s8917_s24 = smov 4  }
  0x7e   : > { %7807 = sst [smem:[#allocation19 + $0x3]] (%p9048_p4), %s8916_s5  ;;  %s559_s14 = scalar_lea.sflag [#allocation6], %s558_s29 }
  0x7f   : > { %7808 = sst [smem:[#allocation19 + $0x4]] (%p9048_p4), %s8916_s5  ;;  %s7223_s23 = sshll.u32 %s573_s2, 26 }
  0x80   : > { %7809 = sst [smem:[#allocation19 + $0x5]] (%p9048_p4), %s8917_s24  ;;  %s7224_s30 = sadd.s32 134217728, %s7223_s23 }
  0x81   : > { %s8918_s22 = smov 131072  }
  0x82   : > { %7810 = dma.general (%p9048_p4), %s568_s15, 2048, %s582_s18, %s559_s14, %s8918_s22, [#allocation19], %s7224_s30, 0  }
  0x83 PF: > { %606 = sbr.rel (%p9066_p9) target bundleno = 3326 (0xcfe), region = 88 }
  0x88   : > { %s608_s4 = sand.u32 1, %s8814_s25  }
  0x89   : > { %s7226_s0 = sshll.u32 %s608_s4, 7  ;;  %s609_s28 = scalar_lea.sflag [#allocation6], %s608_s4 }
  0x8a   : > { %s9179_s13 = scalar_lea.vmem [#allocation5], %s7226_s0 }
  0x8b   : > { %8789 = dma.done.wait (%p9062_p8), %s609_s28, 2048  }
  0x8c   : > { %8791 = vsyncadd (%p9062_p8), %s609_s28, 4294965248  ;;  %p12147_p11 = scmp.ne.s32.totalorder %s12138_s1, 0 }
  0x8e   : > { %8793 = dma.done.wait (%p12147_p11), [#allocation8], 6144  }
  0x8f   : > { %8795 = vsyncadd (%p12147_p11), [#allocation8], 4294961152 }
  0x90   : > { %8797 = dma.done.wait (%p12147_p11), [#allocation11], 12288  }
  0x91   : > { %8799 = vsyncadd (%p12147_p11), [#allocation11], 4294955008 }
  0x92   : > { %8801 = dma.done.wait (%p12147_p11), [#allocation14], 12288  }
  0x93   : > { %8803 = vsyncadd (%p12147_p11), [#allocation14], 4294955008 }
  0x94   : > { %8805 = dma.done.wait (%p12147_p11), [#allocation17], 4096  }
  0x95   : > { %8807 = vsyncadd (%p12147_p11), [#allocation17], 4294963200  ;;  %s12148_s5 = sadd.s32 4294967295, %s8822_s27   ;;  %v12005_v0 = vmov 0   ;;  %v9210_v1 = vld [vmem:[#allocation7] sm:$0xff]  ;;  %v9212_v2 = vld [vmem:[#allocation7 + $0x8] sm:$0xff] }
  0x96   : > { %s7234_s19 = sshll.u32 %s12148_s5, 1  ;;  %1010 = vmatprep.mubr.bf16.mxu0 %v12005_v0  ;;  %1203 = vmatprep.mubr.bf16.mxu1 %v12005_v0  ;;  %12149 = vst [vmem:[#allocation28_spill] sm:$0xff] %v9210_v1  ;;  %12150 = vst [vmem:[#allocation29_spill] sm:$0xff] %v9212_v2  ;;  %v9214_v3 = vld [vmem:[#allocation7 + $0x10] sm:$0xff]  ;;  %v9216_v4 = vld [vmem:[#allocation7 + $0x18] sm:$0xff]  ;;  %s12156_s18 = sld [smem:[#allocation166_spill]] }
  0x97   : > { %p693_p4 = scmp.lt.s32.totalorder %s7234_s19, 3  ;;  %12151 = vst [vmem:[#allocation30_spill] sm:$0xff] %v9214_v3  ;;  %12152 = vst [vmem:[#allocation31_spill] sm:$0xff] %v9216_v4  ;;  %v9218_v5 = vld [vmem:[#allocation7 + $0x20] sm:$0xff]  ;;  %v9220_v6 = vld [vmem:[#allocation7 + $0x28] sm:$0xff]  ;;  %vm929_vm0 = vcmask 523264  }
  0x98   : > { %12153 = vst [vmem:[#allocation32_spill] sm:$0xff] %v9218_v5  ;;  %12154 = vst [vmem:[#allocation33_spill] sm:$0xff] %v9220_v6  ;;  %v9222_v7 = vld [vmem:[#allocation7 + $0x30] sm:$0xff]  ;;  %v9224_v8 = vld [vmem:[#allocation7 + $0x38] sm:$0xff] }
  0x99   : > { %s12676_s19 = smov (!%p693_p4, %s7234_s19), 3  ;;  %12155 = vst [vmem:[#allocation34_spill] sm:$0xff] %v9222_v7  ;;  %v9226_v9 = vld [vmem:[#allocation7 + $0x40] sm:$0xff]  ;;  %v9228_v10 = vld [vmem:[#allocation7 + $0x48] sm:$0xff]  ;;  %v9230_v11 = vld [vmem:[#allocation7 + $0x50] sm:$0xff] }
  0x9a   : > { %s7235_s20 = sshll.u32 %s12676_s19, 3  ;;  %v9232_v12 = vld [vmem:[#allocation7 + $0x58] sm:$0xff]  ;;  %v9234_v13 = vld [vmem:[#allocation7 + $0x60] sm:$0xff]  ;;  %v9236_v14 = vld [vmem:[#allocation7 + $0x68] sm:$0xff] }
  0x9b   : > { %s9208_s15 = scalar_lea.vmem %s11996_s17, %s7235_s20  ;;  %v9238_v15 = vld [vmem:[#allocation7 + $0x70] sm:$0xff]  ;;  %v9240_v16 = vld [vmem:[#allocation7 + $0x78] sm:$0xff]  ;;  %v9242_v17 = vld [vmem:[#allocation7 + $0x80] sm:$0xff] }
  0x9c   : > { %v9244_v18 = vld [vmem:[#allocation7 + $0x88] sm:$0xff]  ;;  %v9246_v19 = vld [vmem:[#allocation7 + $0x90] sm:$0xff]  ;;  %v9248_v20 = vld [vmem:[#allocation7 + $0x98] sm:$0xff] }
  0x9d   : > { %v9250_v21 = vld [vmem:[#allocation7 + $0xa0] sm:$0xff]  ;;  %v9252_v22 = vld [vmem:[#allocation7 + $0xa8] sm:$0xff]  ;;  %v9254_v23 = vld [vmem:[#allocation7 + $0xb0] sm:$0xff] }
  0x9e   : > { %v9256_v24 = vld [vmem:[#allocation7 + $0xb8] sm:$0xff]  ;;  %v9258_v25 = vld [vmem:[#allocation7 + $0xc0] sm:$0xff]  ;;  %v9260_v26 = vld [vmem:[#allocation7 + $0xc8] sm:$0xff] }
  0x9f   : > { %v9262_v27 = vld [vmem:[#allocation7 + $0xd0] sm:$0xff]  ;;  %v9264_v28 = vld [vmem:[#allocation7 + $0xd8] sm:$0xff]  ;;  %v9266_v29 = vld [vmem:[#allocation7 + $0xe0] sm:$0xff] }
  0xa0   : > { %v9268_v30 = vld [vmem:[#allocation7 + $0xe8] sm:$0xff]  ;;  %v9270_v31 = vld [vmem:[#allocation7 + $0xf0] sm:$0xff]  ;;  %v9272_v32 = vld [vmem:[#allocation7 + $0xf8] sm:$0xff] }
  0xa1   : > { %v8076_v33 = vld [vmem:[%s12156_s18 + $0x64] ss:$16 sps:$4 sm:$0xff]   ;;  %v8078_v34 = vld [vmem:[%s12156_s18 + $0x6c] ss:$16 sps:$4 sm:$0xff]   ;;  %v8080_v35 = vld [vmem:[%s12156_s18 + $0x60] ss:$16 sps:$4 sm:$0xff]  }
  0xa2   : > { %986 = vmatprep.subr.bf16.mxu0 %v8076_v33  ;;  %v8081_v36 = vld [vmem:[%s12156_s18 + $0x68] ss:$16 sps:$4 sm:$0xff]   ;;  %1179 = vmatprep.subr.bf16.mxu1 %v8078_v34  ;;  %v8082_v37 = vld [vmem:[%s12156_s18 + $0x44] ss:$16 sps:$4 sm:$0xff]   ;;  %v8084_v38 = vld [vmem:[%s12156_s18 + $0x4c] ss:$16 sps:$4 sm:$0xff]   ;;  %v749_v34 = vlaneseq }
  0xa3   : > { %987 = vmatpush1.bf16.msra.mxu0 %v8080_v35  ;;  %1180 = vmatpush1.bf16.msra.mxu1 %v8081_v36  ;;  %v8086_v39 = vld [vmem:[%s12156_s18 + $0x40] ss:$16 sps:$4 sm:$0xff]   ;;  %v8087_v40 = vld [vmem:[%s12156_s18 + $0x48] ss:$16 sps:$4 sm:$0xff]   ;;  %v8088_v41 = vld [vmem:[%s12156_s18 + $0x24] ss:$16 sps:$4 sm:$0xff]  }
  0xa4   : > { %988 = vmatprep.subr.bf16.mxu0 %v8082_v37  ;;  %1181 = vmatprep.subr.bf16.mxu1 %v8084_v38  ;;  %v8090_v42 = vld [vmem:[%s12156_s18 + $0x2c] ss:$16 sps:$4 sm:$0xff]   ;;  %v8092_v43 = vld [vmem:[%s12156_s18 + $0x20] ss:$16 sps:$4 sm:$0xff]   ;;  %v8093_v44 = vld [vmem:[%s12156_s18 + $0x28] ss:$16 sps:$4 sm:$0xff]  }
  0xa5   : > { %v8094_v45 = vld [vmem:[%s12156_s18 + $0x4] ss:$16 sps:$4 sm:$0xff]   ;;  %v8096_v46 = vld [vmem:[%s12156_s18 + $0xc] ss:$16 sps:$4 sm:$0xff]   ;;  %v8098_v47 = vld [vmem:[%s12156_s18] ss:$16 sps:$4 sm:$0xff]  }
  0xa6   : > { %v8099_v48 = vld [vmem:[%s12156_s18 + $0x8] ss:$16 sps:$4 sm:$0xff]   ;;  %v9323_v49 = vld [vmem:[%s9179_s13] sm:$0xff]   ;;  %v9341_v51 = vld [vmem:[%s9179_s13 + $0x10] sm:$0xff]   ;;  %v750_v35 = vshrl.u32 %v749_v34, 7 }
  0xa7   : > { %989 = vmatpush1.bf16.msra.mxu0 %v8086_v39  ;;  %1182 = vmatpush1.bf16.msra.mxu1 %v8087_v40  ;;  %v9332_v50 = vld [vmem:[%s9179_s13 + $0x8] sm:$0xff]   ;;  %v9350_v52 = vld [vmem:[%s9179_s13 + $0x18] sm:$0xff]   ;;  %v9359_v53 = vld [vmem:[%s9179_s13 + $0x20] sm:$0xff]  }
  0xa8   : > { %990 = vmatprep.subr.bf16.mxu0 %v8088_v41  ;;  %1183 = vmatprep.subr.bf16.mxu1 %v8090_v42  ;;  %v9368_v54 = vld [vmem:[%s9179_s13 + $0x28] sm:$0xff]   ;;  %v9377_v55 = vld [vmem:[%s9179_s13 + $0x30] sm:$0xff]   ;;  %v9386_v56 = vld [vmem:[%s9179_s13 + $0x38] sm:$0xff]   ;;  %v9464_v36 = vsub.s32 0, %v750_v35  ;;  %v9469_v38 = vsub.s32 2, %v750_v35  ;;  %v9471_v39 = vsub.s32 1, %v750_v35 }
  0xa9   : > { %v9395_v57 = vld [vmem:[%s9179_s13 + $0x40] sm:$0xff]   ;;  %v9404_v58 = vld [vmem:[%s9179_s13 + $0x48] sm:$0xff]   ;;  %v9413_v59 = vld [vmem:[%s9179_s13 + $0x50] sm:$0xff]   ;;  %v9473_v40 = vsub.s32 3, %v750_v35 }
  0xaa   : > { %v9422_v60 = vld [vmem:[%s9179_s13 + $0x58] sm:$0xff]   ;;  %v9431_v61 = vld [vmem:[%s9179_s13 + $0x60] sm:$0xff]   ;;  %v9440_v62 = vld [vmem:[%s9179_s13 + $0x68] sm:$0xff]   ;;  %12158 = vst [vmem:[#allocation36_spill] sm:$0xff] %v9464_v36 }
  0xab   : > { %991 = vmatpush1.bf16.msra.mxu0 %v8092_v43  ;;  %1184 = vmatpush1.bf16.msra.mxu1 %v8093_v44  ;;  %v9449_v63 = vld [vmem:[%s9179_s13 + $0x70] sm:$0xff]   ;;  %v9458_v33 = vld [vmem:[%s9179_s13 + $0x78] sm:$0xff]   ;;  %v747_v37 = vld [vmem:[%s11982_s3] sm:$0xf]  ;;  %12159 = vst [vmem:[#allocation37_spill] sm:$0xff] %v9469_v38  ;;  %s9623_s13 = smov 0  }
  0xac   : > { %992 = vmatprep.subr.bf16.mxu0 %v8094_v45  ;;  %1185 = vmatprep.subr.bf16.mxu1 %v8096_v46  ;;  %12157 = vst [vmem:[#allocation35_spill] sm:$0xff] %v9458_v33  ;;  %12160 = vst [vmem:[#allocation38_spill] sm:$0xff] %v9471_v39  ;;  %v9476_v41 = vrot.slane %v747_v37, %v9464_v36  ;;  %v9479_v42 = vrot.slane %v747_v37, %v9469_v38 }
  0xad   : > { %12161 = vst [vmem:[#allocation39_spill] sm:$0xff] %v9473_v40  ;;  %v9482_v43 = vrot.slane %v747_v37, %v9471_v39  ;;  %v9485_v45 = vrot.slane %v747_v37, %v9473_v40 }
  0xaf   : > { %993 = vmatpush1.bf16.msra.mxu0 %v8098_v47  ;;  %1186 = vmatpush1.bf16.msra.mxu1 %v8099_v48 }
  0xb2   : > { %7268 = vmatmul.mubr.msk.bf16.vlgmr.msra.gmra.mxu0 %vm929_vm0, %v9323_v49  ;;  %7284 = vmatmul.mubr.msk.bf16.vlgmr.msra.gmra.mxu1 %vm929_vm0, %v9323_v49 }
  0xb3   : > { %1020 = vmatprep.mubr.bf16.mxu0 %v12005_v0  ;;  %1213 = vmatprep.mubr.bf16.mxu1 %v12005_v0 }
  0xba   : > { %7269 = vmatmul.mubr.msk.bf16.gmra.mxu0 %vm929_vm0, %v9332_v50  ;;  %7285 = vmatmul.mubr.msk.bf16.gmra.mxu1 %vm929_vm0, %v9332_v50 }
  0xbb   : > { %1030 = vmatprep.mubr.bf16.mxu0 %v12005_v0  ;;  %1223 = vmatprep.mubr.bf16.mxu1 %v12005_v0 }
  0xc2   : > { %7270 = vmatmul.mubr.msk.bf16.gmra.mxu0 %vm929_vm0, %v9341_v51  ;;  %7286 = vmatmul.mubr.msk.bf16.gmra.mxu1 %vm929_vm0, %v9341_v51 }
  0xc3   : > { %1040 = vmatprep.mubr.bf16.mxu0 %v12005_v0  ;;  %1233 = vmatprep.mubr.bf16.mxu1 %v12005_v0 }
  0xca   : > { %7271 = vmatmul.mubr.msk.bf16.gmra.mxu0 %vm929_vm0, %v9350_v52  ;;  %7287 = vmatmul.mubr.msk.bf16.gmra.mxu1 %vm929_vm0, %v9350_v52 }
  0xcb   : > { %1050 = vmatprep.mubr.bf16.mxu0 %v12005_v0  ;;  %1243 = vmatprep.mubr.bf16.mxu1 %v12005_v0 }
  0xd2   : > { %7272 = vmatmul.mubr.msk.bf16.gmra.mxu0 %vm929_vm0, %v9359_v53  ;;  %7288 = vmatmul.mubr.msk.bf16.gmra.mxu1 %vm929_vm0, %v9359_v53 }
  0xd3   : > { %1060 = vmatprep.mubr.bf16.mxu0 %v12005_v0  ;;  %1253 = vmatprep.mubr.bf16.mxu1 %v12005_v0 }
  0xda   : > { %7273 = vmatmul.mubr.msk.bf16.gmra.mxu0 %vm929_vm0, %v9368_v54  ;;  %7289 = vmatmul.mubr.msk.bf16.gmra.mxu1 %vm929_vm0, %v9368_v54 }
  0xdb   : > { %1070 = vmatprep.mubr.bf16.mxu0 %v12005_v0  ;;  %1263 = vmatprep.mubr.bf16.mxu1 %v12005_v0 }
  0xe2   : > { %7274 = vmatmul.mubr.msk.bf16.gmra.mxu0 %vm929_vm0, %v9377_v55  ;;  %7290 = vmatmul.mubr.msk.bf16.gmra.mxu1 %vm929_vm0, %v9377_v55 }
  0xe3   : > { %1080 = vmatprep.mubr.bf16.mxu0 %v12005_v0  ;;  %1273 = vmatprep.mubr.bf16.mxu1 %v12005_v0 }
  0xea   : > { %7275 = vmatmul.mubr.msk.bf16.gmra.mxu0 %vm929_vm0, %v9386_v56  ;;  %7291 = vmatmul.mubr.msk.bf16.gmra.mxu1 %vm929_vm0, %v9386_v56 }
  0xeb   : > { %1090 = vmatprep.mubr.bf16.mxu0 %v12005_v0  ;;  %1283 = vmatprep.mubr.bf16.mxu1 %v12005_v0 }
  0xf2   : > { %7276 = vmatmul.mubr.msk.bf16.gmra.mxu0 %vm929_vm0, %v9395_v57  ;;  %7292 = vmatmul.mubr.msk.bf16.gmra.mxu1 %vm929_vm0, %v9395_v57 }
  0xf3   : > { %1100 = vmatprep.mubr.bf16.mxu0 %v12005_v0  ;;  %1293 = vmatprep.mubr.bf16.mxu1 %v12005_v0 }
  0xfa   : > { %7277 = vmatmul.mubr.msk.bf16.gmra.mxu0 %vm929_vm0, %v9404_v58  ;;  %7293 = vmatmul.mubr.msk.bf16.gmra.mxu1 %vm929_vm0, %v9404_v58 }
  0xfb   : > { %1110 = vmatprep.mubr.bf16.mxu0 %v12005_v0  ;;  %1303 = vmatprep.mubr.bf16.mxu1 %v12005_v0 }
 0x102   : > { %7278 = vmatmul.mubr.msk.bf16.gmra.mxu0 %vm929_vm0, %v9413_v59  ;;  %7294 = vmatmul.mubr.msk.bf16.gmra.mxu1 %vm929_vm0, %v9413_v59 }
 0x103   : > { %1120 = vmatprep.mubr.bf16.mxu0 %v12005_v0  ;;  %1313 = vmatprep.mubr.bf16.mxu1 %v12005_v0 }
 0x10a   : > { %7279 = vmatmul.mubr.msk.bf16.gmra.mxu0 %vm929_vm0, %v9422_v60  ;;  %7295 = vmatmul.mubr.msk.bf16.gmra.mxu1 %vm929_vm0, %v9422_v60 }
 0x10b   : > { %1130 = vmatprep.mubr.bf16.mxu0 %v12005_v0  ;;  %1323 = vmatprep.mubr.bf16.mxu1 %v12005_v0 }
 0x112   : > { %7280 = vmatmul.mubr.msk.bf16.gmra.mxu0 %vm929_vm0, %v9431_v61  ;;  %7296 = vmatmul.mubr.msk.bf16.gmra.mxu1 %vm929_vm0, %v9431_v61 }
 0x113   : > { %1140 = vmatprep.mubr.bf16.mxu0 %v12005_v0  ;;  %1333 = vmatprep.mubr.bf16.mxu1 %v12005_v0 }
 0x11a   : > { %7281 = vmatmul.mubr.msk.bf16.gmra.mxu0 %vm929_vm0, %v9440_v62  ;;  %7297 = vmatmul.mubr.msk.bf16.gmra.mxu1 %vm929_vm0, %v9440_v62 }
 0x11b   : > { %1150 = vmatprep.mubr.bf16.mxu0 %v12005_v0  ;;  %1343 = vmatprep.mubr.bf16.mxu1 %v12005_v0 }
 0x122   : > { %7282 = vmatmul.mubr.msk.bf16.gmra.mxu0 %vm929_vm0, %v9449_v63  ;;  %7298 = vmatmul.mubr.msk.bf16.gmra.mxu1 %vm929_vm0, %v9449_v63 }
 0x123   : > { %1160 = vmatprep.mubr.bf16.mxu0 %v12005_v0  ;;  %1353 = vmatprep.mubr.bf16.mxu1 %v12005_v0 }
 0x12a   : > { %7283 = vmatmul.mubr.msk.bf16.gmra.mxu0 %vm929_vm0, %v9458_v33  ;;  %7299 = vmatmul.mubr.msk.bf16.gmra.mxu1 %vm929_vm0, %v9458_v33 }
 0x172   : > { %v1012_v44 = vpop.f32.mrf.mxu0  ;;  %v1205_v47 = vpop.f32.mrf.mxu1 }
 0x173   : > { %v1013_v46 = vadd.f32 %v1012_v44, %v9476_v41  ;;  %v1206_v48 = vadd.f32 %v1205_v47, %v9479_v42 }
 0x174   : > { %v1014_v34 = vpop.f32.mrf.mxu0  ;;  %v1207_v0 = vpop.f32.mrf.mxu1 }
 0x175   : > { %1364 = vst [vmem:[#allocation2] sm:$0xff] %v1013_v46  ;;  %v1015_v35 = vadd.f32 %v1014_v34, %v9482_v43  ;;  %1366 = vst [vmem:[#allocation2 + $0x10] sm:$0xff] %v1206_v48  ;;  %v1208_v38 = vadd.f32 %v1207_v0, %v9485_v45 }
 0x176   : > { %v1016_v36 = vpop.f32.mrf.mxu0  ;;  %v1209_v33 = vpop.f32.mrf.mxu1 }
 0x177   : > { %1365 = vst [vmem:[#allocation2 + $0x8] sm:$0xff] %v1015_v35  ;;  %v1017_v39 = vadd.f32 %v1016_v36, %v9476_v41  ;;  %1367 = vst [vmem:[#allocation2 + $0x18] sm:$0xff] %v1208_v38  ;;  %v1210_v37 = vadd.f32 %v1209_v33, %v9479_v42 }
 0x178   : > { %v1018_v44 = vpop.f32.mrf.mxu0  ;;  %v1211_v40 = vpop.f32.mrf.mxu1 }
 0x179   : > { %1368 = vst [vmem:[#allocation2 + $0x20] sm:$0xff] %v1017_v39  ;;  %v1019_v47 = vadd.f32 %v1018_v44, %v9482_v43  ;;  %1370 = vst [vmem:[#allocation2 + $0x30] sm:$0xff] %v1210_v37  ;;  %v1212_v46 = vadd.f32 %v1211_v40, %v9485_v45 }
 0x17a   : > { %v1022_v34 = vpop.f32.mrf.mxu0  ;;  %v1215_v48 = vpop.f32.mrf.mxu1 }
 0x17b   : > { %1369 = vst [vmem:[#allocation2 + $0x28] sm:$0xff] %v1019_v47  ;;  %v1023_v0 = vadd.f32 %v1022_v34, %v9476_v41  ;;  %1371 = vst [vmem:[#allocation2 + $0x38] sm:$0xff] %v1212_v46  ;;  %v1216_v36 = vadd.f32 %v1215_v48, %v9479_v42 }
 0x17c   : > { %v1024_v35 = vpop.f32.mrf.mxu0  ;;  %v1217_v38 = vpop.f32.mrf.mxu1 }
 0x17d   : > { %1372 = vst [vmem:[#allocation2 + $0x40] sm:$0xff] %v1023_v0  ;;  %v1025_v33 = vadd.f32 %v1024_v35, %v9482_v43  ;;  %1374 = vst [vmem:[#allocation2 + $0x50] sm:$0xff] %v1216_v36  ;;  %v1218_v39 = vadd.f32 %v1217_v38, %v9485_v45 }
 0x17e   : > { %v1026_v44 = vpop.f32.mrf.mxu0  ;;  %v1219_v37 = vpop.f32.mrf.mxu1 }
 0x17f   : > { %1373 = vst [vmem:[#allocation2 + $0x48] sm:$0xff] %v1025_v33  ;;  %v1027_v40 = vadd.f32 %v1026_v44, %v9476_v41  ;;  %1375 = vst [vmem:[#allocation2 + $0x58] sm:$0xff] %v1218_v39  ;;  %v1220_v47 = vadd.f32 %v1219_v37, %v9479_v42 }
 0x180   : > { %v1028_v34 = vpop.f32.mrf.mxu0  ;;  %v1221_v48 = vpop.f32.mrf.mxu1 }
 0x181   : > { %1376 = vst [vmem:[#allocation2 + $0x60] sm:$0xff] %v1027_v40  ;;  %v1029_v46 = vadd.f32 %v1028_v34, %v9482_v43  ;;  %1378 = vst [vmem:[#allocation2 + $0x70] sm:$0xff] %v1220_v47  ;;  %v1222_v0 = vadd.f32 %v1221_v48, %v9485_v45 }
 0x182   : > { %v1032_v35 = vpop.f32.mrf.mxu0  ;;  %v1225_v38 = vpop.f32.mrf.mxu1 }
 0x183   : > { %1377 = vst [vmem:[#allocation2 + $0x68] sm:$0xff] %v1029_v46  ;;  %v1033_v36 = vadd.f32 %v1032_v35, %v9476_v41  ;;  %1379 = vst [vmem:[#allocation2 + $0x78] sm:$0xff] %v1222_v0  ;;  %v1226_v33 = vadd.f32 %v1225_v38, %v9479_v42 }
 0x184   : > { %v1034_v44 = vpop.f32.mrf.mxu0  ;;  %v1227_v37 = vpop.f32.mrf.mxu1 }
 0x185   : > { %1380 = vst [vmem:[#allocation2 + $0x80] sm:$0xff] %v1033_v36  ;;  %v1035_v39 = vadd.f32 %v1034_v44, %v9482_v43  ;;  %1382 = vst [vmem:[#allocation2 + $0x90] sm:$0xff] %v1226_v33  ;;  %v1228_v40 = vadd.f32 %v1227_v37, %v9485_v45 }
 0x186   : > { %v1036_v34 = vpop.f32.mrf.mxu0  ;;  %v1229_v48 = vpop.f32.mrf.mxu1 }
 0x187   : > { %1381 = vst [vmem:[#allocation2 + $0x88] sm:$0xff] %v1035_v39  ;;  %v1037_v47 = vadd.f32 %v1036_v34, %v9476_v41  ;;  %1383 = vst [vmem:[#allocation2 + $0x98] sm:$0xff] %v1228_v40  ;;  %v1230_v46 = vadd.f32 %v1229_v48, %v9479_v42 }
 0x188   : > { %v1038_v35 = vpop.f32.mrf.mxu0  ;;  %v1231_v38 = vpop.f32.mrf.mxu1 }
 0x189   : > { %1384 = vst [vmem:[#allocation2 + $0xa0] sm:$0xff] %v1037_v47  ;;  %v1039_v0 = vadd.f32 %v1038_v35, %v9482_v43  ;;  %1386 = vst [vmem:[#allocation2 + $0xb0] sm:$0xff] %v1230_v46  ;;  %v1232_v36 = vadd.f32 %v1231_v38, %v9485_v45 }
 0x18a   : > { %v1042_v44 = vpop.f32.mrf.mxu0  ;;  %v1235_v37 = vpop.f32.mrf.mxu1 }
 0x18b   : > { %1385 = vst [vmem:[#allocation2 + $0xa8] sm:$0xff] %v1039_v0  ;;  %v1043_v33 = vadd.f32 %v1042_v44, %v9476_v41  ;;  %1387 = vst [vmem:[#allocation2 + $0xb8] sm:$0xff] %v1232_v36  ;;  %v1236_v39 = vadd.f32 %v1235_v37, %v9479_v42 }
 0x18c   : > { %v1044_v34 = vpop.f32.mrf.mxu0  ;;  %v1237_v48 = vpop.f32.mrf.mxu1 }
 0x18d   : > { %1388 = vst [vmem:[#allocation2 + $0xc0] sm:$0xff] %v1043_v33  ;;  %v1045_v40 = vadd.f32 %v1044_v34, %v9482_v43  ;;  %1390 = vst [vmem:[#allocation2 + $0xd0] sm:$0xff] %v1236_v39  ;;  %v1238_v47 = vadd.f32 %v1237_v48, %v9485_v45 }
 0x18e   : > { %v1046_v35 = vpop.f32.mrf.mxu0  ;;  %v1239_v38 = vpop.f32.mrf.mxu1 }
 0x18f   : > { %1389 = vst [vmem:[#allocation2 + $0xc8] sm:$0xff] %v1045_v40  ;;  %v1047_v46 = vadd.f32 %v1046_v35, %v9476_v41  ;;  %1391 = vst [vmem:[#allocation2 + $0xd8] sm:$0xff] %v1238_v47  ;;  %v1240_v0 = vadd.f32 %v1239_v38, %v9479_v42 }
 0x190   : > { %v1048_v44 = vpop.f32.mrf.mxu0  ;;  %v1241_v37 = vpop.f32.mrf.mxu1 }
 0x191   : > { %1392 = vst [vmem:[#allocation2 + $0xe0] sm:$0xff] %v1047_v46  ;;  %v1049_v36 = vadd.f32 %v1048_v44, %v9482_v43  ;;  %1394 = vst [vmem:[#allocation2 + $0xf0] sm:$0xff] %v1240_v0  ;;  %v1242_v33 = vadd.f32 %v1241_v37, %v9485_v45 }
 0x192   : > { %v1052_v34 = vpop.f32.mrf.mxu0  ;;  %v1245_v48 = vpop.f32.mrf.mxu1 }
 0x193   : > { %1393 = vst [vmem:[#allocation2 + $0xe8] sm:$0xff] %v1049_v36  ;;  %v1053_v39 = vadd.f32 %v1052_v34, %v9476_v41  ;;  %1395 = vst [vmem:[#allocation2 + $0xf8] sm:$0xff] %v1242_v33  ;;  %v1246_v40 = vadd.f32 %v1245_v48, %v9479_v42 }
 0x194   : > { %v1054_v35 = vpop.f32.mrf.mxu0  ;;  %v1247_v38 = vpop.f32.mrf.mxu1 }
 0x195   : > { %1396 = vst [vmem:[#allocation2 + $0x100] sm:$0xff] %v1053_v39  ;;  %v1055_v47 = vadd.f32 %v1054_v35, %v9482_v43  ;;  %1398 = vst [vmem:[#allocation2 + $0x110] sm:$0xff] %v1246_v40  ;;  %v1248_v46 = vadd.f32 %v1247_v38, %v9485_v45 }
 0x196   : > { %v1056_v44 = vpop.f32.mrf.mxu0  ;;  %v1249_v37 = vpop.f32.mrf.mxu1 }
 0x197   : > { %1397 = vst [vmem:[#allocation2 + $0x108] sm:$0xff] %v1055_v47  ;;  %v1057_v0 = vadd.f32 %v1056_v44, %v9476_v41  ;;  %1399 = vst [vmem:[#allocation2 + $0x118] sm:$0xff] %v1248_v46  ;;  %v1250_v36 = vadd.f32 %v1249_v37, %v9479_v42 }
 0x198   : > { %v1058_v34 = vpop.f32.mrf.mxu0  ;;  %v1251_v48 = vpop.f32.mrf.mxu1 }
 0x199   : > { %1400 = vst [vmem:[#allocation2 + $0x120] sm:$0xff] %v1057_v0  ;;  %v1059_v33 = vadd.f32 %v1058_v34, %v9482_v43  ;;  %1402 = vst [vmem:[#allocation2 + $0x130] sm:$0xff] %v1250_v36  ;;  %v1252_v39 = vadd.f32 %v1251_v48, %v9485_v45 }
 0x19a   : > { %v1062_v35 = vpop.f32.mrf.mxu0  ;;  %v1255_v38 = vpop.f32.mrf.mxu1 }
 0x19b   : > { %1401 = vst [vmem:[#allocation2 + $0x128] sm:$0xff] %v1059_v33  ;;  %v1063_v40 = vadd.f32 %v1062_v35, %v9476_v41  ;;  %1403 = vst [vmem:[#allocation2 + $0x138] sm:$0xff] %v1252_v39  ;;  %v1256_v47 = vadd.f32 %v1255_v38, %v9479_v42 }
 0x19c   : > { %v1064_v44 = vpop.f32.mrf.mxu0  ;;  %v1257_v37 = vpop.f32.mrf.mxu1 }
 0x19d   : > { %1404 = vst [vmem:[#allocation2 + $0x140] sm:$0xff] %v1063_v40  ;;  %v1065_v46 = vadd.f32 %v1064_v44, %v9482_v43  ;;  %1406 = vst [vmem:[#allocation2 + $0x150] sm:$0xff] %v1256_v47  ;;  %v1258_v0 = vadd.f32 %v1257_v37, %v9485_v45 }
 0x19e   : > { %v1066_v34 = vpop.f32.mrf.mxu0  ;;  %v1259_v48 = vpop.f32.mrf.mxu1 }
 0x19f   : > { %1405 = vst [vmem:[#allocation2 + $0x148] sm:$0xff] %v1065_v46  ;;  %v1067_v36 = vadd.f32 %v1066_v34, %v9476_v41  ;;  %1407 = vst [vmem:[#allocation2 + $0x158] sm:$0xff] %v1258_v0  ;;  %v1260_v33 = vadd.f32 %v1259_v48, %v9479_v42 }
 0x1a0   : > { %v1068_v35 = vpop.f32.mrf.mxu0  ;;  %v1261_v38 = vpop.f32.mrf.mxu1 }
 0x1a1   : > { %1408 = vst [vmem:[#allocation2 + $0x160] sm:$0xff] %v1067_v36  ;;  %v1069_v39 = vadd.f32 %v1068_v35, %v9482_v43  ;;  %1410 = vst [vmem:[#allocation2 + $0x170] sm:$0xff] %v1260_v33  ;;  %v1262_v40 = vadd.f32 %v1261_v38, %v9485_v45 }
 0x1a2   : > { %v1072_v44 = vpop.f32.mrf.mxu0  ;;  %v1265_v37 = vpop.f32.mrf.mxu1 }
 0x1a3   : > { %1409 = vst [vmem:[#allocation2 + $0x168] sm:$0xff] %v1069_v39  ;;  %v1073_v47 = vadd.f32 %v1072_v44, %v9476_v41  ;;  %1411 = vst [vmem:[#allocation2 + $0x178] sm:$0xff] %v1262_v40  ;;  %v1266_v46 = vadd.f32 %v1265_v37, %v9479_v42 }
 0x1a4   : > { %v1074_v34 = vpop.f32.mrf.mxu0  ;;  %v1267_v48 = vpop.f32.mrf.mxu1 }
 0x1a5   : > { %1412 = vst [vmem:[#allocation2 + $0x180] sm:$0xff] %v1073_v47  ;;  %v1075_v0 = vadd.f32 %v1074_v34, %v9482_v43  ;;  %1414 = vst [vmem:[#allocation2 + $0x190] sm:$0xff] %v1266_v46  ;;  %v1268_v36 = vadd.f32 %v1267_v48, %v9485_v45 }
 0x1a6   : > { %v1076_v35 = vpop.f32.mrf.mxu0  ;;  %v1269_v38 = vpop.f32.mrf.mxu1 }
 0x1a7   : > { %1413 = vst [vmem:[#allocation2 + $0x188] sm:$0xff] %v1075_v0  ;;  %v1077_v33 = vadd.f32 %v1076_v35, %v9476_v41  ;;  %1415 = vst [vmem:[#allocation2 + $0x198] sm:$0xff] %v1268_v36  ;;  %v1270_v39 = vadd.f32 %v1269_v38, %v9479_v42 }
 0x1a8   : > { %v1078_v44 = vpop.f32.mrf.mxu0  ;;  %v1271_v37 = vpop.f32.mrf.mxu1 }
 0x1a9   : > { %1416 = vst [vmem:[#allocation2 + $0x1a0] sm:$0xff] %v1077_v33  ;;  %v1079_v40 = vadd.f32 %v1078_v44, %v9482_v43  ;;  %1418 = vst [vmem:[#allocation2 + $0x1b0] sm:$0xff] %v1270_v39  ;;  %v1272_v47 = vadd.f32 %v1271_v37, %v9485_v45 }
 0x1aa   : > { %v1082_v34 = vpop.f32.mrf.mxu0  ;;  %v1275_v48 = vpop.f32.mrf.mxu1 }
 0x1ab   : > { %1417 = vst [vmem:[#allocation2 + $0x1a8] sm:$0xff] %v1079_v40  ;;  %v1083_v46 = vadd.f32 %v1082_v34, %v9476_v41  ;;  %1419 = vst [vmem:[#allocation2 + $0x1b8] sm:$0xff] %v1272_v47  ;;  %v1276_v0 = vadd.f32 %v1275_v48, %v9479_v42 }
 0x1ac   : > { %v1084_v35 = vpop.f32.mrf.mxu0  ;;  %v1277_v38 = vpop.f32.mrf.mxu1 }
 0x1ad   : > { %1420 = vst [vmem:[#allocation2 + $0x1c0] sm:$0xff] %v1083_v46  ;;  %v1085_v36 = vadd.f32 %v1084_v35, %v9482_v43  ;;  %1422 = vst [vmem:[#allocation2 + $0x1d0] sm:$0xff] %v1276_v0  ;;  %v1278_v33 = vadd.f32 %v1277_v38, %v9485_v45 }
 0x1ae   : > { %v1086_v44 = vpop.f32.mrf.mxu0  ;;  %v1279_v37 = vpop.f32.mrf.mxu1 }
 0x1af   : > { %1421 = vst [vmem:[#allocation2 + $0x1c8] sm:$0xff] %v1085_v36  ;;  %v1087_v39 = vadd.f32 %v1086_v44, %v9476_v41  ;;  %1423 = vst [vmem:[#allocation2 + $0x1d8] sm:$0xff] %v1278_v33  ;;  %v1280_v40 = vadd.f32 %v1279_v37, %v9479_v42 }
 0x1b0   : > { %v1088_v34 = vpop.f32.mrf.mxu0  ;;  %v1281_v48 = vpop.f32.mrf.mxu1 }
 0x1b1   : > { %1424 = vst [vmem:[#allocation2 + $0x1e0] sm:$0xff] %v1087_v39  ;;  %v1089_v47 = vadd.f32 %v1088_v34, %v9482_v43  ;;  %1426 = vst [vmem:[#allocation2 + $0x1f0] sm:$0xff] %v1280_v40  ;;  %v1282_v46 = vadd.f32 %v1281_v48, %v9485_v45 }
 0x1b2   : > { %v1092_v35 = vpop.f32.mrf.mxu0  ;;  %v1285_v38 = vpop.f32.mrf.mxu1 }
 0x1b3   : > { %1425 = vst [vmem:[#allocation2 + $0x1e8] sm:$0xff] %v1089_v47  ;;  %v1093_v0 = vadd.f32 %v1092_v35, %v9476_v41  ;;  %1427 = vst [vmem:[#allocation2 + $0x1f8] sm:$0xff] %v1282_v46  ;;  %v1286_v36 = vadd.f32 %v1285_v38, %v9479_v42 }
 0x1b4   : > { %v1094_v44 = vpop.f32.mrf.mxu0  ;;  %v1287_v37 = vpop.f32.mrf.mxu1 }
 0x1b5   : > { %1428 = vst [vmem:[#allocation2 + $0x200] sm:$0xff] %v1093_v0  ;;  %v1095_v33 = vadd.f32 %v1094_v44, %v9482_v43  ;;  %1430 = vst [vmem:[#allocation2 + $0x210] sm:$0xff] %v1286_v36  ;;  %v1288_v39 = vadd.f32 %v1287_v37, %v9485_v45 }
 0x1b6   : > { %v1096_v34 = vpop.f32.mrf.mxu0  ;;  %v1289_v48 = vpop.f32.mrf.mxu1 }
 0x1b7   : > { %1429 = vst [vmem:[#allocation2 + $0x208] sm:$0xff] %v1095_v33  ;;  %v1097_v40 = vadd.f32 %v1096_v34, %v9476_v41  ;;  %1431 = vst [vmem:[#allocation2 + $0x218] sm:$0xff] %v1288_v39  ;;  %v1290_v47 = vadd.f32 %v1289_v48, %v9479_v42 }
 0x1b8   : > { %v1098_v35 = vpop.f32.mrf.mxu0  ;;  %v1291_v38 = vpop.f32.mrf.mxu1 }
 0x1b9   : > { %1432 = vst [vmem:[#allocation2 + $0x220] sm:$0xff] %v1097_v40  ;;  %v1099_v46 = vadd.f32 %v1098_v35, %v9482_v43  ;;  %1434 = vst [vmem:[#allocation2 + $0x230] sm:$0xff] %v1290_v47  ;;  %v1292_v0 = vadd.f32 %v1291_v38, %v9485_v45 }
 0x1ba   : > { %v1102_v44 = vpop.f32.mrf.mxu0  ;;  %v1295_v37 = vpop.f32.mrf.mxu1 }
 0x1bb   : > { %1433 = vst [vmem:[#allocation2 + $0x228] sm:$0xff] %v1099_v46  ;;  %v1103_v36 = vadd.f32 %v1102_v44, %v9476_v41  ;;  %1435 = vst [vmem:[#allocation2 + $0x238] sm:$0xff] %v1292_v0  ;;  %v1296_v33 = vadd.f32 %v1295_v37, %v9479_v42 }
 0x1bc   : > { %v1104_v34 = vpop.f32.mrf.mxu0  ;;  %v1297_v48 = vpop.f32.mrf.mxu1 }
 0x1bd   : > { %1436 = vst [vmem:[#allocation2 + $0x240] sm:$0xff] %v1103_v36  ;;  %v1105_v39 = vadd.f32 %v1104_v34, %v9482_v43  ;;  %1438 = vst [vmem:[#allocation2 + $0x250] sm:$0xff] %v1296_v33  ;;  %v1298_v40 = vadd.f32 %v1297_v48, %v9485_v45 }
 0x1be   : > { %v1106_v35 = vpop.f32.mrf.mxu0  ;;  %v1299_v38 = vpop.f32.mrf.mxu1 }
 0x1bf   : > { %1437 = vst [vmem:[#allocation2 + $0x248] sm:$0xff] %v1105_v39  ;;  %v1107_v47 = vadd.f32 %v1106_v35, %v9476_v41  ;;  %1439 = vst [vmem:[#allocation2 + $0x258] sm:$0xff] %v1298_v40  ;;  %v1300_v46 = vadd.f32 %v1299_v38, %v9479_v42 }
 0x1c0   : > { %v1108_v44 = vpop.f32.mrf.mxu0  ;;  %v1301_v37 = vpop.f32.mrf.mxu1 }
 0x1c1   : > { %1440 = vst [vmem:[#allocation2 + $0x260] sm:$0xff] %v1107_v47  ;;  %v1109_v0 = vadd.f32 %v1108_v44, %v9482_v43  ;;  %1442 = vst [vmem:[#allocation2 + $0x270] sm:$0xff] %v1300_v46  ;;  %v1302_v36 = vadd.f32 %v1301_v37, %v9485_v45 }
 0x1c2   : > { %v1112_v34 = vpop.f32.mrf.mxu0  ;;  %v1305_v48 = vpop.f32.mrf.mxu1 }
 0x1c3   : > { %1441 = vst [vmem:[#allocation2 + $0x268] sm:$0xff] %v1109_v0  ;;  %v1113_v33 = vadd.f32 %v1112_v34, %v9476_v41  ;;  %1443 = vst [vmem:[#allocation2 + $0x278] sm:$0xff] %v1302_v36  ;;  %v1306_v39 = vadd.f32 %v1305_v48, %v9479_v42 }
 0x1c4   : > { %v1114_v35 = vpop.f32.mrf.mxu0  ;;  %v1307_v38 = vpop.f32.mrf.mxu1 }
 0x1c5   : > { %1444 = vst [vmem:[#allocation2 + $0x280] sm:$0xff] %v1113_v33  ;;  %v1115_v40 = vadd.f32 %v1114_v35, %v9482_v43  ;;  %1446 = vst [vmem:[#allocation2 + $0x290] sm:$0xff] %v1306_v39  ;;  %v1308_v47 = vadd.f32 %v1307_v38, %v9485_v45 }
 0x1c6   : > { %v1116_v44 = vpop.f32.mrf.mxu0  ;;  %v1309_v37 = vpop.f32.mrf.mxu1 }
 0x1c7   : > { %1445 = vst [vmem:[#allocation2 + $0x288] sm:$0xff] %v1115_v40  ;;  %v1117_v46 = vadd.f32 %v1116_v44, %v9476_v41  ;;  %1447 = vst [vmem:[#allocation2 + $0x298] sm:$0xff] %v1308_v47  ;;  %v1310_v0 = vadd.f32 %v1309_v37, %v9479_v42 }
 0x1c8   : > { %v1118_v34 = vpop.f32.mrf.mxu0  ;;  %v1311_v48 = vpop.f32.mrf.mxu1 }
 0x1c9   : > { %1448 = vst [vmem:[#allocation2 + $0x2a0] sm:$0xff] %v1117_v46  ;;  %v1119_v36 = vadd.f32 %v1118_v34, %v9482_v43  ;;  %1450 = vst [vmem:[#allocation2 + $0x2b0] sm:$0xff] %v1310_v0  ;;  %v1312_v33 = vadd.f32 %v1311_v48, %v9485_v45 }
 0x1ca   : > { %v1122_v35 = vpop.f32.mrf.mxu0  ;;  %v1315_v38 = vpop.f32.mrf.mxu1 }
 0x1cb   : > { %1449 = vst [vmem:[#allocation2 + $0x2a8] sm:$0xff] %v1119_v36  ;;  %v1123_v39 = vadd.f32 %v1122_v35, %v9476_v41  ;;  %1451 = vst [vmem:[#allocation2 + $0x2b8] sm:$0xff] %v1312_v33  ;;  %v1316_v40 = vadd.f32 %v1315_v38, %v9479_v42 }
 0x1cc   : > { %v1124_v44 = vpop.f32.mrf.mxu0  ;;  %v1317_v37 = vpop.f32.mrf.mxu1 }
 0x1cd   : > { %1452 = vst [vmem:[#allocation2 + $0x2c0] sm:$0xff] %v1123_v39  ;;  %v1125_v47 = vadd.f32 %v1124_v44, %v9482_v43  ;;  %1454 = vst [vmem:[#allocation2 + $0x2d0] sm:$0xff] %v1316_v40  ;;  %v1318_v46 = vadd.f32 %v1317_v37, %v9485_v45 }
 0x1ce   : > { %v1126_v34 = vpop.f32.mrf.mxu0  ;;  %v1319_v48 = vpop.f32.mrf.mxu1 }
 0x1cf   : > { %1453 = vst [vmem:[#allocation2 + $0x2c8] sm:$0xff] %v1125_v47  ;;  %v1127_v0 = vadd.f32 %v1126_v34, %v9476_v41  ;;  %1455 = vst [vmem:[#allocation2 + $0x2d8] sm:$0xff] %v1318_v46  ;;  %v1320_v36 = vadd.f32 %v1319_v48, %v9479_v42 }
 0x1d0   : > { %v1128_v35 = vpop.f32.mrf.mxu0  ;;  %v1321_v38 = vpop.f32.mrf.mxu1 }
 0x1d1   : > { %1456 = vst [vmem:[#allocation2 + $0x2e0] sm:$0xff] %v1127_v0  ;;  %v1129_v33 = vadd.f32 %v1128_v35, %v9482_v43  ;;  %1458 = vst [vmem:[#allocation2 + $0x2f0] sm:$0xff] %v1320_v36  ;;  %v1322_v39 = vadd.f32 %v1321_v38, %v9485_v45 }
 0x1d2   : > { %v1132_v44 = vpop.f32.mrf.mxu0  ;;  %v1325_v37 = vpop.f32.mrf.mxu1 }
 0x1d3   : > { %1457 = vst [vmem:[#allocation2 + $0x2e8] sm:$0xff] %v1129_v33  ;;  %v1133_v40 = vadd.f32 %v1132_v44, %v9476_v41  ;;  %1459 = vst [vmem:[#allocation2 + $0x2f8] sm:$0xff] %v1322_v39  ;;  %v1326_v47 = vadd.f32 %v1325_v37, %v9479_v42 }
 0x1d4   : > { %v1134_v34 = vpop.f32.mrf.mxu0  ;;  %v1327_v48 = vpop.f32.mrf.mxu1 }
 0x1d5   : > { %1460 = vst [vmem:[#allocation2 + $0x300] sm:$0xff] %v1133_v40  ;;  %v1135_v46 = vadd.f32 %v1134_v34, %v9482_v43  ;;  %1462 = vst [vmem:[#allocation2 + $0x310] sm:$0xff] %v1326_v47  ;;  %v1328_v0 = vadd.f32 %v1327_v48, %v9485_v45 }
 0x1d6   : > { %v1136_v35 = vpop.f32.mrf.mxu0  ;;  %v1329_v38 = vpop.f32.mrf.mxu1 }
 0x1d7   : > { %1461 = vst [vmem:[#allocation2 + $0x308] sm:$0xff] %v1135_v46  ;;  %v1137_v36 = vadd.f32 %v1136_v35, %v9476_v41  ;;  %1463 = vst [vmem:[#allocation2 + $0x318] sm:$0xff] %v1328_v0  ;;  %v1330_v33 = vadd.f32 %v1329_v38, %v9479_v42 }
 0x1d8   : > { %v1138_v44 = vpop.f32.mrf.mxu0  ;;  %v1331_v37 = vpop.f32.mrf.mxu1 }
 0x1d9   : > { %1464 = vst [vmem:[#allocation2 + $0x320] sm:$0xff] %v1137_v36  ;;  %v1139_v39 = vadd.f32 %v1138_v44, %v9482_v43  ;;  %1466 = vst [vmem:[#allocation2 + $0x330] sm:$0xff] %v1330_v33  ;;  %v1332_v40 = vadd.f32 %v1331_v37, %v9485_v45 }
 0x1da   : > { %v1142_v34 = vpop.f32.mrf.mxu0  ;;  %v1335_v48 = vpop.f32.mrf.mxu1 }
 0x1db   : > { %1465 = vst [vmem:[#allocation2 + $0x328] sm:$0xff] %v1139_v39  ;;  %v1143_v47 = vadd.f32 %v1142_v34, %v9476_v41  ;;  %1467 = vst [vmem:[#allocation2 + $0x338] sm:$0xff] %v1332_v40  ;;  %v1336_v46 = vadd.f32 %v1335_v48, %v9479_v42 }
 0x1dc   : > { %v1144_v35 = vpop.f32.mrf.mxu0  ;;  %v1337_v38 = vpop.f32.mrf.mxu1 }
 0x1dd   : > { %1468 = vst [vmem:[#allocation2 + $0x340] sm:$0xff] %v1143_v47  ;;  %v1145_v0 = vadd.f32 %v1144_v35, %v9482_v43  ;;  %1470 = vst [vmem:[#allocation2 + $0x350] sm:$0xff] %v1336_v46  ;;  %v1338_v36 = vadd.f32 %v1337_v38, %v9485_v45 }
 0x1de   : > { %v1146_v44 = vpop.f32.mrf.mxu0  ;;  %v1339_v37 = vpop.f32.mrf.mxu1 }
 0x1df   : > { %1469 = vst [vmem:[#allocation2 + $0x348] sm:$0xff] %v1145_v0  ;;  %v1147_v33 = vadd.f32 %v1146_v44, %v9476_v41  ;;  %1471 = vst [vmem:[#allocation2 + $0x358] sm:$0xff] %v1338_v36  ;;  %v1340_v39 = vadd.f32 %v1339_v37, %v9479_v42 }
 0x1e0   : > { %v1148_v34 = vpop.f32.mrf.mxu0  ;;  %v1341_v48 = vpop.f32.mrf.mxu1 }
 0x1e1   : > { %1472 = vst [vmem:[#allocation2 + $0x360] sm:$0xff] %v1147_v33  ;;  %v1149_v40 = vadd.f32 %v1148_v34, %v9482_v43  ;;  %1474 = vst [vmem:[#allocation2 + $0x370] sm:$0xff] %v1340_v39  ;;  %v1342_v47 = vadd.f32 %v1341_v48, %v9485_v45 }
 0x1e2   : > { %v1152_v35 = vpop.f32.mrf.mxu0  ;;  %v1345_v38 = vpop.f32.mrf.mxu1 }
 0x1e3   : > { %1473 = vst [vmem:[#allocation2 + $0x368] sm:$0xff] %v1149_v40  ;;  %v1153_v46 = vadd.f32 %v1152_v35, %v9476_v41  ;;  %1475 = vst [vmem:[#allocation2 + $0x378] sm:$0xff] %v1342_v47  ;;  %v1346_v0 = vadd.f32 %v1345_v38, %v9479_v42 }
 0x1e4   : > { %v1154_v44 = vpop.f32.mrf.mxu0  ;;  %v1347_v37 = vpop.f32.mrf.mxu1 }
 0x1e5   : > { %1476 = vst [vmem:[#allocation2 + $0x380] sm:$0xff] %v1153_v46  ;;  %v1155_v36 = vadd.f32 %v1154_v44, %v9482_v43  ;;  %1478 = vst [vmem:[#allocation2 + $0x390] sm:$0xff] %v1346_v0  ;;  %v1348_v33 = vadd.f32 %v1347_v37, %v9485_v45 }
 0x1e6   : > { %v1156_v34 = vpop.f32.mrf.mxu0  ;;  %v1349_v48 = vpop.f32.mrf.mxu1 }
 0x1e7   : > { %1477 = vst [vmem:[#allocation2 + $0x388] sm:$0xff] %v1155_v36  ;;  %v1157_v39 = vadd.f32 %v1156_v34, %v9476_v41  ;;  %1479 = vst [vmem:[#allocation2 + $0x398] sm:$0xff] %v1348_v33  ;;  %v1350_v40 = vadd.f32 %v1349_v48, %v9479_v42 }
 0x1e8   : > { %v1158_v35 = vpop.f32.mrf.mxu0  ;;  %v1351_v38 = vpop.f32.mrf.mxu1 }
 0x1e9   : > { %1480 = vst [vmem:[#allocation2 + $0x3a0] sm:$0xff] %v1157_v39  ;;  %v1159_v47 = vadd.f32 %v1158_v35, %v9482_v43  ;;  %1482 = vst [vmem:[#allocation2 + $0x3b0] sm:$0xff] %v1350_v40  ;;  %v1352_v46 = vadd.f32 %v1351_v38, %v9485_v45 }
 0x1ea   : > { %v1162_v44 = vpop.f32.mrf.mxu0  ;;  %v1355_v37 = vpop.f32.mrf.mxu1 }
 0x1eb   : > { %1481 = vst [vmem:[#allocation2 + $0x3a8] sm:$0xff] %v1159_v47  ;;  %v1163_v0 = vadd.f32 %v1162_v44, %v9476_v41  ;;  %1483 = vst [vmem:[#allocation2 + $0x3b8] sm:$0xff] %v1352_v46  ;;  %v1356_v36 = vadd.f32 %v1355_v37, %v9479_v42 }
 0x1ec   : > { %v1164_v34 = vpop.f32.mrf.mxu0  ;;  %v1357_v48 = vpop.f32.mrf.mxu1 }
 0x1ed   : > { %1484 = vst [vmem:[#allocation2 + $0x3c0] sm:$0xff] %v1163_v0  ;;  %v1165_v33 = vadd.f32 %v1164_v34, %v9482_v43  ;;  %1486 = vst [vmem:[#allocation2 + $0x3d0] sm:$0xff] %v1356_v36  ;;  %v1358_v39 = vadd.f32 %v1357_v48, %v9485_v45  ;;  %v9615_v36 = vmov 0.0   ;;  %v9617_v34 = vmov 0.0  }
 0x1ee   : > { %v1166_v35 = vpop.f32.mrf.mxu0  ;;  %v1359_v38 = vpop.f32.mrf.mxu1 }
 0x1ef   : > { %1485 = vst [vmem:[#allocation2 + $0x3c8] sm:$0xff] %v1165_v33  ;;  %v1167_v40 = vadd.f32 %v1166_v35, %v9476_v41  ;;  %1487 = vst [vmem:[#allocation2 + $0x3d8] sm:$0xff] %v1358_v39  ;;  %v1360_v47 = vadd.f32 %v1359_v38, %v9479_v42  ;;  %v9619_v33 = vmov 0.0   ;;  %v9621_v41 = vmov 0.0  }
 0x1f0   : > { %v1168_v44 = vpop.f32.mrf.mxu0  ;;  %v1361_v37 = vpop.f32.mrf.mxu1 }
 0x1f1   : > { %1488 = vst [vmem:[#allocation2 + $0x3e0] sm:$0xff] %v1167_v40  ;;  %v1169_v46 = vadd.f32 %v1168_v44, %v9482_v43  ;;  %1490 = vst [vmem:[#allocation2 + $0x3f0] sm:$0xff] %v1360_v47  ;;  %v1362_v0 = vadd.f32 %v1361_v37, %v9485_v45 }
 0x1f3   : > { %1489 = vst [vmem:[#allocation2 + $0x3e8] sm:$0xff] %v1169_v46  ;;  %1491 = vst [vmem:[#allocation2 + $0x3f8] sm:$0xff] %v1362_v0 }
 0x1f4 LB: >> { %v12162_v7 = vld [vmem:[#allocation34_spill] sm:$0xff]  ;;  %v12163_v6 = vld [vmem:[#allocation33_spill] sm:$0xff]  ;;  %v12164_v5 = vld [vmem:[#allocation32_spill] sm:$0xff]  ;;  %v7331_v42 = vcombine.high %v9266_v29, %v9270_v31  ;;  %v7330_v43 = vcombine.low %v9266_v29, %v9270_v31  ;;  %v7327_v45 = vcombine.high %v9258_v25, %v9262_v27  ;;  %v7333_v48 = vcombine.high %v9268_v30, %v9272_v32  ;;  %s7700_s27 = sshll.u32 %s8842_s13, 6  ;;  %s7703_s2 = sshll.u32 %s8842_s13, 3  ;;  %v8830_v34 = vphi %v9617_v34, %v1842_v34   ;;  %v8826_v36 = vphi %v9615_v36, %v1843_v36   ;;  %s8842_s13 = sphi %s9623_s13, %s1529_s13   ;;  %v8838_v41 = vphi %v9621_v41, %v1846_v41   ;;  %v8834_v33 = vphi %v9619_v33, %v1847_v33  }
 0x1f5   : >> { %v12165_v4 = vld [vmem:[#allocation31_spill] sm:$0xff]  ;;  %v12166_v3 = vld [vmem:[#allocation30_spill] sm:$0xff]  ;;  %v12167_v2 = vld [vmem:[#allocation29_spill] sm:$0xff]  ;;  %v7332_v39 = vcombine.low %v9268_v30, %v9272_v32  ;;  %v7329_v35 = vcombine.high %v9260_v26, %v9264_v28  ;;  %v7326_v40 = vcombine.low %v9258_v25, %v9262_v27  ;;  %v7323_v38 = vcombine.high %v9250_v21, %v9254_v23  ;;  %s9707_s1 = scalar_lea.vmem [#allocation2], %s7700_s27  ;;  %s1858_s16 = scalar_lea.vmem [#allocation3], %s7703_s2 }
 0x1f6   : >> { %v12168_v1 = vld [vmem:[#allocation28_spill] sm:$0xff]  ;;  %1706 = vmatprep.subr.bf16.mxu0 %v7331_v42  ;;  %1749 = vmatprep.subr.bf16.mxu1 %v7333_v48  ;;  %v7328_v47 = vcombine.low %v9260_v26, %v9264_v28  ;;  %v7325_v44 = vcombine.high %v9252_v22, %v9256_v24  ;;  %v8920_v46 = vmov 0   ;;  %v7322_v37 = vcombine.low %v9250_v21, %v9254_v23  ;;  %s1529_s13 = sadd.s32 1, %s8842_s13  }
 0x1f7   : >> { %1707 = vmatpush1.bf16.msra.mxu0 %v7330_v43  ;;  %1750 = vmatpush1.bf16.msra.mxu1 %v7332_v39  ;;  %v7319_v0 = vcombine.high %v9242_v17, %v9246_v19  ;;  %v7324_v42 = vcombine.low %v9252_v22, %v9256_v24  ;;  %v7321_v43 = vcombine.high %v9244_v18, %v9248_v20  ;;  %p1526_p8 = scmp.ge.s32.totalorder %s1529_s13, 16  }
 0x1f8   : >> { %1708 = vmatprep.subr.bf16.mxu0 %v7327_v45  ;;  %1751 = vmatprep.subr.bf16.mxu1 %v7329_v35  ;;  %v7318_v45 = vcombine.low %v9242_v17, %v9246_v19  ;;  %v7315_v48 = vcombine.high %v9234_v13, %v9238_v15  ;;  %v7320_v39 = vcombine.low %v9244_v18, %v9248_v20  ;;  %v12172_v18 = vld [vmem:[#allocation37_spill] sm:$0xff] (%p1526_p8)  ;;  %v12173_v20 = vld [vmem:[#allocation38_spill] sm:$0xff] (%p1526_p8)  ;;  %v12174_v22 = vld [vmem:[#allocation39_spill] sm:$0xff] (%p1526_p8)  ;;  %s10042_s30 = smov (%p1526_p8), 0  }
 0x1f9   : >> { %1738 = vmatprep.mubr.bf16.mxu0 %v8920_v46  ;;  %1781 = vmatprep.mubr.bf16.mxu1 %v8920_v46  ;;  %v7317_v35 = vcombine.high %v9236_v14, %v9240_v16  ;;  %v7310_v46 = vcombine.low %v9226_v9, %v9230_v11  ;;  %v9844_v28 = vld [vmem:[#allocation10] sm:$0xff] (%p1526_p8)  ;;  %v9846_v29 = vld [vmem:[#allocation10 + $0x8] sm:$0xff] (%p1526_p8)  ;;  %v9848_v30 = vld [vmem:[#allocation10 + $0x10] sm:$0xff] (%p1526_p8) }
 0x1fb   : >> { %1709 = vmatpush1.bf16.msra.mxu0 %v7326_v40  ;;  %1752 = vmatpush1.bf16.msra.mxu1 %v7328_v47  ;;  %v7314_v40 = vcombine.low %v9234_v13, %v9238_v15  ;;  %v7316_v47 = vcombine.low %v9236_v14, %v9240_v16  ;;  %v8171_v13 = vld [vmem:[#allocation9 + $0x8] ss:$16 sps:$4 sm:$0xff] (%p1526_p8)   ;;  %v1877_v15 = vld [vmem:[%s11985_s6] sm:$0xf] (%p1526_p8) }
 0x1fc   : >> { %1710 = vmatprep.subr.bf16.mxu0 %v7323_v38  ;;  %1753 = vmatprep.subr.bf16.mxu1 %v7325_v44  ;;  %v7311_v38 = vcombine.high %v9226_v9, %v9230_v11  ;;  %v7313_v44 = vcombine.high %v9228_v10, %v9232_v12  ;;  %v8165_v9 = vld [vmem:[#allocation9 + $0x28] ss:$16 sps:$4 sm:$0xff] (%p1526_p8)   ;;  %v8168_v11 = vld [vmem:[#allocation9 + $0xc] ss:$16 sps:$4 sm:$0xff] (%p1526_p8)   ;;  %v12171_v16 = vld [vmem:[#allocation36_spill] sm:$0xff] (%p1526_p8)  ;;  %v9834_v19 = vrot.slane (%p1526_p8), %v1877_v15, %v12172_v18 }
 0x1fd   : > { %v12170_v14 = vld [vmem:[#allocation35_spill] sm:$0xff] (%p1526_p8)  ;;  %v9831_v17 = vrot.slane (%p1526_p8), %v1877_v15, %v12171_v16  ;;  %v9837_v21 = vrot.slane (%p1526_p8), %v1877_v15, %v12173_v20  ;;  %v9840_v23 = vrot.slane (%p1526_p8), %v1877_v15, %v12174_v22 }
 0x1fe   : > { %v9916_v15 = vld [vmem:[#allocation10 + $0xf8] sm:$0xff] (%p1526_p8) }
 0x1ff   : >> { %1711 = vmatpush1.bf16.msra.mxu0 %v7322_v37  ;;  %1754 = vmatpush1.bf16.msra.mxu1 %v7324_v42  ;;  %v7307_v37 = vcombine.high %v12164_v5, %v12162_v7  ;;  %v7309_v42 = vcombine.high %v12163_v6, %v9224_v8 }
 0x200   : >> { %1712 = vmatprep.subr.bf16.mxu0 %v7319_v0  ;;  %1755 = vmatprep.subr.bf16.mxu1 %v7321_v43  ;;  %v7312_v0 = vcombine.low %v9228_v10, %v9232_v12  ;;  %v7306_v43 = vcombine.low %v12164_v5, %v12162_v7  ;;  %v8166_v10 = vld [vmem:[#allocation9 + $0x4] ss:$16 sps:$4 sm:$0xff] (%p1526_p8)   ;;  %v8170_v12 = vld [vmem:[#allocation9] ss:$16 sps:$4 sm:$0xff] (%p1526_p8)  }
 0x203   : >> { %1713 = vmatpush1.bf16.msra.mxu0 %v7318_v45  ;;  %1756 = vmatpush1.bf16.msra.mxu1 %v7320_v39  ;;  %v7303_v45 = vcombine.high %v12168_v1, %v12166_v3  ;;  %v7305_v39 = vcombine.high %v12167_v2, %v12165_v4 }
 0x204   : >> { %1714 = vmatprep.subr.bf16.mxu0 %v7315_v48  ;;  %1757 = vmatprep.subr.bf16.mxu1 %v7317_v35  ;;  %v7308_v48 = vcombine.low %v12163_v6, %v9224_v8  ;;  %v7302_v35 = vcombine.low %v12168_v1, %v12166_v3  ;;  %v1539_v3 = vld [vmem:[%s9707_s1 + $0x10] sm:$0xff] }
 0x205   : > { %v8164_v8 = vld [vmem:[#allocation9 + $0x20] ss:$16 sps:$4 sm:$0xff] (%p1526_p8)  }
 0x207   : >> { %1715 = vmatpush1.bf16.msra.mxu0 %v7314_v40  ;;  %1758 = vmatpush1.bf16.msra.mxu1 %v7316_v47  ;;  %v7304_v40 = vcombine.low %v12167_v2, %v12165_v4  ;;  %v1537_v47 = vld [vmem:[%s9707_s1] sm:$0xff] }
 0x208   : >> { %1716 = vmatprep.subr.bf16.mxu0 %v7311_v38  ;;  %1759 = vmatprep.subr.bf16.mxu1 %v7313_v44  ;;  %v1545_v38 = vpack.c.bf16 %v8834_v33, %v8838_v41 }
 0x20b   : >> { %1717 = vmatpush1.bf16.msra.mxu0 %v7310_v46  ;;  %1760 = vmatpush1.bf16.msra.mxu1 %v7312_v0  ;;  %v1538_v46 = vld [vmem:[%s9707_s1 + $0x8] sm:$0xff] }
 0x20c   : >> { %1718 = vmatprep.subr.bf16.mxu0 %v7307_v37  ;;  %1761 = vmatprep.subr.bf16.mxu1 %v7309_v42 }
 0x20f   : >> { %1719 = vmatpush1.bf16.msra.mxu0 %v7306_v43  ;;  %1762 = vmatpush1.bf16.msra.mxu1 %v7308_v48  ;;  %v1541_v43 = vld [vmem:[%s9707_s1 + $0x20] sm:$0xff]  ;;  %v1542_v48 = vld [vmem:[%s9707_s1 + $0x28] sm:$0xff] }
 0x210   : >> { %1720 = vmatprep.subr.bf16.mxu0 %v7303_v45  ;;  %1763 = vmatprep.subr.bf16.mxu1 %v7305_v39 }
 0x213   : >> { %1721 = vmatpush1.bf16.msra.mxu0 %v7302_v35  ;;  %1764 = vmatpush1.bf16.msra.mxu1 %v7304_v40 }
 0x216   : >> { %1739 = vmatmul.mubr.bf16.vlgmr.msra.gmra.mxu0 %v1545_v38  ;;  %1782 = vmatmul.mubr.bf16.vlgmr.msra.gmra.mxu1 %v1545_v38 }
 0x2d6   : >> { %v1740_v44 = vpop.f32.mrf.mxu0  ;;  %v1783_v0 = vpop.f32.mrf.mxu1 }
 0x2d7   : >> { %v1792_v37 = vadd.f32 %v1740_v44, %v1537_v47  ;;  %v1794_v5 = vadd.f32 %v1783_v0, %v1539_v3 }
 0x2d8   : >> { %v1742_v42 = vpop.f32.mrf.mxu0  ;;  %v1785_v40 = vpop.f32.mrf.mxu1 }
 0x2d9   : >> { %v7334_v45 = vmul.f32 -1.442695, %v1792_v37  ;;  %v1793_v33 = vadd.f32 %v1742_v42, %v1538_v46  ;;  %v1540_v37 = vld [vmem:[%s9707_s1 + $0x18] sm:$0xff] }
 0x2da   : >> { %v1744_v41 = vpop.f32.mrf.mxu0  ;;  %v1787_v44 = vpop.f32.mrf.mxu1  ;;  %v1544_v46 = vld [vmem:[%s9707_s1 + $0x38] sm:$0xff]  ;;  %v1795_v4 = vadd.f32 %v1785_v40, %v1540_v37 }
 0x2db   : >> { %8116 = vpow2.f32 %v7334_v45  ;;  %v7336_v39 = vmul.f32 -1.442695, %v1793_v33  ;;  %v1796_v35 = vadd.f32 %v1744_v41, %v1541_v43  ;;  %v1543_v41 = vld [vmem:[%s9707_s1 + $0x30] sm:$0xff] }
 0x2dc   : >> { %v1746_v38 = vpop.f32.mrf.mxu0  ;;  %v1789_v42 = vpop.f32.mrf.mxu1  ;;  %v7338_v33 = vmul.f32 -1.442695, %v1795_v4 }
 0x2dd   : >> { %8118 = vpow2.f32 %v7336_v39  ;;  %v7335_v1 = vmul.f32 -1.442695, %v1796_v35  ;;  %v1797_v2 = vadd.f32 %v1746_v38, %v1542_v48  ;;  %v1799_v6 = vadd.f32 %v1789_v42, %v1544_v46 }
 0x2df   : >> { %8120 = vpow2.f32 %v7335_v1  ;;  %v7337_v47 = vmul.f32 -1.442695, %v1797_v2  ;;  %v7339_v39 = vmul.f32 -1.442695, %v1799_v6  ;;  %v1798_v2 = vadd.f32 %v1787_v44, %v1543_v41 }
 0x2e1   : >> { %8122 = vpow2.f32 %v7337_v47 }
 0x2e2   : >> { %8124 = vtanh.f32 %v1794_v5 }
 0x2e8   : >> { %v8117_v45 = vpop.eup %8116 }
 0x2e9   : >> { %v1806_v43 = vadd.f32 1.0, %v8117_v45 }
 0x2ea   : >> { %v8119_v7 = vpop.eup %8118 }
 0x2eb   : >> { %8126 = vrcp.f32 %v1806_v43  ;;  %v1818_v48 = vadd.f32 1.0, %v8119_v7 }
 0x2ec   : >> { %v8121_v1 = vpop.eup %8120  ;;  %8128 = vpow2.f32 %v7338_v33 }
 0x2ed   : >> { %8130 = vrcp.f32 %v1818_v48  ;;  %v1807_v35 = vadd.f32 1.0, %v8121_v1 }
 0x2ee   : >> { %v8123_v38 = vpop.eup %8122  ;;  %8132 = vpow2.f32 %v7339_v39 }
 0x2ef   : >> { %8134 = vrcp.f32 %v1807_v35  ;;  %v1819_v40 = vadd.f32 1.0, %v8123_v38  ;;  %v8125_v3 = vpop.eup %8124  ;;  %v8148_v35 = vld [vmem:[#allocation9 + $0x64] ss:$16 sps:$4 sm:$0xff] (%p1526_p8)   ;;  %v12169_v38 = vmov (%p1526_p8), 0  }
 0x2f0   : >> { %8136 = vtanh.f32 %v1798_v2  ;;  %2011 = vmatprep.mubr.bf16.mxu0 (%p1526_p8), %v12169_v38  ;;  %2204 = vmatprep.mubr.bf16.mxu1 (%p1526_p8), %v12169_v38 }
 0x2f1   : >> { %8138 = vrcp.f32 %v1819_v40  ;;  %v8150_v40 = vld [vmem:[#allocation9 + $0x6c] ss:$16 sps:$4 sm:$0xff] (%p1526_p8)   ;;  %1987 = vmatprep.subr.bf16.mxu0 (%p1526_p8), %v8148_v35 }
 0x2f2   : > { %2180 = vmatprep.subr.bf16.mxu1 (%p1526_p8), %v8150_v40  ;;  %v9892_v40 = vld [vmem:[#allocation10 + $0xa8] sm:$0xff] (%p1526_p8) }
 0x2f8   : >> { %v8127_v4 = vpop.eup %8126 }
 0x2f9   : >> { %v8129_v0 = vpop.eup %8128  ;;  %v1840_v6 = vmul.f32 %v8127_v4, %v8125_v3  ;;  %v8152_v3 = vld [vmem:[#allocation9 + $0x60] ss:$16 sps:$4 sm:$0xff] (%p1526_p8)   ;;  %v8153_v4 = vld [vmem:[#allocation9 + $0x68] ss:$16 sps:$4 sm:$0xff] (%p1526_p8)  }
 0x2fa   : >> { %v8131_v47 = vpop.eup %8130  ;;  %v1832_v46 = vadd.f32 1.0, %v8129_v0  ;;  %v8154_v0 = vld [vmem:[#allocation9 + $0x44] ss:$16 sps:$4 sm:$0xff] (%p1526_p8)   ;;  %1988 = vmatpush1.bf16.msra.mxu0 (%p1526_p8), %v8152_v3  ;;  %2181 = vmatpush1.bf16.msra.mxu1 (%p1526_p8), %v8153_v4  ;;  %v9896_v4 = vld [vmem:[#allocation10 + $0xb8] sm:$0xff] (%p1526_p8) }
 0x2fb   : >> { %v8133_v37 = vpop.eup %8132  ;;  %v1838_v5 = vmul.f32 %v8830_v34, %v8131_v47  ;;  %v8156_v47 = vld [vmem:[#allocation9 + $0x4c] ss:$16 sps:$4 sm:$0xff] (%p1526_p8)   ;;  %1989 = vmatprep.subr.bf16.mxu0 (%p1526_p8), %v8154_v0  ;;  %v9894_v3 = vld [vmem:[#allocation10 + $0xb0] sm:$0xff] (%p1526_p8) }
 0x2fc   : >> { %v8135_v7 = vpop.eup %8134  ;;  %v1833_v45 = vadd.f32 1.0, %v8133_v37  ;;  %8140 = vrcp.f32 %v1832_v46  ;;  %v8158_v37 = vld [vmem:[#allocation9 + $0x40] ss:$16 sps:$4 sm:$0xff] (%p1526_p8)   ;;  %2182 = vmatprep.subr.bf16.mxu1 (%p1526_p8), %v8156_v47 }
 0x2fd   : >> { %v8137_v44 = vpop.eup %8136  ;;  %v1842_v34 = vadd.f32 %v1840_v6, %v1838_v5   ;;  %v8159_v5 = vld [vmem:[#allocation9 + $0x48] ss:$16 sps:$4 sm:$0xff] (%p1526_p8)   ;;  %v8160_v6 = vld [vmem:[#allocation9 + $0x24] ss:$16 sps:$4 sm:$0xff] (%p1526_p8)  }
 0x2fe   : >> { %v8139_v42 = vpop.eup %8138  ;;  %v1841_v43 = vmul.f32 %v8137_v44, %v8135_v7  ;;  %v8162_v7 = vld [vmem:[#allocation9 + $0x2c] ss:$16 sps:$4 sm:$0xff] (%p1526_p8)   ;;  %1990 = vmatpush1.bf16.msra.mxu0 (%p1526_p8), %v8158_v37  ;;  %2183 = vmatpush1.bf16.msra.mxu1 (%p1526_p8), %v8159_v5  ;;  %v9876_v46 = vld [vmem:[#allocation10 + $0x70] sm:$0xff] (%p1526_p8)  ;;  %v9900_v37 = vld [vmem:[#allocation10 + $0xc0] sm:$0xff] (%p1526_p8) }
 0x2ff   : >> { %v1839_v33 = vmul.f32 %v8826_v36, %v8139_v42  ;;  %8142 = vtanh.f32 %v1842_v34  ;;  %1991 = vmatprep.subr.bf16.mxu0 (%p1526_p8), %v8160_v6  ;;  %2184 = vmatprep.subr.bf16.mxu1 (%p1526_p8), %v8162_v7  ;;  %v9874_v34 = vld [vmem:[#allocation10 + $0x68] sm:$0xff] (%p1526_p8)  ;;  %v9904_v6 = vld [vmem:[#allocation10 + $0xd0] sm:$0xff] (%p1526_p8) }
 0x300   : >> { %8144 = vrcp.f32 %v1833_v45  ;;  %v9878_v45 = vld [vmem:[#allocation10 + $0x78] sm:$0xff] (%p1526_p8)  ;;  %v9902_v5 = vld [vmem:[#allocation10 + $0xc8] sm:$0xff] (%p1526_p8) }
 0x301   : >> { %v1843_v36 = vadd.f32 %v1841_v43, %v1839_v33   ;;  %v9882_v43 = vld [vmem:[#allocation10 + $0x88] sm:$0xff] (%p1526_p8) }
 0x302   : > { %1992 = vmatpush1.bf16.msra.mxu0 (%p1526_p8), %v8164_v8  ;;  %2185 = vmatpush1.bf16.msra.mxu1 (%p1526_p8), %v8165_v9  ;;  %v9906_v9 = vld [vmem:[#allocation10 + $0xd8] sm:$0xff] (%p1526_p8) }
 0x303   : >> { %8146 = vtanh.f32 %v1843_v36  ;;  %1993 = vmatprep.subr.bf16.mxu0 (%p1526_p8), %v8166_v10  ;;  %2186 = vmatprep.subr.bf16.mxu1 (%p1526_p8), %v8168_v11  ;;  %v9872_v36 = vld [vmem:[#allocation10 + $0x60] sm:$0xff] (%p1526_p8)  ;;  %v9910_v11 = vld [vmem:[#allocation10 + $0xe8] sm:$0xff] (%p1526_p8) }
 0x304   : > { %v9908_v10 = vld [vmem:[#allocation10 + $0xe0] sm:$0xff] (%p1526_p8) }
 0x306   : > { %1994 = vmatpush1.bf16.msra.mxu0 (%p1526_p8), %v8170_v12  ;;  %2187 = vmatpush1.bf16.msra.mxu1 (%p1526_p8), %v8171_v13 }
 0x309   : >> { %v8141_v41 = vpop.eup %8140  ;;  %7360 = vmatmul.mubr.msk.bf16.vlgmr.msra.gmra.mxu0 (%p1526_p8), %vm929_vm0, %v9323_v49  ;;  %7376 = vmatmul.mubr.msk.bf16.vlgmr.msra.gmra.mxu1 (%p1526_p8), %vm929_vm0, %v9323_v49  ;;  %v9850_v49 = vld [vmem:[#allocation10 + $0x18] sm:$0xff] (%p1526_p8) }
 0x30a   : > { %2021 = vmatprep.mubr.bf16.mxu0 (%p1526_p8), %v12169_v38  ;;  %2214 = vmatprep.mubr.bf16.mxu1 (%p1526_p8), %v12169_v38 }
 0x30c   : >> { %v8143_v39 = vpop.eup %8142 }
 0x30d   : >> { %v8145_v48 = vpop.eup %8144  ;;  %v1846_v41 = vmul.f32 %v8143_v39, %v8141_v41  }
 0x310   : >> { %v8147_v1 = vpop.eup %8146 }
 0x311   : >> { %v1847_v33 = vmul.f32 %v8147_v1, %v8145_v48   ;;  %1528 = sbr.rel (!%p1526_p8) target bundleno = 500 (0x1f4), region = 195  ;;  %7361 = vmatmul.mubr.msk.bf16.gmra.mxu0 (%p1526_p8), %vm929_vm0, %v9332_v50  ;;  %7377 = vmatmul.mubr.msk.bf16.gmra.mxu1 (%p1526_p8), %vm929_vm0, %v9332_v50  ;;  %v9852_v50 = vld [vmem:[#allocation10 + $0x20] sm:$0xff] (%p1526_p8)  ;;  %v9886_v48 = vld [vmem:[#allocation10 + $0x90] sm:$0xff] (%p1526_p8)  ;;  %v9888_v1 = vld [vmem:[#allocation10 + $0x98] sm:$0xff] (%p1526_p8) }
 0x312   : > { %2031 = vmatprep.mubr.bf16.mxu0 (%p1526_p8), %v12169_v38  ;;  %2224 = vmatprep.mubr.bf16.mxu1 (%p1526_p8), %v12169_v38 }
 0x313   : >> { %v7713_v2 = vpack.c.bf16 %v1847_v33, %v1846_v41  ;;  %v9880_v33 = vld [vmem:[#allocation10 + $0x80] sm:$0xff] (%p1526_p8) }
 0x315   : >> { %7714 = vst [vmem:[%s1858_s16] sm:$0xff] %v7713_v2   ;;  %v9890_v2 = vld [vmem:[#allocation10 + $0xa0] sm:$0xff] (%p1526_p8) }
 0x319   : > { %7362 = vmatmul.mubr.msk.bf16.gmra.mxu0 %vm929_vm0, %v9341_v51  ;;  %7378 = vmatmul.mubr.msk.bf16.gmra.mxu1 %vm929_vm0, %v9341_v51  ;;  %v9854_v51 = vld [vmem:[#allocation10 + $0x28] sm:$0xff] }
 0x31a   : > { %2041 = vmatprep.mubr.bf16.mxu0 %v12169_v38  ;;  %2234 = vmatprep.mubr.bf16.mxu1 %v12169_v38 }
 0x321   : > { %7363 = vmatmul.mubr.msk.bf16.gmra.mxu0 %vm929_vm0, %v9350_v52  ;;  %7379 = vmatmul.mubr.msk.bf16.gmra.mxu1 %vm929_vm0, %v9350_v52 }
 0x322   : > { %2051 = vmatprep.mubr.bf16.mxu0 %v12169_v38  ;;  %2244 = vmatprep.mubr.bf16.mxu1 %v12169_v38 }
 0x329   : > { %7364 = vmatmul.mubr.msk.bf16.gmra.mxu0 %vm929_vm0, %v9359_v53  ;;  %7380 = vmatmul.mubr.msk.bf16.gmra.mxu1 %vm929_vm0, %v9359_v53 }
 0x32a   : > { %2061 = vmatprep.mubr.bf16.mxu0 %v12169_v38  ;;  %2254 = vmatprep.mubr.bf16.mxu1 %v12169_v38 }
 0x331   : > { %7365 = vmatmul.mubr.msk.bf16.gmra.mxu0 %vm929_vm0, %v9368_v54  ;;  %7381 = vmatmul.mubr.msk.bf16.gmra.mxu1 %vm929_vm0, %v9368_v54  ;;  %v9858_v54 = vld [vmem:[#allocation10 + $0x30] sm:$0xff] }
 0x332   : > { %2071 = vmatprep.mubr.bf16.mxu0 %v12169_v38  ;;  %2264 = vmatprep.mubr.bf16.mxu1 %v12169_v38 }
 0x339   : > { %7366 = vmatmul.mubr.msk.bf16.gmra.mxu0 %vm929_vm0, %v9377_v55  ;;  %7382 = vmatmul.mubr.msk.bf16.gmra.mxu1 %vm929_vm0, %v9377_v55  ;;  %v9860_v55 = vld [vmem:[#allocation10 + $0x38] sm:$0xff] }
 0x33a   : > { %2081 = vmatprep.mubr.bf16.mxu0 %v12169_v38  ;;  %2274 = vmatprep.mubr.bf16.mxu1 %v12169_v38 }
 0x341   : > { %7367 = vmatmul.mubr.msk.bf16.gmra.mxu0 %vm929_vm0, %v9386_v56  ;;  %7383 = vmatmul.mubr.msk.bf16.gmra.mxu1 %vm929_vm0, %v9386_v56  ;;  %v9862_v56 = vld [vmem:[#allocation10 + $0x40] sm:$0xff] }
 0x342   : > { %2091 = vmatprep.mubr.bf16.mxu0 %v12169_v38  ;;  %2284 = vmatprep.mubr.bf16.mxu1 %v12169_v38 }
 0x349   : > { %7368 = vmatmul.mubr.msk.bf16.gmra.mxu0 %vm929_vm0, %v9395_v57  ;;  %7384 = vmatmul.mubr.msk.bf16.gmra.mxu1 %vm929_vm0, %v9395_v57 }
 0x34a   : > { %2101 = vmatprep.mubr.bf16.mxu0 %v12169_v38  ;;  %2294 = vmatprep.mubr.bf16.mxu1 %v12169_v38 }
 0x351   : > { %7369 = vmatmul.mubr.msk.bf16.gmra.mxu0 %vm929_vm0, %v9404_v58  ;;  %7385 = vmatmul.mubr.msk.bf16.gmra.mxu1 %vm929_vm0, %v9404_v58 }
 0x352   : > { %2111 = vmatprep.mubr.bf16.mxu0 %v12169_v38  ;;  %2304 = vmatprep.mubr.bf16.mxu1 %v12169_v38 }
 0x359   : > { %7370 = vmatmul.mubr.msk.bf16.gmra.mxu0 %vm929_vm0, %v9413_v59  ;;  %7386 = vmatmul.mubr.msk.bf16.gmra.mxu1 %vm929_vm0, %v9413_v59  ;;  %v9864_v59 = vld [vmem:[#allocation10 + $0x48] sm:$0xff] }
 0x35a   : > { %2121 = vmatprep.mubr.bf16.mxu0 %v12169_v38  ;;  %2314 = vmatprep.mubr.bf16.mxu1 %v12169_v38 }
 0x361   : > { %7371 = vmatmul.mubr.msk.bf16.gmra.mxu0 %vm929_vm0, %v9422_v60  ;;  %7387 = vmatmul.mubr.msk.bf16.gmra.mxu1 %vm929_vm0, %v9422_v60  ;;  %v9866_v60 = vld [vmem:[#allocation10 + $0x50] sm:$0xff] }
 0x362   : > { %2131 = vmatprep.mubr.bf16.mxu0 %v12169_v38  ;;  %2324 = vmatprep.mubr.bf16.mxu1 %v12169_v38 }
 0x369   : > { %7372 = vmatmul.mubr.msk.bf16.gmra.mxu0 %vm929_vm0, %v9431_v61  ;;  %7388 = vmatmul.mubr.msk.bf16.gmra.mxu1 %vm929_vm0, %v9431_v61  ;;  %v9868_v61 = vld [vmem:[#allocation10 + $0x58] sm:$0xff] }
 0x36a   : > { %2141 = vmatprep.mubr.bf16.mxu0 %v12169_v38  ;;  %2334 = vmatprep.mubr.bf16.mxu1 %v12169_v38 }
 0x371   : > { %7373 = vmatmul.mubr.msk.bf16.gmra.mxu0 %vm929_vm0, %v9440_v62  ;;  %7389 = vmatmul.mubr.msk.bf16.gmra.mxu1 %vm929_vm0, %v9440_v62 }
 0x372   : > { %2151 = vmatprep.mubr.bf16.mxu0 %v12169_v38  ;;  %2344 = vmatprep.mubr.bf16.mxu1 %v12169_v38 }
 0x379   : > { %7374 = vmatmul.mubr.msk.bf16.gmra.mxu0 %vm929_vm0, %v9449_v63  ;;  %7390 = vmatmul.mubr.msk.bf16.gmra.mxu1 %vm929_vm0, %v9449_v63 }
 0x37a   : > { %2161 = vmatprep.mubr.bf16.mxu0 %v12169_v38  ;;  %2354 = vmatprep.mubr.bf16.mxu1 %v12169_v38 }
 0x381   : > { %7375 = vmatmul.mubr.msk.bf16.gmra.mxu0 %vm929_vm0, %v12170_v14  ;;  %7391 = vmatmul.mubr.msk.bf16.gmra.mxu1 %vm929_vm0, %v12170_v14  ;;  %v9914_v14 = vld [vmem:[#allocation10 + $0xf0] sm:$0xff] }
 0x3c9   : > { %v2013_v24 = vpop.f32.mrf.mxu0  ;;  %v2206_v25 = vpop.f32.mrf.mxu1 }
 0x3ca   : > { %v2014_v26 = vadd.f32 %v2013_v24, %v9831_v17  ;;  %v2207_v27 = vadd.f32 %v2206_v25, %v9834_v19 }
 0x3cb   : > { %v2015_v31 = vpop.f32.mrf.mxu0  ;;  %v2208_v32 = vpop.f32.mrf.mxu1 }
 0x3cc   : > { %2365 = vst [vmem:[#allocation2] sm:$0xff] %v2014_v26  ;;  %2367 = vst [vmem:[#allocation2 + $0x10] sm:$0xff] %v2207_v27  ;;  %v2016_v52 = vadd.f32 %v2015_v31, %v9837_v21  ;;  %v2209_v53 = vadd.f32 %v2208_v32, %v9840_v23 }
 0x3cd   : > { %v2017_v57 = vpop.f32.mrf.mxu0  ;;  %v2210_v58 = vpop.f32.mrf.mxu1 }
 0x3ce   : > { %2366 = vst [vmem:[#allocation2 + $0x8] sm:$0xff] %v2016_v52  ;;  %2368 = vst [vmem:[#allocation2 + $0x18] sm:$0xff] %v2209_v53  ;;  %v2018_v62 = vadd.f32 %v2017_v57, %v9831_v17  ;;  %v2211_v63 = vadd.f32 %v2210_v58, %v9834_v19 }
 0x3cf   : > { %v2019_v44 = vpop.f32.mrf.mxu0  ;;  %v2212_v42 = vpop.f32.mrf.mxu1 }
 0x3d0   : > { %2369 = vst [vmem:[#allocation2 + $0x20] sm:$0xff] %v2018_v62  ;;  %2371 = vst [vmem:[#allocation2 + $0x30] sm:$0xff] %v2211_v63  ;;  %v2020_v41 = vadd.f32 %v2019_v44, %v9837_v21  ;;  %v2213_v39 = vadd.f32 %v2212_v42, %v9840_v23 }
 0x3d1   : > { %v2023_v35 = vpop.f32.mrf.mxu0  ;;  %v2216_v38 = vpop.f32.mrf.mxu1 }
 0x3d2   : > { %2370 = vst [vmem:[#allocation2 + $0x28] sm:$0xff] %v2020_v41  ;;  %2372 = vst [vmem:[#allocation2 + $0x38] sm:$0xff] %v2213_v39  ;;  %v2024_v0 = vadd.f32 %v2023_v35, %v9831_v17  ;;  %v2217_v47 = vadd.f32 %v2216_v38, %v9834_v19 }
 0x3d3   : > { %v2025_v7 = vpop.f32.mrf.mxu0  ;;  %v2218_v8 = vpop.f32.mrf.mxu1 }
 0x3d4   : > { %2373 = vst [vmem:[#allocation2 + $0x40] sm:$0xff] %v2024_v0  ;;  %2375 = vst [vmem:[#allocation2 + $0x50] sm:$0xff] %v2217_v47  ;;  %v2026_v12 = vadd.f32 %v2025_v7, %v9837_v21  ;;  %v2219_v13 = vadd.f32 %v2218_v8, %v9840_v23 }
 0x3d5   : > { %v2027_v16 = vpop.f32.mrf.mxu0  ;;  %v2220_v18 = vpop.f32.mrf.mxu1 }
 0x3d6   : > { %2374 = vst [vmem:[#allocation2 + $0x48] sm:$0xff] %v2026_v12  ;;  %2376 = vst [vmem:[#allocation2 + $0x58] sm:$0xff] %v2219_v13  ;;  %v2028_v20 = vadd.f32 %v2027_v16, %v9831_v17  ;;  %v2221_v22 = vadd.f32 %v2220_v18, %v9834_v19 }
 0x3d7   : > { %v2029_v24 = vpop.f32.mrf.mxu0  ;;  %v2222_v25 = vpop.f32.mrf.mxu1 }
 0x3d8   : > { %2377 = vst [vmem:[#allocation2 + $0x60] sm:$0xff] %v2028_v20  ;;  %2379 = vst [vmem:[#allocation2 + $0x70] sm:$0xff] %v2221_v22  ;;  %v2030_v26 = vadd.f32 %v2029_v24, %v9837_v21  ;;  %v2223_v27 = vadd.f32 %v2222_v25, %v9840_v23 }
 0x3d9   : > { %v2033_v31 = vpop.f32.mrf.mxu0  ;;  %v2226_v32 = vpop.f32.mrf.mxu1 }
 0x3da   : > { %2378 = vst [vmem:[#allocation2 + $0x68] sm:$0xff] %v2030_v26  ;;  %2380 = vst [vmem:[#allocation2 + $0x78] sm:$0xff] %v2223_v27  ;;  %v2034_v52 = vadd.f32 %v2033_v31, %v9831_v17  ;;  %v2227_v53 = vadd.f32 %v2226_v32, %v9834_v19 }
 0x3db   : > { %v2035_v57 = vpop.f32.mrf.mxu0  ;;  %v2228_v58 = vpop.f32.mrf.mxu1 }
 0x3dc   : > { %2381 = vst [vmem:[#allocation2 + $0x80] sm:$0xff] %v2034_v52  ;;  %2383 = vst [vmem:[#allocation2 + $0x90] sm:$0xff] %v2227_v53  ;;  %v2036_v62 = vadd.f32 %v2035_v57, %v9837_v21  ;;  %v2229_v63 = vadd.f32 %v2228_v58, %v9840_v23 }
 0x3dd   : > { %v2037_v44 = vpop.f32.mrf.mxu0  ;;  %v2230_v42 = vpop.f32.mrf.mxu1 }
 0x3de   : > { %2382 = vst [vmem:[#allocation2 + $0x88] sm:$0xff] %v2036_v62  ;;  %2384 = vst [vmem:[#allocation2 + $0x98] sm:$0xff] %v2229_v63  ;;  %v2038_v41 = vadd.f32 %v2037_v44, %v9831_v17  ;;  %v2231_v39 = vadd.f32 %v2230_v42, %v9834_v19 }
 0x3df   : > { %v2039_v35 = vpop.f32.mrf.mxu0  ;;  %v2232_v38 = vpop.f32.mrf.mxu1 }
 0x3e0   : > { %2385 = vst [vmem:[#allocation2 + $0xa0] sm:$0xff] %v2038_v41  ;;  %2387 = vst [vmem:[#allocation2 + $0xb0] sm:$0xff] %v2231_v39  ;;  %v2040_v0 = vadd.f32 %v2039_v35, %v9837_v21  ;;  %v2233_v47 = vadd.f32 %v2232_v38, %v9840_v23 }
 0x3e1   : > { %v2043_v7 = vpop.f32.mrf.mxu0  ;;  %v2236_v8 = vpop.f32.mrf.mxu1 }
 0x3e2   : > { %2386 = vst [vmem:[#allocation2 + $0xa8] sm:$0xff] %v2040_v0  ;;  %2388 = vst [vmem:[#allocation2 + $0xb8] sm:$0xff] %v2233_v47  ;;  %v2044_v12 = vadd.f32 %v2043_v7, %v9831_v17  ;;  %v2237_v13 = vadd.f32 %v2236_v8, %v9834_v19 }
 0x3e3   : > { %v2045_v16 = vpop.f32.mrf.mxu0  ;;  %v2238_v18 = vpop.f32.mrf.mxu1 }
 0x3e4   : > { %2389 = vst [vmem:[#allocation2 + $0xc0] sm:$0xff] %v2044_v12  ;;  %2391 = vst [vmem:[#allocation2 + $0xd0] sm:$0xff] %v2237_v13  ;;  %v2046_v20 = vadd.f32 %v2045_v16, %v9837_v21  ;;  %v2239_v22 = vadd.f32 %v2238_v18, %v9840_v23 }
 0x3e5   : > { %v2047_v24 = vpop.f32.mrf.mxu0  ;;  %v2240_v25 = vpop.f32.mrf.mxu1 }
 0x3e6   : > { %2390 = vst [vmem:[#allocation2 + $0xc8] sm:$0xff] %v2046_v20  ;;  %2392 = vst [vmem:[#allocation2 + $0xd8] sm:$0xff] %v2239_v22  ;;  %v2048_v26 = vadd.f32 %v2047_v24, %v9831_v17  ;;  %v2241_v27 = vadd.f32 %v2240_v25, %v9834_v19 }
 0x3e7   : > { %v2049_v31 = vpop.f32.mrf.mxu0  ;;  %v2242_v32 = vpop.f32.mrf.mxu1 }
 0x3e8   : > { %2393 = vst [vmem:[#allocation2 + $0xe0] sm:$0xff] %v2048_v26  ;;  %2395 = vst [vmem:[#allocation2 + $0xf0] sm:$0xff] %v2241_v27  ;;  %v2050_v52 = vadd.f32 %v2049_v31, %v9837_v21  ;;  %v2243_v53 = vadd.f32 %v2242_v32, %v9840_v23 }
 0x3e9   : > { %v2053_v57 = vpop.f32.mrf.mxu0  ;;  %v2246_v58 = vpop.f32.mrf.mxu1 }
 0x3ea   : > { %2394 = vst [vmem:[#allocation2 + $0xe8] sm:$0xff] %v2050_v52  ;;  %2396 = vst [vmem:[#allocation2 + $0xf8] sm:$0xff] %v2243_v53  ;;  %v2054_v62 = vadd.f32 %v2053_v57, %v9831_v17  ;;  %v2247_v63 = vadd.f32 %v2246_v58, %v9834_v19 }
 0x3eb   : > { %v2055_v44 = vpop.f32.mrf.mxu0  ;;  %v2248_v42 = vpop.f32.mrf.mxu1 }
 0x3ec   : > { %2397 = vst [vmem:[#allocation2 + $0x100] sm:$0xff] %v2054_v62  ;;  %2399 = vst [vmem:[#allocation2 + $0x110] sm:$0xff] %v2247_v63  ;;  %v2056_v41 = vadd.f32 %v2055_v44, %v9837_v21  ;;  %v2249_v39 = vadd.f32 %v2248_v42, %v9840_v23 }
 0x3ed   : > { %v2057_v35 = vpop.f32.mrf.mxu0  ;;  %v2250_v38 = vpop.f32.mrf.mxu1 }
 0x3ee   : > { %2398 = vst [vmem:[#allocation2 + $0x108] sm:$0xff] %v2056_v41  ;;  %2400 = vst [vmem:[#allocation2 + $0x118] sm:$0xff] %v2249_v39  ;;  %v2058_v0 = vadd.f32 %v2057_v35, %v9831_v17  ;;  %v2251_v47 = vadd.f32 %v2250_v38, %v9834_v19 }
 0x3ef   : > { %v2059_v7 = vpop.f32.mrf.mxu0  ;;  %v2252_v8 = vpop.f32.mrf.mxu1 }
 0x3f0   : > { %2401 = vst [vmem:[#allocation2 + $0x120] sm:$0xff] %v2058_v0  ;;  %2403 = vst [vmem:[#allocation2 + $0x130] sm:$0xff] %v2251_v47  ;;  %v2060_v12 = vadd.f32 %v2059_v7, %v9837_v21  ;;  %v2253_v13 = vadd.f32 %v2252_v8, %v9840_v23 }
 0x3f1   : > { %v2063_v16 = vpop.f32.mrf.mxu0  ;;  %v2256_v18 = vpop.f32.mrf.mxu1 }
 0x3f2   : > { %2402 = vst [vmem:[#allocation2 + $0x128] sm:$0xff] %v2060_v12  ;;  %2404 = vst [vmem:[#allocation2 + $0x138] sm:$0xff] %v2253_v13  ;;  %v2064_v20 = vadd.f32 %v2063_v16, %v9831_v17  ;;  %v2257_v22 = vadd.f32 %v2256_v18, %v9834_v19 }
 0x3f3   : > { %v2065_v24 = vpop.f32.mrf.mxu0  ;;  %v2258_v25 = vpop.f32.mrf.mxu1 }
 0x3f4   : > { %2405 = vst [vmem:[#allocation2 + $0x140] sm:$0xff] %v2064_v20  ;;  %2407 = vst [vmem:[#allocation2 + $0x150] sm:$0xff] %v2257_v22  ;;  %v2066_v26 = vadd.f32 %v2065_v24, %v9837_v21  ;;  %v2259_v27 = vadd.f32 %v2258_v25, %v9840_v23 }
 0x3f5   : > { %v2067_v31 = vpop.f32.mrf.mxu0  ;;  %v2260_v32 = vpop.f32.mrf.mxu1 }
 0x3f6   : > { %2406 = vst [vmem:[#allocation2 + $0x148] sm:$0xff] %v2066_v26  ;;  %2408 = vst [vmem:[#allocation2 + $0x158] sm:$0xff] %v2259_v27  ;;  %v2068_v52 = vadd.f32 %v2067_v31, %v9831_v17  ;;  %v2261_v53 = vadd.f32 %v2260_v32, %v9834_v19 }
 0x3f7   : > { %v2069_v57 = vpop.f32.mrf.mxu0  ;;  %v2262_v58 = vpop.f32.mrf.mxu1 }
 0x3f8   : > { %2409 = vst [vmem:[#allocation2 + $0x160] sm:$0xff] %v2068_v52  ;;  %2411 = vst [vmem:[#allocation2 + $0x170] sm:$0xff] %v2261_v53  ;;  %v2070_v62 = vadd.f32 %v2069_v57, %v9837_v21  ;;  %v2263_v63 = vadd.f32 %v2262_v58, %v9840_v23 }
 0x3f9   : > { %v2073_v44 = vpop.f32.mrf.mxu0  ;;  %v2266_v42 = vpop.f32.mrf.mxu1 }
 0x3fa   : > { %2410 = vst [vmem:[#allocation2 + $0x168] sm:$0xff] %v2070_v62  ;;  %2412 = vst [vmem:[#allocation2 + $0x178] sm:$0xff] %v2263_v63  ;;  %v2074_v41 = vadd.f32 %v2073_v44, %v9831_v17  ;;  %v2267_v39 = vadd.f32 %v2266_v42, %v9834_v19 }
 0x3fb   : > { %v2075_v35 = vpop.f32.mrf.mxu0  ;;  %v2268_v38 = vpop.f32.mrf.mxu1 }
 0x3fc   : > { %2413 = vst [vmem:[#allocation2 + $0x180] sm:$0xff] %v2074_v41  ;;  %2415 = vst [vmem:[#allocation2 + $0x190] sm:$0xff] %v2267_v39  ;;  %v2076_v0 = vadd.f32 %v2075_v35, %v9837_v21  ;;  %v2269_v47 = vadd.f32 %v2268_v38, %v9840_v23 }
 0x3fd   : > { %v2077_v7 = vpop.f32.mrf.mxu0  ;;  %v2270_v8 = vpop.f32.mrf.mxu1 }
 0x3fe   : > { %2414 = vst [vmem:[#allocation2 + $0x188] sm:$0xff] %v2076_v0  ;;  %2416 = vst [vmem:[#allocation2 + $0x198] sm:$0xff] %v2269_v47  ;;  %v2078_v12 = vadd.f32 %v2077_v7, %v9831_v17  ;;  %v2271_v13 = vadd.f32 %v2270_v8, %v9834_v19 }
 0x3ff   : > { %v2079_v16 = vpop.f32.mrf.mxu0  ;;  %v2272_v18 = vpop.f32.mrf.mxu1 }
 0x400   : > { %2417 = vst [vmem:[#allocation2 + $0x1a0] sm:$0xff] %v2078_v12  ;;  %2419 = vst [vmem:[#allocation2 + $0x1b0] sm:$0xff] %v2271_v13  ;;  %v2080_v20 = vadd.f32 %v2079_v16, %v9837_v21  ;;  %v2273_v22 = vadd.f32 %v2272_v18, %v9840_v23 }
 0x401   : > { %v2083_v24 = vpop.f32.mrf.mxu0  ;;  %v2276_v25 = vpop.f32.mrf.mxu1 }
 0x402   : > { %2418 = vst [vmem:[#allocation2 + $0x1a8] sm:$0xff] %v2080_v20  ;;  %2420 = vst [vmem:[#allocation2 + $0x1b8] sm:$0xff] %v2273_v22  ;;  %v2084_v26 = vadd.f32 %v2083_v24, %v9831_v17  ;;  %v2277_v27 = vadd.f32 %v2276_v25, %v9834_v19 }
 0x403   : > { %v2085_v31 = vpop.f32.mrf.mxu0  ;;  %v2278_v32 = vpop.f32.mrf.mxu1 }
 0x404   : > { %2421 = vst [vmem:[#allocation2 + $0x1c0] sm:$0xff] %v2084_v26  ;;  %2423 = vst [vmem:[#allocation2 + $0x1d0] sm:$0xff] %v2277_v27  ;;  %v2086_v52 = vadd.f32 %v2085_v31, %v9837_v21  ;;  %v2279_v53 = vadd.f32 %v2278_v32, %v9840_v23 }
 0x405   : > { %v2087_v57 = vpop.f32.mrf.mxu0  ;;  %v2280_v58 = vpop.f32.mrf.mxu1 }
 0x406   : > { %2422 = vst [vmem:[#allocation2 + $0x1c8] sm:$0xff] %v2086_v52  ;;  %2424 = vst [vmem:[#allocation2 + $0x1d8] sm:$0xff] %v2279_v53  ;;  %v2088_v62 = vadd.f32 %v2087_v57, %v9831_v17  ;;  %v2281_v63 = vadd.f32 %v2280_v58, %v9834_v19 }
 0x407   : > { %v2089_v44 = vpop.f32.mrf.mxu0  ;;  %v2282_v42 = vpop.f32.mrf.mxu1 }
 0x408   : > { %2425 = vst [vmem:[#allocation2 + $0x1e0] sm:$0xff] %v2088_v62  ;;  %2427 = vst [vmem:[#allocation2 + $0x1f0] sm:$0xff] %v2281_v63  ;;  %v2090_v41 = vadd.f32 %v2089_v44, %v9837_v21  ;;  %v2283_v39 = vadd.f32 %v2282_v42, %v9840_v23 }
 0x409   : > { %v2093_v35 = vpop.f32.mrf.mxu0  ;;  %v2286_v38 = vpop.f32.mrf.mxu1 }
 0x40a   : > { %2426 = vst [vmem:[#allocation2 + $0x1e8] sm:$0xff] %v2090_v41  ;;  %2428 = vst [vmem:[#allocation2 + $0x1f8] sm:$0xff] %v2283_v39  ;;  %v2094_v0 = vadd.f32 %v2093_v35, %v9831_v17  ;;  %v2287_v47 = vadd.f32 %v2286_v38, %v9834_v19 }
 0x40b   : > { %v2095_v7 = vpop.f32.mrf.mxu0  ;;  %v2288_v8 = vpop.f32.mrf.mxu1 }
 0x40c   : > { %2429 = vst [vmem:[#allocation2 + $0x200] sm:$0xff] %v2094_v0  ;;  %2431 = vst [vmem:[#allocation2 + $0x210] sm:$0xff] %v2287_v47  ;;  %v2096_v12 = vadd.f32 %v2095_v7, %v9837_v21  ;;  %v2289_v13 = vadd.f32 %v2288_v8, %v9840_v23 }
 0x40d   : > { %v2097_v16 = vpop.f32.mrf.mxu0  ;;  %v2290_v18 = vpop.f32.mrf.mxu1 }
 0x40e   : > { %2430 = vst [vmem:[#allocation2 + $0x208] sm:$0xff] %v2096_v12  ;;  %2432 = vst [vmem:[#allocation2 + $0x218] sm:$0xff] %v2289_v13  ;;  %v2098_v20 = vadd.f32 %v2097_v16, %v9831_v17  ;;  %v2291_v22 = vadd.f32 %v2290_v18, %v9834_v19 }
 0x40f   : > { %v2099_v24 = vpop.f32.mrf.mxu0  ;;  %v2292_v25 = vpop.f32.mrf.mxu1 }
 0x410   : > { %2433 = vst [vmem:[#allocation2 + $0x220] sm:$0xff] %v2098_v20  ;;  %2435 = vst [vmem:[#allocation2 + $0x230] sm:$0xff] %v2291_v22  ;;  %v2100_v26 = vadd.f32 %v2099_v24, %v9837_v21  ;;  %v2293_v27 = vadd.f32 %v2292_v25, %v9840_v23 }
 0x411   : > { %v2103_v31 = vpop.f32.mrf.mxu0  ;;  %v2296_v32 = vpop.f32.mrf.mxu1 }
 0x412   : > { %2434 = vst [vmem:[#allocation2 + $0x228] sm:$0xff] %v2100_v26  ;;  %2436 = vst [vmem:[#allocation2 + $0x238] sm:$0xff] %v2293_v27  ;;  %v2104_v52 = vadd.f32 %v2103_v31, %v9831_v17  ;;  %v2297_v53 = vadd.f32 %v2296_v32, %v9834_v19 }
 0x413   : > { %v2105_v57 = vpop.f32.mrf.mxu0  ;;  %v2298_v58 = vpop.f32.mrf.mxu1 }
 0x414   : > { %2437 = vst [vmem:[#allocation2 + $0x240] sm:$0xff] %v2104_v52  ;;  %2439 = vst [vmem:[#allocation2 + $0x250] sm:$0xff] %v2297_v53  ;;  %v2106_v62 = vadd.f32 %v2105_v57, %v9837_v21  ;;  %v2299_v63 = vadd.f32 %v2298_v58, %v9840_v23 }
 0x415   : > { %v2107_v44 = vpop.f32.mrf.mxu0  ;;  %v2300_v42 = vpop.f32.mrf.mxu1 }
 0x416   : > { %2438 = vst [vmem:[#allocation2 + $0x248] sm:$0xff] %v2106_v62  ;;  %2440 = vst [vmem:[#allocation2 + $0x258] sm:$0xff] %v2299_v63  ;;  %v2108_v41 = vadd.f32 %v2107_v44, %v9831_v17  ;;  %v2301_v39 = vadd.f32 %v2300_v42, %v9834_v19 }
 0x417   : > { %v2109_v35 = vpop.f32.mrf.mxu0  ;;  %v2302_v38 = vpop.f32.mrf.mxu1 }
 0x418   : > { %2441 = vst [vmem:[#allocation2 + $0x260] sm:$0xff] %v2108_v41  ;;  %2443 = vst [vmem:[#allocation2 + $0x270] sm:$0xff] %v2301_v39  ;;  %v2110_v0 = vadd.f32 %v2109_v35, %v9837_v21  ;;  %v2303_v47 = vadd.f32 %v2302_v38, %v9840_v23 }
 0x419   : > { %v2113_v7 = vpop.f32.mrf.mxu0  ;;  %v2306_v8 = vpop.f32.mrf.mxu1 }
 0x41a   : > { %2442 = vst [vmem:[#allocation2 + $0x268] sm:$0xff] %v2110_v0  ;;  %2444 = vst [vmem:[#allocation2 + $0x278] sm:$0xff] %v2303_v47  ;;  %v2114_v12 = vadd.f32 %v2113_v7, %v9831_v17  ;;  %v2307_v13 = vadd.f32 %v2306_v8, %v9834_v19 }
 0x41b   : > { %v2115_v16 = vpop.f32.mrf.mxu0  ;;  %v2308_v18 = vpop.f32.mrf.mxu1 }
 0x41c   : > { %2445 = vst [vmem:[#allocation2 + $0x280] sm:$0xff] %v2114_v12  ;;  %2447 = vst [vmem:[#allocation2 + $0x290] sm:$0xff] %v2307_v13  ;;  %v2116_v20 = vadd.f32 %v2115_v16, %v9837_v21  ;;  %v2309_v22 = vadd.f32 %v2308_v18, %v9840_v23 }
 0x41d   : > { %v2117_v24 = vpop.f32.mrf.mxu0  ;;  %v2310_v25 = vpop.f32.mrf.mxu1 }
 0x41e   : > { %2446 = vst [vmem:[#allocation2 + $0x288] sm:$0xff] %v2116_v20  ;;  %2448 = vst [vmem:[#allocation2 + $0x298] sm:$0xff] %v2309_v22  ;;  %v2118_v26 = vadd.f32 %v2117_v24, %v9831_v17  ;;  %v2311_v27 = vadd.f32 %v2310_v25, %v9834_v19 }
 0x41f   : > { %v2119_v31 = vpop.f32.mrf.mxu0  ;;  %v2312_v32 = vpop.f32.mrf.mxu1 }
 0x420   : > { %2449 = vst [vmem:[#allocation2 + $0x2a0] sm:$0xff] %v2118_v26  ;;  %2451 = vst [vmem:[#allocation2 + $0x2b0] sm:$0xff] %v2311_v27  ;;  %v2120_v52 = vadd.f32 %v2119_v31, %v9837_v21  ;;  %v2313_v53 = vadd.f32 %v2312_v32, %v9840_v23 }
 0x421   : > { %v2123_v57 = vpop.f32.mrf.mxu0  ;;  %v2316_v58 = vpop.f32.mrf.mxu1 }
 0x422   : > { %2450 = vst [vmem:[#allocation2 + $0x2a8] sm:$0xff] %v2120_v52  ;;  %2452 = vst [vmem:[#allocation2 + $0x2b8] sm:$0xff] %v2313_v53  ;;  %v2124_v62 = vadd.f32 %v2123_v57, %v9831_v17  ;;  %v2317_v63 = vadd.f32 %v2316_v58, %v9834_v19 }
 0x423   : > { %v2125_v44 = vpop.f32.mrf.mxu0  ;;  %v2318_v42 = vpop.f32.mrf.mxu1 }
 0x424   : > { %2453 = vst [vmem:[#allocation2 + $0x2c0] sm:$0xff] %v2124_v62  ;;  %2455 = vst [vmem:[#allocation2 + $0x2d0] sm:$0xff] %v2317_v63  ;;  %v2126_v41 = vadd.f32 %v2125_v44, %v9837_v21  ;;  %v2319_v39 = vadd.f32 %v2318_v42, %v9840_v23 }
 0x425   : > { %v2127_v35 = vpop.f32.mrf.mxu0  ;;  %v2320_v38 = vpop.f32.mrf.mxu1 }
 0x426   : > { %2454 = vst [vmem:[#allocation2 + $0x2c8] sm:$0xff] %v2126_v41  ;;  %2456 = vst [vmem:[#allocation2 + $0x2d8] sm:$0xff] %v2319_v39  ;;  %v2128_v0 = vadd.f32 %v2127_v35, %v9831_v17  ;;  %v2321_v47 = vadd.f32 %v2320_v38, %v9834_v19 }
 0x427   : > { %v2129_v7 = vpop.f32.mrf.mxu0  ;;  %v2322_v8 = vpop.f32.mrf.mxu1 }
 0x428   : > { %2457 = vst [vmem:[#allocation2 + $0x2e0] sm:$0xff] %v2128_v0  ;;  %2459 = vst [vmem:[#allocation2 + $0x2f0] sm:$0xff] %v2321_v47  ;;  %v2130_v12 = vadd.f32 %v2129_v7, %v9837_v21  ;;  %v2323_v13 = vadd.f32 %v2322_v8, %v9840_v23 }
 0x429   : > { %v2133_v16 = vpop.f32.mrf.mxu0  ;;  %v2326_v18 = vpop.f32.mrf.mxu1 }
 0x42a   : > { %2458 = vst [vmem:[#allocation2 + $0x2e8] sm:$0xff] %v2130_v12  ;;  %2460 = vst [vmem:[#allocation2 + $0x2f8] sm:$0xff] %v2323_v13  ;;  %v2134_v20 = vadd.f32 %v2133_v16, %v9831_v17  ;;  %v2327_v22 = vadd.f32 %v2326_v18, %v9834_v19 }
 0x42b   : > { %v2135_v24 = vpop.f32.mrf.mxu0  ;;  %v2328_v25 = vpop.f32.mrf.mxu1 }
 0x42c   : > { %2461 = vst [vmem:[#allocation2 + $0x300] sm:$0xff] %v2134_v20  ;;  %2463 = vst [vmem:[#allocation2 + $0x310] sm:$0xff] %v2327_v22  ;;  %v2136_v26 = vadd.f32 %v2135_v24, %v9837_v21  ;;  %v2329_v27 = vadd.f32 %v2328_v25, %v9840_v23 }
 0x42d   : > { %v2137_v31 = vpop.f32.mrf.mxu0  ;;  %v2330_v32 = vpop.f32.mrf.mxu1 }
 0x42e   : > { %2462 = vst [vmem:[#allocation2 + $0x308] sm:$0xff] %v2136_v26  ;;  %2464 = vst [vmem:[#allocation2 + $0x318] sm:$0xff] %v2329_v27  ;;  %v2138_v52 = vadd.f32 %v2137_v31, %v9831_v17  ;;  %v2331_v53 = vadd.f32 %v2330_v32, %v9834_v19 }
 0x42f   : > { %v2139_v57 = vpop.f32.mrf.mxu0  ;;  %v2332_v58 = vpop.f32.mrf.mxu1 }
 0x430   : > { %2465 = vst [vmem:[#allocation2 + $0x320] sm:$0xff] %v2138_v52  ;;  %2467 = vst [vmem:[#allocation2 + $0x330] sm:$0xff] %v2331_v53  ;;  %v2140_v62 = vadd.f32 %v2139_v57, %v9837_v21  ;;  %v2333_v63 = vadd.f32 %v2332_v58, %v9840_v23 }
 0x431   : > { %v2143_v44 = vpop.f32.mrf.mxu0  ;;  %v2336_v42 = vpop.f32.mrf.mxu1 }
 0x432   : > { %2466 = vst [vmem:[#allocation2 + $0x328] sm:$0xff] %v2140_v62  ;;  %2468 = vst [vmem:[#allocation2 + $0x338] sm:$0xff] %v2333_v63  ;;  %v2144_v41 = vadd.f32 %v2143_v44, %v9831_v17  ;;  %v2337_v39 = vadd.f32 %v2336_v42, %v9834_v19 }
 0x433   : > { %v2145_v35 = vpop.f32.mrf.mxu0  ;;  %v2338_v38 = vpop.f32.mrf.mxu1 }
 0x434   : > { %2469 = vst [vmem:[#allocation2 + $0x340] sm:$0xff] %v2144_v41  ;;  %2471 = vst [vmem:[#allocation2 + $0x350] sm:$0xff] %v2337_v39  ;;  %v2146_v0 = vadd.f32 %v2145_v35, %v9837_v21  ;;  %v2339_v47 = vadd.f32 %v2338_v38, %v9840_v23 }
 0x435   : > { %v2147_v7 = vpop.f32.mrf.mxu0  ;;  %v2340_v8 = vpop.f32.mrf.mxu1 }
 0x436   : > { %2470 = vst [vmem:[#allocation2 + $0x348] sm:$0xff] %v2146_v0  ;;  %2472 = vst [vmem:[#allocation2 + $0x358] sm:$0xff] %v2339_v47  ;;  %v2148_v12 = vadd.f32 %v2147_v7, %v9831_v17  ;;  %v2341_v13 = vadd.f32 %v2340_v8, %v9834_v19 }
 0x437   : > { %v2149_v16 = vpop.f32.mrf.mxu0  ;;  %v2342_v18 = vpop.f32.mrf.mxu1 }
 0x438   : > { %2473 = vst [vmem:[#allocation2 + $0x360] sm:$0xff] %v2148_v12  ;;  %2475 = vst [vmem:[#allocation2 + $0x370] sm:$0xff] %v2341_v13  ;;  %v2150_v20 = vadd.f32 %v2149_v16, %v9837_v21  ;;  %v2343_v22 = vadd.f32 %v2342_v18, %v9840_v23 }
 0x439   : > { %v2153_v24 = vpop.f32.mrf.mxu0  ;;  %v2346_v25 = vpop.f32.mrf.mxu1 }
 0x43a   : > { %2474 = vst [vmem:[#allocation2 + $0x368] sm:$0xff] %v2150_v20  ;;  %2476 = vst [vmem:[#allocation2 + $0x378] sm:$0xff] %v2343_v22  ;;  %v2154_v26 = vadd.f32 %v2153_v24, %v9831_v17  ;;  %v2347_v27 = vadd.f32 %v2346_v25, %v9834_v19 }
 0x43b   : > { %v2155_v31 = vpop.f32.mrf.mxu0  ;;  %v2348_v32 = vpop.f32.mrf.mxu1 }
 0x43c   : > { %2477 = vst [vmem:[#allocation2 + $0x380] sm:$0xff] %v2154_v26  ;;  %2479 = vst [vmem:[#allocation2 + $0x390] sm:$0xff] %v2347_v27  ;;  %v2156_v52 = vadd.f32 %v2155_v31, %v9837_v21  ;;  %v2349_v53 = vadd.f32 %v2348_v32, %v9840_v23  ;;  %v10034_v31 = vmov 0.0   ;;  %v10036_v32 = vmov 0.0  }
 0x43d   : > { %v2157_v57 = vpop.f32.mrf.mxu0  ;;  %v2350_v58 = vpop.f32.mrf.mxu1 }
 0x43e   : > { %2478 = vst [vmem:[#allocation2 + $0x388] sm:$0xff] %v2156_v52  ;;  %2480 = vst [vmem:[#allocation2 + $0x398] sm:$0xff] %v2349_v53  ;;  %v2158_v62 = vadd.f32 %v2157_v57, %v9831_v17  ;;  %v2351_v63 = vadd.f32 %v2350_v58, %v9834_v19  ;;  %v10038_v52 = vmov 0.0   ;;  %v10040_v53 = vmov 0.0  }
 0x43f   : > { %v2159_v44 = vpop.f32.mrf.mxu0  ;;  %v2352_v42 = vpop.f32.mrf.mxu1 }
 0x440   : > { %2481 = vst [vmem:[#allocation2 + $0x3a0] sm:$0xff] %v2158_v62  ;;  %2483 = vst [vmem:[#allocation2 + $0x3b0] sm:$0xff] %v2351_v63  ;;  %v2160_v41 = vadd.f32 %v2159_v44, %v9837_v21  ;;  %v2353_v39 = vadd.f32 %v2352_v42, %v9840_v23 }
 0x441   : > { %v2163_v35 = vpop.f32.mrf.mxu0  ;;  %v2356_v38 = vpop.f32.mrf.mxu1 }
 0x442   : > { %2482 = vst [vmem:[#allocation2 + $0x3a8] sm:$0xff] %v2160_v41  ;;  %2484 = vst [vmem:[#allocation2 + $0x3b8] sm:$0xff] %v2353_v39  ;;  %v2164_v0 = vadd.f32 %v2163_v35, %v9831_v17  ;;  %v2357_v47 = vadd.f32 %v2356_v38, %v9834_v19 }
 0x443   : > { %v2165_v7 = vpop.f32.mrf.mxu0  ;;  %v2358_v8 = vpop.f32.mrf.mxu1 }
 0x444   : > { %2485 = vst [vmem:[#allocation2 + $0x3c0] sm:$0xff] %v2164_v0  ;;  %2487 = vst [vmem:[#allocation2 + $0x3d0] sm:$0xff] %v2357_v47  ;;  %v2166_v12 = vadd.f32 %v2165_v7, %v9837_v21  ;;  %v2359_v13 = vadd.f32 %v2358_v8, %v9840_v23 }
 0x445   : > { %v2167_v16 = vpop.f32.mrf.mxu0  ;;  %v2360_v18 = vpop.f32.mrf.mxu1 }
 0x446   : > { %2486 = vst [vmem:[#allocation2 + $0x3c8] sm:$0xff] %v2166_v12  ;;  %2488 = vst [vmem:[#allocation2 + $0x3d8] sm:$0xff] %v2359_v13  ;;  %v2168_v20 = vadd.f32 %v2167_v16, %v9831_v17  ;;  %v2361_v22 = vadd.f32 %v2360_v18, %v9834_v19 }
 0x447   : > { %v2169_v24 = vpop.f32.mrf.mxu0  ;;  %v2362_v25 = vpop.f32.mrf.mxu1 }
 0x448   : > { %2489 = vst [vmem:[#allocation2 + $0x3e0] sm:$0xff] %v2168_v20  ;;  %2491 = vst [vmem:[#allocation2 + $0x3f0] sm:$0xff] %v2361_v22  ;;  %v2170_v26 = vadd.f32 %v2169_v24, %v9837_v21  ;;  %v2363_v27 = vadd.f32 %v2362_v25, %v9840_v23 }
 0x44a   : > { %2490 = vst [vmem:[#allocation2 + $0x3e8] sm:$0xff] %v2170_v26  ;;  %2492 = vst [vmem:[#allocation2 + $0x3f8] sm:$0xff] %v2363_v27 }
 0x44b LB: >> { %v7423_v17 = vcombine.high %v9908_v10, %v9914_v14  ;;  %v7422_v19 = vcombine.low %v9908_v10, %v9914_v14  ;;  %v7419_v21 = vcombine.high %v9900_v37, %v9904_v6  ;;  %v7425_v23 = vcombine.high %v9910_v11, %v9916_v15  ;;  %s2535_s14 = ssub.s32 15, %s8862_s30  ;;  %s2530_s30 = sadd.s32 1, %s8862_s30   ;;  %s8862_s30 = sphi %s10042_s30, %s2530_s30   ;;  %v8858_v53 = vphi %v10040_v53, %v2848_v53   ;;  %v8854_v52 = vphi %v10038_v52, %v2849_v52   ;;  %v8850_v32 = vphi %v10036_v32, %v2844_v32   ;;  %v8846_v31 = vphi %v10034_v31, %v2845_v31  }
 0x44c   : >> { %v7424_v57 = vcombine.low %v9910_v11, %v9916_v15  ;;  %v7421_v58 = vcombine.high %v9902_v5, %v9906_v9  ;;  %v7418_v62 = vcombine.low %v9900_v37, %v9904_v6  ;;  %v7415_v63 = vcombine.high %v9890_v2, %v9894_v3  ;;  %s7704_s22 = sshll.u32 %s2535_s14, 6  ;;  %s7707_s0 = sshll.u32 %s2535_s14, 3 }
 0x44d   : >> { %2708 = vmatprep.subr.bf16.mxu0 %v7423_v17  ;;  %2751 = vmatprep.subr.bf16.mxu1 %v7425_v23  ;;  %v7420_v44 = vcombine.low %v9902_v5, %v9906_v9  ;;  %v7417_v42 = vcombine.high %v9892_v40, %v9896_v4  ;;  %v8921_v41 = vmov 0   ;;  %v7414_v39 = vcombine.low %v9890_v2, %v9894_v3  ;;  %s10128_s4 = scalar_lea.vmem [#allocation2], %s7704_s22  ;;  %s2860_s28 = scalar_lea.vmem [#allocation4], %s7707_s0 }
 0x44e   : >> { %2709 = vmatpush1.bf16.msra.mxu0 %v7422_v19  ;;  %2752 = vmatpush1.bf16.msra.mxu1 %v7424_v57  ;;  %v7411_v35 = vcombine.high %v9880_v33, %v9886_v48  ;;  %v7416_v38 = vcombine.low %v9892_v40, %v9896_v4  ;;  %v7413_v0 = vcombine.high %v9882_v43, %v9888_v1  ;;  %p2527_p9 = scmp.ge.s32.totalorder %s2530_s30, 16  }
 0x44f   : >> { %2710 = vmatprep.subr.bf16.mxu0 %v7419_v21  ;;  %2753 = vmatprep.subr.bf16.mxu1 %v7421_v58  ;;  %v7410_v47 = vcombine.low %v9880_v33, %v9886_v48  ;;  %v7407_v7 = vcombine.high %v9872_v36, %v9876_v46  ;;  %v7412_v8 = vcombine.low %v9882_v43, %v9888_v1  ;;  %v8244_v33 = vld [vmem:[#allocation12 + $0x120] ss:$16 sps:$4 sm:$0xff] (%p2527_p9)   ;;  %v8245_v43 = vld [vmem:[#allocation12 + $0x128] ss:$16 sps:$4 sm:$0xff] (%p2527_p9)   ;;  %v8246_v48 = vld [vmem:[#allocation12 + $0x104] ss:$16 sps:$4 sm:$0xff] (%p2527_p9)  }
 0x450   : >> { %2740 = vmatprep.mubr.bf16.mxu0 %v8921_v41  ;;  %2783 = vmatprep.mubr.bf16.mxu1 %v8921_v41  ;;  %v7409_v12 = vcombine.high %v9874_v34, %v9878_v45  ;;  %v7406_v13 = vcombine.low %v9872_v36, %v9876_v46  ;;  %v7403_v16 = vcombine.high %v9862_v56, %v9866_v60  ;;  %v8238_v36 = vld [vmem:[#allocation12 + $0x140] ss:$16 sps:$4 sm:$0xff] (%p2527_p9)   ;;  %v8240_v46 = vld [vmem:[#allocation12 + $0x124] ss:$16 sps:$4 sm:$0xff] (%p2527_p9)   ;;  %v8248_v1 = vld [vmem:[#allocation12 + $0x10c] ss:$16 sps:$4 sm:$0xff] (%p2527_p9)  }
 0x451   : >> { %v7408_v18 = vcombine.low %v9874_v34, %v9878_v45  ;;  %v7405_v20 = vcombine.high %v9864_v59, %v9868_v61  ;;  %v7402_v22 = vcombine.low %v9862_v56, %v9866_v60  ;;  %v7399_v24 = vcombine.high %v9852_v50, %v9858_v54  ;;  %v8232_v56 = vld [vmem:[#allocation12 + $0x160] ss:$16 sps:$4 sm:$0xff] (%p2527_p9)   ;;  %v8234_v60 = vld [vmem:[#allocation12 + $0x144] ss:$16 sps:$4 sm:$0xff] (%p2527_p9)   ;;  %v8239_v34 = vld [vmem:[#allocation12 + $0x148] ss:$16 sps:$4 sm:$0xff] (%p2527_p9)  }
 0x452   : >> { %2711 = vmatpush1.bf16.msra.mxu0 %v7418_v62  ;;  %2754 = vmatpush1.bf16.msra.mxu1 %v7420_v44  ;;  %v7404_v25 = vcombine.low %v9864_v59, %v9868_v61  ;;  %v7401_v26 = vcombine.high %v9854_v51, %v9860_v55  ;;  %v7398_v27 = vcombine.low %v9852_v50, %v9858_v54  ;;  %v2539_v62 = vld [vmem:[%s10128_s4] sm:$0xff]  ;;  %v2540_v44 = vld [vmem:[%s10128_s4 + $0x8] sm:$0xff]  ;;  %s10944_s20 = smov (%p2527_p9), 0  }
 0x453   : >> { %2712 = vmatprep.subr.bf16.mxu0 %v7415_v63  ;;  %2755 = vmatprep.subr.bf16.mxu1 %v7417_v42  ;;  %v7395_v17 = vcombine.high %v9844_v28, %v9848_v30  ;;  %v7400_v19 = vcombine.low %v9854_v51, %v9860_v55  ;;  %v7397_v21 = vcombine.high %v9846_v29, %v9850_v49  ;;  %v8226_v50 = vld [vmem:[#allocation12 + $0x180] ss:$16 sps:$4 sm:$0xff] (%p2527_p9)   ;;  %v8227_v51 = vld [vmem:[#allocation12 + $0x188] ss:$16 sps:$4 sm:$0xff] (%p2527_p9)   ;;  %v8228_v54 = vld [vmem:[#allocation12 + $0x164] ss:$16 sps:$4 sm:$0xff] (%p2527_p9)  }
 0x454   : >> { %v7394_v23 = vcombine.low %v9844_v28, %v9848_v30  ;;  %v7396_v57 = vcombine.low %v9846_v29, %v9850_v49  ;;  %v2547_v58 = vpack.c.bf16 %v8854_v52, %v8858_v53  ;;  %v2543_v52 = vld [vmem:[%s10128_s4 + $0x20] sm:$0xff]  ;;  %v8221_v29 = vld [vmem:[#allocation12 + $0x1a8] ss:$16 sps:$4 sm:$0xff] (%p2527_p9)   ;;  %v8224_v49 = vld [vmem:[#allocation12 + $0x18c] ss:$16 sps:$4 sm:$0xff] (%p2527_p9)  }
 0x455   : > { %v8220_v28 = vld [vmem:[#allocation12 + $0x1a0] ss:$16 sps:$4 sm:$0xff] (%p2527_p9)   ;;  %v8222_v30 = vld [vmem:[#allocation12 + $0x184] ss:$16 sps:$4 sm:$0xff] (%p2527_p9)   ;;  %v8230_v55 = vld [vmem:[#allocation12 + $0x16c] ss:$16 sps:$4 sm:$0xff] (%p2527_p9)  }
 0x456   : >> { %2713 = vmatpush1.bf16.msra.mxu0 %v7414_v39  ;;  %2756 = vmatpush1.bf16.msra.mxu1 %v7416_v38  ;;  %v8233_v59 = vld [vmem:[#allocation12 + $0x168] ss:$16 sps:$4 sm:$0xff] (%p2527_p9)   ;;  %v8236_v61 = vld [vmem:[#allocation12 + $0x14c] ss:$16 sps:$4 sm:$0xff] (%p2527_p9)   ;;  %v8250_v2 = vld [vmem:[#allocation12 + $0x100] ss:$16 sps:$4 sm:$0xff] (%p2527_p9)  }
 0x457   : >> { %2714 = vmatprep.subr.bf16.mxu0 %v7411_v35  ;;  %2757 = vmatprep.subr.bf16.mxu1 %v7413_v0  ;;  %v2544_v0 = vld [vmem:[%s10128_s4 + $0x28] sm:$0xff]  ;;  %v8255_v3 = vld [vmem:[#allocation12 + $0xe4] ss:$16 sps:$4 sm:$0xff] (%p2527_p9)   ;;  %v8253_v5 = vld [vmem:[#allocation12 + $0xe0] ss:$16 sps:$4 sm:$0xff] (%p2527_p9)  }
 0x458   : > { %v8242_v45 = vld [vmem:[#allocation12 + $0x12c] ss:$16 sps:$4 sm:$0xff] (%p2527_p9)   ;;  %v8251_v40 = vld [vmem:[#allocation12 + $0x108] ss:$16 sps:$4 sm:$0xff] (%p2527_p9)   ;;  %v8263_v9 = vld [vmem:[#allocation12 + $0xc4] ss:$16 sps:$4 sm:$0xff] (%p2527_p9)  }
 0x459   : > { %v8258_v4 = vld [vmem:[#allocation12 + $0xec] ss:$16 sps:$4 sm:$0xff] (%p2527_p9)   ;;  %v8256_v6 = vld [vmem:[#allocation12 + $0xe8] ss:$16 sps:$4 sm:$0xff] (%p2527_p9)   ;;  %v8261_v11 = vld [vmem:[#allocation12 + $0xc0] ss:$16 sps:$4 sm:$0xff] (%p2527_p9)  }
 0x45a   : >> { %2715 = vmatpush1.bf16.msra.mxu0 %v7410_v47  ;;  %2758 = vmatpush1.bf16.msra.mxu1 %v7412_v8  ;;  %v8266_v10 = vld [vmem:[#allocation12 + $0xcc] ss:$16 sps:$4 sm:$0xff] (%p2527_p9)   ;;  %v8264_v14 = vld [vmem:[#allocation12 + $0xc8] ss:$16 sps:$4 sm:$0xff] (%p2527_p9)   ;;  %v8271_v15 = vld [vmem:[#allocation12 + $0xa4] ss:$16 sps:$4 sm:$0xff] (%p2527_p9)  }
 0x45b   : >> { %2716 = vmatprep.subr.bf16.mxu0 %v7407_v7  ;;  %2759 = vmatprep.subr.bf16.mxu1 %v7409_v12 }
 0x45e   : >> { %2717 = vmatpush1.bf16.msra.mxu0 %v7406_v13  ;;  %2760 = vmatpush1.bf16.msra.mxu1 %v7408_v18 }
 0x45f   : >> { %2718 = vmatprep.subr.bf16.mxu0 %v7403_v16  ;;  %2761 = vmatprep.subr.bf16.mxu1 %v7405_v20 }
 0x462   : >> { %2719 = vmatpush1.bf16.msra.mxu0 %v7402_v22  ;;  %2762 = vmatpush1.bf16.msra.mxu1 %v7404_v25  ;;  %v2542_v22 = vld [vmem:[%s10128_s4 + $0x18] sm:$0xff] }
 0x463   : >> { %2720 = vmatprep.subr.bf16.mxu0 %v7399_v24  ;;  %2763 = vmatprep.subr.bf16.mxu1 %v7401_v26  ;;  %v2541_v24 = vld [vmem:[%s10128_s4 + $0x10] sm:$0xff]  ;;  %v2546_v25 = vld [vmem:[%s10128_s4 + $0x38] sm:$0xff] }
 0x466   : >> { %2721 = vmatpush1.bf16.msra.mxu0 %v7398_v27  ;;  %2764 = vmatpush1.bf16.msra.mxu1 %v7400_v19 }
 0x467   : >> { %2722 = vmatprep.subr.bf16.mxu0 %v7395_v17  ;;  %2765 = vmatprep.subr.bf16.mxu1 %v7397_v21 }
 0x46a   : >> { %2723 = vmatpush1.bf16.msra.mxu0 %v7394_v23  ;;  %2766 = vmatpush1.bf16.msra.mxu1 %v7396_v57 }
 0x46d   : >> { %2741 = vmatmul.mubr.bf16.vlgmr.msra.gmra.mxu0 %v2547_v58  ;;  %2784 = vmatmul.mubr.bf16.vlgmr.msra.gmra.mxu1 %v2547_v58  ;;  %v2545_v58 = vld [vmem:[%s10128_s4 + $0x30] sm:$0xff] }
 0x52d   : >> { %v2742_v63 = vpop.f32.mrf.mxu0  ;;  %v2785_v41 = vpop.f32.mrf.mxu1 }
 0x52e   : >> { %v2794_v42 = vadd.f32 %v2742_v63, %v2539_v62  ;;  %v2796_v17 = vadd.f32 %v2785_v41, %v2541_v24 }
 0x52f   : >> { %v2744_v39 = vpop.f32.mrf.mxu0  ;;  %v2787_v8 = vpop.f32.mrf.mxu1 }
 0x530   : >> { %v7426_v53 = vmul.f32 -1.442695, %v2794_v42  ;;  %v2795_v35 = vadd.f32 %v2744_v39, %v2540_v44  ;;  %v2797_v27 = vadd.f32 %v2787_v8, %v2542_v22 }
 0x531   : >> { %v2746_v38 = vpop.f32.mrf.mxu0  ;;  %v2789_v20 = vpop.f32.mrf.mxu1 }
 0x532   : >> { %8172 = vpow2.f32 %v7426_v53  ;;  %v7428_v47 = vmul.f32 -1.442695, %v2795_v35  ;;  %v2798_v7 = vadd.f32 %v2746_v38, %v2543_v52  ;;  %v7430_v23 = vmul.f32 -1.442695, %v2797_v27 }
 0x533   : >> { %v2748_v12 = vpop.f32.mrf.mxu0  ;;  %v2791_v26 = vpop.f32.mrf.mxu1  ;;  %v2800_v39 = vadd.f32 %v2789_v20, %v2545_v58  ;;  %v8206_v58 = vld [vmem:[#allocation12 + $0x1ec] ss:$16 sps:$4 sm:$0xff] (%p2527_p9)  }
 0x534   : >> { %8174 = vpow2.f32 %v7428_v47  ;;  %v7427_v13 = vmul.f32 -1.442695, %v2798_v7  ;;  %v2799_v16 = vadd.f32 %v2748_v12, %v2544_v0  ;;  %v2801_v19 = vadd.f32 %v2791_v26, %v2546_v25  ;;  %3440 = vmatprep.subr.bf16.mxu1 (%p2527_p9), %v8206_v58  ;;  %v8311_v58 = vld [vmem:[#allocation12 + $0x4] ss:$16 sps:$4 sm:$0xff] (%p2527_p9)  }
 0x536   : >> { %8176 = vpow2.f32 %v7427_v13  ;;  %v7429_v18 = vmul.f32 -1.442695, %v2799_v16  ;;  %v7431_v63 = vmul.f32 -1.442695, %v2801_v19 }
 0x538   : >> { %8178 = vpow2.f32 %v7429_v18 }
 0x539   : >> { %8180 = vtanh.f32 %v2796_v17 }
 0x53f   : >> { %v8173_v21 = vpop.eup %8172 }
 0x540   : >> { %v2808_v57 = vadd.f32 1.0, %v8173_v21 }
 0x541   : >> { %v8175_v62 = vpop.eup %8174 }
 0x542   : >> { %8182 = vrcp.f32 %v2808_v57  ;;  %v2820_v44 = vadd.f32 1.0, %v8175_v62  ;;  %v12175_v57 = vmov (%p2527_p9), 0   ;;  %v8208_v62 = vld [vmem:[#allocation12 + $0x1e0] ss:$16 sps:$4 sm:$0xff] (%p2527_p9)  }
 0x543   : >> { %v8177_v42 = vpop.eup %8176  ;;  %8184 = vpow2.f32 %v7430_v23  ;;  %v8204_v23 = vld [vmem:[#allocation12 + $0x1e4] ss:$16 sps:$4 sm:$0xff] (%p2527_p9)   ;;  %3279 = vmatprep.mubr.bf16.mxu0 (%p2527_p9), %v12175_v57  ;;  %3472 = vmatprep.mubr.bf16.mxu1 (%p2527_p9), %v12175_v57 }
 0x544   : >> { %8186 = vrcp.f32 %v2820_v44  ;;  %v2809_v52 = vadd.f32 1.0, %v8177_v42  ;;  %3247 = vmatprep.subr.bf16.mxu0 (%p2527_p9), %v8204_v23  ;;  %v8210_v44 = vld [vmem:[#allocation12 + $0x1c4] ss:$16 sps:$4 sm:$0xff] (%p2527_p9)   ;;  %v8212_v42 = vld [vmem:[#allocation12 + $0x1cc] ss:$16 sps:$4 sm:$0xff] (%p2527_p9)  }
 0x545   : >> { %v8179_v53 = vpop.eup %8178  ;;  %8188 = vpow2.f32 %v7431_v63  ;;  %v8209_v63 = vld [vmem:[#allocation12 + $0x1e8] ss:$16 sps:$4 sm:$0xff] (%p2527_p9)   ;;  %3248 = vmatpush1.bf16.msra.mxu0 (%p2527_p9), %v8208_v62  ;;  %v8314_v62 = vld [vmem:[#allocation12 + $0xc] ss:$16 sps:$4 sm:$0xff] (%p2527_p9)  }
 0x546   : >> { %8190 = vrcp.f32 %v2809_v52  ;;  %v2821_v35 = vadd.f32 1.0, %v8179_v53  ;;  %v8181_v41 = vpop.eup %8180  ;;  %3441 = vmatpush1.bf16.msra.mxu1 (%p2527_p9), %v8209_v63  ;;  %3249 = vmatprep.subr.bf16.mxu0 (%p2527_p9), %v8210_v44  ;;  %v8304_v23 = vld [vmem:[#allocation12 + $0x28] ss:$16 sps:$4 sm:$0xff] (%p2527_p9)   ;;  %v8309_v63 = vld [vmem:[#allocation12] ss:$16 sps:$4 sm:$0xff] (%p2527_p9)  }
 0x547   : >> { %8192 = vtanh.f32 %v2800_v39  ;;  %v8214_v39 = vld [vmem:[#allocation12 + $0x1c0] ss:$16 sps:$4 sm:$0xff] (%p2527_p9)   ;;  %3442 = vmatprep.subr.bf16.mxu1 (%p2527_p9), %v8212_v42  ;;  %v8312_v44 = vld [vmem:[#allocation12 + $0x8] ss:$16 sps:$4 sm:$0xff] (%p2527_p9)  }
 0x548   : >> { %8194 = vrcp.f32 %v2821_v35  ;;  %v8216_v35 = vld [vmem:[#allocation12 + $0x1a4] ss:$16 sps:$4 sm:$0xff] (%p2527_p9)  }
 0x549   : > { %3250 = vmatpush1.bf16.msra.mxu0 (%p2527_p9), %v8214_v39 }
 0x54a   : > { %3251 = vmatprep.subr.bf16.mxu0 (%p2527_p9), %v8216_v35 }
 0x54d   : > { %3252 = vmatpush1.bf16.msra.mxu0 (%p2527_p9), %v8220_v28 }
 0x54e   : > { %3253 = vmatprep.subr.bf16.mxu0 (%p2527_p9), %v8222_v30 }
 0x54f   : >> { %v8183_v38 = vpop.eup %8182 }
 0x550   : >> { %v8185_v0 = vpop.eup %8184  ;;  %v2842_v12 = vmul.f32 %v8183_v38, %v8181_v41  ;;  %v8218_v41 = vld [vmem:[#allocation12 + $0x1ac] ss:$16 sps:$4 sm:$0xff] (%p2527_p9)   ;;  %v8272_v38 = vld [vmem:[#allocation12 + $0xa8] ss:$16 sps:$4 sm:$0xff] (%p2527_p9)  }
 0x551   : >> { %v8187_v47 = vpop.eup %8186  ;;  %v2834_v16 = vadd.f32 1.0, %v8185_v0  ;;  %3254 = vmatpush1.bf16.msra.mxu0 (%p2527_p9), %v8226_v50  ;;  %v8279_v0 = vld [vmem:[#allocation12 + $0x84] ss:$16 sps:$4 sm:$0xff] (%p2527_p9)  }
 0x552   : >> { %v8189_v7 = vpop.eup %8188  ;;  %v2840_v8 = vmul.f32 %v8850_v32, %v8187_v47  ;;  %3255 = vmatprep.subr.bf16.mxu0 (%p2527_p9), %v8228_v54  ;;  %v8282_v47 = vld [vmem:[#allocation12 + $0x8c] ss:$16 sps:$4 sm:$0xff] (%p2527_p9)  }
 0x553   : >> { %v8191_v13 = vpop.eup %8190  ;;  %v2835_v22 = vadd.f32 1.0, %v8189_v7  ;;  %8196 = vrcp.f32 %v2834_v16  ;;  %v8277_v7 = vld [vmem:[#allocation12 + $0x80] ss:$16 sps:$4 sm:$0xff] (%p2527_p9)   ;;  %v8290_v16 = vld [vmem:[#allocation12 + $0x6c] ss:$16 sps:$4 sm:$0xff] (%p2527_p9)  }
 0x554   : >> { %v8193_v18 = vpop.eup %8192  ;;  %v2844_v32 = vadd.f32 %v2842_v12, %v2840_v8   ;;  %v8280_v12 = vld [vmem:[#allocation12 + $0x88] ss:$16 sps:$4 sm:$0xff] (%p2527_p9)  }
 0x555   : >> { %v8195_v20 = vpop.eup %8194  ;;  %v2843_v25 = vmul.f32 %v8193_v18, %v8191_v13  ;;  %3256 = vmatpush1.bf16.msra.mxu0 (%p2527_p9), %v8232_v56  ;;  %v8287_v13 = vld [vmem:[#allocation12 + $0x64] ss:$16 sps:$4 sm:$0xff] (%p2527_p9)   ;;  %v8285_v18 = vld [vmem:[#allocation12 + $0x60] ss:$16 sps:$4 sm:$0xff] (%p2527_p9)   ;;  %v10257_v56 = vld [vmem:[#allocation3 + $0x8] sm:$0xff] (%p2527_p9)  }
 0x556   : >> { %v2841_v24 = vmul.f32 %v8846_v31, %v8195_v20  ;;  %8198 = vtanh.f32 %v2844_v32  ;;  %3257 = vmatprep.subr.bf16.mxu0 (%p2527_p9), %v8234_v60  ;;  %v8288_v20 = vld [vmem:[#allocation12 + $0x68] ss:$16 sps:$4 sm:$0xff] (%p2527_p9)   ;;  %12193 = vst [vmem:[#allocation49_spill] sm:$0xff] (%p2527_p9), %v10257_v56 }
 0x557   : >> { %8200 = vrcp.f32 %v2835_v22  ;;  %v8295_v22 = vld [vmem:[#allocation12 + $0x44] ss:$16 sps:$4 sm:$0xff] (%p2527_p9)   ;;  %v10269_v60 = vld [vmem:[#allocation3 + $0x18] sm:$0xff] (%p2527_p9)  }
 0x558   : >> { %v2845_v31 = vadd.f32 %v2843_v25, %v2841_v24   ;;  %v8298_v24 = vld [vmem:[#allocation12 + $0x4c] ss:$16 sps:$4 sm:$0xff] (%p2527_p9)   ;;  %v8293_v25 = vld [vmem:[#allocation12 + $0x40] ss:$16 sps:$4 sm:$0xff] (%p2527_p9)   ;;  %12195 = vst [vmem:[#allocation51_spill] sm:$0xff] (%p2527_p9), %v10269_v60 }
 0x559   : > { %3258 = vmatpush1.bf16.msra.mxu0 (%p2527_p9), %v8238_v36  ;;  %v10281_v36 = vld [vmem:[#allocation3 + $0x28] sm:$0xff] (%p2527_p9)  }
 0x55a   : >> { %8202 = vtanh.f32 %v2845_v31  ;;  %3259 = vmatprep.subr.bf16.mxu0 (%p2527_p9), %v8240_v46  ;;  %v8274_v31 = vld [vmem:[#allocation12 + $0xac] ss:$16 sps:$4 sm:$0xff] (%p2527_p9)   ;;  %12197 = vst [vmem:[#allocation53_spill] sm:$0xff] (%p2527_p9), %v10281_v36 }
 0x55b   : > { %v10293_v46 = vld [vmem:[#allocation3 + $0x38] sm:$0xff] (%p2527_p9)  }
 0x55c   : > { %12199 = vst [vmem:[#allocation55_spill] sm:$0xff] (%p2527_p9), %v10293_v46 }
 0x55d   : > { %3260 = vmatpush1.bf16.msra.mxu0 (%p2527_p9), %v8244_v33 }
 0x55e   : > { %3261 = vmatprep.subr.bf16.mxu0 (%p2527_p9), %v8246_v48 }
 0x560   : >> { %v8197_v26 = vpop.eup %8196 }
 0x561   : > { %3262 = vmatpush1.bf16.msra.mxu0 (%p2527_p9), %v8250_v2 }
 0x562   : > { %3889 = vmatprep.subr.bf16.mxu0 (%p2527_p9), %v8255_v3  ;;  %v10317_v3 = vld [vmem:[#allocation3 + $0x48] sm:$0xff] (%p2527_p9)  }
 0x563   : >> { %v8199_v27 = vpop.eup %8198  ;;  %12201 = vst [vmem:[#allocation57_spill] sm:$0xff] (%p2527_p9), %v10317_v3 }
 0x564   : >> { %v8201_v17 = vpop.eup %8200  ;;  %v2848_v53 = vmul.f32 %v8199_v27, %v8197_v26   ;;  %v8296_v26 = vld [vmem:[#allocation12 + $0x48] ss:$16 sps:$4 sm:$0xff] (%p2527_p9)   ;;  %v8303_v27 = vld [vmem:[#allocation12 + $0x24] ss:$16 sps:$4 sm:$0xff] (%p2527_p9)  }
 0x567   : >> { %v8203_v19 = vpop.eup %8202 }
 0x568   : >> { %v2849_v52 = vmul.f32 %v8203_v19, %v8201_v17   ;;  %2529 = sbr.rel (!%p2527_p9) target bundleno = 1099 (0x44b), region = 206  ;;  %v8306_v17 = vld [vmem:[#allocation12 + $0x2c] ss:$16 sps:$4 sm:$0xff] (%p2527_p9)  }
 0x56a   : >> { %v7718_v21 = vpack.c.bf16 %v2849_v52, %v2848_v53  ;;  %v8215_v53 = vld [vmem:[#allocation12 + $0x1c8] ss:$16 sps:$4 sm:$0xff] (%p2527_p9)   ;;  %v8269_v52 = vld [vmem:[#allocation12 + $0xa0] ss:$16 sps:$4 sm:$0xff] (%p2527_p9)  }
 0x56b   : > { %3443 = vmatpush1.bf16.msra.mxu1 (%p2527_p9), %v8215_v53 }
 0x56c   : >> { %7719 = vst [vmem:[%s2860_s28] sm:$0xff] %v7718_v21   ;;  %3444 = vmatprep.subr.bf16.mxu1 (%p2527_p9), %v8218_v41  ;;  %v8301_v21 = vld [vmem:[#allocation12 + $0x20] ss:$16 sps:$4 sm:$0xff] (%p2527_p9)  }
 0x56f   : > { %3445 = vmatpush1.bf16.msra.mxu1 %v8221_v29 }
 0x570   : > { %3446 = vmatprep.subr.bf16.mxu1 %v8224_v49 }
 0x573   : > { %3447 = vmatpush1.bf16.msra.mxu1 %v8227_v51  ;;  %v10155_v37 = vld [vmem:[#allocation4] sm:$0xff]   ;;  %v10161_v32 = vld [vmem:[#allocation4 + $0x8] sm:$0xff]   ;;  %v10167_v8 = vld [vmem:[#allocation4 + $0x10] sm:$0xff]  }
 0x574   : > { %3448 = vmatprep.subr.bf16.mxu1 %v8230_v55  ;;  %12176 = vst [vmem:[#allocation28_spill] sm:$0xff] %v10155_v37  ;;  %3280 = vmatmul.mubr.bf16.vlgmr.msra.gmra.mxu0 %v10155_v37  ;;  %12177 = vst [vmem:[#allocation29_spill] sm:$0xff] %v10161_v32  ;;  %v10173_v19 = vld [vmem:[#allocation4 + $0x18] sm:$0xff]   ;;  %v10179_v42 = vld [vmem:[#allocation4 + $0x20] sm:$0xff]  }
 0x575   : > { %3890 = vmatpush1.bf16.msra.mxu0 %v8253_v5  ;;  %3289 = vmatprep.mubr.bf16.mxu0 %v12175_v57  ;;  %12178 = vst [vmem:[#allocation30_spill] sm:$0xff] %v10167_v8  ;;  %12179 = vst [vmem:[#allocation31_spill] sm:$0xff] %v10173_v19  ;;  %v10185_v39 = vld [vmem:[#allocation4 + $0x28] sm:$0xff]   ;;  %v10191_v53 = vld [vmem:[#allocation4 + $0x30] sm:$0xff]  }
 0x576   : > { %3891 = vmatprep.subr.bf16.mxu0 %v8263_v9  ;;  %12180 = vst [vmem:[#allocation32_spill] sm:$0xff] %v10179_v42  ;;  %12181 = vst [vmem:[#allocation33_spill] sm:$0xff] %v10185_v39  ;;  %v10197_v35 = vld [vmem:[#allocation4 + $0x38] sm:$0xff]   ;;  %v10203_v41 = vld [vmem:[#allocation4 + $0x40] sm:$0xff]  }
 0x577   : > { %3449 = vmatpush1.bf16.msra.mxu1 %v8233_v59  ;;  %12182 = vst [vmem:[#allocation34_spill] sm:$0xff] %v10191_v53  ;;  %12183 = vst [vmem:[#allocation35_spill] sm:$0xff] %v10197_v35  ;;  %v10209_v28 = vld [vmem:[#allocation4 + $0x48] sm:$0xff]   ;;  %v10215_v29 = vld [vmem:[#allocation4 + $0x50] sm:$0xff]  }
 0x578   : > { %3450 = vmatprep.subr.bf16.mxu1 %v8236_v61  ;;  %12184 = vst [vmem:[#allocation40_spill] sm:$0xff] %v10203_v41  ;;  %12185 = vst [vmem:[#allocation41_spill] sm:$0xff] %v10209_v28  ;;  %v10221_v30 = vld [vmem:[#allocation4 + $0x58] sm:$0xff]   ;;  %v10227_v49 = vld [vmem:[#allocation4 + $0x60] sm:$0xff]  }
 0x579   : > { %3892 = vmatpush1.bf16.msra.mxu0 %v8261_v11  ;;  %12186 = vst [vmem:[#allocation42_spill] sm:$0xff] %v10215_v29  ;;  %12187 = vst [vmem:[#allocation43_spill] sm:$0xff] %v10221_v30  ;;  %v10233_v50 = vld [vmem:[#allocation4 + $0x68] sm:$0xff]   ;;  %v10239_v51 = vld [vmem:[#allocation4 + $0x70] sm:$0xff]  }
 0x57a   : > { %3893 = vmatprep.subr.bf16.mxu0 %v8271_v15  ;;  %12188 = vst [vmem:[#allocation44_spill] sm:$0xff] %v10227_v49  ;;  %12189 = vst [vmem:[#allocation45_spill] sm:$0xff] %v10233_v50  ;;  %v10245_v54 = vld [vmem:[#allocation4 + $0x78] sm:$0xff]   ;;  %v10251_v55 = vld [vmem:[#allocation3] sm:$0xff]  }
 0x57b   : > { %3451 = vmatpush1.bf16.msra.mxu1 %v8239_v34  ;;  %12190 = vst [vmem:[#allocation46_spill] sm:$0xff] %v10239_v51  ;;  %12191 = vst [vmem:[#allocation47_spill] sm:$0xff] %v10245_v54  ;;  %v10263_v59 = vld [vmem:[#allocation3 + $0x10] sm:$0xff]   ;;  %v10275_v61 = vld [vmem:[#allocation3 + $0x20] sm:$0xff]  }
 0x57c   : > { %3452 = vmatprep.subr.bf16.mxu1 %v8242_v45  ;;  %3290 = vmatmul.mubr.bf16.gmra.mxu0 %v10161_v32  ;;  %12192 = vst [vmem:[#allocation48_spill] sm:$0xff] %v10251_v55  ;;  %12194 = vst [vmem:[#allocation50_spill] sm:$0xff] %v10263_v59  ;;  %v10287_v34 = vld [vmem:[#allocation3 + $0x30] sm:$0xff]   ;;  %v10299_v45 = vld [vmem:[#allocation3 + $0x40] sm:$0xff]  }
 0x57d   : > { %3299 = vmatprep.mubr.bf16.mxu0 %v12175_v57  ;;  %3894 = vmatpush1.bf16.msra.mxu0 %v8269_v52  ;;  %12196 = vst [vmem:[#allocation52_spill] sm:$0xff] %v10275_v61  ;;  %12198 = vst [vmem:[#allocation54_spill] sm:$0xff] %v10287_v34 }
 0x57e   : > { %3895 = vmatprep.subr.bf16.mxu0 %v8279_v0  ;;  %12200 = vst [vmem:[#allocation56_spill] sm:$0xff] %v10299_v45 }
 0x57f   : > { %3453 = vmatpush1.bf16.msra.mxu1 %v8245_v43 }
 0x580   : > { %3454 = vmatprep.subr.bf16.mxu1 %v8248_v1 }
 0x581   : > { %3896 = vmatpush1.bf16.msra.mxu0 %v8277_v7 }
 0x582   : > { %3897 = vmatprep.subr.bf16.mxu0 %v8287_v13 }
 0x583   : > { %3455 = vmatpush1.bf16.msra.mxu1 %v8251_v40 }
 0x584   : > { %4082 = vmatprep.subr.bf16.mxu1 %v8258_v4  ;;  %3300 = vmatmul.mubr.bf16.gmra.mxu0 %v10167_v8 }
 0x585   : > { %3309 = vmatprep.mubr.bf16.mxu0 %v12175_v57  ;;  %3898 = vmatpush1.bf16.msra.mxu0 %v8285_v18  ;;  %v10361_v18 = vld [vmem:[#allocation3 + $0x58] sm:$0xff]  }
 0x586   : > { %3473 = vmatmul.mubr.bf16.vlgmr.msra.gmra.mxu1 %v10155_v37  ;;  %3899 = vmatprep.subr.bf16.mxu0 %v8295_v22  ;;  %12203 = vst [vmem:[#allocation59_spill] sm:$0xff] %v10361_v18 }
 0x587   : > { %4083 = vmatpush1.bf16.msra.mxu1 %v8256_v6  ;;  %3482 = vmatprep.mubr.bf16.mxu1 %v12175_v57 }
 0x588   : > { %4084 = vmatprep.subr.bf16.mxu1 %v8266_v10 }
 0x589   : > { %3900 = vmatpush1.bf16.msra.mxu0 %v8293_v25 }
 0x58a   : > { %3901 = vmatprep.subr.bf16.mxu0 %v8303_v27 }
 0x58b   : > { %4085 = vmatpush1.bf16.msra.mxu1 %v8264_v14 }
 0x58c   : > { %4086 = vmatprep.subr.bf16.mxu1 %v8274_v31  ;;  %3310 = vmatmul.mubr.bf16.gmra.mxu0 %v10173_v19  ;;  %v10339_v31 = vld [vmem:[#allocation3 + $0x50] sm:$0xff]  }
 0x58d   : > { %3319 = vmatprep.mubr.bf16.mxu0 %v12175_v57  ;;  %3902 = vmatpush1.bf16.msra.mxu0 %v8301_v21  ;;  %12202 = vst [vmem:[#allocation58_spill] sm:$0xff] %v10339_v31 }
 0x58e   : > { %3483 = vmatmul.mubr.bf16.gmra.mxu1 %v10161_v32  ;;  %3903 = vmatprep.subr.bf16.mxu0 %v8311_v58 }
 0x58f   : > { %3492 = vmatprep.mubr.bf16.mxu1 %v12175_v57  ;;  %4087 = vmatpush1.bf16.msra.mxu1 %v8272_v38 }
 0x590   : > { %4088 = vmatprep.subr.bf16.mxu1 %v8282_v47 }
 0x591   : > { %3904 = vmatpush1.bf16.msra.mxu0 %v8309_v63 }
 0x593   : > { %4089 = vmatpush1.bf16.msra.mxu1 %v8280_v12 }
 0x594   : > { %4090 = vmatprep.subr.bf16.mxu1 %v8290_v16  ;;  %3320 = vmatmul.mubr.bf16.gmra.mxu0 %v10179_v42 }
 0x595   : > { %3329 = vmatprep.mubr.bf16.mxu0 %v12175_v57 }
 0x596   : > { %3493 = vmatmul.mubr.bf16.gmra.mxu1 %v10167_v8 }
 0x597   : > { %3502 = vmatprep.mubr.bf16.mxu1 %v12175_v57  ;;  %4091 = vmatpush1.bf16.msra.mxu1 %v8288_v20 }
 0x598   : > { %4092 = vmatprep.subr.bf16.mxu1 %v8298_v24 }
 0x59b   : > { %4093 = vmatpush1.bf16.msra.mxu1 %v8296_v26 }
 0x59c   : > { %4094 = vmatprep.subr.bf16.mxu1 %v8306_v17  ;;  %3330 = vmatmul.mubr.bf16.gmra.mxu0 %v10185_v39 }
 0x59d   : > { %3339 = vmatprep.mubr.bf16.mxu0 %v12175_v57 }
 0x59e   : > { %3503 = vmatmul.mubr.bf16.gmra.mxu1 %v10173_v19 }
 0x59f   : > { %3512 = vmatprep.mubr.bf16.mxu1 %v12175_v57  ;;  %4095 = vmatpush1.bf16.msra.mxu1 %v8304_v23  ;;  %v10383_v23 = vld [vmem:[#allocation3 + $0x60] sm:$0xff]  }
 0x5a0   : > { %4096 = vmatprep.subr.bf16.mxu1 %v8314_v62  ;;  %12204 = vst [vmem:[#allocation60_spill] sm:$0xff] %v10383_v23 }
 0x5a3   : > { %4097 = vmatpush1.bf16.msra.mxu1 %v8312_v44 }
 0x5a4   : > { %3340 = vmatmul.mubr.bf16.gmra.mxu0 %v10191_v53 }
 0x5a5   : > { %3349 = vmatprep.mubr.bf16.mxu0 %v12175_v57 }
 0x5a6   : > { %3513 = vmatmul.mubr.bf16.gmra.mxu1 %v10179_v42 }
 0x5a7   : > { %3522 = vmatprep.mubr.bf16.mxu1 %v12175_v57 }
 0x5ac   : > { %3350 = vmatmul.mubr.bf16.gmra.mxu0 %v10197_v35 }
 0x5ad   : > { %3359 = vmatprep.mubr.bf16.mxu0 %v12175_v57 }
 0x5ae   : > { %3523 = vmatmul.mubr.bf16.gmra.mxu1 %v10185_v39 }
 0x5af   : > { %3532 = vmatprep.mubr.bf16.mxu1 %v12175_v57 }
 0x5b4   : > { %3360 = vmatmul.mubr.bf16.gmra.mxu0 %v10203_v41 }
 0x5b5   : > { %3369 = vmatprep.mubr.bf16.mxu0 %v12175_v57 }
 0x5b6   : > { %3533 = vmatmul.mubr.bf16.gmra.mxu1 %v10191_v53 }
 0x5b7   : > { %3542 = vmatprep.mubr.bf16.mxu1 %v12175_v57 }
 0x5bc   : > { %3370 = vmatmul.mubr.bf16.gmra.mxu0 %v10209_v28 }
 0x5bd   : > { %3379 = vmatprep.mubr.bf16.mxu0 %v12175_v57 }
 0x5be   : > { %3543 = vmatmul.mubr.bf16.gmra.mxu1 %v10197_v35  ;;  %v10449_v35 = vld [vmem:[#allocation3 + $0x78] sm:$0xff]  }
 0x5bf   : > { %3552 = vmatprep.mubr.bf16.mxu1 %v12175_v57  ;;  %12215 = vst [vmem:[#allocation71_spill] sm:$0xff] %v10449_v35 }
 0x5c4   : > { %3380 = vmatmul.mubr.bf16.gmra.mxu0 %v10215_v29 }
 0x5c5   : > { %3389 = vmatprep.mubr.bf16.mxu0 %v12175_v57 }
 0x5c6   : > { %3553 = vmatmul.mubr.bf16.gmra.mxu1 %v10203_v41 }
 0x5c7   : > { %3562 = vmatprep.mubr.bf16.mxu1 %v12175_v57 }
 0x5cc   : > { %3390 = vmatmul.mubr.bf16.gmra.mxu0 %v10221_v30 }
 0x5cd   : > { %3399 = vmatprep.mubr.bf16.mxu0 %v12175_v57 }
 0x5ce   : > { %3563 = vmatmul.mubr.bf16.gmra.mxu1 %v10209_v28 }
 0x5cf   : > { %3572 = vmatprep.mubr.bf16.mxu1 %v12175_v57 }
 0x5d4   : > { %3400 = vmatmul.mubr.bf16.gmra.mxu0 %v10227_v49 }
 0x5d5   : > { %3409 = vmatprep.mubr.bf16.mxu0 %v12175_v57 }
 0x5d6   : > { %3573 = vmatmul.mubr.bf16.gmra.mxu1 %v10215_v29 }
 0x5d7   : > { %3582 = vmatprep.mubr.bf16.mxu1 %v12175_v57 }
 0x5dc   : > { %3410 = vmatmul.mubr.bf16.gmra.mxu0 %v10233_v50 }
 0x5dd   : > { %3419 = vmatprep.mubr.bf16.mxu0 %v12175_v57 }
 0x5de   : > { %3583 = vmatmul.mubr.bf16.gmra.mxu1 %v10221_v30 }
 0x5df   : > { %3592 = vmatprep.mubr.bf16.mxu1 %v12175_v57 }
 0x5e4   : > { %3420 = vmatmul.mubr.bf16.gmra.mxu0 %v10239_v51 }
 0x5e5   : > { %3429 = vmatprep.mubr.bf16.mxu0 %v12175_v57 }
 0x5e6   : > { %3593 = vmatmul.mubr.bf16.gmra.mxu1 %v10227_v49 }
 0x5e7   : > { %3602 = vmatprep.mubr.bf16.mxu1 %v12175_v57 }
 0x5ec   : > { %3430 = vmatmul.mubr.bf16.gmra.mxu0 %v10245_v54 }
 0x5ed   : > { %3921 = vmatprep.mubr.bf16.mxu0 %v12175_v57 }
 0x5ee   : > { %3603 = vmatmul.mubr.bf16.gmra.mxu1 %v10233_v50 }
 0x5ef   : > { %3612 = vmatprep.mubr.bf16.mxu1 %v12175_v57 }
 0x5f4   : > { %3922 = vmatmul.mubr.bf16.vlgmr.msra.gmra.mxu0 %v10251_v55 }
 0x5f5   : > { %3931 = vmatprep.mubr.bf16.mxu0 %v12175_v57 }
 0x5f6   : > { %3613 = vmatmul.mubr.bf16.gmra.mxu1 %v10239_v51 }
 0x5f7   : > { %3622 = vmatprep.mubr.bf16.mxu1 %v12175_v57 }
 0x5fc   : > { %3932 = vmatmul.mubr.bf16.gmra.mxu0 %v10257_v56 }
 0x5fd   : > { %3941 = vmatprep.mubr.bf16.mxu0 %v12175_v57 }
 0x5fe   : > { %3623 = vmatmul.mubr.bf16.gmra.mxu1 %v10245_v54  ;;  %v10427_v54 = vld [vmem:[#allocation3 + $0x70] sm:$0xff]  }
 0x5ff   : > { %4114 = vmatprep.mubr.bf16.mxu1 %v12175_v57  ;;  %12206 = vst [vmem:[#allocation62_spill] sm:$0xff] %v10427_v54 }
 0x604   : > { %3942 = vmatmul.mubr.bf16.gmra.mxu0 %v10263_v59 }
 0x605   : > { %3951 = vmatprep.mubr.bf16.mxu0 %v12175_v57 }
 0x606   : > { %4115 = vmatmul.mubr.bf16.vlgmr.msra.gmra.mxu1 %v10251_v55 }
 0x607   : > { %4124 = vmatprep.mubr.bf16.mxu1 %v12175_v57 }
 0x60c   : > { %3952 = vmatmul.mubr.bf16.gmra.mxu0 %v10269_v60 }
 0x60d   : > { %3961 = vmatprep.mubr.bf16.mxu0 %v12175_v57 }
 0x60e   : > { %4125 = vmatmul.mubr.bf16.gmra.mxu1 %v10257_v56 }
 0x60f   : > { %4134 = vmatprep.mubr.bf16.mxu1 %v12175_v57 }
 0x614   : > { %3962 = vmatmul.mubr.bf16.gmra.mxu0 %v10275_v61 }
 0x615   : > { %3971 = vmatprep.mubr.bf16.mxu0 %v12175_v57 }
 0x616   : > { %4135 = vmatmul.mubr.bf16.gmra.mxu1 %v10263_v59 }
 0x617   : > { %4144 = vmatprep.mubr.bf16.mxu1 %v12175_v57 }
 0x61c   : > { %3972 = vmatmul.mubr.bf16.gmra.mxu0 %v10281_v36 }
 0x61d   : > { %3981 = vmatprep.mubr.bf16.mxu0 %v12175_v57 }
 0x61e   : > { %4145 = vmatmul.mubr.bf16.gmra.mxu1 %v10269_v60 }
 0x61f   : > { %4154 = vmatprep.mubr.bf16.mxu1 %v12175_v57 }
 0x624   : > { %3982 = vmatmul.mubr.bf16.gmra.mxu0 %v10287_v34 }
 0x625   : > { %3991 = vmatprep.mubr.bf16.mxu0 %v12175_v57 }
 0x626   : > { %4155 = vmatmul.mubr.bf16.gmra.mxu1 %v10275_v61 }
 0x627   : > { %4164 = vmatprep.mubr.bf16.mxu1 %v12175_v57 }
 0x62c   : > { %3992 = vmatmul.mubr.bf16.gmra.mxu0 %v10293_v46 }
 0x62d   : > { %4001 = vmatprep.mubr.bf16.mxu0 %v12175_v57 }
 0x62e   : > { %4165 = vmatmul.mubr.bf16.gmra.mxu1 %v10281_v36 }
 0x62f   : > { %4174 = vmatprep.mubr.bf16.mxu1 %v12175_v57 }
 0x634   : > { %v10301_v33 = vpop.f32.mrf.mxu0  ;;  %4002 = vmatmul.mubr.bf16.gmra.mxu0 %v10299_v45 }
 0x635   : > { %4011 = vmatprep.mubr.bf16.mxu0 %v12175_v57 }
 0x636   : > { %4175 = vmatmul.mubr.bf16.gmra.mxu1 %v10287_v34  ;;  %v10309_v48 = vpop.f32.mrf.mxu0 }
 0x637   : > { %4184 = vmatprep.mubr.bf16.mxu1 %v12175_v57 }
 0x638   : > { %v10313_v2 = vpop.f32.mrf.mxu0 }
 0x63a   : > { %v10319_v4 = vpop.f32.mrf.mxu0 }
 0x63c   : > { %v10323_v6 = vpop.f32.mrf.mxu0  ;;  %4012 = vmatmul.mubr.bf16.gmra.mxu0 %v10317_v3 }
 0x63d   : > { %4021 = vmatprep.mubr.bf16.mxu0 %v12175_v57 }
 0x63e   : > { %4185 = vmatmul.mubr.bf16.gmra.mxu1 %v10293_v46  ;;  %v10331_v10 = vpop.f32.mrf.mxu0  ;;  %v10405_v46 = vld [vmem:[#allocation3 + $0x68] sm:$0xff]  }
 0x63f   : > { %4194 = vmatprep.mubr.bf16.mxu1 %v12175_v57  ;;  %12205 = vst [vmem:[#allocation61_spill] sm:$0xff] %v10405_v46 }
 0x640   : > { %v10335_v14 = vpop.f32.mrf.mxu0 }
 0x642   : > { %v10341_v52 = vpop.f32.mrf.mxu0 }
 0x644   : > { %v10345_v0 = vpop.f32.mrf.mxu0  ;;  %4022 = vmatmul.mubr.bf16.gmra.mxu0 %v10339_v31 }
 0x645   : > { %4031 = vmatprep.mubr.bf16.mxu0 %v12175_v57 }
 0x646   : > { %v10303_v43 = vpop.f32.mrf.mxu1  ;;  %4195 = vmatmul.mubr.bf16.gmra.mxu1 %v10299_v45  ;;  %v10353_v7 = vpop.f32.mrf.mxu0 }
 0x647   : > { %4204 = vmatprep.mubr.bf16.mxu1 %v12175_v57 }
 0x648   : > { %v10311_v1 = vpop.f32.mrf.mxu1  ;;  %v10357_v13 = vpop.f32.mrf.mxu0 }
 0x64a   : > { %v10315_v40 = vpop.f32.mrf.mxu1  ;;  %v10363_v20 = vpop.f32.mrf.mxu0 }
 0x64c   : > { %v10321_v5 = vpop.f32.mrf.mxu1  ;;  %v10367_v24 = vpop.f32.mrf.mxu0  ;;  %4032 = vmatmul.mubr.bf16.gmra.mxu0 %v10361_v18 }
 0x64d   : > { %4041 = vmatprep.mubr.bf16.mxu0 %v12175_v57 }
 0x64e   : > { %v10325_v9 = vpop.f32.mrf.mxu1  ;;  %4205 = vmatmul.mubr.bf16.gmra.mxu1 %v10317_v3  ;;  %v10375_v26 = vpop.f32.mrf.mxu0 }
 0x64f   : > { %4214 = vmatprep.mubr.bf16.mxu1 %v12175_v57 }
 0x650   : > { %v10333_v11 = vpop.f32.mrf.mxu1  ;;  %v10379_v17 = vpop.f32.mrf.mxu0 }
 0x652   : > { %v10337_v15 = vpop.f32.mrf.mxu1  ;;  %v10385_v58 = vpop.f32.mrf.mxu0 }
 0x654   : > { %v10343_v38 = vpop.f32.mrf.mxu1  ;;  %v10389_v63 = vpop.f32.mrf.mxu0  ;;  %4042 = vmatmul.mubr.bf16.gmra.mxu0 %v10383_v23 }
 0x655   : > { %4051 = vmatprep.mubr.bf16.mxu0 %v12175_v57 }
 0x656   : > { %v10347_v47 = vpop.f32.mrf.mxu1  ;;  %4215 = vmatmul.mubr.bf16.gmra.mxu1 %v10339_v31 }
 0x657   : > { %4224 = vmatprep.mubr.bf16.mxu1 %v12175_v57 }
 0x658   : > { %v10355_v12 = vpop.f32.mrf.mxu1 }
 0x65a   : > { %v10359_v16 = vpop.f32.mrf.mxu1 }
 0x65c   : > { %v10365_v22 = vpop.f32.mrf.mxu1  ;;  %4052 = vmatmul.mubr.bf16.gmra.mxu0 %v10405_v46 }
 0x65d   : > { %4061 = vmatprep.mubr.bf16.mxu0 %v12175_v57 }
 0x65e   : > { %v10369_v25 = vpop.f32.mrf.mxu1  ;;  %4225 = vmatmul.mubr.bf16.gmra.mxu1 %v10361_v18  ;;  %v10397_v18 = vpop.f32.mrf.mxu0 }
 0x65f   : > { %4234 = vmatprep.mubr.bf16.mxu1 %v12175_v57 }
 0x660   : > { %v10377_v27 = vpop.f32.mrf.mxu1  ;;  %v10401_v3 = vpop.f32.mrf.mxu0 }
 0x662   : > { %v10381_v21 = vpop.f32.mrf.mxu1  ;;  %v10407_v34 = vpop.f32.mrf.mxu0 }
 0x664   : > { %v10387_v62 = vpop.f32.mrf.mxu1  ;;  %v10411_v61 = vpop.f32.mrf.mxu0  ;;  %4062 = vmatmul.mubr.bf16.gmra.mxu0 %v10427_v54 }
 0x665   : > { %4071 = vmatprep.mubr.bf16.mxu0 %v12175_v57 }
 0x666   : > { %v10391_v44 = vpop.f32.mrf.mxu1  ;;  %4235 = vmatmul.mubr.bf16.gmra.mxu1 %v10383_v23  ;;  %v10419_v60 = vpop.f32.mrf.mxu0 }
 0x667   : > { %4244 = vmatprep.mubr.bf16.mxu1 %v12175_v57 }
 0x668   : > { %v10399_v31 = vpop.f32.mrf.mxu1  ;;  %v10423_v56 = vpop.f32.mrf.mxu0 }
 0x66a   : > { %v10403_v45 = vpop.f32.mrf.mxu1  ;;  %v10429_v51 = vpop.f32.mrf.mxu0 }
 0x66b   : > { %12207 = vst [vmem:[#allocation63_spill] sm:$0xff] %v10429_v51  ;;  %v10622_v51 = vld [vmem:[#allocation13] sm:$0xff] }
 0x66c   : > { %v10409_v36 = vpop.f32.mrf.mxu1  ;;  %v10433_v49 = vpop.f32.mrf.mxu0  ;;  %4072 = vmatmul.mubr.bf16.gmra.mxu0 %v10449_v35  ;;  %12294 = vst [vmem:[#allocation146_spill] sm:$0xff] %v10622_v51 }
 0x66d   : > { %12209 = vst [vmem:[#allocation65_spill] sm:$0xff] %v10433_v49 }
 0x66e   : > { %v10413_v23 = vpop.f32.mrf.mxu1  ;;  %4245 = vmatmul.mubr.bf16.gmra.mxu1 %v10405_v46  ;;  %v10441_v30 = vpop.f32.mrf.mxu0 }
 0x66f   : > { %4254 = vmatprep.mubr.bf16.mxu1 %v12175_v57  ;;  %12211 = vst [vmem:[#allocation67_spill] sm:$0xff] %v10441_v30  ;;  %v12293_v30 = vld [vmem:[#allocation39_spill] sm:$0xff] }
 0x670   : > { %v10421_v59 = vpop.f32.mrf.mxu1  ;;  %v10445_v28 = vpop.f32.mrf.mxu0 }
 0x671   : > { %12213 = vst [vmem:[#allocation69_spill] sm:$0xff] %v10445_v28  ;;  %v12292_v28 = vld [vmem:[#allocation38_spill] sm:$0xff] }
 0x672   : > { %v10425_v55 = vpop.f32.mrf.mxu1  ;;  %v10451_v53 = vpop.f32.mrf.mxu0 }
 0x673   : > { %12216 = vst [vmem:[#allocation72_spill] sm:$0xff] %v10451_v53 }
 0x674   : > { %v10431_v50 = vpop.f32.mrf.mxu1  ;;  %v10455_v42 = vpop.f32.mrf.mxu0 }
 0x675   : > { %12208 = vst [vmem:[#allocation64_spill] sm:$0xff] %v10431_v50  ;;  %12218 = vst [vmem:[#allocation74_spill] sm:$0xff] %v10455_v42 }
 0x676   : > { %v10435_v46 = vpop.f32.mrf.mxu1  ;;  %4255 = vmatmul.mubr.bf16.gmra.mxu1 %v10427_v54 }
 0x677   : > { %12210 = vst [vmem:[#allocation66_spill] sm:$0xff] %v10435_v46  ;;  %4264 = vmatprep.mubr.bf16.mxu1 %v12175_v57  ;;  %v10461_v57 = vpop.f32.mrf.mxu0 }
 0x678   : > { %v10443_v29 = vpop.f32.mrf.mxu1  ;;  %12220 = vst [vmem:[#allocation76_spill] sm:$0xff] %v10461_v57 }
 0x679   : > { %12212 = vst [vmem:[#allocation68_spill] sm:$0xff] %v10443_v29  ;;  %v10465_v8 = vpop.f32.mrf.mxu0 }
 0x67a   : > { %v10447_v41 = vpop.f32.mrf.mxu1  ;;  %12222 = vst [vmem:[#allocation78_spill] sm:$0xff] %v10465_v8 }
 0x67b   : > { %12214 = vst [vmem:[#allocation70_spill] sm:$0xff] %v10447_v41  ;;  %v10469_v37 = vpop.f32.mrf.mxu0 }
 0x67c   : > { %v10453_v39 = vpop.f32.mrf.mxu1  ;;  %12224 = vst [vmem:[#allocation80_spill] sm:$0xff] %v10469_v37 }
 0x67d   : > { %12217 = vst [vmem:[#allocation73_spill] sm:$0xff] %v10453_v39  ;;  %v10473_v39 = vpop.f32.mrf.mxu0 }
 0x67e   : > { %v10457_v54 = vpop.f32.mrf.mxu1  ;;  %4265 = vmatmul.mubr.bf16.gmra.mxu1 %v10449_v35  ;;  %12226 = vst [vmem:[#allocation82_spill] sm:$0xff] %v10473_v39 }
 0x67f   : > { %12219 = vst [vmem:[#allocation75_spill] sm:$0xff] %v10457_v54  ;;  %v10477_v54 = vpop.f32.mrf.mxu0 }
 0x680   : > { %v10463_v19 = vpop.f32.mrf.mxu1  ;;  %12228 = vst [vmem:[#allocation84_spill] sm:$0xff] %v10477_v54 }
 0x681   : > { %12221 = vst [vmem:[#allocation77_spill] sm:$0xff] %v10463_v19  ;;  %v10481_v35 = vpop.f32.mrf.mxu0 }
 0x682   : > { %v10467_v32 = vpop.f32.mrf.mxu1  ;;  %12230 = vst [vmem:[#allocation86_spill] sm:$0xff] %v10481_v35 }
 0x683   : > { %12223 = vst [vmem:[#allocation79_spill] sm:$0xff] %v10467_v32  ;;  %v10485_v19 = vpop.f32.mrf.mxu0 }
 0x684   : > { %v10471_v53 = vpop.f32.mrf.mxu1  ;;  %12232 = vst [vmem:[#allocation88_spill] sm:$0xff] %v10485_v19 }
 0x685   : > { %12225 = vst [vmem:[#allocation81_spill] sm:$0xff] %v10471_v53  ;;  %v10489_v32 = vpop.f32.mrf.mxu0 }
 0x686   : > { %v10475_v42 = vpop.f32.mrf.mxu1  ;;  %12234 = vst [vmem:[#allocation90_spill] sm:$0xff] %v10489_v32 }
 0x687   : > { %12227 = vst [vmem:[#allocation83_spill] sm:$0xff] %v10475_v42  ;;  %v10493_v53 = vpop.f32.mrf.mxu0 }
 0x688   : > { %v10479_v41 = vpop.f32.mrf.mxu1  ;;  %12236 = vst [vmem:[#allocation92_spill] sm:$0xff] %v10493_v53 }
 0x689   : > { %12229 = vst [vmem:[#allocation85_spill] sm:$0xff] %v10479_v41  ;;  %v10497_v42 = vpop.f32.mrf.mxu0 }
 0x68a   : > { %v10483_v57 = vpop.f32.mrf.mxu1  ;;  %12238 = vst [vmem:[#allocation94_spill] sm:$0xff] %v10497_v42 }
 0x68b   : > { %12231 = vst [vmem:[#allocation87_spill] sm:$0xff] %v10483_v57  ;;  %v10501_v41 = vpop.f32.mrf.mxu0 }
 0x68c   : > { %v10487_v8 = vpop.f32.mrf.mxu1  ;;  %12240 = vst [vmem:[#allocation96_spill] sm:$0xff] %v10501_v41 }
 0x68d   : > { %12233 = vst [vmem:[#allocation89_spill] sm:$0xff] %v10487_v8  ;;  %v10505_v57 = vpop.f32.mrf.mxu0 }
 0x68e   : > { %v10491_v37 = vpop.f32.mrf.mxu1  ;;  %12242 = vst [vmem:[#allocation98_spill] sm:$0xff] %v10505_v57 }
 0x68f   : > { %12235 = vst [vmem:[#allocation91_spill] sm:$0xff] %v10491_v37  ;;  %v10509_v8 = vpop.f32.mrf.mxu0 }
 0x690   : > { %v10495_v39 = vpop.f32.mrf.mxu1  ;;  %12244 = vst [vmem:[#allocation100_spill] sm:$0xff] %v10509_v8 }
 0x691   : > { %12237 = vst [vmem:[#allocation93_spill] sm:$0xff] %v10495_v39  ;;  %v10513_v37 = vpop.f32.mrf.mxu0 }
 0x692   : > { %v10499_v54 = vpop.f32.mrf.mxu1  ;;  %12246 = vst [vmem:[#allocation102_spill] sm:$0xff] %v10513_v37 }
 0x693   : > { %12239 = vst [vmem:[#allocation95_spill] sm:$0xff] %v10499_v54  ;;  %v10517_v39 = vpop.f32.mrf.mxu0 }
 0x694   : > { %v10503_v35 = vpop.f32.mrf.mxu1  ;;  %12248 = vst [vmem:[#allocation104_spill] sm:$0xff] %v10517_v39 }
 0x695   : > { %12241 = vst [vmem:[#allocation97_spill] sm:$0xff] %v10503_v35  ;;  %v10521_v54 = vpop.f32.mrf.mxu0 }
 0x696   : > { %v10507_v19 = vpop.f32.mrf.mxu1  ;;  %12250 = vst [vmem:[#allocation106_spill] sm:$0xff] %v10521_v54 }
 0x697   : > { %12243 = vst [vmem:[#allocation99_spill] sm:$0xff] %v10507_v19  ;;  %v10525_v35 = vpop.f32.mrf.mxu0 }
 0x698   : > { %v10511_v32 = vpop.f32.mrf.mxu1  ;;  %12252 = vst [vmem:[#allocation108_spill] sm:$0xff] %v10525_v35 }
 0x699   : > { %12245 = vst [vmem:[#allocation101_spill] sm:$0xff] %v10511_v32  ;;  %v10529_v19 = vpop.f32.mrf.mxu0 }
 0x69a   : > { %v10515_v53 = vpop.f32.mrf.mxu1  ;;  %12254 = vst [vmem:[#allocation110_spill] sm:$0xff] %v10529_v19 }
 0x69b   : > { %12247 = vst [vmem:[#allocation103_spill] sm:$0xff] %v10515_v53  ;;  %v10533_v32 = vpop.f32.mrf.mxu0 }
 0x69c   : > { %v10519_v42 = vpop.f32.mrf.mxu1  ;;  %12256 = vst [vmem:[#allocation112_spill] sm:$0xff] %v10533_v32 }
 0x69d   : > { %12249 = vst [vmem:[#allocation105_spill] sm:$0xff] %v10519_v42  ;;  %v10537_v53 = vpop.f32.mrf.mxu0 }
 0x69e   : > { %v10523_v41 = vpop.f32.mrf.mxu1  ;;  %12258 = vst [vmem:[#allocation114_spill] sm:$0xff] %v10537_v53 }
 0x69f   : > { %12251 = vst [vmem:[#allocation107_spill] sm:$0xff] %v10523_v41  ;;  %v10541_v42 = vpop.f32.mrf.mxu0 }
 0x6a0   : > { %v10527_v57 = vpop.f32.mrf.mxu1  ;;  %12260 = vst [vmem:[#allocation116_spill] sm:$0xff] %v10541_v42 }
 0x6a1   : > { %12253 = vst [vmem:[#allocation109_spill] sm:$0xff] %v10527_v57  ;;  %v10545_v41 = vpop.f32.mrf.mxu0 }
 0x6a2   : > { %v10531_v8 = vpop.f32.mrf.mxu1  ;;  %12262 = vst [vmem:[#allocation118_spill] sm:$0xff] %v10545_v41 }
 0x6a3   : > { %12255 = vst [vmem:[#allocation111_spill] sm:$0xff] %v10531_v8  ;;  %v10549_v57 = vpop.f32.mrf.mxu0 }
 0x6a4   : > { %v10535_v37 = vpop.f32.mrf.mxu1  ;;  %12264 = vst [vmem:[#allocation120_spill] sm:$0xff] %v10549_v57 }
 0x6a5   : > { %12257 = vst [vmem:[#allocation113_spill] sm:$0xff] %v10535_v37  ;;  %v10553_v8 = vpop.f32.mrf.mxu0 }
 0x6a6   : > { %v10539_v39 = vpop.f32.mrf.mxu1  ;;  %12266 = vst [vmem:[#allocation122_spill] sm:$0xff] %v10553_v8 }
 0x6a7   : > { %12259 = vst [vmem:[#allocation115_spill] sm:$0xff] %v10539_v39  ;;  %v10557_v37 = vpop.f32.mrf.mxu0 }
 0x6a8   : > { %v10543_v54 = vpop.f32.mrf.mxu1  ;;  %12268 = vst [vmem:[#allocation124_spill] sm:$0xff] %v10557_v37 }
 0x6a9   : > { %12261 = vst [vmem:[#allocation117_spill] sm:$0xff] %v10543_v54  ;;  %v10561_v39 = vpop.f32.mrf.mxu0 }
 0x6aa   : > { %v10547_v35 = vpop.f32.mrf.mxu1  ;;  %12270 = vst [vmem:[#allocation126_spill] sm:$0xff] %v10561_v39 }
 0x6ab   : > { %12263 = vst [vmem:[#allocation119_spill] sm:$0xff] %v10547_v35  ;;  %v10565_v54 = vpop.f32.mrf.mxu0 }
 0x6ac   : > { %v10551_v19 = vpop.f32.mrf.mxu1  ;;  %12272 = vst [vmem:[#allocation128_spill] sm:$0xff] %v10565_v54 }
 0x6ad   : > { %12265 = vst [vmem:[#allocation121_spill] sm:$0xff] %v10551_v19  ;;  %v10569_v35 = vpop.f32.mrf.mxu0 }
 0x6ae   : > { %v10555_v32 = vpop.f32.mrf.mxu1  ;;  %12274 = vst [vmem:[#allocation130_spill] sm:$0xff] %v10569_v35 }
 0x6af   : > { %12267 = vst [vmem:[#allocation123_spill] sm:$0xff] %v10555_v32  ;;  %v10573_v19 = vpop.f32.mrf.mxu0 }
 0x6b0   : > { %v10559_v53 = vpop.f32.mrf.mxu1  ;;  %12276 = vst [vmem:[#allocation132_spill] sm:$0xff] %v10573_v19 }
 0x6b1   : > { %12269 = vst [vmem:[#allocation125_spill] sm:$0xff] %v10559_v53  ;;  %v10577_v32 = vpop.f32.mrf.mxu0 }
 0x6b2   : > { %v10563_v42 = vpop.f32.mrf.mxu1  ;;  %12278 = vst [vmem:[#allocation134_spill] sm:$0xff] %v10577_v32 }
 0x6b3   : > { %12271 = vst [vmem:[#allocation127_spill] sm:$0xff] %v10563_v42  ;;  %v10581_v53 = vpop.f32.mrf.mxu0 }
 0x6b4   : > { %v10567_v41 = vpop.f32.mrf.mxu1  ;;  %12280 = vst [vmem:[#allocation136_spill] sm:$0xff] %v10581_v53 }
 0x6b5   : > { %12273 = vst [vmem:[#allocation129_spill] sm:$0xff] %v10567_v41  ;;  %v10585_v42 = vpop.f32.mrf.mxu0 }
 0x6b6   : > { %v10571_v57 = vpop.f32.mrf.mxu1  ;;  %12282 = vst [vmem:[#allocation138_spill] sm:$0xff] %v10585_v42 }
 0x6b7   : > { %12275 = vst [vmem:[#allocation131_spill] sm:$0xff] %v10571_v57  ;;  %v10589_v41 = vpop.f32.mrf.mxu0 }
 0x6b8   : > { %v10575_v8 = vpop.f32.mrf.mxu1  ;;  %12284 = vst [vmem:[#allocation140_spill] sm:$0xff] %v10589_v41 }
 0x6b9   : > { %12277 = vst [vmem:[#allocation133_spill] sm:$0xff] %v10575_v8  ;;  %v10593_v57 = vpop.f32.mrf.mxu0 }
 0x6ba   : > { %v10579_v37 = vpop.f32.mrf.mxu1  ;;  %12286 = vst [vmem:[#allocation142_spill] sm:$0xff] %v10593_v57 }
 0x6bb   : > { %12279 = vst [vmem:[#allocation135_spill] sm:$0xff] %v10579_v37  ;;  %v4275_v37 = vld [vmem:[%s11988_s9] sm:$0xf]  ;;  %v10600_v32 = vpop.f32.mrf.mxu0 }
 0x6bc   : > { %v10583_v39 = vpop.f32.mrf.mxu1  ;;  %12288 = vst [vmem:[#allocation144_spill] sm:$0xff] %v10600_v32  ;;  %v10613_v29 = vrot.slane %v4275_v37, %v12292_v28  ;;  %v10616_v46 = vrot.slane %v4275_v37, %v12293_v30  ;;  %v10630_v30 = vld [vmem:[#allocation13 + $0x20] sm:$0xff] }
 0x6bd   : > { %12281 = vst [vmem:[#allocation137_spill] sm:$0xff] %v10583_v39  ;;  %v12290_v39 = vld [vmem:[#allocation36_spill] sm:$0xff]  ;;  %v3923_v41 = vpop.f32.mrf.mxu0  ;;  %12298 = vst [vmem:[#allocation150_spill] sm:$0xff] %v10630_v30 }
 0x6be   : > { %v10587_v54 = vpop.f32.mrf.mxu1  ;;  %v10605_v42 = vrot.slane %v4275_v37, %v12290_v39  ;;  %v3924_v57 = vadd.f32 %v3923_v41, %v10301_v33  ;;  %v10624_v41 = vld [vmem:[#allocation13 + $0x8] sm:$0xff] }
 0x6bf   : > { %12283 = vst [vmem:[#allocation139_spill] sm:$0xff] %v10587_v54  ;;  %v12291_v54 = vld [vmem:[#allocation37_spill] sm:$0xff]  ;;  %v3925_v32 = vpop.f32.mrf.mxu0  ;;  %12295 = vst [vmem:[#allocation147_spill] sm:$0xff] %v10624_v41  ;;  %v10642_v41 = vld [vmem:[#allocation13 + $0x40] sm:$0xff] }
 0x6c0   : > { %v10591_v35 = vpop.f32.mrf.mxu1  ;;  %v10608_v8 = vrot.slane %v4275_v37, %v12291_v54  ;;  %v4297_v39 = vadd.f32 %v10605_v42, %v3924_v57  ;;  %v3926_v54 = vadd.f32 %v3925_v32, %v10309_v48  ;;  %v10628_v37 = vld [vmem:[#allocation13 + $0x18] sm:$0xff]  ;;  %12302 = vst [vmem:[#allocation154_spill] sm:$0xff] %v10642_v41 }
 0x6c1   : > { %12285 = vst [vmem:[#allocation141_spill] sm:$0xff] %v10591_v35  ;;  %v3927_v28 = vpop.f32.mrf.mxu0  ;;  %12297 = vst [vmem:[#allocation149_spill] sm:$0xff] %v10628_v37  ;;  %v10640_v57 = vld [vmem:[#allocation13 + $0x38] sm:$0xff] }
 0x6c2   : > { %v10595_v19 = vpop.f32.mrf.mxu1  ;;  %4425 = vst [vmem:[#allocation2] sm:$0xff] %v4297_v39  ;;  %v4298_v32 = vadd.f32 %v10613_v29, %v3926_v54  ;;  %12301 = vst [vmem:[#allocation153_spill] sm:$0xff] %v10640_v57  ;;  %v10646_v39 = vld [vmem:[#allocation13 + $0x50] sm:$0xff] }
 0x6c3   : > { %12287 = vst [vmem:[#allocation143_spill] sm:$0xff] %v10595_v19  ;;  %v3929_v37 = vpop.f32.mrf.mxu0  ;;  %12304 = vst [vmem:[#allocation156_spill] sm:$0xff] %v10646_v39  ;;  %v10676_v39 = vld [vmem:[#allocation13 + $0xa8] sm:$0xff] }
 0x6c4   : > { %v10602_v53 = vpop.f32.mrf.mxu1  ;;  %4426 = vst [vmem:[#allocation2 + $0x8] sm:$0xff] %v4298_v32  ;;  %v10662_v32 = vld [vmem:[#allocation13 + $0x80] sm:$0xff] }
 0x6c5   : > { %12289 = vst [vmem:[#allocation145_spill] sm:$0xff] %v10602_v53  ;;  %v3933_v57 = vpop.f32.mrf.mxu0  ;;  %12310 = vst [vmem:[#allocation162_spill] sm:$0xff] %v10662_v32 }
 0x6c6   : > { %v4116_v35 = vpop.f32.mrf.mxu1 }
 0x6c7   : > { %v4117_v19 = vadd.f32 %v4116_v35, %v10303_v43  ;;  %v10626_v35 = vld [vmem:[#allocation13 + $0x10] sm:$0xff]  ;;  %v10632_v43 = vld [vmem:[#allocation13 + $0x28] sm:$0xff] }
 0x6c8   : > { %v4118_v53 = vpop.f32.mrf.mxu1  ;;  %12296 = vst [vmem:[#allocation148_spill] sm:$0xff] %v10626_v35  ;;  %12299 = vst [vmem:[#allocation151_spill] sm:$0xff] %v10632_v43  ;;  %v10644_v35 = vld [vmem:[#allocation13 + $0x48] sm:$0xff]  ;;  %v10658_v43 = vld [vmem:[#allocation13 + $0x70] sm:$0xff] }
 0x6c9   : > { %v4299_v49 = vadd.f32 %v10608_v8, %v4117_v19  ;;  %v4119_v50 = vadd.f32 %v4118_v53, %v10311_v1  ;;  %v3928_v53 = vadd.f32 %v3927_v28, %v10313_v2  ;;  %v10638_v1 = vld [vmem:[#allocation13 + $0x30] sm:$0xff]  ;;  %12303 = vst [vmem:[#allocation155_spill] sm:$0xff] %v10644_v35  ;;  %v10654_v28 = vld [vmem:[#allocation13 + $0x60] sm:$0xff]  ;;  %12308 = vst [vmem:[#allocation160_spill] sm:$0xff] %v10658_v43 }
 0x6ca   : > { %v4120_v33 = vpop.f32.mrf.mxu1  ;;  %12300 = vst [vmem:[#allocation152_spill] sm:$0xff] %v10638_v1  ;;  %12306 = vst [vmem:[#allocation158_spill] sm:$0xff] %v10654_v28  ;;  %v10660_v1 = vld [vmem:[#allocation13 + $0x78] sm:$0xff]  ;;  %v10674_v35 = vld [vmem:[#allocation13 + $0xa0] sm:$0xff] }
 0x6cb   : > { %4427 = vst [vmem:[#allocation2 + $0x10] sm:$0xff] %v4299_v49  ;;  %v4300_v19 = vadd.f32 %v10616_v46, %v4119_v50  ;;  %v4121_v48 = vadd.f32 %v4120_v33, %v10315_v40  ;;  %v10648_v49 = vld [vmem:[#allocation13 + $0x58] sm:$0xff]  ;;  %v4301_v50 = vadd.f32 %v10605_v42, %v3928_v53  ;;  %v3930_v40 = vadd.f32 %v3929_v37, %v10319_v4  ;;  %v10656_v33 = vld [vmem:[#allocation13 + $0x68] sm:$0xff]  ;;  %v10670_v53 = vld [vmem:[#allocation13 + $0x90] sm:$0xff] }
 0x6cc   : > { %v4122_v51 = vpop.f32.mrf.mxu1  ;;  %12305 = vst [vmem:[#allocation157_spill] sm:$0xff] %v10648_v49  ;;  %12307 = vst [vmem:[#allocation159_spill] sm:$0xff] %v10656_v33  ;;  %v3935_v49 = vpop.f32.mrf.mxu0  ;;  %v10690_v33 = vld [vmem:[#allocation13 + $0xd0] sm:$0xff]  ;;  %v10692_v43 = vld [vmem:[#allocation13 + $0xd8] sm:$0xff] }
 0x6cd   : > { %4428 = vst [vmem:[#allocation2 + $0x18] sm:$0xff] %v4300_v19  ;;  %v4303_v2 = vadd.f32 %v10608_v8, %v4121_v48  ;;  %v4123_v54 = vadd.f32 %v4122_v51, %v10321_v5  ;;  %12309 = vst [vmem:[#allocation161_spill] sm:$0xff] %v10660_v1  ;;  %v10664_v19 = vld [vmem:[#allocation13 + $0x88] sm:$0xff]  ;;  %v4302_v4 = vadd.f32 %v10613_v29, %v3930_v40  ;;  %v10672_v48 = vld [vmem:[#allocation13 + $0x98] sm:$0xff] }
 0x6ce   : > { %v4126_v30 = vpop.f32.mrf.mxu1  ;;  %12311 = vst [vmem:[#allocation163_spill] sm:$0xff] %v10664_v19  ;;  %4429 = vst [vmem:[#allocation2 + $0x20] sm:$0xff] %v4301_v50  ;;  %v3934_v5 = vadd.f32 %v3933_v57, %v10323_v6  ;;  %v10678_v50 = vld [vmem:[#allocation13 + $0xb0] sm:$0xff]  ;;  %v10686_v40 = vld [vmem:[#allocation13 + $0xc0] sm:$0xff]  ;;  %v3937_v1 = vpop.f32.mrf.mxu0 }
 0x6cf   : > { %4431 = vst [vmem:[#allocation2 + $0x30] sm:$0xff] %v4303_v2  ;;  %v4304_v51 = vadd.f32 %v10616_v46, %v4123_v54  ;;  %v4127_v37 = vadd.f32 %v4126_v30, %v10325_v9  ;;  %12312 = vst [vmem:[#allocation164_spill] sm:$0xff] %v10672_v48  ;;  %v10680_v2 = vld [vmem:[#allocation13 + $0xb8] sm:$0xff]  ;;  %v3936_v30 = vadd.f32 %v3935_v49, %v10331_v10  ;;  %v10688_v54 = vld [vmem:[#allocation13 + $0xc8] sm:$0xff] }
 0x6d0   : > { %v4128_v41 = vpop.f32.mrf.mxu1  ;;  %4430 = vst [vmem:[#allocation2 + $0x28] sm:$0xff] %v4302_v4  ;;  %v4305_v6 = vadd.f32 %v10605_v42, %v3934_v5  ;;  %v10694_v4 = vld [vmem:[#allocation13 + $0xe0] sm:$0xff]  ;;  %v10702_v5 = vld [vmem:[#allocation13 + $0xf0] sm:$0xff]  ;;  %v3939_v19 = vpop.f32.mrf.mxu0 }
 0x6d1   : > { %4432 = vst [vmem:[#allocation2 + $0x38] sm:$0xff] %v4304_v51  ;;  %v4307_v9 = vadd.f32 %v10608_v8, %v4127_v37  ;;  %v4129_v57 = vadd.f32 %v4128_v41, %v10333_v11  ;;  %v10696_v51 = vld [vmem:[#allocation13 + $0xe8] sm:$0xff]  ;;  %v4306_v10 = vadd.f32 %v10613_v29, %v3936_v30  ;;  %v3938_v41 = vadd.f32 %v3937_v1, %v10335_v14  ;;  %v10704_v37 = vld [vmem:[#allocation13 + $0xf8] sm:$0xff] }
 0x6d2   : > { %v4130_v28 = vpop.f32.mrf.mxu1  ;;  %4433 = vst [vmem:[#allocation2 + $0x40] sm:$0xff] %v4305_v6 }
 0x6d3   : > { %4435 = vst [vmem:[#allocation2 + $0x50] sm:$0xff] %v4307_v9  ;;  %v4308_v11 = vadd.f32 %v10616_v46, %v4129_v57  ;;  %v4131_v49 = vadd.f32 %v4130_v28, %v10337_v15  ;;  %4434 = vst [vmem:[#allocation2 + $0x48] sm:$0xff] %v4306_v10  ;;  %v4309_v32 = vadd.f32 %v10605_v42, %v3938_v41  ;;  %v3943_v57 = vpop.f32.mrf.mxu0 }
 0x6d4   : > { %v4132_v48 = vpop.f32.mrf.mxu1  ;;  %v3940_v9 = vadd.f32 %v3939_v19, %v10341_v52  ;;  %v3944_v28 = vadd.f32 %v3943_v57, %v10345_v0 }
 0x6d5   : > { %4436 = vst [vmem:[#allocation2 + $0x58] sm:$0xff] %v4308_v11  ;;  %v4311_v6 = vadd.f32 %v10608_v8, %v4131_v49  ;;  %v4133_v30 = vadd.f32 %v4132_v48, %v10343_v38  ;;  %4437 = vst [vmem:[#allocation2 + $0x60] sm:$0xff] %v4309_v32  ;;  %v3945_v11 = vpop.f32.mrf.mxu0 }
 0x6d6   : > { %v4136_v14 = vpop.f32.mrf.mxu1  ;;  %v4310_v15 = vadd.f32 %v10613_v29, %v3940_v9  ;;  %v4313_v52 = vadd.f32 %v10605_v42, %v3944_v28  ;;  %v3946_v19 = vadd.f32 %v3945_v11, %v10353_v7 }
 0x6d7   : > { %4439 = vst [vmem:[#allocation2 + $0x70] sm:$0xff] %v4311_v6  ;;  %v4312_v1 = vadd.f32 %v10616_v46, %v4133_v30  ;;  %v4137_v10 = vadd.f32 %v4136_v14, %v10347_v47  ;;  %v3947_v48 = vpop.f32.mrf.mxu0 }
 0x6d8   : > { %v4138_v41 = vpop.f32.mrf.mxu1  ;;  %4438 = vst [vmem:[#allocation2 + $0x68] sm:$0xff] %v4310_v15  ;;  %4441 = vst [vmem:[#allocation2 + $0x80] sm:$0xff] %v4313_v52  ;;  %v4314_v0 = vadd.f32 %v10613_v29, %v3946_v19  ;;  %v3948_v6 = vadd.f32 %v3947_v48, %v10357_v13 }
 0x6d9   : > { %4440 = vst [vmem:[#allocation2 + $0x78] sm:$0xff] %v4312_v1  ;;  %v4315_v38 = vadd.f32 %v10608_v8, %v4137_v10  ;;  %v4139_v32 = vadd.f32 %v4138_v41, %v10355_v12  ;;  %v3949_v30 = vpop.f32.mrf.mxu0 }
 0x6da   : > { %v4140_v49 = vpop.f32.mrf.mxu1  ;;  %4442 = vst [vmem:[#allocation2 + $0x88] sm:$0xff] %v4314_v0  ;;  %v4317_v7 = vadd.f32 %v10605_v42, %v3948_v6  ;;  %v3950_v14 = vadd.f32 %v3949_v30, %v10363_v20 }
 0x6db   : > { %4443 = vst [vmem:[#allocation2 + $0x90] sm:$0xff] %v4315_v38  ;;  %v4316_v47 = vadd.f32 %v10616_v46, %v4139_v32  ;;  %v4141_v9 = vadd.f32 %v4140_v49, %v10359_v16  ;;  %v3953_v1 = vpop.f32.mrf.mxu0 }
 0x6dc   : > { %v4142_v57 = vpop.f32.mrf.mxu1  ;;  %4445 = vst [vmem:[#allocation2 + $0xa0] sm:$0xff] %v4317_v7  ;;  %v4318_v13 = vadd.f32 %v10613_v29, %v3950_v14  ;;  %v3954_v10 = vadd.f32 %v3953_v1, %v10367_v24 }
 0x6dd   : > { %4444 = vst [vmem:[#allocation2 + $0x98] sm:$0xff] %v4316_v47  ;;  %v4319_v12 = vadd.f32 %v10608_v8, %v4141_v9  ;;  %v4143_v15 = vadd.f32 %v4142_v57, %v10365_v22  ;;  %v3955_v41 = vpop.f32.mrf.mxu0 }
 0x6de   : > { %v4146_v28 = vpop.f32.mrf.mxu1  ;;  %4446 = vst [vmem:[#allocation2 + $0xa8] sm:$0xff] %v4318_v13  ;;  %v4321_v20 = vadd.f32 %v10605_v42, %v3954_v10  ;;  %v3956_v38 = vadd.f32 %v3955_v41, %v10375_v26 }
 0x6df   : > { %4447 = vst [vmem:[#allocation2 + $0xb0] sm:$0xff] %v4319_v12  ;;  %v4320_v16 = vadd.f32 %v10616_v46, %v4143_v15  ;;  %v4147_v11 = vadd.f32 %v4146_v28, %v10369_v25  ;;  %v3957_v32 = vpop.f32.mrf.mxu0 }
 0x6e0   : > { %v4148_v52 = vpop.f32.mrf.mxu1  ;;  %4449 = vst [vmem:[#allocation2 + $0xc0] sm:$0xff] %v4321_v20  ;;  %v4322_v24 = vadd.f32 %v10613_v29, %v3956_v38  ;;  %v3958_v49 = vadd.f32 %v3957_v32, %v10379_v17 }
 0x6e1   : > { %4448 = vst [vmem:[#allocation2 + $0xb8] sm:$0xff] %v4320_v16  ;;  %v4323_v22 = vadd.f32 %v10608_v8, %v4147_v11  ;;  %v4149_v19 = vadd.f32 %v4148_v52, %v10377_v27  ;;  %v3959_v47 = vpop.f32.mrf.mxu0 }
 0x6e2   : > { %v4150_v48 = vpop.f32.mrf.mxu1  ;;  %4450 = vst [vmem:[#allocation2 + $0xc8] sm:$0xff] %v4322_v24  ;;  %v4325_v26 = vadd.f32 %v10605_v42, %v3958_v49  ;;  %v3960_v9 = vadd.f32 %v3959_v47, %v10385_v58 }
 0x6e3   : > { %4451 = vst [vmem:[#allocation2 + $0xd0] sm:$0xff] %v4323_v22  ;;  %v4324_v25 = vadd.f32 %v10616_v46, %v4149_v19  ;;  %v4151_v0 = vadd.f32 %v4150_v48, %v10381_v21  ;;  %v3963_v57 = vpop.f32.mrf.mxu0 }
 0x6e4   : > { %v4152_v6 = vpop.f32.mrf.mxu1  ;;  %4453 = vst [vmem:[#allocation2 + $0xe0] sm:$0xff] %v4325_v26  ;;  %v4326_v17 = vadd.f32 %v10613_v29, %v3960_v9  ;;  %v3964_v12 = vadd.f32 %v3963_v57, %v10389_v63 }
 0x6e5   : > { %4452 = vst [vmem:[#allocation2 + $0xd8] sm:$0xff] %v4324_v25  ;;  %v4327_v27 = vadd.f32 %v10608_v8, %v4151_v0  ;;  %v4153_v30 = vadd.f32 %v4152_v6, %v10387_v62  ;;  %v3965_v15 = vpop.f32.mrf.mxu0 }
 0x6e6   : > { %v4156_v7 = vpop.f32.mrf.mxu1  ;;  %4454 = vst [vmem:[#allocation2 + $0xe8] sm:$0xff] %v4326_v17  ;;  %v4329_v58 = vadd.f32 %v10605_v42, %v3964_v12  ;;  %v3966_v28 = vadd.f32 %v3965_v15, %v10397_v18 }
 0x6e7   : > { %4455 = vst [vmem:[#allocation2 + $0xf0] sm:$0xff] %v4327_v27  ;;  %v4328_v21 = vadd.f32 %v10616_v46, %v4153_v30  ;;  %v4157_v14 = vadd.f32 %v4156_v7, %v10391_v44  ;;  %v3967_v16 = vpop.f32.mrf.mxu0  ;;  %v12313_v7 = vld [vmem:[#allocation63_spill] sm:$0xff] }
 0x6e8   : > { %v4158_v1 = vpop.f32.mrf.mxu1  ;;  %4457 = vst [vmem:[#allocation2 + $0x100] sm:$0xff] %v4329_v58  ;;  %v4330_v63 = vadd.f32 %v10613_v29, %v3966_v28  ;;  %v3968_v11 = vadd.f32 %v3967_v16, %v10401_v3 }
 0x6e9   : > { %4456 = vst [vmem:[#allocation2 + $0xf8] sm:$0xff] %v4328_v21  ;;  %v4331_v62 = vadd.f32 %v10608_v8, %v4157_v14  ;;  %v4159_v13 = vadd.f32 %v4158_v1, %v10399_v31  ;;  %v3969_v52 = vpop.f32.mrf.mxu0  ;;  %v12314_v21 = vld [vmem:[#allocation64_spill] sm:$0xff]  ;;  %v12315_v1 = vld [vmem:[#allocation65_spill] sm:$0xff] }
 0x6ea   : > { %v4160_v10 = vpop.f32.mrf.mxu1  ;;  %4458 = vst [vmem:[#allocation2 + $0x108] sm:$0xff] %v4330_v63  ;;  %v4333_v18 = vadd.f32 %v10605_v42, %v3968_v11  ;;  %v3970_v22 = vadd.f32 %v3969_v52, %v10407_v34 }
 0x6eb   : > { %4459 = vst [vmem:[#allocation2 + $0x110] sm:$0xff] %v4331_v62  ;;  %v4332_v44 = vadd.f32 %v10616_v46, %v4159_v13  ;;  %v4161_v41 = vadd.f32 %v4160_v10, %v10403_v45  ;;  %v3973_v19 = vpop.f32.mrf.mxu0  ;;  %v12316_v62 = vld [vmem:[#allocation66_spill] sm:$0xff] }
 0x6ec   : > { %v4162_v20 = vpop.f32.mrf.mxu1  ;;  %4461 = vst [vmem:[#allocation2 + $0x120] sm:$0xff] %v4333_v18  ;;  %v4334_v3 = vadd.f32 %v10613_v29, %v3970_v22  ;;  %v3974_v48 = vadd.f32 %v3973_v19, %v10411_v61 }
 0x6ed   : > { %4460 = vst [vmem:[#allocation2 + $0x118] sm:$0xff] %v4332_v44  ;;  %v4335_v31 = vadd.f32 %v10608_v8, %v4161_v41  ;;  %v4163_v38 = vadd.f32 %v4162_v20, %v10409_v36  ;;  %v3975_v25 = vpop.f32.mrf.mxu0  ;;  %v12317_v44 = vld [vmem:[#allocation67_spill] sm:$0xff]  ;;  %v12318_v41 = vld [vmem:[#allocation68_spill] sm:$0xff] }
 0x6ee   : > { %v4166_v32 = vpop.f32.mrf.mxu1  ;;  %4462 = vst [vmem:[#allocation2 + $0x128] sm:$0xff] %v4334_v3  ;;  %v4337_v34 = vadd.f32 %v10605_v42, %v3974_v48  ;;  %v3976_v0 = vadd.f32 %v3975_v25, %v10419_v60 }
 0x6ef   : > { %4463 = vst [vmem:[#allocation2 + $0x130] sm:$0xff] %v4335_v31  ;;  %v4336_v45 = vadd.f32 %v10616_v46, %v4163_v38  ;;  %v4167_v24 = vadd.f32 %v4166_v32, %v10413_v23  ;;  %v3977_v6 = vpop.f32.mrf.mxu0  ;;  %v12319_v38 = vld [vmem:[#allocation69_spill] sm:$0xff]  ;;  %v12320_v32 = vld [vmem:[#allocation70_spill] sm:$0xff] }
 0x6f0   : > { %v4168_v49 = vpop.f32.mrf.mxu1  ;;  %4465 = vst [vmem:[#allocation2 + $0x140] sm:$0xff] %v4337_v34  ;;  %v4338_v61 = vadd.f32 %v10613_v29, %v3976_v0  ;;  %v3978_v27 = vadd.f32 %v3977_v6, %v10423_v56 }
 0x6f1   : > { %4464 = vst [vmem:[#allocation2 + $0x138] sm:$0xff] %v4336_v45  ;;  %v4339_v36 = vadd.f32 %v10608_v8, %v4167_v24  ;;  %v4169_v47 = vadd.f32 %v4168_v49, %v10421_v59  ;;  %v3979_v30 = vpop.f32.mrf.mxu0  ;;  %v12321_v49 = vld [vmem:[#allocation72_spill] sm:$0xff] }
 0x6f2   : > { %v4170_v26 = vpop.f32.mrf.mxu1  ;;  %4466 = vst [vmem:[#allocation2 + $0x148] sm:$0xff] %v4338_v61  ;;  %v4341_v60 = vadd.f32 %v10605_v42, %v3978_v27  ;;  %v3980_v17 = vadd.f32 %v3979_v30, %v12313_v7 }
 0x6f3   : > { %4467 = vst [vmem:[#allocation2 + $0x150] sm:$0xff] %v4339_v36  ;;  %v4340_v23 = vadd.f32 %v10616_v46, %v4169_v47  ;;  %v4171_v9 = vadd.f32 %v4170_v26, %v10425_v55  ;;  %v3983_v14 = vpop.f32.mrf.mxu0  ;;  %v12322_v36 = vld [vmem:[#allocation73_spill] sm:$0xff] }
 0x6f4   : > { %v4172_v57 = vpop.f32.mrf.mxu1  ;;  %4469 = vst [vmem:[#allocation2 + $0x160] sm:$0xff] %v4341_v60  ;;  %v4342_v56 = vadd.f32 %v10613_v29, %v3980_v17  ;;  %v3984_v58 = vadd.f32 %v3983_v14, %v12315_v1  ;;  %v12325_v17 = vld [vmem:[#allocation76_spill] sm:$0xff] }
 0x6f5   : > { %4468 = vst [vmem:[#allocation2 + $0x158] sm:$0xff] %v4340_v23  ;;  %v4343_v59 = vadd.f32 %v10608_v8, %v4171_v9  ;;  %v4173_v12 = vadd.f32 %v4172_v57, %v12314_v21  ;;  %v3985_v13 = vpop.f32.mrf.mxu0  ;;  %v12323_v23 = vld [vmem:[#allocation74_spill] sm:$0xff]  ;;  %v12324_v9 = vld [vmem:[#allocation75_spill] sm:$0xff] }
 0x6f6   : > { %v4176_v15 = vpop.f32.mrf.mxu1  ;;  %4470 = vst [vmem:[#allocation2 + $0x168] sm:$0xff] %v4342_v56  ;;  %v4345_v10 = vadd.f32 %v10605_v42, %v3984_v58  ;;  %v3986_v11 = vadd.f32 %v3985_v13, %v12317_v44  ;;  %v12327_v58 = vld [vmem:[#allocation78_spill] sm:$0xff] }
 0x6f7   : > { %4471 = vst [vmem:[#allocation2 + $0x170] sm:$0xff] %v4343_v59  ;;  %v4344_v55 = vadd.f32 %v10616_v46, %v4173_v12  ;;  %v4177_v28 = vadd.f32 %v4176_v15, %v12316_v62  ;;  %v3987_v20 = vpop.f32.mrf.mxu0  ;;  %v12326_v12 = vld [vmem:[#allocation77_spill] sm:$0xff] }
 0x6f8   : > { %v4178_v16 = vpop.f32.mrf.mxu1  ;;  %4473 = vst [vmem:[#allocation2 + $0x180] sm:$0xff] %v4345_v10  ;;  %v4346_v31 = vadd.f32 %v10613_v29, %v3986_v11  ;;  %v3988_v19 = vadd.f32 %v3987_v20, %v12319_v38  ;;  %v12329_v11 = vld [vmem:[#allocation80_spill] sm:$0xff] }
 0x6f9   : > { %4472 = vst [vmem:[#allocation2 + $0x178] sm:$0xff] %v4344_v55  ;;  %v4347_v63 = vadd.f32 %v10608_v8, %v4177_v28  ;;  %v4179_v52 = vadd.f32 %v4178_v16, %v12318_v41  ;;  %v3989_v45 = vpop.f32.mrf.mxu0  ;;  %v12328_v28 = vld [vmem:[#allocation79_spill] sm:$0xff] }
 0x6fa   : > { %v4180_v18 = vpop.f32.mrf.mxu1  ;;  %4474 = vst [vmem:[#allocation2 + $0x188] sm:$0xff] %v4346_v31  ;;  %v4349_v24 = vadd.f32 %v10605_v42, %v3988_v19  ;;  %v3990_v34 = vadd.f32 %v3989_v45, %v12321_v49  ;;  %v12331_v19 = vld [vmem:[#allocation82_spill] sm:$0xff] }
 0x6fb   : > { %4475 = vst [vmem:[#allocation2 + $0x190] sm:$0xff] %v4347_v63  ;;  %v4348_v22 = vadd.f32 %v10616_v46, %v4179_v52  ;;  %v4181_v3 = vadd.f32 %v4180_v18, %v12320_v32  ;;  %v3993_v47 = vpop.f32.mrf.mxu0  ;;  %v12330_v52 = vld [vmem:[#allocation81_spill] sm:$0xff] }
 0x6fc   : > { %v4182_v48 = vpop.f32.mrf.mxu1  ;;  %4477 = vst [vmem:[#allocation2 + $0x1a0] sm:$0xff] %v4349_v24  ;;  %v4350_v26 = vadd.f32 %v10613_v29, %v3990_v34  ;;  %v3994_v27 = vadd.f32 %v3993_v47, %v12323_v23  ;;  %v12333_v34 = vld [vmem:[#allocation84_spill] sm:$0xff] }
 0x6fd   : > { %4476 = vst [vmem:[#allocation2 + $0x198] sm:$0xff] %v4348_v22  ;;  %v4351_v25 = vadd.f32 %v10608_v8, %v4181_v3  ;;  %v4183_v0 = vadd.f32 %v4182_v48, %v12322_v36  ;;  %v3995_v57 = vpop.f32.mrf.mxu0  ;;  %v12332_v3 = vld [vmem:[#allocation83_spill] sm:$0xff] }
 0x6fe   : > { %v4186_v6 = vpop.f32.mrf.mxu1  ;;  %4478 = vst [vmem:[#allocation2 + $0x1a8] sm:$0xff] %v4350_v26  ;;  %v4353_v59 = vadd.f32 %v10605_v42, %v3994_v27  ;;  %v3996_v21 = vadd.f32 %v3995_v57, %v12325_v17  ;;  %v12335_v27 = vld [vmem:[#allocation86_spill] sm:$0xff] }
 0x6ff   : > { %4479 = vst [vmem:[#allocation2 + $0x1b0] sm:$0xff] %v4351_v25  ;;  %v4352_v61 = vadd.f32 %v10616_v46, %v4183_v0  ;;  %v4187_v30 = vadd.f32 %v4186_v6, %v12324_v9  ;;  %v3997_v15 = vpop.f32.mrf.mxu0  ;;  %v12334_v0 = vld [vmem:[#allocation85_spill] sm:$0xff] }
 0x700   : > { %v4188_v60 = vpop.f32.mrf.mxu1  ;;  %4481 = vst [vmem:[#allocation2 + $0x1c0] sm:$0xff] %v4353_v59  ;;  %v4354_v55 = vadd.f32 %v10613_v29, %v3996_v21  ;;  %v3998_v62 = vadd.f32 %v3997_v15, %v12327_v58  ;;  %v12337_v21 = vld [vmem:[#allocation88_spill] sm:$0xff] }
 0x701   : > { %4480 = vst [vmem:[#allocation2 + $0x1b8] sm:$0xff] %v4352_v61  ;;  %v4355_v7 = vadd.f32 %v10608_v8, %v4187_v30  ;;  %v4189_v14 = vadd.f32 %v4188_v60, %v12326_v12  ;;  %v3999_v16 = vpop.f32.mrf.mxu0  ;;  %v12336_v30 = vld [vmem:[#allocation87_spill] sm:$0xff] }
 0x702   : > { %v4190_v56 = vpop.f32.mrf.mxu1  ;;  %4482 = vst [vmem:[#allocation2 + $0x1c8] sm:$0xff] %v4354_v55  ;;  %v4357_v63 = vadd.f32 %v10605_v42, %v3998_v62  ;;  %v4000_v41 = vadd.f32 %v3999_v16, %v12329_v11  ;;  %v12339_v62 = vld [vmem:[#allocation90_spill] sm:$0xff] }
 0x703   : > { %4483 = vst [vmem:[#allocation2 + $0x1d0] sm:$0xff] %v4355_v7  ;;  %v4356_v1 = vadd.f32 %v10616_v46, %v4189_v14  ;;  %v4191_v13 = vadd.f32 %v4190_v56, %v12328_v28  ;;  %v4003_v18 = vpop.f32.mrf.mxu0  ;;  %v12338_v14 = vld [vmem:[#allocation89_spill] sm:$0xff] }
 0x704   : > { %v4192_v10 = vpop.f32.mrf.mxu1  ;;  %4485 = vst [vmem:[#allocation2 + $0x1e0] sm:$0xff] %v4357_v63  ;;  %v4358_v22 = vadd.f32 %v10613_v29, %v4000_v41  ;;  %v4004_v32 = vadd.f32 %v4003_v18, %v12331_v19  ;;  %v12341_v41 = vld [vmem:[#allocation92_spill] sm:$0xff] }
 0x705   : > { %4484 = vst [vmem:[#allocation2 + $0x1d8] sm:$0xff] %v4356_v1  ;;  %v4359_v44 = vadd.f32 %v10608_v8, %v4191_v13  ;;  %v4193_v20 = vadd.f32 %v4192_v10, %v12330_v52  ;;  %v4005_v48 = vpop.f32.mrf.mxu0  ;;  %v12340_v13 = vld [vmem:[#allocation91_spill] sm:$0xff] }
 0x706   : > { %v4196_v31 = vpop.f32.mrf.mxu1  ;;  %4486 = vst [vmem:[#allocation2 + $0x1e8] sm:$0xff] %v4358_v22  ;;  %v4361_v25 = vadd.f32 %v10605_v42, %v4004_v32  ;;  %v4006_v36 = vadd.f32 %v4005_v48, %v12333_v34  ;;  %v12343_v32 = vld [vmem:[#allocation94_spill] sm:$0xff] }
 0x707   : > { %4487 = vst [vmem:[#allocation2 + $0x1f0] sm:$0xff] %v4359_v44  ;;  %v4360_v38 = vadd.f32 %v10616_v46, %v4193_v20  ;;  %v4197_v45 = vadd.f32 %v4196_v31, %v12332_v3  ;;  %v4007_v6 = vpop.f32.mrf.mxu0  ;;  %v12342_v20 = vld [vmem:[#allocation93_spill] sm:$0xff] }
 0x708   : > { %v4198_v24 = vpop.f32.mrf.mxu1  ;;  %4489 = vst [vmem:[#allocation2 + $0x200] sm:$0xff] %v4361_v25  ;;  %v4362_v61 = vadd.f32 %v10613_v29, %v4006_v36  ;;  %v4008_v9 = vadd.f32 %v4007_v6, %v12335_v27  ;;  %v12345_v36 = vld [vmem:[#allocation96_spill] sm:$0xff] }
 0x709   : > { %4488 = vst [vmem:[#allocation2 + $0x1f8] sm:$0xff] %v4360_v38  ;;  %v4363_v49 = vadd.f32 %v10608_v8, %v4197_v45  ;;  %v4199_v47 = vadd.f32 %v4198_v24, %v12334_v0  ;;  %v4009_v60 = vpop.f32.mrf.mxu0  ;;  %v12344_v45 = vld [vmem:[#allocation95_spill] sm:$0xff] }
 0x70a   : > { %v4200_v26 = vpop.f32.mrf.mxu1  ;;  %4490 = vst [vmem:[#allocation2 + $0x208] sm:$0xff] %v4362_v61  ;;  %v4365_v7 = vadd.f32 %v10605_v42, %v4008_v9  ;;  %v4010_v12 = vadd.f32 %v4009_v60, %v12337_v21  ;;  %v12347_v9 = vld [vmem:[#allocation98_spill] sm:$0xff] }
 0x70b   : > { %4491 = vst [vmem:[#allocation2 + $0x210] sm:$0xff] %v4363_v49  ;;  %v4364_v23 = vadd.f32 %v10616_v46, %v4199_v47  ;;  %v4201_v57 = vadd.f32 %v4200_v26, %v12336_v30  ;;  %v4013_v56 = vpop.f32.mrf.mxu0  ;;  %v12346_v47 = vld [vmem:[#allocation97_spill] sm:$0xff] }
 0x70c   : > { %v4202_v59 = vpop.f32.mrf.mxu1  ;;  %4493 = vst [vmem:[#allocation2 + $0x220] sm:$0xff] %v4365_v7  ;;  %v4366_v1 = vadd.f32 %v10613_v29, %v4010_v12  ;;  %v4014_v28 = vadd.f32 %v4013_v56, %v12339_v62  ;;  %v12349_v12 = vld [vmem:[#allocation100_spill] sm:$0xff] }
 0x70d   : > { %4492 = vst [vmem:[#allocation2 + $0x218] sm:$0xff] %v4364_v23  ;;  %v4367_v17 = vadd.f32 %v10608_v8, %v4201_v57  ;;  %v4203_v15 = vadd.f32 %v4202_v59, %v12338_v14  ;;  %v4015_v10 = vpop.f32.mrf.mxu0  ;;  %v12348_v57 = vld [vmem:[#allocation99_spill] sm:$0xff] }
 0x70e   : > { %v4206_v55 = vpop.f32.mrf.mxu1  ;;  %4494 = vst [vmem:[#allocation2 + $0x228] sm:$0xff] %v4366_v1  ;;  %v4369_v44 = vadd.f32 %v10605_v42, %v4014_v28  ;;  %v4016_v52 = vadd.f32 %v4015_v10, %v12341_v41  ;;  %v12351_v28 = vld [vmem:[#allocation102_spill] sm:$0xff] }
 0x70f   : > { %4495 = vst [vmem:[#allocation2 + $0x230] sm:$0xff] %v4367_v17  ;;  %v4368_v58 = vadd.f32 %v10616_v46, %v4203_v15  ;;  %v4207_v16 = vadd.f32 %v4206_v55, %v12340_v13  ;;  %v4017_v31 = vpop.f32.mrf.mxu0  ;;  %v12350_v15 = vld [vmem:[#allocation101_spill] sm:$0xff] }
 0x710   : > { %v4208_v63 = vpop.f32.mrf.mxu1  ;;  %4497 = vst [vmem:[#allocation2 + $0x240] sm:$0xff] %v4369_v44  ;;  %v4370_v38 = vadd.f32 %v10613_v29, %v4016_v52  ;;  %v4018_v3 = vadd.f32 %v4017_v31, %v12343_v32  ;;  %v12353_v52 = vld [vmem:[#allocation104_spill] sm:$0xff] }
 0x711   : > { %4496 = vst [vmem:[#allocation2 + $0x238] sm:$0xff] %v4368_v58  ;;  %v4371_v11 = vadd.f32 %v10608_v8, %v4207_v16  ;;  %v4209_v18 = vadd.f32 %v4208_v63, %v12342_v20  ;;  %v4019_v24 = vpop.f32.mrf.mxu0  ;;  %v12352_v16 = vld [vmem:[#allocation103_spill] sm:$0xff] }
 0x712   : > { %v4210_v22 = vpop.f32.mrf.mxu1  ;;  %4498 = vst [vmem:[#allocation2 + $0x248] sm:$0xff] %v4370_v38  ;;  %v4373_v49 = vadd.f32 %v10605_v42, %v4018_v3  ;;  %v4020_v0 = vadd.f32 %v4019_v24, %v12345_v36  ;;  %v12355_v3 = vld [vmem:[#allocation106_spill] sm:$0xff] }
 0x713   : > { %4499 = vst [vmem:[#allocation2 + $0x250] sm:$0xff] %v4371_v11  ;;  %v4372_v19 = vadd.f32 %v10616_v46, %v4209_v18  ;;  %v4211_v48 = vadd.f32 %v4210_v22, %v12344_v45  ;;  %v4023_v26 = vpop.f32.mrf.mxu0  ;;  %v12354_v18 = vld [vmem:[#allocation105_spill] sm:$0xff] }
 0x714   : > { %v4212_v25 = vpop.f32.mrf.mxu1  ;;  %4501 = vst [vmem:[#allocation2 + $0x260] sm:$0xff] %v4373_v49  ;;  %v4374_v23 = vadd.f32 %v10613_v29, %v4020_v0  ;;  %v4024_v30 = vadd.f32 %v4023_v26, %v12347_v9  ;;  %v12357_v0 = vld [vmem:[#allocation108_spill] sm:$0xff] }
 0x715   : > { %4500 = vst [vmem:[#allocation2 + $0x258] sm:$0xff] %v4372_v19  ;;  %v4375_v34 = vadd.f32 %v10608_v8, %v4211_v48  ;;  %v4213_v6 = vadd.f32 %v4212_v25, %v12346_v47  ;;  %v4025_v59 = vpop.f32.mrf.mxu0  ;;  %v12356_v48 = vld [vmem:[#allocation107_spill] sm:$0xff] }
 0x716   : > { %v4216_v61 = vpop.f32.mrf.mxu1  ;;  %4502 = vst [vmem:[#allocation2 + $0x268] sm:$0xff] %v4374_v23  ;;  %v4377_v17 = vadd.f32 %v10605_v42, %v4024_v30  ;;  %v4026_v14 = vadd.f32 %v4025_v59, %v12349_v12  ;;  %v12359_v30 = vld [vmem:[#allocation110_spill] sm:$0xff] }
 0x717   : > { %4503 = vst [vmem:[#allocation2 + $0x270] sm:$0xff] %v4375_v34  ;;  %v4376_v27 = vadd.f32 %v10616_v46, %v4213_v6  ;;  %v4217_v60 = vadd.f32 %v4216_v61, %v12348_v57  ;;  %v4027_v55 = vpop.f32.mrf.mxu0  ;;  %v12358_v6 = vld [vmem:[#allocation109_spill] sm:$0xff] }
 0x718   : > { %v4218_v7 = vpop.f32.mrf.mxu1  ;;  %4505 = vst [vmem:[#allocation2 + $0x280] sm:$0xff] %v4377_v17  ;;  %v4378_v58 = vadd.f32 %v10613_v29, %v4026_v14  ;;  %v4028_v13 = vadd.f32 %v4027_v55, %v12351_v28  ;;  %v12361_v14 = vld [vmem:[#allocation112_spill] sm:$0xff] }
 0x719   : > { %4504 = vst [vmem:[#allocation2 + $0x278] sm:$0xff] %v4376_v27  ;;  %v4379_v21 = vadd.f32 %v10608_v8, %v4217_v60  ;;  %v4219_v56 = vadd.f32 %v4218_v7, %v12350_v15  ;;  %v4029_v63 = vpop.f32.mrf.mxu0  ;;  %v12360_v60 = vld [vmem:[#allocation111_spill] sm:$0xff] }
 0x71a   : > { %v4220_v1 = vpop.f32.mrf.mxu1  ;;  %4506 = vst [vmem:[#allocation2 + $0x288] sm:$0xff] %v4378_v58  ;;  %v4381_v11 = vadd.f32 %v10605_v42, %v4028_v13  ;;  %v4030_v20 = vadd.f32 %v4029_v63, %v12353_v52  ;;  %v12363_v13 = vld [vmem:[#allocation114_spill] sm:$0xff] }
 0x71b   : > { %4507 = vst [vmem:[#allocation2 + $0x290] sm:$0xff] %v4379_v21  ;;  %v4380_v62 = vadd.f32 %v10616_v46, %v4219_v56  ;;  %v4221_v10 = vadd.f32 %v4220_v1, %v12352_v16  ;;  %v4033_v22 = vpop.f32.mrf.mxu0  ;;  %v12362_v56 = vld [vmem:[#allocation113_spill] sm:$0xff] }
 0x71c   : > { %v4222_v44 = vpop.f32.mrf.mxu1  ;;  %4509 = vst [vmem:[#allocation2 + $0x2a0] sm:$0xff] %v4381_v11  ;;  %v4382_v19 = vadd.f32 %v10613_v29, %v4030_v20  ;;  %v4034_v45 = vadd.f32 %v4033_v22, %v12355_v3  ;;  %v12365_v20 = vld [vmem:[#allocation116_spill] sm:$0xff] }
 0x71d   : > { %4508 = vst [vmem:[#allocation2 + $0x298] sm:$0xff] %v4380_v62  ;;  %v4383_v41 = vadd.f32 %v10608_v8, %v4221_v10  ;;  %v4223_v31 = vadd.f32 %v4222_v44, %v12354_v18  ;;  %v4035_v25 = vpop.f32.mrf.mxu0  ;;  %v12364_v10 = vld [vmem:[#allocation115_spill] sm:$0xff] }
 0x71e   : > { %v4226_v38 = vpop.f32.mrf.mxu1  ;;  %4510 = vst [vmem:[#allocation2 + $0x2a8] sm:$0xff] %v4382_v19  ;;  %v4385_v34 = vadd.f32 %v10605_v42, %v4034_v45  ;;  %v4036_v47 = vadd.f32 %v4035_v25, %v12357_v0  ;;  %v12367_v45 = vld [vmem:[#allocation118_spill] sm:$0xff] }
 0x71f   : > { %4511 = vst [vmem:[#allocation2 + $0x2b0] sm:$0xff] %v4383_v41  ;;  %v4384_v32 = vadd.f32 %v10616_v46, %v4223_v31  ;;  %v4227_v24 = vadd.f32 %v4226_v38, %v12356_v48  ;;  %v4037_v61 = vpop.f32.mrf.mxu0  ;;  %v12366_v31 = vld [vmem:[#allocation117_spill] sm:$0xff] }
 0x720   : > { %v4228_v49 = vpop.f32.mrf.mxu1  ;;  %4513 = vst [vmem:[#allocation2 + $0x2c0] sm:$0xff] %v4385_v34  ;;  %v4386_v27 = vadd.f32 %v10613_v29, %v4036_v47  ;;  %v4038_v57 = vadd.f32 %v4037_v61, %v12359_v30  ;;  %v12369_v47 = vld [vmem:[#allocation120_spill] sm:$0xff] }
 0x721   : > { %4512 = vst [vmem:[#allocation2 + $0x2b8] sm:$0xff] %v4384_v32  ;;  %v4387_v36 = vadd.f32 %v10608_v8, %v4227_v24  ;;  %v4229_v26 = vadd.f32 %v4228_v49, %v12358_v6  ;;  %v4039_v7 = vpop.f32.mrf.mxu0  ;;  %v12368_v24 = vld [vmem:[#allocation119_spill] sm:$0xff] }
 0x722   : > { %v4230_v23 = vpop.f32.mrf.mxu1  ;;  %4514 = vst [vmem:[#allocation2 + $0x2c8] sm:$0xff] %v4386_v27  ;;  %v4389_v21 = vadd.f32 %v10605_v42, %v4038_v57  ;;  %v4040_v15 = vadd.f32 %v4039_v7, %v12361_v14  ;;  %v12371_v57 = vld [vmem:[#allocation122_spill] sm:$0xff] }
 0x723   : > { %4515 = vst [vmem:[#allocation2 + $0x2d0] sm:$0xff] %v4387_v36  ;;  %v4388_v9 = vadd.f32 %v10616_v46, %v4229_v26  ;;  %v4231_v59 = vadd.f32 %v4230_v23, %v12360_v60  ;;  %v4043_v1 = vpop.f32.mrf.mxu0  ;;  %v12370_v26 = vld [vmem:[#allocation121_spill] sm:$0xff] }
 0x724   : > { %v4232_v17 = vpop.f32.mrf.mxu1  ;;  %4517 = vst [vmem:[#allocation2 + $0x2e0] sm:$0xff] %v4389_v21  ;;  %v4390_v62 = vadd.f32 %v10613_v29, %v4040_v15  ;;  %v4044_v16 = vadd.f32 %v4043_v1, %v12363_v13  ;;  %v12373_v15 = vld [vmem:[#allocation124_spill] sm:$0xff] }
 0x725   : > { %4516 = vst [vmem:[#allocation2 + $0x2d8] sm:$0xff] %v4388_v9  ;;  %v4391_v12 = vadd.f32 %v10608_v8, %v4231_v59  ;;  %v4233_v55 = vadd.f32 %v4232_v17, %v12362_v56  ;;  %v4045_v44 = vpop.f32.mrf.mxu0  ;;  %v12372_v59 = vld [vmem:[#allocation123_spill] sm:$0xff] }
 0x726   : > { %v4236_v58 = vpop.f32.mrf.mxu1  ;;  %4518 = vst [vmem:[#allocation2 + $0x2e8] sm:$0xff] %v4390_v62  ;;  %v4393_v41 = vadd.f32 %v10605_v42, %v4044_v16  ;;  %v4046_v18 = vadd.f32 %v4045_v44, %v12365_v20  ;;  %v12375_v16 = vld [vmem:[#allocation126_spill] sm:$0xff] }
 0x727   : > { %4519 = vst [vmem:[#allocation2 + $0x2f0] sm:$0xff] %v4391_v12  ;;  %v4392_v28 = vadd.f32 %v10616_v46, %v4233_v55  ;;  %v4237_v63 = vadd.f32 %v4236_v58, %v12364_v10  ;;  %v4047_v38 = vpop.f32.mrf.mxu0  ;;  %v12374_v55 = vld [vmem:[#allocation125_spill] sm:$0xff] }
 0x728   : > { %v4238_v11 = vpop.f32.mrf.mxu1  ;;  %4521 = vst [vmem:[#allocation2 + $0x300] sm:$0xff] %v4393_v41  ;;  %v4394_v32 = vadd.f32 %v10613_v29, %v4046_v18  ;;  %v4048_v48 = vadd.f32 %v4047_v38, %v12367_v45  ;;  %v12377_v18 = vld [vmem:[#allocation128_spill] sm:$0xff] }
 0x729   : > { %4520 = vst [vmem:[#allocation2 + $0x2f8] sm:$0xff] %v4392_v28  ;;  %v4395_v52 = vadd.f32 %v10608_v8, %v4237_v63  ;;  %v4239_v22 = vadd.f32 %v4238_v11, %v12366_v31  ;;  %v4049_v49 = vpop.f32.mrf.mxu0  ;;  %v12376_v63 = vld [vmem:[#allocation127_spill] sm:$0xff] }
 0x72a   : > { %v4240_v19 = vpop.f32.mrf.mxu1  ;;  %4522 = vst [vmem:[#allocation2 + $0x308] sm:$0xff] %v4394_v32  ;;  %v4397_v36 = vadd.f32 %v10605_v42, %v4048_v48  ;;  %v4050_v6 = vadd.f32 %v4049_v49, %v12369_v47  ;;  %v12379_v48 = vld [vmem:[#allocation130_spill] sm:$0xff] }
 0x72b   : > { %4523 = vst [vmem:[#allocation2 + $0x310] sm:$0xff] %v4395_v52  ;;  %v4396_v3 = vadd.f32 %v10616_v46, %v4239_v22  ;;  %v4241_v25 = vadd.f32 %v4240_v19, %v12368_v24  ;;  %v4053_v23 = vpop.f32.mrf.mxu0  ;;  %v12378_v22 = vld [vmem:[#allocation129_spill] sm:$0xff] }
 0x72c   : > { %v4242_v34 = vpop.f32.mrf.mxu1  ;;  %4525 = vst [vmem:[#allocation2 + $0x320] sm:$0xff] %v4397_v36  ;;  %v4398_v9 = vadd.f32 %v10613_v29, %v4050_v6  ;;  %v4054_v60 = vadd.f32 %v4053_v23, %v12371_v57  ;;  %v12381_v6 = vld [vmem:[#allocation132_spill] sm:$0xff] }
 0x72d   : > { %4524 = vst [vmem:[#allocation2 + $0x318] sm:$0xff] %v4396_v3  ;;  %v4399_v0 = vadd.f32 %v10608_v8, %v4241_v25  ;;  %v4243_v61 = vadd.f32 %v4242_v34, %v12370_v26  ;;  %v4055_v17 = vpop.f32.mrf.mxu0  ;;  %v12380_v25 = vld [vmem:[#allocation131_spill] sm:$0xff] }
 0x72e   : > { %v4246_v27 = vpop.f32.mrf.mxu1  ;;  %4526 = vst [vmem:[#allocation2 + $0x328] sm:$0xff] %v4398_v9  ;;  %v4401_v12 = vadd.f32 %v10605_v42, %v4054_v60  ;;  %v4056_v56 = vadd.f32 %v4055_v17, %v12373_v15  ;;  %v12383_v60 = vld [vmem:[#allocation134_spill] sm:$0xff] }
 0x72f   : > { %4527 = vst [vmem:[#allocation2 + $0x330] sm:$0xff] %v4399_v0  ;;  %v4400_v30 = vadd.f32 %v10616_v46, %v4243_v61  ;;  %v4247_v7 = vadd.f32 %v4246_v27, %v12372_v59  ;;  %v4057_v58 = vpop.f32.mrf.mxu0  ;;  %v12382_v61 = vld [vmem:[#allocation133_spill] sm:$0xff] }
 0x730   : > { %v4248_v21 = vpop.f32.mrf.mxu1  ;;  %4529 = vst [vmem:[#allocation2 + $0x340] sm:$0xff] %v4401_v12  ;;  %v4402_v28 = vadd.f32 %v10613_v29, %v4056_v56  ;;  %v4058_v10 = vadd.f32 %v4057_v58, %v12375_v16  ;;  %v12385_v56 = vld [vmem:[#allocation136_spill] sm:$0xff] }
 0x731   : > { %4528 = vst [vmem:[#allocation2 + $0x338] sm:$0xff] %v4400_v30  ;;  %v4403_v14 = vadd.f32 %v10608_v8, %v4247_v7  ;;  %v4249_v1 = vadd.f32 %v4248_v21, %v12374_v55  ;;  %v4059_v11 = vpop.f32.mrf.mxu0  ;;  %v12384_v7 = vld [vmem:[#allocation135_spill] sm:$0xff] }
 0x732   : > { %v4250_v62 = vpop.f32.mrf.mxu1  ;;  %4530 = vst [vmem:[#allocation2 + $0x348] sm:$0xff] %v4402_v28  ;;  %v4405_v52 = vadd.f32 %v10605_v42, %v4058_v10  ;;  %v4060_v31 = vadd.f32 %v4059_v11, %v12377_v18  ;;  %v12387_v10 = vld [vmem:[#allocation138_spill] sm:$0xff] }
 0x733   : > { %4531 = vst [vmem:[#allocation2 + $0x350] sm:$0xff] %v4403_v14  ;;  %v4404_v13 = vadd.f32 %v10616_v46, %v4249_v1  ;;  %v4251_v44 = vadd.f32 %v4250_v62, %v12376_v63  ;;  %v4063_v19 = vpop.f32.mrf.mxu0  ;;  %v12386_v1 = vld [vmem:[#allocation137_spill] sm:$0xff] }
 0x734   : > { %v4252_v41 = vpop.f32.mrf.mxu1  ;;  %4533 = vst [vmem:[#allocation2 + $0x360] sm:$0xff] %v4405_v52  ;;  %v4406_v3 = vadd.f32 %v10613_v29, %v4060_v31  ;;  %v4064_v24 = vadd.f32 %v4063_v19, %v12379_v48  ;;  %v12389_v31 = vld [vmem:[#allocation140_spill] sm:$0xff] }
 0x735   : > { %4532 = vst [vmem:[#allocation2 + $0x358] sm:$0xff] %v4404_v13  ;;  %v4407_v20 = vadd.f32 %v10608_v8, %v4251_v44  ;;  %v4253_v38 = vadd.f32 %v4252_v41, %v12378_v22  ;;  %v4065_v34 = vpop.f32.mrf.mxu0  ;;  %v12388_v44 = vld [vmem:[#allocation139_spill] sm:$0xff] }
 0x736   : > { %v4256_v32 = vpop.f32.mrf.mxu1  ;;  %4534 = vst [vmem:[#allocation2 + $0x368] sm:$0xff] %v4406_v3  ;;  %v4409_v0 = vadd.f32 %v10605_v42, %v4064_v24  ;;  %v4066_v26 = vadd.f32 %v4065_v34, %v12381_v6  ;;  %v12391_v24 = vld [vmem:[#allocation142_spill] sm:$0xff] }
 0x737   : > { %4535 = vst [vmem:[#allocation2 + $0x370] sm:$0xff] %v4407_v20  ;;  %v4408_v45 = vadd.f32 %v10616_v46, %v4253_v38  ;;  %v4257_v49 = vadd.f32 %v4256_v32, %v12380_v25  ;;  %v4067_v27 = vpop.f32.mrf.mxu0  ;;  %v12390_v38 = vld [vmem:[#allocation141_spill] sm:$0xff] }
 0x738   : > { %v4258_v36 = vpop.f32.mrf.mxu1  ;;  %4537 = vst [vmem:[#allocation2 + $0x380] sm:$0xff] %v4409_v0  ;;  %v4410_v30 = vadd.f32 %v10613_v29, %v4066_v26  ;;  %v4068_v59 = vadd.f32 %v4067_v27, %v12383_v60  ;;  %v12393_v26 = vld [vmem:[#allocation144_spill] sm:$0xff]  ;;  %v10938_v60 = vmov 0.0  }
 0x739   : > { %4536 = vst [vmem:[#allocation2 + $0x378] sm:$0xff] %v4408_v45  ;;  %v4411_v47 = vadd.f32 %v10608_v8, %v4257_v49  ;;  %v4259_v23 = vadd.f32 %v4258_v36, %v12382_v61  ;;  %v4069_v21 = vpop.f32.mrf.mxu0  ;;  %v12392_v49 = vld [vmem:[#allocation143_spill] sm:$0xff] }
 0x73a   : > { %v4260_v9 = vpop.f32.mrf.mxu1  ;;  %4538 = vst [vmem:[#allocation2 + $0x388] sm:$0xff] %v4410_v30  ;;  %v4413_v14 = vadd.f32 %v10605_v42, %v4068_v59  ;;  %v4070_v55 = vadd.f32 %v4069_v21, %v12385_v56  ;;  %v10940_v59 = vmov 0.0  }
 0x73b   : > { %4539 = vst [vmem:[#allocation2 + $0x390] sm:$0xff] %v4411_v47  ;;  %v4412_v57 = vadd.f32 %v10616_v46, %v4259_v23  ;;  %v4261_v17 = vadd.f32 %v4260_v9, %v12384_v7  ;;  %v4073_v62 = vpop.f32.mrf.mxu0  ;;  %v12394_v23 = vld [vmem:[#allocation145_spill] sm:$0xff] }
 0x73c   : > { %v4262_v12 = vpop.f32.mrf.mxu1  ;;  %4541 = vst [vmem:[#allocation2 + $0x3a0] sm:$0xff] %v4413_v14  ;;  %v4414_v13 = vadd.f32 %v10613_v29, %v4070_v55  ;;  %v4074_v63 = vadd.f32 %v4073_v62, %v12387_v10 }
 0x73d   : > { %4540 = vst [vmem:[#allocation2 + $0x398] sm:$0xff] %v4412_v57  ;;  %v4415_v15 = vadd.f32 %v10608_v8, %v4261_v17  ;;  %v4263_v58 = vadd.f32 %v4262_v12, %v12386_v1  ;;  %v4075_v41 = vpop.f32.mrf.mxu0  ;;  %v10936_v57 = vmov 0.0  }
 0x73e   : > { %v4266_v28 = vpop.f32.mrf.mxu1  ;;  %4542 = vst [vmem:[#allocation2 + $0x3a8] sm:$0xff] %v4414_v13  ;;  %v4417_v20 = vadd.f32 %v10605_v42, %v4074_v63  ;;  %v4076_v22 = vadd.f32 %v4075_v41, %v12389_v31 }
 0x73f   : > { %4543 = vst [vmem:[#allocation2 + $0x3b0] sm:$0xff] %v4415_v15  ;;  %v4416_v16 = vadd.f32 %v10616_v46, %v4263_v58  ;;  %v4267_v11 = vadd.f32 %v4266_v28, %v12388_v44  ;;  %v4077_v32 = vpop.f32.mrf.mxu0 }
 0x740   : > { %v4268_v52 = vpop.f32.mrf.mxu1  ;;  %4545 = vst [vmem:[#allocation2 + $0x3c0] sm:$0xff] %v4417_v20  ;;  %v4418_v45 = vadd.f32 %v10613_v29, %v4076_v22  ;;  %v4078_v25 = vadd.f32 %v4077_v32, %v12391_v24 }
 0x741   : > { %4544 = vst [vmem:[#allocation2 + $0x3b8] sm:$0xff] %v4416_v16  ;;  %v4419_v18 = vadd.f32 %v10608_v8, %v4267_v11  ;;  %v4269_v19 = vadd.f32 %v4268_v52, %v12390_v38  ;;  %v4079_v36 = vpop.f32.mrf.mxu0 }
 0x742   : > { %v4270_v3 = vpop.f32.mrf.mxu1  ;;  %4546 = vst [vmem:[#allocation2 + $0x3c8] sm:$0xff] %v4418_v45  ;;  %v4421_v47 = vadd.f32 %v10605_v42, %v4078_v25  ;;  %v4080_v61 = vadd.f32 %v4079_v36, %v12393_v26  ;;  %v10942_v42 = vmov 0.0  }
 0x743   : > { %4547 = vst [vmem:[#allocation2 + $0x3d0] sm:$0xff] %v4419_v18  ;;  %v4420_v48 = vadd.f32 %v10616_v46, %v4269_v19  ;;  %v4271_v34 = vadd.f32 %v4270_v3, %v12392_v49 }
 0x744   : > { %v4272_v0 = vpop.f32.mrf.mxu1  ;;  %4549 = vst [vmem:[#allocation2 + $0x3e0] sm:$0xff] %v4421_v47  ;;  %v4422_v9 = vadd.f32 %v10613_v29, %v4080_v61 }
 0x745   : > { %4548 = vst [vmem:[#allocation2 + $0x3d8] sm:$0xff] %v4420_v48  ;;  %v4423_v6 = vadd.f32 %v10608_v8, %v4271_v34  ;;  %v4273_v27 = vadd.f32 %v4272_v0, %v12394_v23 }
 0x746   : > { %4550 = vst [vmem:[#allocation2 + $0x3e8] sm:$0xff] %v4422_v9 }
 0x747   : > { %4551 = vst [vmem:[#allocation2 + $0x3f0] sm:$0xff] %v4423_v6  ;;  %v4424_v30 = vadd.f32 %v10616_v46, %v4273_v27 }
 0x749   : > { %4552 = vst [vmem:[#allocation2 + $0x3f8] sm:$0xff] %v4424_v30 }
 0x74a LB: >> { %v7563_v8 = vcombine.high %v10694_v4, %v10702_v5  ;;  %v7562_v29 = vcombine.low %v10694_v4, %v10702_v5  ;;  %v7559_v46 = vcombine.high %v10686_v40, %v10690_v33  ;;  %v7565_v7 = vcombine.high %v10696_v51, %v10704_v37  ;;  %v12395_v58 = vld [vmem:[#allocation162_spill] sm:$0xff]  ;;  %v12396_v13 = vld [vmem:[#allocation164_spill] sm:$0xff]  ;;  %v12397_v16 = vld [vmem:[#allocation163_spill] sm:$0xff]  ;;  %s7708_s21 = sshll.u32 %s8882_s20, 6  ;;  %s4590_s20 = sadd.s32 1, %s8882_s20   ;;  %s8882_s20 = sphi %s10944_s20, %s4590_s20   ;;  %v8878_v42 = vphi %v10942_v42, %v12419_v42   ;;  %v8874_v59 = vphi %v10940_v59, %v12418_v59   ;;  %v8870_v60 = vphi %v10938_v60, %v4903_v60   ;;  %v8866_v57 = vphi %v10936_v57, %v4904_v57  }
 0x74b   : >> { %v7564_v17 = vcombine.low %v10696_v51, %v10704_v37  ;;  %v7561_v21 = vcombine.high %v10688_v54, %v10692_v43  ;;  %v7558_v12 = vcombine.low %v10686_v40, %v10690_v33  ;;  %v7555_v14 = vcombine.high %v10674_v35, %v10678_v50  ;;  %v12398_v44 = vld [vmem:[#allocation160_spill] sm:$0xff]  ;;  %v12399_v11 = vld [vmem:[#allocation158_spill] sm:$0xff]  ;;  %v12400_v20 = vld [vmem:[#allocation161_spill] sm:$0xff]  ;;  %s11028_s29 = scalar_lea.vmem [#allocation2], %s7708_s21  ;;  %p4587_p12 = scmp.ge.s32.totalorder %s4590_s20, 16  }
 0x74c   : >> { %4767 = vmatprep.subr.bf16.mxu0 %v7563_v8  ;;  %4810 = vmatprep.subr.bf16.mxu1 %v7565_v7  ;;  %v7560_v15 = vcombine.low %v10688_v54, %v10692_v43  ;;  %v7557_v56 = vcombine.high %v10676_v39, %v10680_v2  ;;  %v8922_v55 = vmov 0   ;;  %v7554_v1 = vcombine.low %v10674_v35, %v10678_v50  ;;  %v12401_v18 = vld [vmem:[#allocation159_spill] sm:$0xff]  ;;  %v12402_v38 = vld [vmem:[#allocation156_spill] sm:$0xff]  ;;  %v12403_v19 = vld [vmem:[#allocation154_spill] sm:$0xff]  ;;  %s11784_s1 = smov (%p4587_p12), 0  }
 0x74d   : >> { %4768 = vmatpush1.bf16.msra.mxu0 %v7562_v29  ;;  %4811 = vmatpush1.bf16.msra.mxu1 %v7564_v17  ;;  %v7551_v62 = vcombine.high %v12395_v58, %v10670_v53  ;;  %v7556_v28 = vcombine.low %v10676_v39, %v10680_v2  ;;  %v7553_v10 = vcombine.high %v12397_v16, %v12396_v13  ;;  %v12404_v45 = vld [vmem:[#allocation157_spill] sm:$0xff]  ;;  %v12405_v48 = vld [vmem:[#allocation155_spill] sm:$0xff]  ;;  %v12406_v49 = vld [vmem:[#allocation152_spill] sm:$0xff] }
 0x74e   : >> { %4769 = vmatprep.subr.bf16.mxu0 %v7559_v46  ;;  %4812 = vmatprep.subr.bf16.mxu1 %v7561_v21  ;;  %v7550_v63 = vcombine.low %v12395_v58, %v10670_v53  ;;  %v7547_v41 = vcombine.high %v12399_v11, %v12398_v44  ;;  %v7552_v52 = vcombine.low %v12397_v16, %v12396_v13  ;;  %v12407_v34 = vld [vmem:[#allocation150_spill] sm:$0xff]  ;;  %v12408_v47 = vld [vmem:[#allocation153_spill] sm:$0xff]  ;;  %v12409_v6 = vld [vmem:[#allocation151_spill] sm:$0xff] }
 0x74f   : >> { %4799 = vmatprep.mubr.bf16.mxu0 %v8922_v55  ;;  %4842 = vmatprep.mubr.bf16.mxu1 %v8922_v55  ;;  %v7549_v31 = vcombine.high %v12401_v18, %v12400_v20  ;;  %v7546_v22 = vcombine.low %v12399_v11, %v12398_v44  ;;  %v7543_v32 = vcombine.high %v12403_v19, %v12402_v38  ;;  %v12410_v23 = vld [vmem:[#allocation148_spill] sm:$0xff]  ;;  %v12411_v27 = vld [vmem:[#allocation146_spill] sm:$0xff]  ;;  %v12412_v8 = vld [vmem:[#allocation149_spill] sm:$0xff] }
 0x750   : >> { %v7548_v3 = vcombine.low %v12401_v18, %v12400_v20  ;;  %v7545_v24 = vcombine.high %v12405_v48, %v12404_v45  ;;  %v7542_v25 = vcombine.low %v12403_v19, %v12402_v38  ;;  %v7539_v36 = vcombine.high %v12407_v34, %v12406_v49  ;;  %v12413_v29 = vld [vmem:[#allocation147_spill] sm:$0xff]  ;;  %v8380_v35 = vld [vmem:[#allocation15 + $0x1a0] ss:$16 sps:$4 sm:$0xff] (%p4587_p12)   ;;  %v8382_v39 = vld [vmem:[#allocation15 + $0x184] ss:$16 sps:$4 sm:$0xff] (%p4587_p12)  }
 0x751   : >> { %4770 = vmatpush1.bf16.msra.mxu0 %v7558_v12  ;;  %4813 = vmatpush1.bf16.msra.mxu1 %v7560_v15  ;;  %v7544_v0 = vcombine.low %v12405_v48, %v12404_v45  ;;  %v7541_v26 = vcombine.high %v12409_v6, %v12408_v47  ;;  %v7538_v61 = vcombine.low %v12407_v34, %v12406_v49  ;;  %v4598_v12 = vld [vmem:[%s11028_s29] sm:$0xff]  ;;  %v4599_v15 = vld [vmem:[%s11028_s29 + $0x8] sm:$0xff] }
 0x752   : >> { %4771 = vmatprep.subr.bf16.mxu0 %v7555_v14  ;;  %4814 = vmatprep.subr.bf16.mxu1 %v7557_v56  ;;  %v7535_v9 = vcombine.high %v12411_v27, %v12410_v23  ;;  %v7540_v30 = vcombine.low %v12409_v6, %v12408_v47  ;;  %v7537_v46 = vcombine.high %v12413_v29, %v12412_v8  ;;  %v8381_v43 = vld [vmem:[#allocation15 + $0x1a8] ss:$16 sps:$4 sm:$0xff] (%p4587_p12)   ;;  %v8384_v33 = vld [vmem:[#allocation15 + $0x18c] ss:$16 sps:$4 sm:$0xff] (%p4587_p12)   ;;  %v8386_v53 = vld [vmem:[#allocation15 + $0x180] ss:$16 sps:$4 sm:$0xff] (%p4587_p12)  }
 0x753   : >> { %v7534_v7 = vcombine.low %v12411_v27, %v12410_v23  ;;  %v7536_v17 = vcombine.low %v12413_v29, %v12412_v8  ;;  %v4606_v21 = vpack.c.bf16 %v8874_v59, %v8878_v42  ;;  %v8387_v50 = vld [vmem:[#allocation15 + $0x188] ss:$16 sps:$4 sm:$0xff] (%p4587_p12)   ;;  %v8388_v2 = vld [vmem:[#allocation15 + $0x164] ss:$16 sps:$4 sm:$0xff] (%p4587_p12)   ;;  %v8390_v40 = vld [vmem:[#allocation15 + $0x16c] ss:$16 sps:$4 sm:$0xff] (%p4587_p12)  }
 0x754   : > { %v8392_v54 = vld [vmem:[#allocation15 + $0x160] ss:$16 sps:$4 sm:$0xff] (%p4587_p12)   ;;  %v8393_v4 = vld [vmem:[#allocation15 + $0x168] ss:$16 sps:$4 sm:$0xff] (%p4587_p12)   ;;  %v8394_v51 = vld [vmem:[#allocation15 + $0x144] ss:$16 sps:$4 sm:$0xff] (%p4587_p12)  }
 0x755   : >> { %4772 = vmatpush1.bf16.msra.mxu0 %v7554_v1  ;;  %4815 = vmatpush1.bf16.msra.mxu1 %v7556_v28  ;;  %v8396_v5 = vld [vmem:[#allocation15 + $0x14c] ss:$16 sps:$4 sm:$0xff] (%p4587_p12)   ;;  %v8398_v37 = vld [vmem:[#allocation15 + $0x140] ss:$16 sps:$4 sm:$0xff] (%p4587_p12)   ;;  %v8405_v16 = vld [vmem:[#allocation15 + $0x128] ss:$16 sps:$4 sm:$0xff] (%p4587_p12)  }
 0x756   : >> { %4773 = vmatprep.subr.bf16.mxu0 %v7551_v62  ;;  %4816 = vmatprep.subr.bf16.mxu1 %v7553_v10  ;;  %v4602_v62 = vld [vmem:[%s11028_s29 + $0x20] sm:$0xff]  ;;  %v4603_v10 = vld [vmem:[%s11028_s29 + $0x28] sm:$0xff] }
 0x757   : > { %v8402_v58 = vld [vmem:[#allocation15 + $0x12c] ss:$16 sps:$4 sm:$0xff] (%p4587_p12)   ;;  %v8404_v13 = vld [vmem:[#allocation15 + $0x120] ss:$16 sps:$4 sm:$0xff] (%p4587_p12)   ;;  %v8406_v44 = vld [vmem:[#allocation15 + $0x104] ss:$16 sps:$4 sm:$0xff] (%p4587_p12)  }
 0x758   : > { %v8408_v11 = vld [vmem:[#allocation15 + $0x10c] ss:$16 sps:$4 sm:$0xff] (%p4587_p12)   ;;  %v8410_v20 = vld [vmem:[#allocation15 + $0x100] ss:$16 sps:$4 sm:$0xff] (%p4587_p12)   ;;  %v8411_v18 = vld [vmem:[#allocation15 + $0x108] ss:$16 sps:$4 sm:$0xff] (%p4587_p12)  }
 0x759   : >> { %4774 = vmatpush1.bf16.msra.mxu0 %v7550_v63  ;;  %4817 = vmatpush1.bf16.msra.mxu1 %v7552_v52  ;;  %v8414_v38 = vld [vmem:[#allocation15 + $0xe4] ss:$16 sps:$4 sm:$0xff] (%p4587_p12)   ;;  %v8417_v19 = vld [vmem:[#allocation15 + $0xec] ss:$16 sps:$4 sm:$0xff] (%p4587_p12)   ;;  %v8412_v45 = vld [vmem:[#allocation15 + $0xe0] ss:$16 sps:$4 sm:$0xff] (%p4587_p12)  }
 0x75a   : >> { %4775 = vmatprep.subr.bf16.mxu0 %v7547_v41  ;;  %4818 = vmatprep.subr.bf16.mxu1 %v7549_v31  ;;  %v8415_v48 = vld [vmem:[#allocation15 + $0xe8] ss:$16 sps:$4 sm:$0xff] (%p4587_p12)   ;;  %v8420_v49 = vld [vmem:[#allocation15 + $0xc4] ss:$16 sps:$4 sm:$0xff] (%p4587_p12)   ;;  %v8423_v34 = vld [vmem:[#allocation15 + $0xcc] ss:$16 sps:$4 sm:$0xff] (%p4587_p12)  }
 0x75b   : > { %v12421_v47 = vld [vmem:[#allocation28_spill] sm:$0xff] (%p4587_p12)  ;;  %v8421_v23 = vld [vmem:[#allocation15 + $0xc8] ss:$16 sps:$4 sm:$0xff] (%p4587_p12)   ;;  %v8429_v8 = vld [vmem:[#allocation15 + $0xac] ss:$16 sps:$4 sm:$0xff] (%p4587_p12)  }
 0x75c   : > { %v8418_v6 = vld [vmem:[#allocation15 + $0xc0] ss:$16 sps:$4 sm:$0xff] (%p4587_p12)   ;;  %v8426_v27 = vld [vmem:[#allocation15 + $0xa4] ss:$16 sps:$4 sm:$0xff] (%p4587_p12)  }
 0x75d   : >> { %4776 = vmatpush1.bf16.msra.mxu0 %v7546_v22  ;;  %4819 = vmatpush1.bf16.msra.mxu1 %v7548_v3  ;;  %v8424_v29 = vld [vmem:[#allocation15 + $0xa0] ss:$16 sps:$4 sm:$0xff] (%p4587_p12)  }
 0x75e   : >> { %4777 = vmatprep.subr.bf16.mxu0 %v7543_v32  ;;  %4820 = vmatprep.subr.bf16.mxu1 %v7545_v24  ;;  %v4601_v24 = vld [vmem:[%s11028_s29 + $0x18] sm:$0xff] }
 0x761   : >> { %4778 = vmatpush1.bf16.msra.mxu0 %v7542_v25  ;;  %4821 = vmatpush1.bf16.msra.mxu1 %v7544_v0 }
 0x762   : >> { %4779 = vmatprep.subr.bf16.mxu0 %v7539_v36  ;;  %4822 = vmatprep.subr.bf16.mxu1 %v7541_v26  ;;  %v4600_v36 = vld [vmem:[%s11028_s29 + $0x10] sm:$0xff]  ;;  %v4605_v26 = vld [vmem:[%s11028_s29 + $0x38] sm:$0xff] }
 0x765   : >> { %4780 = vmatpush1.bf16.msra.mxu0 %v7538_v61  ;;  %4823 = vmatpush1.bf16.msra.mxu1 %v7540_v30 }
 0x766   : >> { %4781 = vmatprep.subr.bf16.mxu0 %v7535_v9  ;;  %4824 = vmatprep.subr.bf16.mxu1 %v7537_v46 }
 0x769   : >> { %4782 = vmatpush1.bf16.msra.mxu0 %v7534_v7  ;;  %4825 = vmatpush1.bf16.msra.mxu1 %v7536_v17 }
 0x76c   : >> { %4800 = vmatmul.mubr.bf16.vlgmr.msra.gmra.mxu0 %v4606_v21  ;;  %4843 = vmatmul.mubr.bf16.vlgmr.msra.gmra.mxu1 %v4606_v21  ;;  %v4604_v21 = vld [vmem:[%s11028_s29 + $0x30] sm:$0xff] }
 0x82c   : >> { %v4801_v14 = vpop.f32.mrf.mxu0  ;;  %v4844_v55 = vpop.f32.mrf.mxu1 }
 0x82d   : >> { %v4853_v56 = vadd.f32 %v4801_v14, %v4598_v12  ;;  %v4855_v9 = vadd.f32 %v4844_v55, %v4600_v36 }
 0x82e   : >> { %v4803_v1 = vpop.f32.mrf.mxu0  ;;  %v4846_v52 = vpop.f32.mrf.mxu1 }
 0x82f   : >> { %v7566_v59 = vmul.f32 -1.442695, %v4853_v56  ;;  %v4854_v42 = vadd.f32 %v4803_v1, %v4599_v15  ;;  %v4856_v0 = vadd.f32 %v4846_v52, %v4601_v24 }
 0x830   : >> { %v4805_v28 = vpop.f32.mrf.mxu0  ;;  %v4848_v25 = vpop.f32.mrf.mxu1 }
 0x831   : >> { %8332 = vpow2.f32 %v7566_v59  ;;  %v7568_v63 = vmul.f32 -1.442695, %v4854_v42  ;;  %v4857_v41 = vadd.f32 %v4805_v28, %v4602_v62  ;;  %v7570_v30 = vmul.f32 -1.442695, %v4856_v0 }
 0x832   : >> { %v4807_v31 = vpop.f32.mrf.mxu0  ;;  %v4850_v61 = vpop.f32.mrf.mxu1  ;;  %v4859_v1 = vadd.f32 %v4848_v25, %v4604_v21  ;;  %v12420_v21 = vmov (%p4587_p12), 0  }
 0x833   : >> { %8334 = vpow2.f32 %v7568_v63  ;;  %v7567_v22 = vmul.f32 -1.442695, %v4857_v41  ;;  %v4858_v32 = vadd.f32 %v4807_v31, %v4603_v10  ;;  %v4860_v46 = vadd.f32 %v4850_v61, %v4605_v26  ;;  %5165 = vmatprep.mubr.bf16.mxu0 (%p4587_p12), %v12420_v21  ;;  %5358 = vmatprep.mubr.bf16.mxu1 (%p4587_p12), %v12420_v21 }
 0x835   : >> { %8336 = vpow2.f32 %v7567_v22  ;;  %v7569_v3 = vmul.f32 -1.442695, %v4858_v32  ;;  %v7571_v14 = vmul.f32 -1.442695, %v4860_v46 }
 0x837   : >> { %8338 = vpow2.f32 %v7569_v3 }
 0x838   : >> { %8340 = vtanh.f32 %v4855_v9 }
 0x839   : >> { %8342 = vpow2.f32 %v7570_v30 }
 0x83e   : >> { %v8333_v7 = vpop.eup %8332 }
 0x83f   : >> { %v4867_v17 = vadd.f32 1.0, %v8333_v7 }
 0x840   : >> { %v8335_v12 = vpop.eup %8334 }
 0x841   : >> { %8344 = vrcp.f32 %v4867_v17  ;;  %v4879_v15 = vadd.f32 1.0, %v8335_v12  ;;  %v8364_v17 = vld [vmem:[#allocation15 + $0x1e4] ss:$16 sps:$4 sm:$0xff] (%p4587_p12)   ;;  %v8366_v12 = vld [vmem:[#allocation15 + $0x1ec] ss:$16 sps:$4 sm:$0xff] (%p4587_p12)  }
 0x842   : >> { %v8337_v56 = vpop.eup %8336  ;;  %5133 = vmatprep.subr.bf16.mxu0 (%p4587_p12), %v8364_v17  ;;  %5326 = vmatprep.subr.bf16.mxu1 (%p4587_p12), %v8366_v12  ;;  %v8448_v17 = vld [vmem:[#allocation15 + $0x20] ss:$16 sps:$4 sm:$0xff] (%p4587_p12)   ;;  %v8451_v12 = vld [vmem:[#allocation15 + $0x28] ss:$16 sps:$4 sm:$0xff] (%p4587_p12)  }
 0x843   : >> { %8346 = vrcp.f32 %v4879_v15  ;;  %v4868_v62 = vadd.f32 1.0, %v8337_v56  ;;  %v8369_v15 = vld [vmem:[#allocation15 + $0x1e8] ss:$16 sps:$4 sm:$0xff] (%p4587_p12)   ;;  %v8370_v56 = vld [vmem:[#allocation15 + $0x1c4] ss:$16 sps:$4 sm:$0xff] (%p4587_p12)  }
 0x844   : >> { %v8339_v59 = vpop.eup %8338  ;;  %8348 = vpow2.f32 %v7571_v14  ;;  %v8368_v14 = vld [vmem:[#allocation15 + $0x1e0] ss:$16 sps:$4 sm:$0xff] (%p4587_p12)   ;;  %5327 = vmatpush1.bf16.msra.mxu1 (%p4587_p12), %v8369_v15  ;;  %v8459_v15 = vld [vmem:[#allocation15 + $0xc] ss:$16 sps:$4 sm:$0xff] (%p4587_p12)  }
 0x845   : >> { %8350 = vrcp.f32 %v4868_v62  ;;  %v4880_v42 = vadd.f32 1.0, %v8339_v59  ;;  %v8341_v55 = vpop.eup %8340  ;;  %5134 = vmatpush1.bf16.msra.mxu0 (%p4587_p12), %v8368_v14  ;;  %v8374_v62 = vld [vmem:[#allocation15 + $0x1c0] ss:$16 sps:$4 sm:$0xff] (%p4587_p12)   ;;  %v8456_v14 = vld [vmem:[#allocation15 + $0x4] ss:$16 sps:$4 sm:$0xff] (%p4587_p12)  }
 0x846   : >> { %8352 = vtanh.f32 %v4859_v1  ;;  %v8343_v28 = vpop.eup %8342  ;;  %v8372_v1 = vld [vmem:[#allocation15 + $0x1cc] ss:$16 sps:$4 sm:$0xff] (%p4587_p12)   ;;  %5135 = vmatprep.subr.bf16.mxu0 (%p4587_p12), %v8370_v56 }
 0x847   : >> { %8354 = vrcp.f32 %v4880_v42  ;;  %v4893_v41 = vadd.f32 1.0, %v8343_v28  ;;  %5328 = vmatprep.subr.bf16.mxu1 (%p4587_p12), %v8372_v1  ;;  %v8378_v28 = vld [vmem:[#allocation15 + $0x1ac] ss:$16 sps:$4 sm:$0xff] (%p4587_p12)   ;;  %v8454_v1 = vld [vmem:[#allocation15] ss:$16 sps:$4 sm:$0xff] (%p4587_p12)  }
 0x848   : > { %v12424_v56 = vld [vmem:[#allocation31_spill] sm:$0xff] (%p4587_p12) }
 0x849   : >> { %8356 = vrcp.f32 %v4893_v41  ;;  %5136 = vmatpush1.bf16.msra.mxu0 (%p4587_p12), %v8374_v62  ;;  %v12422_v41 = vld [vmem:[#allocation29_spill] sm:$0xff] (%p4587_p12) }
 0x84a   : > { %v8457_v62 = vld [vmem:[#allocation15 + $0x8] ss:$16 sps:$4 sm:$0xff] (%p4587_p12)  }
 0x84e   : >> { %v8345_v10 = vpop.eup %8344 }
 0x84f   : >> { %v4901_v22 = vmul.f32 %v8345_v10, %v8341_v55  ;;  %v8376_v55 = vld [vmem:[#allocation15 + $0x1a4] ss:$16 sps:$4 sm:$0xff] (%p4587_p12)  }
 0x850   : >> { %v8347_v63 = vpop.eup %8346  ;;  %5137 = vmatprep.subr.bf16.mxu0 (%p4587_p12), %v8376_v55  ;;  %v8432_v10 = vld [vmem:[#allocation15 + $0x84] ss:$16 sps:$4 sm:$0xff] (%p4587_p12)   ;;  %v12426_v55 = vld [vmem:[#allocation33_spill] sm:$0xff] (%p4587_p12) }
 0x851   : >> { %v8349_v52 = vpop.eup %8348  ;;  %v4899_v31 = vmul.f32 %v8870_v60, %v8347_v63  ;;  %5138 = vmatpush1.bf16.msra.mxu0 (%p4587_p12), %v8380_v35  ;;  %v8435_v63 = vld [vmem:[#allocation15 + $0x8c] ss:$16 sps:$4 sm:$0xff] (%p4587_p12)  }
 0x852   : >> { %v8351_v32 = vpop.eup %8350  ;;  %v4894_v25 = vadd.f32 1.0, %v8349_v52  ;;  %5139 = vmatprep.subr.bf16.mxu0 (%p4587_p12), %v8382_v39  ;;  %v8430_v52 = vld [vmem:[#allocation15 + $0x80] ss:$16 sps:$4 sm:$0xff] (%p4587_p12)   ;;  %v12428_v35 = vld [vmem:[#allocation35_spill] sm:$0xff] (%p4587_p12)  ;;  %v12430_v39 = vld [vmem:[#allocation41_spill] sm:$0xff] (%p4587_p12) }
 0x853   : >> { %v8353_v3 = vpop.eup %8352  ;;  %v4903_v60 = vadd.f32 %v4901_v22, %v4899_v31   ;;  %v8433_v31 = vld [vmem:[#allocation15 + $0x88] ss:$16 sps:$4 sm:$0xff] (%p4587_p12)   ;;  %v8438_v22 = vld [vmem:[#allocation15 + $0x64] ss:$16 sps:$4 sm:$0xff] (%p4587_p12)  }
 0x854   : >> { %v8355_v24 = vpop.eup %8354  ;;  %v4902_v0 = vmul.f32 %v8353_v3, %v8351_v32  ;;  %v8441_v32 = vld [vmem:[#allocation15 + $0x6c] ss:$16 sps:$4 sm:$0xff] (%p4587_p12)   ;;  %v8436_v3 = vld [vmem:[#allocation15 + $0x60] ss:$16 sps:$4 sm:$0xff] (%p4587_p12)  }
 0x855   : >> { %8358 = vtanh.f32 %v4903_v60  ;;  %v4900_v36 = vmul.f32 %v8866_v57, %v8355_v24  ;;  %5140 = vmatpush1.bf16.msra.mxu0 (%p4587_p12), %v8386_v53  ;;  %v8400_v60 = vld [vmem:[#allocation15 + $0x124] ss:$16 sps:$4 sm:$0xff] (%p4587_p12)   ;;  %v8439_v24 = vld [vmem:[#allocation15 + $0x68] ss:$16 sps:$4 sm:$0xff] (%p4587_p12)  }
 0x856   : >> { %8360 = vrcp.f32 %v4894_v25  ;;  %v8357_v26 = vpop.eup %8356  ;;  %5141 = vmatprep.subr.bf16.mxu0 (%p4587_p12), %v8388_v2  ;;  %v8444_v25 = vld [vmem:[#allocation15 + $0x44] ss:$16 sps:$4 sm:$0xff] (%p4587_p12)   ;;  %v12432_v53 = vld [vmem:[#allocation43_spill] sm:$0xff] (%p4587_p12)  ;;  %v12434_v2 = vld [vmem:[#allocation45_spill] sm:$0xff] (%p4587_p12) }
 0x857   : >> { %v4904_v57 = vadd.f32 %v4902_v0, %v4900_v36   ;;  %v8447_v36 = vld [vmem:[#allocation15 + $0x4c] ss:$16 sps:$4 sm:$0xff] (%p4587_p12)   ;;  %v12423_v0 = vld [vmem:[#allocation30_spill] sm:$0xff] (%p4587_p12) }
 0x859   : >> { %8362 = vtanh.f32 %v4904_v57  ;;  %5142 = vmatpush1.bf16.msra.mxu0 (%p4587_p12), %v8392_v54  ;;  %v8399_v57 = vld [vmem:[#allocation15 + $0x148] ss:$16 sps:$4 sm:$0xff] (%p4587_p12)  }
 0x85a   : > { %5143 = vmatprep.subr.bf16.mxu0 (%p4587_p12), %v8394_v51  ;;  %v12436_v54 = vld [vmem:[#allocation47_spill] sm:$0xff] (%p4587_p12)  ;;  %v12438_v51 = vld [vmem:[#allocation49_spill] sm:$0xff] (%p4587_p12) }
 0x85d   : > { %5144 = vmatpush1.bf16.msra.mxu0 (%p4587_p12), %v8398_v37  ;;  %v12440_v37 = vld [vmem:[#allocation51_spill] sm:$0xff] (%p4587_p12) }
 0x85e   : > { %5145 = vmatprep.subr.bf16.mxu0 (%p4587_p12), %v8400_v60  ;;  %v12442_v60 = vld [vmem:[#allocation53_spill] sm:$0xff] (%p4587_p12) }
 0x861   : > { %5146 = vmatpush1.bf16.msra.mxu0 (%p4587_p12), %v8404_v13  ;;  %v12444_v13 = vld [vmem:[#allocation55_spill] sm:$0xff] (%p4587_p12) }
 0x862   : >> { %v8359_v61 = vpop.eup %8358  ;;  %5147 = vmatprep.subr.bf16.mxu0 (%p4587_p12), %v8406_v44 }
 0x863   : >> { %v11040_v42 = vmul.f32 %v8359_v61, %v8357_v26   ;;  %v8361_v30 = vpop.eup %8360  ;;  %v8442_v26 = vld [vmem:[#allocation15 + $0x40] ss:$16 sps:$4 sm:$0xff] (%p4587_p12)   ;;  %v8445_v61 = vld [vmem:[#allocation15 + $0x48] ss:$16 sps:$4 sm:$0xff] (%p4587_p12)  }
 0x865   : >> { %12414 = vst [vmem:[#allocation63_spill] sm:$0xff] %v11040_v42  ;;  %v12415_v9 = vmov %v11040_v42  ;;  %5148 = vmatpush1.bf16.msra.mxu0 (%p4587_p12), %v8410_v20 }
 0x866   : >> { %v8363_v46 = vpop.eup %8362  ;;  %v12419_v42 = vmov %v12415_v9  ;;  %4589 = sbr.rel (!%p4587_p12) target bundleno = 1866 (0x74a), region = 217  ;;  %5679 = vmatprep.subr.bf16.mxu0 (%p4587_p12), %v8414_v38 }
 0x867   : >> { %v11042_v59 = vmul.f32 %v8363_v46, %v8361_v30   ;;  %v8375_v42 = vld [vmem:[#allocation15 + $0x1c8] ss:$16 sps:$4 sm:$0xff] (%p4587_p12)   ;;  %v8450_v30 = vld [vmem:[#allocation15 + $0x24] ss:$16 sps:$4 sm:$0xff] (%p4587_p12)   ;;  %v8453_v46 = vld [vmem:[#allocation15 + $0x2c] ss:$16 sps:$4 sm:$0xff] (%p4587_p12)  }
 0x868   : > { %5329 = vmatpush1.bf16.msra.mxu1 (%p4587_p12), %v8375_v42  ;;  %5166 = vmatmul.mubr.bf16.vlgmr.msra.gmra.mxu0 (%p4587_p12), %v12421_v47  ;;  %v12425_v42 = vld [vmem:[#allocation32_spill] sm:$0xff] (%p4587_p12) }
 0x869   : >> { %12416 = vst [vmem:[#allocation64_spill] sm:$0xff] %v11042_v59  ;;  %v12417_v7 = vmov %v11042_v59  ;;  %5330 = vmatprep.subr.bf16.mxu1 (%p4587_p12), %v8378_v28  ;;  %5680 = vmatpush1.bf16.msra.mxu0 (%p4587_p12), %v8412_v45  ;;  %v12427_v28 = vld [vmem:[#allocation34_spill] sm:$0xff] (%p4587_p12) }
 0x86a   : >> { %v12418_v59 = vmov %v12417_v7  ;;  %5175 = vmatprep.mubr.bf16.mxu0 (%p4587_p12), %v12420_v21  ;;  %5681 = vmatprep.subr.bf16.mxu0 (%p4587_p12), %v8420_v49 }
 0x86b   : > { %v8427_v59 = vld [vmem:[#allocation15 + $0xa8] ss:$16 sps:$4 sm:$0xff]  }
 0x86c   : > { %5331 = vmatpush1.bf16.msra.mxu1 %v8381_v43  ;;  %v12429_v43 = vld [vmem:[#allocation40_spill] sm:$0xff] }
 0x86d   : > { %5332 = vmatprep.subr.bf16.mxu1 %v8384_v33  ;;  %5682 = vmatpush1.bf16.msra.mxu0 %v8418_v6  ;;  %v12431_v33 = vld [vmem:[#allocation42_spill] sm:$0xff] }
 0x86e   : > { %5683 = vmatprep.subr.bf16.mxu0 %v8426_v27 }
 0x870   : > { %5333 = vmatpush1.bf16.msra.mxu1 %v8387_v50  ;;  %5176 = vmatmul.mubr.bf16.gmra.mxu0 %v12422_v41  ;;  %v12433_v50 = vld [vmem:[#allocation44_spill] sm:$0xff] }
 0x871   : > { %5334 = vmatprep.subr.bf16.mxu1 %v8390_v40  ;;  %5185 = vmatprep.mubr.bf16.mxu0 %v12420_v21  ;;  %v12435_v40 = vld [vmem:[#allocation46_spill] sm:$0xff] }
 0x872   : > { %5684 = vmatpush1.bf16.msra.mxu0 %v8424_v29 }
 0x873   : > { %5685 = vmatprep.subr.bf16.mxu0 %v8432_v10 }
 0x874   : > { %5335 = vmatpush1.bf16.msra.mxu1 %v8393_v4  ;;  %v12437_v4 = vld [vmem:[#allocation48_spill] sm:$0xff] }
 0x875   : > { %5336 = vmatprep.subr.bf16.mxu1 %v8396_v5  ;;  %v12439_v5 = vld [vmem:[#allocation50_spill] sm:$0xff] }
 0x876   : > { %5686 = vmatpush1.bf16.msra.mxu0 %v8430_v52 }
 0x877   : > { %5687 = vmatprep.subr.bf16.mxu0 %v8438_v22 }
 0x878   : > { %5337 = vmatpush1.bf16.msra.mxu1 %v8399_v57  ;;  %5186 = vmatmul.mubr.bf16.gmra.mxu0 %v12423_v0  ;;  %v12441_v57 = vld [vmem:[#allocation52_spill] sm:$0xff] }
 0x879   : > { %5338 = vmatprep.subr.bf16.mxu1 %v8402_v58  ;;  %5195 = vmatprep.mubr.bf16.mxu0 %v12420_v21  ;;  %v12443_v58 = vld [vmem:[#allocation54_spill] sm:$0xff] }
 0x87a   : > { %5688 = vmatpush1.bf16.msra.mxu0 %v8436_v3 }
 0x87b   : > { %5689 = vmatprep.subr.bf16.mxu0 %v8444_v25 }
 0x87c   : > { %5339 = vmatpush1.bf16.msra.mxu1 %v8405_v16 }
 0x87d   : > { %5340 = vmatprep.subr.bf16.mxu1 %v8408_v11  ;;  %v12445_v11 = vld [vmem:[#allocation56_spill] sm:$0xff] }
 0x87e   : > { %5690 = vmatpush1.bf16.msra.mxu0 %v8442_v26 }
 0x87f   : > { %5691 = vmatprep.subr.bf16.mxu0 %v8450_v30 }
 0x880   : > { %5341 = vmatpush1.bf16.msra.mxu1 %v8411_v18  ;;  %5196 = vmatmul.mubr.bf16.gmra.mxu0 %v12424_v56 }
 0x881   : > { %5872 = vmatprep.subr.bf16.mxu1 %v8417_v19  ;;  %5205 = vmatprep.mubr.bf16.mxu0 %v12420_v21 }
 0x882   : > { %5692 = vmatpush1.bf16.msra.mxu0 %v8448_v17 }
 0x883   : > { %5359 = vmatmul.mubr.bf16.vlgmr.msra.gmra.mxu1 %v12421_v47  ;;  %5693 = vmatprep.subr.bf16.mxu0 %v8456_v14  ;;  %v12446_v47 = vld [vmem:[#allocation57_spill] sm:$0xff] }
 0x884   : > { %5873 = vmatpush1.bf16.msra.mxu1 %v8415_v48  ;;  %5368 = vmatprep.mubr.bf16.mxu1 %v12420_v21 }
 0x885   : > { %5874 = vmatprep.subr.bf16.mxu1 %v8423_v34 }
 0x886   : > { %5694 = vmatpush1.bf16.msra.mxu0 %v8454_v1 }
 0x888   : > { %5875 = vmatpush1.bf16.msra.mxu1 %v8421_v23  ;;  %5206 = vmatmul.mubr.bf16.gmra.mxu0 %v12425_v42 }
 0x889   : > { %5876 = vmatprep.subr.bf16.mxu1 %v8429_v8  ;;  %5215 = vmatprep.mubr.bf16.mxu0 %v12420_v21 }
 0x88b   : > { %5369 = vmatmul.mubr.bf16.gmra.mxu1 %v12422_v41  ;;  %v12447_v41 = vld [vmem:[#allocation58_spill] sm:$0xff] }
 0x88c   : > { %5378 = vmatprep.mubr.bf16.mxu1 %v12420_v21  ;;  %5877 = vmatpush1.bf16.msra.mxu1 %v8427_v59 }
 0x88d   : > { %5878 = vmatprep.subr.bf16.mxu1 %v8435_v63 }
 0x890   : > { %5879 = vmatpush1.bf16.msra.mxu1 %v8433_v31  ;;  %5216 = vmatmul.mubr.bf16.gmra.mxu0 %v12426_v55 }
 0x891   : > { %5880 = vmatprep.subr.bf16.mxu1 %v8441_v32  ;;  %5225 = vmatprep.mubr.bf16.mxu0 %v12420_v21 }
 0x893   : > { %5379 = vmatmul.mubr.bf16.gmra.mxu1 %v12423_v0  ;;  %v12448_v0 = vld [vmem:[#allocation59_spill] sm:$0xff] }
 0x894   : > { %5388 = vmatprep.mubr.bf16.mxu1 %v12420_v21  ;;  %5881 = vmatpush1.bf16.msra.mxu1 %v8439_v24 }
 0x895   : > { %5882 = vmatprep.subr.bf16.mxu1 %v8447_v36 }
 0x898   : > { %5883 = vmatpush1.bf16.msra.mxu1 %v8445_v61  ;;  %5226 = vmatmul.mubr.bf16.gmra.mxu0 %v12427_v28 }
 0x899   : > { %5884 = vmatprep.subr.bf16.mxu1 %v8453_v46  ;;  %5235 = vmatprep.mubr.bf16.mxu0 %v12420_v21 }
 0x89b   : > { %5389 = vmatmul.mubr.bf16.gmra.mxu1 %v12424_v56  ;;  %v12449_v56 = vld [vmem:[#allocation60_spill] sm:$0xff] }
 0x89c   : > { %5398 = vmatprep.mubr.bf16.mxu1 %v12420_v21  ;;  %5885 = vmatpush1.bf16.msra.mxu1 %v8451_v12 }
 0x89d   : > { %5886 = vmatprep.subr.bf16.mxu1 %v8459_v15 }
 0x8a0   : > { %5887 = vmatpush1.bf16.msra.mxu1 %v8457_v62  ;;  %5236 = vmatmul.mubr.bf16.gmra.mxu0 %v12428_v35 }
 0x8a1   : > { %5245 = vmatprep.mubr.bf16.mxu0 %v12420_v21 }
 0x8a3   : > { %5399 = vmatmul.mubr.bf16.gmra.mxu1 %v12425_v42 }
 0x8a4   : > { %5408 = vmatprep.mubr.bf16.mxu1 %v12420_v21 }
 0x8a8   : > { %5246 = vmatmul.mubr.bf16.gmra.mxu0 %v12429_v43 }
 0x8a9   : > { %5255 = vmatprep.mubr.bf16.mxu0 %v12420_v21 }
 0x8ab   : > { %5409 = vmatmul.mubr.bf16.gmra.mxu1 %v12426_v55 }
 0x8ac   : > { %5418 = vmatprep.mubr.bf16.mxu1 %v12420_v21 }
 0x8b0   : > { %5256 = vmatmul.mubr.bf16.gmra.mxu0 %v12430_v39 }
 0x8b1   : > { %5265 = vmatprep.mubr.bf16.mxu0 %v12420_v21 }
 0x8b3   : > { %5419 = vmatmul.mubr.bf16.gmra.mxu1 %v12427_v28 }
 0x8b4   : > { %5428 = vmatprep.mubr.bf16.mxu1 %v12420_v21 }
 0x8b8   : > { %5266 = vmatmul.mubr.bf16.gmra.mxu0 %v12431_v33 }
 0x8b9   : > { %5275 = vmatprep.mubr.bf16.mxu0 %v12420_v21 }
 0x8bb   : > { %5429 = vmatmul.mubr.bf16.gmra.mxu1 %v12428_v35 }
 0x8bc   : > { %5438 = vmatprep.mubr.bf16.mxu1 %v12420_v21 }
 0x8c0   : > { %5276 = vmatmul.mubr.bf16.gmra.mxu0 %v12432_v53 }
 0x8c1   : > { %5285 = vmatprep.mubr.bf16.mxu0 %v12420_v21 }
 0x8c3   : > { %5439 = vmatmul.mubr.bf16.gmra.mxu1 %v12429_v43 }
 0x8c4   : > { %5448 = vmatprep.mubr.bf16.mxu1 %v12420_v21 }
 0x8c8   : > { %5286 = vmatmul.mubr.bf16.gmra.mxu0 %v12433_v50 }
 0x8c9   : > { %5295 = vmatprep.mubr.bf16.mxu0 %v12420_v21 }
 0x8cb   : > { %5449 = vmatmul.mubr.bf16.gmra.mxu1 %v12430_v39 }
 0x8cc   : > { %5458 = vmatprep.mubr.bf16.mxu1 %v12420_v21 }
 0x8d0   : > { %5296 = vmatmul.mubr.bf16.gmra.mxu0 %v12434_v2 }
 0x8d1   : > { %5305 = vmatprep.mubr.bf16.mxu0 %v12420_v21 }
 0x8d3   : > { %5459 = vmatmul.mubr.bf16.gmra.mxu1 %v12431_v33  ;;  %v12450_v33 = vld [vmem:[#allocation61_spill] sm:$0xff] }
 0x8d4   : > { %5468 = vmatprep.mubr.bf16.mxu1 %v12420_v21 }
 0x8d8   : > { %5306 = vmatmul.mubr.bf16.gmra.mxu0 %v12435_v40 }
 0x8d9   : > { %5315 = vmatprep.mubr.bf16.mxu0 %v12420_v21 }
 0x8db   : > { %5469 = vmatmul.mubr.bf16.gmra.mxu1 %v12432_v53 }
 0x8dc   : > { %5478 = vmatprep.mubr.bf16.mxu1 %v12420_v21 }
 0x8e0   : > { %5316 = vmatmul.mubr.bf16.gmra.mxu0 %v12436_v54 }
 0x8e1   : > { %5711 = vmatprep.mubr.bf16.mxu0 %v12420_v21 }
 0x8e3   : > { %5479 = vmatmul.mubr.bf16.gmra.mxu1 %v12433_v50 }
 0x8e4   : > { %5488 = vmatprep.mubr.bf16.mxu1 %v12420_v21 }
 0x8e8   : > { %5712 = vmatmul.mubr.bf16.vlgmr.msra.gmra.mxu0 %v12437_v4 }
 0x8e9   : > { %5721 = vmatprep.mubr.bf16.mxu0 %v12420_v21 }
 0x8eb   : > { %5489 = vmatmul.mubr.bf16.gmra.mxu1 %v12434_v2 }
 0x8ec   : > { %5498 = vmatprep.mubr.bf16.mxu1 %v12420_v21 }
 0x8f0   : > { %5722 = vmatmul.mubr.bf16.gmra.mxu0 %v12438_v51 }
 0x8f1   : > { %5731 = vmatprep.mubr.bf16.mxu0 %v12420_v21 }
 0x8f3   : > { %5499 = vmatmul.mubr.bf16.gmra.mxu1 %v12435_v40 }
 0x8f4   : > { %5508 = vmatprep.mubr.bf16.mxu1 %v12420_v21 }
 0x8f8   : > { %5732 = vmatmul.mubr.bf16.gmra.mxu0 %v12439_v5 }
 0x8f9   : > { %5741 = vmatprep.mubr.bf16.mxu0 %v12420_v21 }
 0x8fb   : > { %5509 = vmatmul.mubr.bf16.gmra.mxu1 %v12436_v54 }
 0x8fc   : > { %5904 = vmatprep.mubr.bf16.mxu1 %v12420_v21 }
 0x900   : > { %5742 = vmatmul.mubr.bf16.gmra.mxu0 %v12440_v37 }
 0x901   : > { %5751 = vmatprep.mubr.bf16.mxu0 %v12420_v21 }
 0x903   : > { %5905 = vmatmul.mubr.bf16.vlgmr.msra.gmra.mxu1 %v12437_v4 }
 0x904   : > { %5914 = vmatprep.mubr.bf16.mxu1 %v12420_v21 }
 0x908   : > { %5752 = vmatmul.mubr.bf16.gmra.mxu0 %v12441_v57 }
 0x909   : > { %5761 = vmatprep.mubr.bf16.mxu0 %v12420_v21 }
 0x90b   : > { %5915 = vmatmul.mubr.bf16.gmra.mxu1 %v12438_v51 }
 0x90c   : > { %5924 = vmatprep.mubr.bf16.mxu1 %v12420_v21 }
 0x910   : > { %5762 = vmatmul.mubr.bf16.gmra.mxu0 %v12442_v60 }
 0x911   : > { %5771 = vmatprep.mubr.bf16.mxu0 %v12420_v21 }
 0x913   : > { %5925 = vmatmul.mubr.bf16.gmra.mxu1 %v12439_v5 }
 0x914   : > { %5934 = vmatprep.mubr.bf16.mxu1 %v12420_v21 }
 0x918   : > { %5772 = vmatmul.mubr.bf16.gmra.mxu0 %v12443_v58 }
 0x919   : > { %5781 = vmatprep.mubr.bf16.mxu0 %v12420_v21 }
 0x91b   : > { %5935 = vmatmul.mubr.bf16.gmra.mxu1 %v12440_v37  ;;  %v12455_v37 = vld [vmem:[#allocation62_spill] sm:$0xff] }
 0x91c   : > { %5944 = vmatprep.mubr.bf16.mxu1 %v12420_v21 }
 0x920   : > { %5782 = vmatmul.mubr.bf16.gmra.mxu0 %v12444_v13 }
 0x921   : > { %5791 = vmatprep.mubr.bf16.mxu0 %v12420_v21 }
 0x923   : > { %5945 = vmatmul.mubr.bf16.gmra.mxu1 %v12441_v57 }
 0x924   : > { %5954 = vmatprep.mubr.bf16.mxu1 %v12420_v21 }
 0x928   : > { %v11155_v16 = vpop.f32.mrf.mxu0  ;;  %5792 = vmatmul.mubr.bf16.gmra.mxu0 %v12445_v11 }
 0x929   : > { %5801 = vmatprep.mubr.bf16.mxu0 %v12420_v21 }
 0x92a   : > { %v11163_v20 = vpop.f32.mrf.mxu0 }
 0x92b   : > { %5955 = vmatmul.mubr.bf16.gmra.mxu1 %v12442_v60 }
 0x92c   : > { %5964 = vmatprep.mubr.bf16.mxu1 %v12420_v21  ;;  %v11167_v38 = vpop.f32.mrf.mxu0 }
 0x92e   : > { %v11171_v45 = vpop.f32.mrf.mxu0 }
 0x930   : > { %v11175_v49 = vpop.f32.mrf.mxu0  ;;  %5802 = vmatmul.mubr.bf16.gmra.mxu0 %v12446_v47 }
 0x931   : > { %5811 = vmatprep.mubr.bf16.mxu0 %v12420_v21 }
 0x932   : > { %v11183_v6 = vpop.f32.mrf.mxu0 }
 0x933   : > { %5965 = vmatmul.mubr.bf16.gmra.mxu1 %v12443_v58 }
 0x934   : > { %5974 = vmatprep.mubr.bf16.mxu1 %v12420_v21  ;;  %v11187_v27 = vpop.f32.mrf.mxu0 }
 0x936   : > { %v11191_v29 = vpop.f32.mrf.mxu0 }
 0x938   : > { %v11195_v10 = vpop.f32.mrf.mxu0  ;;  %5812 = vmatmul.mubr.bf16.gmra.mxu0 %v12447_v41 }
 0x939   : > { %5821 = vmatprep.mubr.bf16.mxu0 %v12420_v21 }
 0x93a   : > { %v11203_v52 = vpop.f32.mrf.mxu0 }
 0x93b   : > { %5975 = vmatmul.mubr.bf16.gmra.mxu1 %v12444_v13 }
 0x93c   : > { %5984 = vmatprep.mubr.bf16.mxu1 %v12420_v21  ;;  %v11207_v22 = vpop.f32.mrf.mxu0 }
 0x93e   : > { %v11211_v3 = vpop.f32.mrf.mxu0 }
 0x940   : > { %v11215_v25 = vpop.f32.mrf.mxu0  ;;  %5822 = vmatmul.mubr.bf16.gmra.mxu0 %v12448_v0 }
 0x941   : > { %5831 = vmatprep.mubr.bf16.mxu0 %v12420_v21 }
 0x942   : > { %v11223_v26 = vpop.f32.mrf.mxu0 }
 0x943   : > { %v11157_v44 = vpop.f32.mrf.mxu1  ;;  %5985 = vmatmul.mubr.bf16.gmra.mxu1 %v12445_v11 }
 0x944   : > { %5994 = vmatprep.mubr.bf16.mxu1 %v12420_v21  ;;  %v11227_v30 = vpop.f32.mrf.mxu0 }
 0x945   : > { %v11165_v18 = vpop.f32.mrf.mxu1 }
 0x946   : > { %v11231_v17 = vpop.f32.mrf.mxu0 }
 0x947   : > { %v11169_v19 = vpop.f32.mrf.mxu1 }
 0x948   : > { %v11235_v14 = vpop.f32.mrf.mxu0  ;;  %5832 = vmatmul.mubr.bf16.gmra.mxu0 %v12449_v56 }
 0x949   : > { %v11173_v48 = vpop.f32.mrf.mxu1  ;;  %5841 = vmatprep.mubr.bf16.mxu0 %v12420_v21 }
 0x94a   : > { %v11243_v1 = vpop.f32.mrf.mxu0 }
 0x94b   : > { %v11177_v34 = vpop.f32.mrf.mxu1  ;;  %5995 = vmatmul.mubr.bf16.gmra.mxu1 %v12446_v47 }
 0x94c   : > { %6004 = vmatprep.mubr.bf16.mxu1 %v12420_v21  ;;  %v11247_v42 = vpop.f32.mrf.mxu0 }
 0x94d   : > { %v11185_v23 = vpop.f32.mrf.mxu1 }
 0x94e   : > { %v11251_v28 = vpop.f32.mrf.mxu0 }
 0x94f   : > { %v11189_v8 = vpop.f32.mrf.mxu1 }
 0x950   : > { %v11255_v43 = vpop.f32.mrf.mxu0  ;;  %5842 = vmatmul.mubr.bf16.gmra.mxu0 %v12450_v33 }
 0x951   : > { %v11193_v59 = vpop.f32.mrf.mxu1  ;;  %5851 = vmatprep.mubr.bf16.mxu0 %v12420_v21 }
 0x952   : > { %v11263_v53 = vpop.f32.mrf.mxu0 }
 0x953   : > { %v11197_v63 = vpop.f32.mrf.mxu1  ;;  %6005 = vmatmul.mubr.bf16.gmra.mxu1 %v12447_v41 }
 0x954   : > { %6014 = vmatprep.mubr.bf16.mxu1 %v12420_v21  ;;  %v11267_v2 = vpop.f32.mrf.mxu0 }
 0x955   : > { %v11205_v31 = vpop.f32.mrf.mxu1 }
 0x956   : > { %v11271_v54 = vpop.f32.mrf.mxu0 }
 0x957   : > { %v11209_v32 = vpop.f32.mrf.mxu1  ;;  %12451 = vst [vmem:[#allocation65_spill] sm:$0xff] %v11271_v54  ;;  %v11462_v54 = vld [vmem:[#allocation16] sm:$0xff] }
 0x958   : > { %v11275_v51 = vpop.f32.mrf.mxu0  ;;  %5852 = vmatmul.mubr.bf16.gmra.mxu0 %v12455_v37  ;;  %12539 = vst [vmem:[#allocation148_spill] sm:$0xff] %v11462_v54 }
 0x959   : > { %v11213_v24 = vpop.f32.mrf.mxu1  ;;  %12453 = vst [vmem:[#allocation67_spill] sm:$0xff] %v11275_v51  ;;  %5861 = vmatprep.mubr.bf16.mxu0 %v12420_v21 }
 0x95a   : > { %v11283_v57 = vpop.f32.mrf.mxu0 }
 0x95b   : > { %v11217_v36 = vpop.f32.mrf.mxu1  ;;  %6015 = vmatmul.mubr.bf16.gmra.mxu1 %v12448_v0  ;;  %12456 = vst [vmem:[#allocation69_spill] sm:$0xff] %v11283_v57  ;;  %v12538_v57 = vld [vmem:[#allocation39_spill] sm:$0xff] }
 0x95c   : > { %6024 = vmatprep.mubr.bf16.mxu1 %v12420_v21  ;;  %v11287_v58 = vpop.f32.mrf.mxu0 }
 0x95d   : > { %v11225_v61 = vpop.f32.mrf.mxu1  ;;  %12458 = vst [vmem:[#allocation72_spill] sm:$0xff] %v11287_v58  ;;  %v12537_v58 = vld [vmem:[#allocation38_spill] sm:$0xff] }
 0x95e   : > { %v11291_v11 = vpop.f32.mrf.mxu0 }
 0x95f   : > { %v11229_v46 = vpop.f32.mrf.mxu1  ;;  %12460 = vst [vmem:[#allocation74_spill] sm:$0xff] %v11291_v11 }
 0x960   : > { %v11295_v41 = vpop.f32.mrf.mxu0 }
 0x961   : > { %v11233_v12 = vpop.f32.mrf.mxu1  ;;  %12462 = vst [vmem:[#allocation76_spill] sm:$0xff] %v11295_v41 }
 0x963   : > { %v11237_v15 = vpop.f32.mrf.mxu1  ;;  %6025 = vmatmul.mubr.bf16.gmra.mxu1 %v12449_v56  ;;  %v12464_v56 = vld [vmem:[#allocation71_spill] sm:$0xff] }
 0x964   : > { %6034 = vmatprep.mubr.bf16.mxu1 %v12420_v21  ;;  %5862 = vmatmul.mubr.bf16.gmra.mxu0 %v12464_v56 }
 0x965   : > { %v11245_v62 = vpop.f32.mrf.mxu1 }
 0x967   : > { %v11249_v55 = vpop.f32.mrf.mxu1 }
 0x969   : > { %v11253_v35 = vpop.f32.mrf.mxu1 }
 0x96b   : > { %v11257_v39 = vpop.f32.mrf.mxu1  ;;  %6035 = vmatmul.mubr.bf16.gmra.mxu1 %v12450_v33 }
 0x96c   : > { %6044 = vmatprep.mubr.bf16.mxu1 %v12420_v21 }
 0x96d   : > { %v11265_v50 = vpop.f32.mrf.mxu1 }
 0x96f   : > { %v11269_v40 = vpop.f32.mrf.mxu1 }
 0x971   : > { %v11273_v4 = vpop.f32.mrf.mxu1 }
 0x972   : > { %12452 = vst [vmem:[#allocation66_spill] sm:$0xff] %v11273_v4 }
 0x973   : > { %v11277_v5 = vpop.f32.mrf.mxu1  ;;  %6045 = vmatmul.mubr.bf16.gmra.mxu1 %v12455_v37 }
 0x974   : > { %12454 = vst [vmem:[#allocation68_spill] sm:$0xff] %v11277_v5  ;;  %6054 = vmatprep.mubr.bf16.mxu1 %v12420_v21  ;;  %v11301_v21 = vpop.f32.mrf.mxu0 }
 0x975   : > { %v11285_v60 = vpop.f32.mrf.mxu1  ;;  %12465 = vst [vmem:[#allocation78_spill] sm:$0xff] %v11301_v21 }
 0x976   : > { %12457 = vst [vmem:[#allocation70_spill] sm:$0xff] %v11285_v60  ;;  %v11305_v37 = vpop.f32.mrf.mxu0 }
 0x977   : > { %v11289_v13 = vpop.f32.mrf.mxu1  ;;  %12467 = vst [vmem:[#allocation80_spill] sm:$0xff] %v11305_v37 }
 0x978   : > { %12459 = vst [vmem:[#allocation73_spill] sm:$0xff] %v11289_v13  ;;  %v11309_v9 = vpop.f32.mrf.mxu0 }
 0x979   : > { %v11293_v47 = vpop.f32.mrf.mxu1  ;;  %12469 = vst [vmem:[#allocation82_spill] sm:$0xff] %v11309_v9 }
 0x97a   : > { %12461 = vst [vmem:[#allocation75_spill] sm:$0xff] %v11293_v47  ;;  %v11313_v47 = vpop.f32.mrf.mxu0 }
 0x97b   : > { %v11297_v0 = vpop.f32.mrf.mxu1  ;;  %6055 = vmatmul.mubr.bf16.gmra.mxu1 %v12464_v56  ;;  %12471 = vst [vmem:[#allocation84_spill] sm:$0xff] %v11313_v47 }
 0x97c   : > { %12463 = vst [vmem:[#allocation77_spill] sm:$0xff] %v11297_v0  ;;  %v11317_v0 = vpop.f32.mrf.mxu0 }
 0x97d   : > { %v11303_v33 = vpop.f32.mrf.mxu1  ;;  %12473 = vst [vmem:[#allocation86_spill] sm:$0xff] %v11317_v0 }
 0x97e   : > { %12466 = vst [vmem:[#allocation79_spill] sm:$0xff] %v11303_v33  ;;  %v11321_v56 = vpop.f32.mrf.mxu0 }
 0x97f   : > { %v11307_v7 = vpop.f32.mrf.mxu1  ;;  %12475 = vst [vmem:[#allocation88_spill] sm:$0xff] %v11321_v56 }
 0x980   : > { %12468 = vst [vmem:[#allocation81_spill] sm:$0xff] %v11307_v7  ;;  %v11325_v33 = vpop.f32.mrf.mxu0 }
 0x981   : > { %v11311_v11 = vpop.f32.mrf.mxu1  ;;  %12477 = vst [vmem:[#allocation90_spill] sm:$0xff] %v11325_v33 }
 0x982   : > { %12470 = vst [vmem:[#allocation83_spill] sm:$0xff] %v11311_v11  ;;  %v11329_v7 = vpop.f32.mrf.mxu0 }
 0x983   : > { %v11315_v41 = vpop.f32.mrf.mxu1  ;;  %12479 = vst [vmem:[#allocation92_spill] sm:$0xff] %v11329_v7 }
 0x984   : > { %12472 = vst [vmem:[#allocation85_spill] sm:$0xff] %v11315_v41  ;;  %v11333_v11 = vpop.f32.mrf.mxu0 }
 0x985   : > { %v11319_v13 = vpop.f32.mrf.mxu1  ;;  %12481 = vst [vmem:[#allocation94_spill] sm:$0xff] %v11333_v11 }
 0x986   : > { %12474 = vst [vmem:[#allocation87_spill] sm:$0xff] %v11319_v13  ;;  %v11337_v41 = vpop.f32.mrf.mxu0 }
 0x987   : > { %v11323_v21 = vpop.f32.mrf.mxu1  ;;  %12483 = vst [vmem:[#allocation96_spill] sm:$0xff] %v11337_v41 }
 0x988   : > { %12476 = vst [vmem:[#allocation89_spill] sm:$0xff] %v11323_v21  ;;  %v11341_v13 = vpop.f32.mrf.mxu0 }
 0x989   : > { %v11327_v37 = vpop.f32.mrf.mxu1  ;;  %12485 = vst [vmem:[#allocation98_spill] sm:$0xff] %v11341_v13 }
 0x98a   : > { %12478 = vst [vmem:[#allocation91_spill] sm:$0xff] %v11327_v37  ;;  %v11345_v21 = vpop.f32.mrf.mxu0 }
 0x98b   : > { %v11331_v9 = vpop.f32.mrf.mxu1  ;;  %12487 = vst [vmem:[#allocation100_spill] sm:$0xff] %v11345_v21 }
 0x98c   : > { %12480 = vst [vmem:[#allocation93_spill] sm:$0xff] %v11331_v9  ;;  %v11349_v37 = vpop.f32.mrf.mxu0 }
 0x98d   : > { %v11335_v47 = vpop.f32.mrf.mxu1  ;;  %12489 = vst [vmem:[#allocation102_spill] sm:$0xff] %v11349_v37 }
 0x98e   : > { %12482 = vst [vmem:[#allocation95_spill] sm:$0xff] %v11335_v47  ;;  %v11353_v9 = vpop.f32.mrf.mxu0 }
 0x98f   : > { %v11339_v0 = vpop.f32.mrf.mxu1  ;;  %12491 = vst [vmem:[#allocation104_spill] sm:$0xff] %v11353_v9 }
 0x990   : > { %12484 = vst [vmem:[#allocation97_spill] sm:$0xff] %v11339_v0  ;;  %v11357_v47 = vpop.f32.mrf.mxu0 }
 0x991   : > { %v11343_v56 = vpop.f32.mrf.mxu1  ;;  %12493 = vst [vmem:[#allocation106_spill] sm:$0xff] %v11357_v47 }
 0x992   : > { %12486 = vst [vmem:[#allocation99_spill] sm:$0xff] %v11343_v56  ;;  %v11361_v0 = vpop.f32.mrf.mxu0 }
 0x993   : > { %v11347_v33 = vpop.f32.mrf.mxu1  ;;  %12495 = vst [vmem:[#allocation108_spill] sm:$0xff] %v11361_v0 }
 0x994   : > { %12488 = vst [vmem:[#allocation101_spill] sm:$0xff] %v11347_v33  ;;  %v11365_v56 = vpop.f32.mrf.mxu0 }
 0x995   : > { %v11351_v7 = vpop.f32.mrf.mxu1  ;;  %12497 = vst [vmem:[#allocation110_spill] sm:$0xff] %v11365_v56 }
 0x996   : > { %12490 = vst [vmem:[#allocation103_spill] sm:$0xff] %v11351_v7  ;;  %v11369_v33 = vpop.f32.mrf.mxu0 }
 0x997   : > { %v11355_v11 = vpop.f32.mrf.mxu1  ;;  %12499 = vst [vmem:[#allocation112_spill] sm:$0xff] %v11369_v33 }
 0x998   : > { %12492 = vst [vmem:[#allocation105_spill] sm:$0xff] %v11355_v11  ;;  %v11373_v7 = vpop.f32.mrf.mxu0 }
 0x999   : > { %v11359_v41 = vpop.f32.mrf.mxu1  ;;  %12501 = vst [vmem:[#allocation114_spill] sm:$0xff] %v11373_v7 }
 0x99a   : > { %12494 = vst [vmem:[#allocation107_spill] sm:$0xff] %v11359_v41  ;;  %v11377_v11 = vpop.f32.mrf.mxu0 }
 0x99b   : > { %v11363_v13 = vpop.f32.mrf.mxu1  ;;  %12503 = vst [vmem:[#allocation116_spill] sm:$0xff] %v11377_v11 }
 0x99c   : > { %12496 = vst [vmem:[#allocation109_spill] sm:$0xff] %v11363_v13  ;;  %v11381_v41 = vpop.f32.mrf.mxu0 }
 0x99d   : > { %v11367_v21 = vpop.f32.mrf.mxu1  ;;  %12505 = vst [vmem:[#allocation118_spill] sm:$0xff] %v11381_v41 }
 0x99e   : > { %12498 = vst [vmem:[#allocation111_spill] sm:$0xff] %v11367_v21  ;;  %v11385_v13 = vpop.f32.mrf.mxu0 }
 0x99f   : > { %v11371_v37 = vpop.f32.mrf.mxu1  ;;  %12507 = vst [vmem:[#allocation120_spill] sm:$0xff] %v11385_v13 }
 0x9a0   : > { %12500 = vst [vmem:[#allocation113_spill] sm:$0xff] %v11371_v37  ;;  %v11389_v21 = vpop.f32.mrf.mxu0 }
 0x9a1   : > { %v11375_v9 = vpop.f32.mrf.mxu1  ;;  %12509 = vst [vmem:[#allocation122_spill] sm:$0xff] %v11389_v21 }
 0x9a2   : > { %12502 = vst [vmem:[#allocation115_spill] sm:$0xff] %v11375_v9  ;;  %v11393_v37 = vpop.f32.mrf.mxu0 }
 0x9a3   : > { %v11379_v47 = vpop.f32.mrf.mxu1  ;;  %12511 = vst [vmem:[#allocation124_spill] sm:$0xff] %v11393_v37 }
 0x9a4   : > { %12504 = vst [vmem:[#allocation117_spill] sm:$0xff] %v11379_v47  ;;  %v11397_v9 = vpop.f32.mrf.mxu0 }
 0x9a5   : > { %v11383_v0 = vpop.f32.mrf.mxu1  ;;  %12513 = vst [vmem:[#allocation126_spill] sm:$0xff] %v11397_v9 }
 0x9a6   : > { %12506 = vst [vmem:[#allocation119_spill] sm:$0xff] %v11383_v0  ;;  %v11401_v47 = vpop.f32.mrf.mxu0 }
 0x9a7   : > { %v11387_v56 = vpop.f32.mrf.mxu1  ;;  %12515 = vst [vmem:[#allocation128_spill] sm:$0xff] %v11401_v47 }
 0x9a8   : > { %12508 = vst [vmem:[#allocation121_spill] sm:$0xff] %v11387_v56  ;;  %v11405_v0 = vpop.f32.mrf.mxu0 }
 0x9a9   : > { %v11391_v33 = vpop.f32.mrf.mxu1  ;;  %12517 = vst [vmem:[#allocation130_spill] sm:$0xff] %v11405_v0 }
 0x9aa   : > { %12510 = vst [vmem:[#allocation123_spill] sm:$0xff] %v11391_v33  ;;  %v11409_v56 = vpop.f32.mrf.mxu0 }
 0x9ab   : > { %v11395_v7 = vpop.f32.mrf.mxu1  ;;  %12519 = vst [vmem:[#allocation132_spill] sm:$0xff] %v11409_v56 }
 0x9ac   : > { %12512 = vst [vmem:[#allocation125_spill] sm:$0xff] %v11395_v7  ;;  %v11413_v33 = vpop.f32.mrf.mxu0 }
 0x9ad   : > { %v11399_v11 = vpop.f32.mrf.mxu1  ;;  %12521 = vst [vmem:[#allocation134_spill] sm:$0xff] %v11413_v33 }
 0x9ae   : > { %12514 = vst [vmem:[#allocation127_spill] sm:$0xff] %v11399_v11  ;;  %v11417_v7 = vpop.f32.mrf.mxu0 }
 0x9af   : > { %v11403_v41 = vpop.f32.mrf.mxu1  ;;  %12523 = vst [vmem:[#allocation136_spill] sm:$0xff] %v11417_v7 }
 0x9b0   : > { %12516 = vst [vmem:[#allocation129_spill] sm:$0xff] %v11403_v41  ;;  %v11421_v11 = vpop.f32.mrf.mxu0 }
 0x9b1   : > { %v11407_v13 = vpop.f32.mrf.mxu1  ;;  %12525 = vst [vmem:[#allocation138_spill] sm:$0xff] %v11421_v11 }
 0x9b2   : > { %12518 = vst [vmem:[#allocation131_spill] sm:$0xff] %v11407_v13  ;;  %v11425_v41 = vpop.f32.mrf.mxu0 }
 0x9b3   : > { %v11411_v21 = vpop.f32.mrf.mxu1  ;;  %12527 = vst [vmem:[#allocation140_spill] sm:$0xff] %v11425_v41 }
 0x9b4   : > { %12520 = vst [vmem:[#allocation133_spill] sm:$0xff] %v11411_v21  ;;  %v11429_v13 = vpop.f32.mrf.mxu0 }
 0x9b5   : > { %v11415_v37 = vpop.f32.mrf.mxu1  ;;  %12529 = vst [vmem:[#allocation142_spill] sm:$0xff] %v11429_v13 }
 0x9b6   : > { %12522 = vst [vmem:[#allocation135_spill] sm:$0xff] %v11415_v37  ;;  %v11433_v21 = vpop.f32.mrf.mxu0 }
 0x9b7   : > { %v11419_v9 = vpop.f32.mrf.mxu1  ;;  %12531 = vst [vmem:[#allocation144_spill] sm:$0xff] %v11433_v21 }
 0x9b8   : > { %12524 = vst [vmem:[#allocation137_spill] sm:$0xff] %v11419_v9  ;;  %v6065_v9 = vld [vmem:[%s11991_s12] sm:$0xf]  ;;  %v11440_v7 = vpop.f32.mrf.mxu0 }
 0x9b9   : > { %v11423_v47 = vpop.f32.mrf.mxu1  ;;  %12533 = vst [vmem:[#allocation146_spill] sm:$0xff] %v11440_v7  ;;  %v11453_v60 = vrot.slane %v6065_v9, %v12537_v58  ;;  %v11456_v5 = vrot.slane %v6065_v9, %v12538_v57  ;;  %v11470_v57 = vld [vmem:[#allocation16 + $0x20] sm:$0xff] }
 0x9ba   : > { %12526 = vst [vmem:[#allocation139_spill] sm:$0xff] %v11423_v47  ;;  %v12535_v47 = vld [vmem:[#allocation36_spill] sm:$0xff]  ;;  %v5713_v13 = vpop.f32.mrf.mxu0  ;;  %12543 = vst [vmem:[#allocation152_spill] sm:$0xff] %v11470_v57 }
 0x9bb   : > { %v11427_v0 = vpop.f32.mrf.mxu1  ;;  %v11445_v41 = vrot.slane %v6065_v9, %v12535_v47  ;;  %v5714_v21 = vadd.f32 %v5713_v13, %v11155_v16  ;;  %v11464_v16 = vld [vmem:[#allocation16 + $0x8] sm:$0xff] }
 0x9bc   : > { %12528 = vst [vmem:[#allocation141_spill] sm:$0xff] %v11427_v0  ;;  %v12536_v0 = vld [vmem:[#allocation37_spill] sm:$0xff]  ;;  %v5715_v7 = vpop.f32.mrf.mxu0  ;;  %12540 = vst [vmem:[#allocation149_spill] sm:$0xff] %v11464_v16  ;;  %v11482_v16 = vld [vmem:[#allocation16 + $0x40] sm:$0xff] }
 0x9bd   : > { %v11431_v56 = vpop.f32.mrf.mxu1  ;;  %v11448_v37 = vrot.slane %v6065_v9, %v12536_v0  ;;  %v6087_v47 = vadd.f32 %v11445_v41, %v5714_v21  ;;  %v5716_v0 = vadd.f32 %v5715_v7, %v11163_v20  ;;  %v11468_v9 = vld [vmem:[#allocation16 + $0x18] sm:$0xff]  ;;  %v11478_v21 = vld [vmem:[#allocation16 + $0x30] sm:$0xff]  ;;  %12547 = vst [vmem:[#allocation156_spill] sm:$0xff] %v11482_v16 }
 0x9be   : > { %12530 = vst [vmem:[#allocation143_spill] sm:$0xff] %v11431_v56  ;;  %v5717_v58 = vpop.f32.mrf.mxu0  ;;  %12542 = vst [vmem:[#allocation151_spill] sm:$0xff] %v11468_v9 }
 0x9bf   : > { %v11435_v33 = vpop.f32.mrf.mxu1  ;;  %6215 = vst [vmem:[#allocation2] sm:$0xff] %v6087_v47  ;;  %v6088_v7 = vadd.f32 %v11453_v60, %v5716_v0  ;;  %12545 = vst [vmem:[#allocation154_spill] sm:$0xff] %v11478_v21  ;;  %v11486_v47 = vld [vmem:[#allocation16 + $0x50] sm:$0xff]  ;;  %v11500_v21 = vld [vmem:[#allocation16 + $0x78] sm:$0xff] }
 0x9c0   : > { %12532 = vst [vmem:[#allocation145_spill] sm:$0xff] %v11435_v33  ;;  %v5719_v9 = vpop.f32.mrf.mxu0  ;;  %12549 = vst [vmem:[#allocation158_spill] sm:$0xff] %v11486_v47  ;;  %v11516_v47 = vld [vmem:[#allocation16 + $0xa8] sm:$0xff] }
 0x9c1   : > { %v11442_v11 = vpop.f32.mrf.mxu1  ;;  %6216 = vst [vmem:[#allocation2 + $0x8] sm:$0xff] %v6088_v7  ;;  %12554 = vst [vmem:[#allocation163_spill] sm:$0xff] %v11500_v21  ;;  %v11502_v7 = vld [vmem:[#allocation16 + $0x80] sm:$0xff] }
 0x9c2   : > { %12534 = vst [vmem:[#allocation147_spill] sm:$0xff] %v11442_v11  ;;  %12555 = vst [vmem:[#allocation164_spill] sm:$0xff] %v11502_v7 }
 0x9c3   : > { %v5906_v56 = vpop.f32.mrf.mxu1 }
 0x9c4   : > { %v5907_v33 = vadd.f32 %v5906_v56, %v11157_v44  ;;  %v11466_v44 = vld [vmem:[#allocation16 + $0x10] sm:$0xff]  ;;  %v11472_v56 = vld [vmem:[#allocation16 + $0x28] sm:$0xff] }
 0x9c5   : > { %v5908_v11 = vpop.f32.mrf.mxu1  ;;  %12541 = vst [vmem:[#allocation150_spill] sm:$0xff] %v11466_v44  ;;  %12544 = vst [vmem:[#allocation153_spill] sm:$0xff] %v11472_v56  ;;  %v11484_v44 = vld [vmem:[#allocation16 + $0x48] sm:$0xff]  ;;  %v11498_v56 = vld [vmem:[#allocation16 + $0x70] sm:$0xff] }
 0x9c6   : > { %v6089_v51 = vadd.f32 %v11448_v37, %v5907_v33  ;;  %v5909_v4 = vadd.f32 %v5908_v11, %v11165_v18  ;;  %v5718_v18 = vadd.f32 %v5717_v58, %v11167_v38  ;;  %v11480_v33 = vld [vmem:[#allocation16 + $0x38] sm:$0xff]  ;;  %12548 = vst [vmem:[#allocation157_spill] sm:$0xff] %v11484_v44  ;;  %v11494_v58 = vld [vmem:[#allocation16 + $0x60] sm:$0xff]  ;;  %12553 = vst [vmem:[#allocation162_spill] sm:$0xff] %v11498_v56 }
 0x9c7   : > { %v5910_v13 = vpop.f32.mrf.mxu1  ;;  %12546 = vst [vmem:[#allocation155_spill] sm:$0xff] %v11480_v33  ;;  %12551 = vst [vmem:[#allocation160_spill] sm:$0xff] %v11494_v58  ;;  %v5723_v33 = vpop.f32.mrf.mxu0  ;;  %v11514_v44 = vld [vmem:[#allocation16 + $0xa0] sm:$0xff]  ;;  %v11532_v56 = vld [vmem:[#allocation16 + $0xd8] sm:$0xff] }
 0x9c8   : > { %6217 = vst [vmem:[#allocation2 + $0x10] sm:$0xff] %v6089_v51  ;;  %v6090_v20 = vadd.f32 %v11456_v5, %v5909_v4  ;;  %v5911_v11 = vadd.f32 %v5910_v13, %v11169_v19  ;;  %v11488_v51 = vld [vmem:[#allocation16 + $0x58] sm:$0xff]  ;;  %v6091_v38 = vadd.f32 %v11445_v41, %v5718_v18  ;;  %v5720_v4 = vadd.f32 %v5719_v9, %v11171_v45  ;;  %v11496_v13 = vld [vmem:[#allocation16 + $0x68] sm:$0xff]  ;;  %v11510_v18 = vld [vmem:[#allocation16 + $0x90] sm:$0xff] }
 0x9c9   : > { %v5912_v54 = vpop.f32.mrf.mxu1  ;;  %12550 = vst [vmem:[#allocation159_spill] sm:$0xff] %v11488_v51  ;;  %12552 = vst [vmem:[#allocation161_spill] sm:$0xff] %v11496_v13  ;;  %v5725_v51 = vpop.f32.mrf.mxu0  ;;  %v11530_v13 = vld [vmem:[#allocation16 + $0xd0] sm:$0xff] }
 0x9ca   : > { %6218 = vst [vmem:[#allocation2 + $0x18] sm:$0xff] %v6090_v20  ;;  %v6093_v19 = vadd.f32 %v11448_v37, %v5911_v11  ;;  %v5913_v0 = vadd.f32 %v5912_v54, %v11173_v48  ;;  %v11504_v20 = vld [vmem:[#allocation16 + $0x88] sm:$0xff]  ;;  %6219 = vst [vmem:[#allocation2 + $0x20] sm:$0xff] %v6091_v38  ;;  %v6092_v45 = vadd.f32 %v11453_v60, %v5720_v4  ;;  %v11512_v11 = vld [vmem:[#allocation16 + $0x98] sm:$0xff] }
 0x9cb   : > { %v5916_v57 = vpop.f32.mrf.mxu1  ;;  %12556 = vst [vmem:[#allocation28_spill] sm:$0xff] %v11504_v20  ;;  %v5724_v54 = vadd.f32 %v5723_v33, %v11175_v49  ;;  %12557 = vst [vmem:[#allocation29_spill] sm:$0xff] %v11512_v11  ;;  %v11518_v38 = vld [vmem:[#allocation16 + $0xb0] sm:$0xff]  ;;  %v11526_v4 = vld [vmem:[#allocation16 + $0xc0] sm:$0xff]  ;;  %v5727_v21 = vpop.f32.mrf.mxu0 }
 0x9cc   : > { %6221 = vst [vmem:[#allocation2 + $0x30] sm:$0xff] %v6093_v19  ;;  %v6094_v48 = vadd.f32 %v11456_v5, %v5913_v0  ;;  %v5917_v9 = vadd.f32 %v5916_v57, %v11177_v34  ;;  %v11520_v19 = vld [vmem:[#allocation16 + $0xb8] sm:$0xff]  ;;  %6220 = vst [vmem:[#allocation2 + $0x28] sm:$0xff] %v6092_v45  ;;  %v5726_v57 = vadd.f32 %v5725_v51, %v11183_v6  ;;  %v11528_v0 = vld [vmem:[#allocation16 + $0xc8] sm:$0xff] }
 0x9cd   : > { %v5918_v16 = vpop.f32.mrf.mxu1  ;;  %v6095_v49 = vadd.f32 %v11445_v41, %v5724_v54  ;;  %v11534_v45 = vld [vmem:[#allocation16 + $0xe0] sm:$0xff]  ;;  %v11542_v54 = vld [vmem:[#allocation16 + $0xf0] sm:$0xff]  ;;  %v5729_v20 = vpop.f32.mrf.mxu0 }
 0x9ce   : > { %6222 = vst [vmem:[#allocation2 + $0x38] sm:$0xff] %v6094_v48  ;;  %v6097_v34 = vadd.f32 %v11448_v37, %v5917_v9  ;;  %v5919_v33 = vadd.f32 %v5918_v16, %v11185_v23  ;;  %v11536_v48 = vld [vmem:[#allocation16 + $0xe8] sm:$0xff]  ;;  %v6096_v6 = vadd.f32 %v11453_v60, %v5726_v57  ;;  %v5728_v16 = vadd.f32 %v5727_v21, %v11187_v27  ;;  %v11544_v9 = vld [vmem:[#allocation16 + $0xf8] sm:$0xff] }
 0x9cf   : > { %v5920_v58 = vpop.f32.mrf.mxu1  ;;  %6223 = vst [vmem:[#allocation2 + $0x40] sm:$0xff] %v6095_v49 }
 0x9d0   : > { %6225 = vst [vmem:[#allocation2 + $0x50] sm:$0xff] %v6097_v34  ;;  %v6098_v23 = vadd.f32 %v11456_v5, %v5919_v33  ;;  %v5921_v51 = vadd.f32 %v5920_v58, %v11189_v8  ;;  %6224 = vst [vmem:[#allocation2 + $0x48] sm:$0xff] %v6096_v6  ;;  %v6099_v7 = vadd.f32 %v11445_v41, %v5728_v16  ;;  %v5733_v33 = vpop.f32.mrf.mxu0 }
 0x9d1   : > { %v5922_v11 = vpop.f32.mrf.mxu1  ;;  %v5730_v34 = vadd.f32 %v5729_v20, %v11191_v29  ;;  %v5734_v58 = vadd.f32 %v5733_v33, %v11195_v10 }
 0x9d2   : > { %6226 = vst [vmem:[#allocation2 + $0x58] sm:$0xff] %v6098_v23  ;;  %v6101_v49 = vadd.f32 %v11448_v37, %v5921_v51  ;;  %v5923_v57 = vadd.f32 %v5922_v11, %v11193_v59  ;;  %6227 = vst [vmem:[#allocation2 + $0x60] sm:$0xff] %v6099_v7  ;;  %v5735_v23 = vpop.f32.mrf.mxu0 }
 0x9d3   : > { %v5926_v27 = vpop.f32.mrf.mxu1  ;;  %v6100_v8 = vadd.f32 %v11453_v60, %v5730_v34  ;;  %v6103_v29 = vadd.f32 %v11445_v41, %v5734_v58  ;;  %v5736_v20 = vadd.f32 %v5735_v23, %v11203_v52 }
 0x9d4   : > { %6229 = vst [vmem:[#allocation2 + $0x70] sm:$0xff] %v6101_v49  ;;  %v6102_v21 = vadd.f32 %v11456_v5, %v5923_v57  ;;  %v5927_v6 = vadd.f32 %v5926_v27, %v11197_v63  ;;  %v5737_v11 = vpop.f32.mrf.mxu0 }
 0x9d5   : > { %v5928_v16 = vpop.f32.mrf.mxu1  ;;  %6228 = vst [vmem:[#allocation2 + $0x68] sm:$0xff] %v6100_v8  ;;  %6231 = vst [vmem:[#allocation2 + $0x80] sm:$0xff] %v6103_v29  ;;  %v6104_v10 = vadd.f32 %v11453_v60, %v5736_v20  ;;  %v5738_v49 = vadd.f32 %v5737_v11, %v11207_v22 }
 0x9d6   : > { %6230 = vst [vmem:[#allocation2 + $0x78] sm:$0xff] %v6102_v21  ;;  %v6105_v59 = vadd.f32 %v11448_v37, %v5927_v6  ;;  %v5929_v7 = vadd.f32 %v5928_v16, %v11205_v31  ;;  %v5739_v57 = vpop.f32.mrf.mxu0 }
 0x9d7   : > { %v5930_v51 = vpop.f32.mrf.mxu1  ;;  %6232 = vst [vmem:[#allocation2 + $0x88] sm:$0xff] %v6104_v10  ;;  %v6107_v52 = vadd.f32 %v11445_v41, %v5738_v49  ;;  %v5740_v27 = vadd.f32 %v5739_v57, %v11211_v3 }
 0x9d8   : > { %6233 = vst [vmem:[#allocation2 + $0x90] sm:$0xff] %v6105_v59  ;;  %v6106_v63 = vadd.f32 %v11456_v5, %v5929_v7  ;;  %v5931_v34 = vadd.f32 %v5930_v51, %v11209_v32  ;;  %v5743_v21 = vpop.f32.mrf.mxu0 }
 0x9d9   : > { %v5932_v33 = vpop.f32.mrf.mxu1  ;;  %6235 = vst [vmem:[#allocation2 + $0xa0] sm:$0xff] %v6107_v52  ;;  %v6108_v22 = vadd.f32 %v11453_v60, %v5740_v27  ;;  %v5744_v6 = vadd.f32 %v5743_v21, %v11215_v25 }
 0x9da   : > { %6234 = vst [vmem:[#allocation2 + $0x98] sm:$0xff] %v6106_v63  ;;  %v6109_v31 = vadd.f32 %v11448_v37, %v5931_v34  ;;  %v5933_v8 = vadd.f32 %v5932_v33, %v11213_v24  ;;  %v5745_v16 = vpop.f32.mrf.mxu0 }
 0x9db   : > { %v5936_v58 = vpop.f32.mrf.mxu1  ;;  %6236 = vst [vmem:[#allocation2 + $0xa8] sm:$0xff] %v6108_v22  ;;  %v6111_v3 = vadd.f32 %v11445_v41, %v5744_v6  ;;  %v5746_v59 = vadd.f32 %v5745_v16, %v11223_v26 }
 0x9dc   : > { %6237 = vst [vmem:[#allocation2 + $0xb0] sm:$0xff] %v6109_v31  ;;  %v6110_v32 = vadd.f32 %v11456_v5, %v5933_v8  ;;  %v5937_v23 = vadd.f32 %v5936_v58, %v11217_v36  ;;  %v5747_v7 = vpop.f32.mrf.mxu0 }
 0x9dd   : > { %v5938_v29 = vpop.f32.mrf.mxu1  ;;  %6239 = vst [vmem:[#allocation2 + $0xc0] sm:$0xff] %v6111_v3  ;;  %v6112_v25 = vadd.f32 %v11453_v60, %v5746_v59  ;;  %v5748_v51 = vadd.f32 %v5747_v7, %v11227_v30 }
 0x9de   : > { %6238 = vst [vmem:[#allocation2 + $0xb8] sm:$0xff] %v6110_v32  ;;  %v6113_v24 = vadd.f32 %v11448_v37, %v5937_v23  ;;  %v5939_v20 = vadd.f32 %v5938_v29, %v11225_v61  ;;  %v5749_v63 = vpop.f32.mrf.mxu0 }
 0x9df   : > { %v5940_v11 = vpop.f32.mrf.mxu1  ;;  %6240 = vst [vmem:[#allocation2 + $0xc8] sm:$0xff] %v6112_v25  ;;  %v6115_v26 = vadd.f32 %v11445_v41, %v5748_v51  ;;  %v5750_v34 = vadd.f32 %v5749_v63, %v11231_v17 }
 0x9e0   : > { %6241 = vst [vmem:[#allocation2 + $0xd0] sm:$0xff] %v6113_v24  ;;  %v6114_v36 = vadd.f32 %v11456_v5, %v5939_v20  ;;  %v5941_v10 = vadd.f32 %v5940_v11, %v11229_v46  ;;  %v5753_v33 = vpop.f32.mrf.mxu0 }
 0x9e1   : > { %v5942_v49 = vpop.f32.mrf.mxu1  ;;  %6243 = vst [vmem:[#allocation2 + $0xe0] sm:$0xff] %v6115_v26  ;;  %v6116_v30 = vadd.f32 %v11453_v60, %v5750_v34  ;;  %v5754_v31 = vadd.f32 %v5753_v33, %v11235_v14 }
 0x9e2   : > { %6242 = vst [vmem:[#allocation2 + $0xd8] sm:$0xff] %v6114_v36  ;;  %v6117_v61 = vadd.f32 %v11448_v37, %v5941_v10  ;;  %v5943_v57 = vadd.f32 %v5942_v49, %v11233_v12  ;;  %v5755_v8 = vpop.f32.mrf.mxu0 }
 0x9e3   : > { %v5946_v52 = vpop.f32.mrf.mxu1  ;;  %6244 = vst [vmem:[#allocation2 + $0xe8] sm:$0xff] %v6116_v30  ;;  %v6119_v17 = vadd.f32 %v11445_v41, %v5754_v31  ;;  %v5756_v58 = vadd.f32 %v5755_v8, %v11243_v1 }
 0x9e4   : > { %6245 = vst [vmem:[#allocation2 + $0xf0] sm:$0xff] %v6117_v61  ;;  %v6118_v46 = vadd.f32 %v11456_v5, %v5943_v57  ;;  %v5947_v27 = vadd.f32 %v5946_v52, %v11237_v15  ;;  %v5757_v32 = vpop.f32.mrf.mxu0  ;;  %v12558_v52 = vld [vmem:[#allocation65_spill] sm:$0xff] }
 0x9e5   : > { %v5948_v21 = vpop.f32.mrf.mxu1  ;;  %6247 = vst [vmem:[#allocation2 + $0x100] sm:$0xff] %v6119_v17  ;;  %v6120_v14 = vadd.f32 %v11453_v60, %v5756_v58  ;;  %v5758_v23 = vadd.f32 %v5757_v32, %v11247_v42 }
 0x9e6   : > { %6246 = vst [vmem:[#allocation2 + $0xf8] sm:$0xff] %v6118_v46  ;;  %v6121_v12 = vadd.f32 %v11448_v37, %v5947_v27  ;;  %v5949_v22 = vadd.f32 %v5948_v21, %v11245_v62  ;;  %v5759_v29 = vpop.f32.mrf.mxu0  ;;  %v12559_v46 = vld [vmem:[#allocation66_spill] sm:$0xff]  ;;  %v12560_v21 = vld [vmem:[#allocation67_spill] sm:$0xff] }
 0x9e7   : > { %v5950_v6 = vpop.f32.mrf.mxu1  ;;  %6248 = vst [vmem:[#allocation2 + $0x108] sm:$0xff] %v6120_v14  ;;  %v6123_v1 = vadd.f32 %v11445_v41, %v5758_v23  ;;  %v5760_v24 = vadd.f32 %v5759_v29, %v11251_v28 }
 0x9e8   : > { %6249 = vst [vmem:[#allocation2 + $0x110] sm:$0xff] %v6121_v12  ;;  %v6122_v15 = vadd.f32 %v11456_v5, %v5949_v22  ;;  %v5951_v16 = vadd.f32 %v5950_v6, %v11249_v55  ;;  %v5763_v20 = vpop.f32.mrf.mxu0  ;;  %v12561_v12 = vld [vmem:[#allocation68_spill] sm:$0xff] }
 0x9e9   : > { %v5952_v3 = vpop.f32.mrf.mxu1  ;;  %6251 = vst [vmem:[#allocation2 + $0x120] sm:$0xff] %v6123_v1  ;;  %v6124_v42 = vadd.f32 %v11453_v60, %v5760_v24  ;;  %v5764_v11 = vadd.f32 %v5763_v20, %v11255_v43 }
 0x9ea   : > { %6250 = vst [vmem:[#allocation2 + $0x118] sm:$0xff] %v6122_v15  ;;  %v6125_v62 = vadd.f32 %v11448_v37, %v5951_v16  ;;  %v5953_v59 = vadd.f32 %v5952_v3, %v11253_v35  ;;  %v5765_v36 = vpop.f32.mrf.mxu0  ;;  %v12562_v15 = vld [vmem:[#allocation69_spill] sm:$0xff]  ;;  %v12563_v16 = vld [vmem:[#allocation70_spill] sm:$0xff] }
 0x9eb   : > { %v5956_v7 = vpop.f32.mrf.mxu1  ;;  %6252 = vst [vmem:[#allocation2 + $0x128] sm:$0xff] %v6124_v42  ;;  %v6127_v28 = vadd.f32 %v11445_v41, %v5764_v11  ;;  %v5766_v10 = vadd.f32 %v5765_v36, %v11263_v53 }
 0x9ec   : > { %6253 = vst [vmem:[#allocation2 + $0x130] sm:$0xff] %v6125_v62  ;;  %v6126_v55 = vadd.f32 %v11456_v5, %v5953_v59  ;;  %v5957_v25 = vadd.f32 %v5956_v7, %v11257_v39  ;;  %v5767_v49 = vpop.f32.mrf.mxu0  ;;  %v12564_v59 = vld [vmem:[#allocation72_spill] sm:$0xff]  ;;  %v12565_v7 = vld [vmem:[#allocation73_spill] sm:$0xff] }
 0x9ed   : > { %v5958_v51 = vpop.f32.mrf.mxu1  ;;  %6255 = vst [vmem:[#allocation2 + $0x140] sm:$0xff] %v6127_v28  ;;  %v6128_v43 = vadd.f32 %v11453_v60, %v5766_v10  ;;  %v5768_v61 = vadd.f32 %v5767_v49, %v11267_v2 }
 0x9ee   : > { %6254 = vst [vmem:[#allocation2 + $0x138] sm:$0xff] %v6126_v55  ;;  %v6129_v35 = vadd.f32 %v11448_v37, %v5957_v25  ;;  %v5959_v63 = vadd.f32 %v5958_v51, %v11265_v50  ;;  %v5769_v57 = vpop.f32.mrf.mxu0  ;;  %v12566_v51 = vld [vmem:[#allocation74_spill] sm:$0xff] }
 0x9ef   : > { %v5960_v26 = vpop.f32.mrf.mxu1  ;;  %6256 = vst [vmem:[#allocation2 + $0x148] sm:$0xff] %v6128_v43  ;;  %v6131_v53 = vadd.f32 %v11445_v41, %v5768_v61  ;;  %v5770_v30 = vadd.f32 %v5769_v57, %v12558_v52 }
 0x9f0   : > { %6257 = vst [vmem:[#allocation2 + $0x150] sm:$0xff] %v6129_v35  ;;  %v6130_v39 = vadd.f32 %v11456_v5, %v5959_v63  ;;  %v5961_v34 = vadd.f32 %v5960_v26, %v11269_v40  ;;  %v5773_v27 = vpop.f32.mrf.mxu0  ;;  %v12567_v35 = vld [vmem:[#allocation75_spill] sm:$0xff] }
 0x9f1   : > { %v5962_v33 = vpop.f32.mrf.mxu1  ;;  %6259 = vst [vmem:[#allocation2 + $0x160] sm:$0xff] %v6131_v53  ;;  %v6132_v2 = vadd.f32 %v11453_v60, %v5770_v30  ;;  %v5774_v17 = vadd.f32 %v5773_v27, %v12560_v21  ;;  %v12570_v30 = vld [vmem:[#allocation78_spill] sm:$0xff] }
 0x9f2   : > { %6258 = vst [vmem:[#allocation2 + $0x158] sm:$0xff] %v6130_v39  ;;  %v6133_v50 = vadd.f32 %v11448_v37, %v5961_v34  ;;  %v5963_v31 = vadd.f32 %v5962_v33, %v12559_v46  ;;  %v5775_v22 = vpop.f32.mrf.mxu0  ;;  %v12568_v39 = vld [vmem:[#allocation76_spill] sm:$0xff]  ;;  %v12569_v34 = vld [vmem:[#allocation77_spill] sm:$0xff] }
 0x9f3   : > { %v5966_v8 = vpop.f32.mrf.mxu1  ;;  %6260 = vst [vmem:[#allocation2 + $0x168] sm:$0xff] %v6132_v2  ;;  %v6135_v6 = vadd.f32 %v11445_v41, %v5774_v17  ;;  %v5776_v23 = vadd.f32 %v5775_v22, %v12562_v15  ;;  %v12572_v17 = vld [vmem:[#allocation80_spill] sm:$0xff] }
 0x9f4   : > { %6261 = vst [vmem:[#allocation2 + $0x170] sm:$0xff] %v6133_v50  ;;  %v6134_v40 = vadd.f32 %v11456_v5, %v5963_v31  ;;  %v5967_v58 = vadd.f32 %v5966_v8, %v12561_v12  ;;  %v5777_v3 = vpop.f32.mrf.mxu0  ;;  %v12571_v31 = vld [vmem:[#allocation79_spill] sm:$0xff] }
 0x9f5   : > { %v5968_v32 = vpop.f32.mrf.mxu1  ;;  %6263 = vst [vmem:[#allocation2 + $0x180] sm:$0xff] %v6135_v6  ;;  %v6136_v62 = vadd.f32 %v11453_v60, %v5776_v23  ;;  %v5778_v20 = vadd.f32 %v5777_v3, %v12564_v59  ;;  %v12574_v23 = vld [vmem:[#allocation82_spill] sm:$0xff] }
 0x9f6   : > { %6262 = vst [vmem:[#allocation2 + $0x178] sm:$0xff] %v6134_v40  ;;  %v6137_v14 = vadd.f32 %v11448_v37, %v5967_v58  ;;  %v5969_v29 = vadd.f32 %v5968_v32, %v12563_v16  ;;  %v5779_v55 = vpop.f32.mrf.mxu0  ;;  %v12573_v58 = vld [vmem:[#allocation81_spill] sm:$0xff] }
 0x9f7   : > { %v5970_v1 = vpop.f32.mrf.mxu1  ;;  %6264 = vst [vmem:[#allocation2 + $0x188] sm:$0xff] %v6136_v62  ;;  %v6139_v25 = vadd.f32 %v11445_v41, %v5778_v20  ;;  %v5780_v28 = vadd.f32 %v5779_v55, %v12566_v51  ;;  %v12576_v20 = vld [vmem:[#allocation84_spill] sm:$0xff] }
 0x9f8   : > { %6265 = vst [vmem:[#allocation2 + $0x190] sm:$0xff] %v6137_v14  ;;  %v6138_v24 = vadd.f32 %v11456_v5, %v5969_v29  ;;  %v5971_v42 = vadd.f32 %v5970_v1, %v12565_v7  ;;  %v5783_v63 = vpop.f32.mrf.mxu0  ;;  %v12575_v29 = vld [vmem:[#allocation83_spill] sm:$0xff] }
 0x9f9   : > { %v5972_v11 = vpop.f32.mrf.mxu1  ;;  %6267 = vst [vmem:[#allocation2 + $0x1a0] sm:$0xff] %v6139_v25  ;;  %v6140_v26 = vadd.f32 %v11453_v60, %v5780_v28  ;;  %v5784_v61 = vadd.f32 %v5783_v63, %v12568_v39  ;;  %v12578_v28 = vld [vmem:[#allocation86_spill] sm:$0xff] }
 0x9fa   : > { %6266 = vst [vmem:[#allocation2 + $0x198] sm:$0xff] %v6138_v24  ;;  %v6141_v36 = vadd.f32 %v11448_v37, %v5971_v42  ;;  %v5973_v10 = vadd.f32 %v5972_v11, %v12567_v35  ;;  %v5785_v33 = vpop.f32.mrf.mxu0  ;;  %v12577_v42 = vld [vmem:[#allocation85_spill] sm:$0xff] }
 0x9fb   : > { %v5976_v49 = vpop.f32.mrf.mxu1  ;;  %6268 = vst [vmem:[#allocation2 + $0x1a8] sm:$0xff] %v6140_v26  ;;  %v6143_v50 = vadd.f32 %v11445_v41, %v5784_v61  ;;  %v5786_v46 = vadd.f32 %v5785_v33, %v12570_v30  ;;  %v12580_v61 = vld [vmem:[#allocation88_spill] sm:$0xff] }
 0x9fc   : > { %6269 = vst [vmem:[#allocation2 + $0x1b0] sm:$0xff] %v6141_v36  ;;  %v6142_v43 = vadd.f32 %v11456_v5, %v5973_v10  ;;  %v5977_v57 = vadd.f32 %v5976_v49, %v12569_v34  ;;  %v5787_v8 = vpop.f32.mrf.mxu0  ;;  %v12579_v10 = vld [vmem:[#allocation87_spill] sm:$0xff] }
 0x9fd   : > { %v5978_v53 = vpop.f32.mrf.mxu1  ;;  %6271 = vst [vmem:[#allocation2 + $0x1c0] sm:$0xff] %v6143_v50  ;;  %v6144_v40 = vadd.f32 %v11453_v60, %v5786_v46  ;;  %v5788_v12 = vadd.f32 %v5787_v8, %v12572_v17  ;;  %v12582_v46 = vld [vmem:[#allocation90_spill] sm:$0xff] }
 0x9fe   : > { %6270 = vst [vmem:[#allocation2 + $0x1b8] sm:$0xff] %v6142_v43  ;;  %v6145_v52 = vadd.f32 %v11448_v37, %v5977_v57  ;;  %v5979_v27 = vadd.f32 %v5978_v53, %v12571_v31  ;;  %v5789_v32 = vpop.f32.mrf.mxu0  ;;  %v12581_v57 = vld [vmem:[#allocation89_spill] sm:$0xff] }
 0x9ff   : > { %v5980_v2 = vpop.f32.mrf.mxu1  ;;  %6272 = vst [vmem:[#allocation2 + $0x1c8] sm:$0xff] %v6144_v40  ;;  %v6147_v14 = vadd.f32 %v11445_v41, %v5788_v12  ;;  %v5790_v16 = vadd.f32 %v5789_v32, %v12574_v23  ;;  %v12584_v12 = vld [vmem:[#allocation92_spill] sm:$0xff] }
 0xa00   : > { %6273 = vst [vmem:[#allocation2 + $0x1d0] sm:$0xff] %v6145_v52  ;;  %v6146_v21 = vadd.f32 %v11456_v5, %v5979_v27  ;;  %v5981_v22 = vadd.f32 %v5980_v2, %v12573_v58  ;;  %v5793_v1 = vpop.f32.mrf.mxu0  ;;  %v12583_v27 = vld [vmem:[#allocation91_spill] sm:$0xff] }
 0xa01   : > { %v5982_v6 = vpop.f32.mrf.mxu1  ;;  %6275 = vst [vmem:[#allocation2 + $0x1e0] sm:$0xff] %v6147_v14  ;;  %v6148_v24 = vadd.f32 %v11453_v60, %v5790_v16  ;;  %v5794_v7 = vadd.f32 %v5793_v1, %v12576_v20  ;;  %v12586_v16 = vld [vmem:[#allocation94_spill] sm:$0xff] }
 0xa02   : > { %6274 = vst [vmem:[#allocation2 + $0x1d8] sm:$0xff] %v6146_v21  ;;  %v6149_v15 = vadd.f32 %v11448_v37, %v5981_v22  ;;  %v5983_v3 = vadd.f32 %v5982_v6, %v12575_v29  ;;  %v5795_v11 = vpop.f32.mrf.mxu0  ;;  %v12585_v22 = vld [vmem:[#allocation93_spill] sm:$0xff] }
 0xa03   : > { %v5986_v62 = vpop.f32.mrf.mxu1  ;;  %6276 = vst [vmem:[#allocation2 + $0x1e8] sm:$0xff] %v6148_v24  ;;  %v6151_v36 = vadd.f32 %v11445_v41, %v5794_v7  ;;  %v5796_v35 = vadd.f32 %v5795_v11, %v12578_v28  ;;  %v12588_v7 = vld [vmem:[#allocation96_spill] sm:$0xff] }
 0xa04   : > { %6277 = vst [vmem:[#allocation2 + $0x1f0] sm:$0xff] %v6149_v15  ;;  %v6150_v59 = vadd.f32 %v11456_v5, %v5983_v3  ;;  %v5987_v55 = vadd.f32 %v5986_v62, %v12577_v42  ;;  %v5797_v49 = vpop.f32.mrf.mxu0  ;;  %v12587_v3 = vld [vmem:[#allocation95_spill] sm:$0xff] }
 0xa05   : > { %v5988_v25 = vpop.f32.mrf.mxu1  ;;  %6279 = vst [vmem:[#allocation2 + $0x200] sm:$0xff] %v6151_v36  ;;  %v6152_v43 = vadd.f32 %v11453_v60, %v5796_v35  ;;  %v5798_v34 = vadd.f32 %v5797_v49, %v12580_v61  ;;  %v12590_v35 = vld [vmem:[#allocation98_spill] sm:$0xff] }
 0xa06   : > { %6278 = vst [vmem:[#allocation2 + $0x1f8] sm:$0xff] %v6150_v59  ;;  %v6153_v51 = vadd.f32 %v11448_v37, %v5987_v55  ;;  %v5989_v63 = vadd.f32 %v5988_v25, %v12579_v10  ;;  %v5799_v53 = vpop.f32.mrf.mxu0  ;;  %v12589_v55 = vld [vmem:[#allocation97_spill] sm:$0xff] }
 0xa07   : > { %v5990_v26 = vpop.f32.mrf.mxu1  ;;  %6280 = vst [vmem:[#allocation2 + $0x208] sm:$0xff] %v6152_v43  ;;  %v6155_v52 = vadd.f32 %v11445_v41, %v5798_v34  ;;  %v5800_v31 = vadd.f32 %v5799_v53, %v12582_v46  ;;  %v12592_v34 = vld [vmem:[#allocation100_spill] sm:$0xff] }
 0xa08   : > { %6281 = vst [vmem:[#allocation2 + $0x210] sm:$0xff] %v6153_v51  ;;  %v6154_v39 = vadd.f32 %v11456_v5, %v5989_v63  ;;  %v5991_v33 = vadd.f32 %v5990_v26, %v12581_v57  ;;  %v5803_v2 = vpop.f32.mrf.mxu0  ;;  %v12591_v63 = vld [vmem:[#allocation99_spill] sm:$0xff] }
 0xa09   : > { %v5992_v50 = vpop.f32.mrf.mxu1  ;;  %6283 = vst [vmem:[#allocation2 + $0x220] sm:$0xff] %v6155_v52  ;;  %v6156_v21 = vadd.f32 %v11453_v60, %v5800_v31  ;;  %v5804_v58 = vadd.f32 %v5803_v2, %v12584_v12  ;;  %v12594_v31 = vld [vmem:[#allocation102_spill] sm:$0xff] }
 0xa0a   : > { %6282 = vst [vmem:[#allocation2 + $0x218] sm:$0xff] %v6154_v39  ;;  %v6157_v30 = vadd.f32 %v11448_v37, %v5991_v33  ;;  %v5993_v8 = vadd.f32 %v5992_v50, %v12583_v27  ;;  %v5805_v6 = vpop.f32.mrf.mxu0  ;;  %v12593_v33 = vld [vmem:[#allocation101_spill] sm:$0xff] }
 0xa0b   : > { %v5996_v40 = vpop.f32.mrf.mxu1  ;;  %6284 = vst [vmem:[#allocation2 + $0x228] sm:$0xff] %v6156_v21  ;;  %v6159_v15 = vadd.f32 %v11445_v41, %v5804_v58  ;;  %v5806_v29 = vadd.f32 %v5805_v6, %v12586_v16  ;;  %v12596_v58 = vld [vmem:[#allocation104_spill] sm:$0xff] }
 0xa0c   : > { %6285 = vst [vmem:[#allocation2 + $0x230] sm:$0xff] %v6157_v30  ;;  %v6158_v17 = vadd.f32 %v11456_v5, %v5993_v8  ;;  %v5997_v32 = vadd.f32 %v5996_v40, %v12585_v22  ;;  %v5807_v62 = vpop.f32.mrf.mxu0  ;;  %v12595_v8 = vld [vmem:[#allocation103_spill] sm:$0xff] }
 0xa0d   : > { %v5998_v14 = vpop.f32.mrf.mxu1  ;;  %6287 = vst [vmem:[#allocation2 + $0x240] sm:$0xff] %v6159_v15  ;;  %v6160_v59 = vadd.f32 %v11453_v60, %v5806_v29  ;;  %v5808_v42 = vadd.f32 %v5807_v62, %v12588_v7  ;;  %v12598_v29 = vld [vmem:[#allocation106_spill] sm:$0xff] }
 0xa0e   : > { %6286 = vst [vmem:[#allocation2 + $0x238] sm:$0xff] %v6158_v17  ;;  %v6161_v23 = vadd.f32 %v11448_v37, %v5997_v32  ;;  %v5999_v1 = vadd.f32 %v5998_v14, %v12587_v3  ;;  %v5809_v25 = vpop.f32.mrf.mxu0  ;;  %v12597_v32 = vld [vmem:[#allocation105_spill] sm:$0xff] }
 0xa0f   : > { %v6000_v24 = vpop.f32.mrf.mxu1  ;;  %6288 = vst [vmem:[#allocation2 + $0x248] sm:$0xff] %v6160_v59  ;;  %v6163_v51 = vadd.f32 %v11445_v41, %v5808_v42  ;;  %v5810_v10 = vadd.f32 %v5809_v25, %v12590_v35  ;;  %v12600_v42 = vld [vmem:[#allocation108_spill] sm:$0xff] }
 0xa10   : > { %6289 = vst [vmem:[#allocation2 + $0x250] sm:$0xff] %v6161_v23  ;;  %v6162_v20 = vadd.f32 %v11456_v5, %v5999_v1  ;;  %v6001_v11 = vadd.f32 %v6000_v24, %v12589_v55  ;;  %v5813_v26 = vpop.f32.mrf.mxu0  ;;  %v12599_v1 = vld [vmem:[#allocation107_spill] sm:$0xff] }
 0xa11   : > { %v6002_v36 = vpop.f32.mrf.mxu1  ;;  %6291 = vst [vmem:[#allocation2 + $0x260] sm:$0xff] %v6163_v51  ;;  %v6164_v39 = vadd.f32 %v11453_v60, %v5810_v10  ;;  %v5814_v57 = vadd.f32 %v5813_v26, %v12592_v34  ;;  %v12602_v10 = vld [vmem:[#allocation110_spill] sm:$0xff] }
 0xa12   : > { %6290 = vst [vmem:[#allocation2 + $0x258] sm:$0xff] %v6162_v20  ;;  %v6165_v28 = vadd.f32 %v11448_v37, %v6001_v11  ;;  %v6003_v49 = vadd.f32 %v6002_v36, %v12591_v63  ;;  %v5815_v50 = vpop.f32.mrf.mxu0  ;;  %v12601_v11 = vld [vmem:[#allocation109_spill] sm:$0xff] }
 0xa13   : > { %v6006_v43 = vpop.f32.mrf.mxu1  ;;  %6292 = vst [vmem:[#allocation2 + $0x268] sm:$0xff] %v6164_v39  ;;  %v6167_v30 = vadd.f32 %v11445_v41, %v5814_v57  ;;  %v5816_v27 = vadd.f32 %v5815_v50, %v12594_v31  ;;  %v12604_v57 = vld [vmem:[#allocation112_spill] sm:$0xff] }
 0xa14   : > { %6293 = vst [vmem:[#allocation2 + $0x270] sm:$0xff] %v6165_v28  ;;  %v6166_v61 = vadd.f32 %v11456_v5, %v6003_v49  ;;  %v6007_v53 = vadd.f32 %v6006_v43, %v12593_v33  ;;  %v5817_v40 = vpop.f32.mrf.mxu0  ;;  %v12603_v49 = vld [vmem:[#allocation111_spill] sm:$0xff] }
 0xa15   : > { %v6008_v52 = vpop.f32.mrf.mxu1  ;;  %6295 = vst [vmem:[#allocation2 + $0x280] sm:$0xff] %v6167_v30  ;;  %v6168_v17 = vadd.f32 %v11453_v60, %v5816_v27  ;;  %v5818_v22 = vadd.f32 %v5817_v40, %v12596_v58  ;;  %v12606_v27 = vld [vmem:[#allocation114_spill] sm:$0xff] }
 0xa16   : > { %6294 = vst [vmem:[#allocation2 + $0x278] sm:$0xff] %v6166_v61  ;;  %v6169_v46 = vadd.f32 %v11448_v37, %v6007_v53  ;;  %v6009_v2 = vadd.f32 %v6008_v52, %v12595_v8  ;;  %v5819_v14 = vpop.f32.mrf.mxu0  ;;  %v12605_v53 = vld [vmem:[#allocation113_spill] sm:$0xff] }
 0xa17   : > { %v6010_v21 = vpop.f32.mrf.mxu1  ;;  %6296 = vst [vmem:[#allocation2 + $0x288] sm:$0xff] %v6168_v17  ;;  %v6171_v23 = vadd.f32 %v11445_v41, %v5818_v22  ;;  %v5820_v3 = vadd.f32 %v5819_v14, %v12598_v29  ;;  %v12608_v22 = vld [vmem:[#allocation116_spill] sm:$0xff] }
 0xa18   : > { %6297 = vst [vmem:[#allocation2 + $0x290] sm:$0xff] %v6169_v46  ;;  %v6170_v12 = vadd.f32 %v11456_v5, %v6009_v2  ;;  %v6011_v6 = vadd.f32 %v6010_v21, %v12597_v32  ;;  %v5823_v24 = vpop.f32.mrf.mxu0  ;;  %v12607_v2 = vld [vmem:[#allocation115_spill] sm:$0xff] }
 0xa19   : > { %v6012_v15 = vpop.f32.mrf.mxu1  ;;  %6299 = vst [vmem:[#allocation2 + $0x2a0] sm:$0xff] %v6171_v23  ;;  %v6172_v20 = vadd.f32 %v11453_v60, %v5820_v3  ;;  %v5824_v55 = vadd.f32 %v5823_v24, %v12600_v42  ;;  %v12610_v3 = vld [vmem:[#allocation118_spill] sm:$0xff] }
 0xa1a   : > { %6298 = vst [vmem:[#allocation2 + $0x298] sm:$0xff] %v6170_v12  ;;  %v6173_v16 = vadd.f32 %v11448_v37, %v6011_v6  ;;  %v6013_v62 = vadd.f32 %v6012_v15, %v12599_v1  ;;  %v5825_v36 = vpop.f32.mrf.mxu0  ;;  %v12609_v6 = vld [vmem:[#allocation117_spill] sm:$0xff] }
 0xa1b   : > { %v6016_v59 = vpop.f32.mrf.mxu1  ;;  %6300 = vst [vmem:[#allocation2 + $0x2a8] sm:$0xff] %v6172_v20  ;;  %v6175_v28 = vadd.f32 %v11445_v41, %v5824_v55  ;;  %v5826_v63 = vadd.f32 %v5825_v36, %v12602_v10  ;;  %v12612_v55 = vld [vmem:[#allocation120_spill] sm:$0xff] }
 0xa1c   : > { %6301 = vst [vmem:[#allocation2 + $0x2b0] sm:$0xff] %v6173_v16  ;;  %v6174_v7 = vadd.f32 %v11456_v5, %v6013_v62  ;;  %v6017_v25 = vadd.f32 %v6016_v59, %v12601_v11  ;;  %v5827_v43 = vpop.f32.mrf.mxu0  ;;  %v12611_v62 = vld [vmem:[#allocation119_spill] sm:$0xff] }
 0xa1d   : > { %v6018_v51 = vpop.f32.mrf.mxu1  ;;  %6303 = vst [vmem:[#allocation2 + $0x2c0] sm:$0xff] %v6175_v28  ;;  %v6176_v61 = vadd.f32 %v11453_v60, %v5826_v63  ;;  %v5828_v33 = vadd.f32 %v5827_v43, %v12604_v57  ;;  %v12614_v63 = vld [vmem:[#allocation122_spill] sm:$0xff] }
 0xa1e   : > { %6302 = vst [vmem:[#allocation2 + $0x2b8] sm:$0xff] %v6174_v7  ;;  %v6177_v35 = vadd.f32 %v11448_v37, %v6017_v25  ;;  %v6019_v26 = vadd.f32 %v6018_v51, %v12603_v49  ;;  %v5829_v52 = vpop.f32.mrf.mxu0  ;;  %v12613_v25 = vld [vmem:[#allocation121_spill] sm:$0xff] }
 0xa1f   : > { %v6020_v39 = vpop.f32.mrf.mxu1  ;;  %6304 = vst [vmem:[#allocation2 + $0x2c8] sm:$0xff] %v6176_v61  ;;  %v6179_v46 = vadd.f32 %v11445_v41, %v5828_v33  ;;  %v5830_v8 = vadd.f32 %v5829_v52, %v12606_v27  ;;  %v12616_v33 = vld [vmem:[#allocation124_spill] sm:$0xff] }
 0xa20   : > { %6305 = vst [vmem:[#allocation2 + $0x2d0] sm:$0xff] %v6177_v35  ;;  %v6178_v34 = vadd.f32 %v11456_v5, %v6019_v26  ;;  %v6021_v50 = vadd.f32 %v6020_v39, %v12605_v53  ;;  %v5833_v21 = vpop.f32.mrf.mxu0  ;;  %v12615_v26 = vld [vmem:[#allocation123_spill] sm:$0xff] }
 0xa21   : > { %v6022_v30 = vpop.f32.mrf.mxu1  ;;  %6307 = vst [vmem:[#allocation2 + $0x2e0] sm:$0xff] %v6179_v46  ;;  %v6180_v12 = vadd.f32 %v11453_v60, %v5830_v8  ;;  %v5834_v32 = vadd.f32 %v5833_v21, %v12608_v22  ;;  %v12618_v8 = vld [vmem:[#allocation126_spill] sm:$0xff] }
 0xa22   : > { %6306 = vst [vmem:[#allocation2 + $0x2d8] sm:$0xff] %v6178_v34  ;;  %v6181_v31 = vadd.f32 %v11448_v37, %v6021_v50  ;;  %v6023_v40 = vadd.f32 %v6022_v30, %v12607_v2  ;;  %v5835_v15 = vpop.f32.mrf.mxu0  ;;  %v12617_v50 = vld [vmem:[#allocation125_spill] sm:$0xff] }
 0xa23   : > { %v6026_v17 = vpop.f32.mrf.mxu1  ;;  %6308 = vst [vmem:[#allocation2 + $0x2e8] sm:$0xff] %v6180_v12  ;;  %v6183_v16 = vadd.f32 %v11445_v41, %v5834_v32  ;;  %v5836_v1 = vadd.f32 %v5835_v15, %v12610_v3  ;;  %v12620_v32 = vld [vmem:[#allocation128_spill] sm:$0xff] }
 0xa24   : > { %6309 = vst [vmem:[#allocation2 + $0x2f0] sm:$0xff] %v6181_v31  ;;  %v6182_v58 = vadd.f32 %v11456_v5, %v6023_v40  ;;  %v6027_v14 = vadd.f32 %v6026_v17, %v12609_v6  ;;  %v5837_v59 = vpop.f32.mrf.mxu0  ;;  %v12619_v40 = vld [vmem:[#allocation127_spill] sm:$0xff] }
 0xa25   : > { %v6028_v23 = vpop.f32.mrf.mxu1  ;;  %6311 = vst [vmem:[#allocation2 + $0x300] sm:$0xff] %v6183_v16  ;;  %v6184_v7 = vadd.f32 %v11453_v60, %v5836_v1  ;;  %v5838_v11 = vadd.f32 %v5837_v59, %v12612_v55  ;;  %v12622_v1 = vld [vmem:[#allocation130_spill] sm:$0xff] }
 0xa26   : > { %6310 = vst [vmem:[#allocation2 + $0x2f8] sm:$0xff] %v6182_v58  ;;  %v6185_v29 = vadd.f32 %v11448_v37, %v6027_v14  ;;  %v6029_v24 = vadd.f32 %v6028_v23, %v12611_v62  ;;  %v5839_v51 = vpop.f32.mrf.mxu0  ;;  %v12621_v14 = vld [vmem:[#allocation129_spill] sm:$0xff] }
 0xa27   : > { %v6030_v20 = vpop.f32.mrf.mxu1  ;;  %6312 = vst [vmem:[#allocation2 + $0x308] sm:$0xff] %v6184_v7  ;;  %v6187_v35 = vadd.f32 %v11445_v41, %v5838_v11  ;;  %v5840_v49 = vadd.f32 %v5839_v51, %v12614_v63  ;;  %v12624_v11 = vld [vmem:[#allocation132_spill] sm:$0xff] }
 0xa28   : > { %6313 = vst [vmem:[#allocation2 + $0x310] sm:$0xff] %v6185_v29  ;;  %v6186_v42 = vadd.f32 %v11456_v5, %v6029_v24  ;;  %v6031_v36 = vadd.f32 %v6030_v20, %v12613_v25  ;;  %v5843_v39 = vpop.f32.mrf.mxu0  ;;  %v12623_v24 = vld [vmem:[#allocation131_spill] sm:$0xff] }
 0xa29   : > { %v6032_v28 = vpop.f32.mrf.mxu1  ;;  %6315 = vst [vmem:[#allocation2 + $0x320] sm:$0xff] %v6187_v35  ;;  %v6188_v34 = vadd.f32 %v11453_v60, %v5840_v49  ;;  %v5844_v53 = vadd.f32 %v5843_v39, %v12616_v33  ;;  %v12626_v49 = vld [vmem:[#allocation134_spill] sm:$0xff] }
 0xa2a   : > { %6314 = vst [vmem:[#allocation2 + $0x318] sm:$0xff] %v6186_v42  ;;  %v6189_v10 = vadd.f32 %v11448_v37, %v6031_v36  ;;  %v6033_v43 = vadd.f32 %v6032_v28, %v12615_v26  ;;  %v5845_v30 = vpop.f32.mrf.mxu0  ;;  %v12625_v36 = vld [vmem:[#allocation133_spill] sm:$0xff] }
 0xa2b   : > { %v6036_v61 = vpop.f32.mrf.mxu1  ;;  %6316 = vst [vmem:[#allocation2 + $0x328] sm:$0xff] %v6188_v34  ;;  %v6191_v31 = vadd.f32 %v11445_v41, %v5844_v53  ;;  %v5846_v2 = vadd.f32 %v5845_v30, %v12618_v8  ;;  %v12628_v53 = vld [vmem:[#allocation136_spill] sm:$0xff] }
 0xa2c   : > { %6317 = vst [vmem:[#allocation2 + $0x330] sm:$0xff] %v6189_v10  ;;  %v6190_v57 = vadd.f32 %v11456_v5, %v6033_v43  ;;  %v6037_v52 = vadd.f32 %v6036_v61, %v12617_v50  ;;  %v5847_v17 = vpop.f32.mrf.mxu0  ;;  %v12627_v43 = vld [vmem:[#allocation135_spill] sm:$0xff] }
 0xa2d   : > { %v6038_v46 = vpop.f32.mrf.mxu1  ;;  %6319 = vst [vmem:[#allocation2 + $0x340] sm:$0xff] %v6191_v31  ;;  %v6192_v58 = vadd.f32 %v11453_v60, %v5846_v2  ;;  %v5848_v6 = vadd.f32 %v5847_v17, %v12620_v32  ;;  %v12630_v2 = vld [vmem:[#allocation138_spill] sm:$0xff] }
 0xa2e   : > { %6318 = vst [vmem:[#allocation2 + $0x338] sm:$0xff] %v6190_v57  ;;  %v6193_v27 = vadd.f32 %v11448_v37, %v6037_v52  ;;  %v6039_v21 = vadd.f32 %v6038_v46, %v12619_v40  ;;  %v5849_v23 = vpop.f32.mrf.mxu0  ;;  %v12629_v52 = vld [vmem:[#allocation137_spill] sm:$0xff] }
 0xa2f   : > { %v6040_v12 = vpop.f32.mrf.mxu1  ;;  %6320 = vst [vmem:[#allocation2 + $0x348] sm:$0xff] %v6192_v58  ;;  %v6195_v29 = vadd.f32 %v11445_v41, %v5848_v6  ;;  %v5850_v62 = vadd.f32 %v5849_v23, %v12622_v1  ;;  %v12632_v6 = vld [vmem:[#allocation140_spill] sm:$0xff] }
 0xa30   : > { %6321 = vst [vmem:[#allocation2 + $0x350] sm:$0xff] %v6193_v27  ;;  %v6194_v22 = vadd.f32 %v11456_v5, %v6039_v21  ;;  %v6041_v15 = vadd.f32 %v6040_v12, %v12621_v14  ;;  %v5853_v20 = vpop.f32.mrf.mxu0  ;;  %v12631_v21 = vld [vmem:[#allocation139_spill] sm:$0xff] }
 0xa31   : > { %v6042_v16 = vpop.f32.mrf.mxu1  ;;  %6323 = vst [vmem:[#allocation2 + $0x360] sm:$0xff] %v6195_v29  ;;  %v6196_v42 = vadd.f32 %v11453_v60, %v5850_v62  ;;  %v5854_v25 = vadd.f32 %v5853_v20, %v12624_v11  ;;  %v12634_v62 = vld [vmem:[#allocation142_spill] sm:$0xff] }
 0xa32   : > { %6322 = vst [vmem:[#allocation2 + $0x358] sm:$0xff] %v6194_v22  ;;  %v6197_v3 = vadd.f32 %v11448_v37, %v6041_v15  ;;  %v6043_v59 = vadd.f32 %v6042_v16, %v12623_v24  ;;  %v5855_v28 = vpop.f32.mrf.mxu0  ;;  %v12633_v15 = vld [vmem:[#allocation141_spill] sm:$0xff] }
 0xa33   : > { %v6046_v7 = vpop.f32.mrf.mxu1  ;;  %6324 = vst [vmem:[#allocation2 + $0x368] sm:$0xff] %v6196_v42  ;;  %v6199_v10 = vadd.f32 %v11445_v41, %v5854_v25  ;;  %v5856_v26 = vadd.f32 %v5855_v28, %v12626_v49  ;;  %v12636_v25 = vld [vmem:[#allocation144_spill] sm:$0xff] }
 0xa34   : > { %6325 = vst [vmem:[#allocation2 + $0x370] sm:$0xff] %v6197_v3  ;;  %v6198_v55 = vadd.f32 %v11456_v5, %v6043_v59  ;;  %v6047_v51 = vadd.f32 %v6046_v7, %v12625_v36  ;;  %v5857_v61 = vpop.f32.mrf.mxu0  ;;  %v12635_v59 = vld [vmem:[#allocation143_spill] sm:$0xff] }
 0xa35   : > { %v6048_v35 = vpop.f32.mrf.mxu1  ;;  %6327 = vst [vmem:[#allocation2 + $0x380] sm:$0xff] %v6199_v10  ;;  %v6200_v57 = vadd.f32 %v11453_v60, %v5856_v26  ;;  %v5858_v50 = vadd.f32 %v5857_v61, %v12628_v53  ;;  %v12638_v26 = vld [vmem:[#allocation146_spill] sm:$0xff]  ;;  %v11778_v53 = vmov 0.0  }
 0xa36   : > { %6326 = vst [vmem:[#allocation2 + $0x378] sm:$0xff] %v6198_v55  ;;  %v6201_v63 = vadd.f32 %v11448_v37, %v6047_v51  ;;  %v6049_v39 = vadd.f32 %v6048_v35, %v12627_v43  ;;  %v5859_v46 = vpop.f32.mrf.mxu0  ;;  %v12637_v51 = vld [vmem:[#allocation145_spill] sm:$0xff] }
 0xa37   : > { %v6050_v34 = vpop.f32.mrf.mxu1  ;;  %6328 = vst [vmem:[#allocation2 + $0x388] sm:$0xff] %v6200_v57  ;;  %v6203_v27 = vadd.f32 %v11445_v41, %v5858_v50  ;;  %v5860_v40 = vadd.f32 %v5859_v46, %v12630_v2  ;;  %v11780_v50 = vmov 0.0  }
 0xa38   : > { %6329 = vst [vmem:[#allocation2 + $0x390] sm:$0xff] %v6201_v63  ;;  %v6202_v33 = vadd.f32 %v11456_v5, %v6049_v39  ;;  %v6051_v30 = vadd.f32 %v6050_v34, %v12629_v52  ;;  %v5863_v12 = vpop.f32.mrf.mxu0  ;;  %v12639_v39 = vld [vmem:[#allocation147_spill] sm:$0xff] }
 0xa39   : > { %v6052_v31 = vpop.f32.mrf.mxu1  ;;  %6331 = vst [vmem:[#allocation2 + $0x3a0] sm:$0xff] %v6203_v27  ;;  %v6204_v22 = vadd.f32 %v11453_v60, %v5860_v40  ;;  %v5864_v14 = vadd.f32 %v5863_v12, %v12632_v6 }
 0xa3a   : > { %6330 = vst [vmem:[#allocation2 + $0x398] sm:$0xff] %v6202_v33  ;;  %v6205_v8 = vadd.f32 %v11448_v37, %v6051_v30  ;;  %v6053_v17 = vadd.f32 %v6052_v31, %v12631_v21  ;;  %v5865_v16 = vpop.f32.mrf.mxu0  ;;  %v11776_v33 = vmov 0.0  }
 0xa3b   : > { %v6056_v58 = vpop.f32.mrf.mxu1  ;;  %6332 = vst [vmem:[#allocation2 + $0x3a8] sm:$0xff] %v6204_v22  ;;  %v6207_v3 = vadd.f32 %v11445_v41, %v5864_v14  ;;  %v5866_v24 = vadd.f32 %v5865_v16, %v12634_v62 }
 0xa3c   : > { %6333 = vst [vmem:[#allocation2 + $0x3b0] sm:$0xff] %v6205_v8  ;;  %v6206_v32 = vadd.f32 %v11456_v5, %v6053_v17  ;;  %v6057_v23 = vadd.f32 %v6056_v58, %v12633_v15  ;;  %v5867_v7 = vpop.f32.mrf.mxu0 }
 0xa3d   : > { %v6058_v29 = vpop.f32.mrf.mxu1  ;;  %6335 = vst [vmem:[#allocation2 + $0x3c0] sm:$0xff] %v6207_v3  ;;  %v6208_v55 = vadd.f32 %v11453_v60, %v5866_v24  ;;  %v5868_v36 = vadd.f32 %v5867_v7, %v12636_v25 }
 0xa3e   : > { %6334 = vst [vmem:[#allocation2 + $0x3b8] sm:$0xff] %v6206_v32  ;;  %v6209_v1 = vadd.f32 %v11448_v37, %v6057_v23  ;;  %v6059_v20 = vadd.f32 %v6058_v29, %v12635_v59  ;;  %v5869_v35 = vpop.f32.mrf.mxu0 }
 0xa3f   : > { %v6060_v42 = vpop.f32.mrf.mxu1  ;;  %6336 = vst [vmem:[#allocation2 + $0x3c8] sm:$0xff] %v6208_v55  ;;  %v6211_v63 = vadd.f32 %v11445_v41, %v5868_v36  ;;  %v5870_v43 = vadd.f32 %v5869_v35, %v12638_v26  ;;  %v11782_v41 = vmov 0.0  }
 0xa40   : > { %6337 = vst [vmem:[#allocation2 + $0x3d0] sm:$0xff] %v6209_v1  ;;  %v6210_v11 = vadd.f32 %v11456_v5, %v6059_v20  ;;  %v6061_v28 = vadd.f32 %v6060_v42, %v12637_v51 }
 0xa41   : > { %v6062_v10 = vpop.f32.mrf.mxu1  ;;  %6339 = vst [vmem:[#allocation2 + $0x3e0] sm:$0xff] %v6211_v63  ;;  %v6212_v34 = vadd.f32 %v11453_v60, %v5870_v43 }
 0xa42   : > { %6338 = vst [vmem:[#allocation2 + $0x3d8] sm:$0xff] %v6210_v11  ;;  %v6213_v49 = vadd.f32 %v11448_v37, %v6061_v28  ;;  %v6063_v61 = vadd.f32 %v6062_v10, %v12639_v39 }
 0xa43   : > { %6340 = vst [vmem:[#allocation2 + $0x3e8] sm:$0xff] %v6212_v34 }
 0xa44   : > { %6341 = vst [vmem:[#allocation2 + $0x3f0] sm:$0xff] %v6213_v49  ;;  %v6214_v57 = vadd.f32 %v11456_v5, %v6063_v61 }
 0xa46   : > { %6342 = vst [vmem:[#allocation2 + $0x3f8] sm:$0xff] %v6214_v57 }
 0xa47 LB: >> { %v7667_v5 = vcombine.high %v11534_v45, %v11542_v54  ;;  %v7666_v60 = vcombine.low %v11534_v45, %v11542_v54  ;;  %v7663_v37 = vcombine.high %v11526_v4, %v11530_v13  ;;  %v7669_v52 = vcombine.high %v11536_v48, %v11544_v9  ;;  %v12640_v17 = vld [vmem:[#allocation164_spill] sm:$0xff]  ;;  %v12641_v22 = vld [vmem:[#allocation29_spill] sm:$0xff]  ;;  %v12643_v15 = vld [vmem:[#allocation162_spill] sm:$0xff]  ;;  %s6385_s2 = ssub.s32 15, %s8902_s1  ;;  %s6380_s1 = sadd.s32 1, %s8902_s1   ;;  %s8902_s1 = sphi %s11784_s1, %s6380_s1   ;;  %v8898_v41 = vphi %v11782_v41, %v12662_v41   ;;  %v8894_v50 = vphi %v11780_v50, %v12661_v50   ;;  %v8890_v53 = vphi %v11778_v53, %v6694_v53   ;;  %v8886_v33 = vphi %v11776_v33, %v6695_v33  }
 0xa48   : >> { %v7668_v30 = vcombine.low %v11536_v48, %v11544_v9  ;;  %v7665_v46 = vcombine.high %v11528_v0, %v11532_v56  ;;  %v7662_v31 = vcombine.low %v11526_v4, %v11530_v13  ;;  %v7659_v27 = vcombine.high %v11514_v44, %v11518_v38  ;;  %v12642_v32 = vld [vmem:[#allocation28_spill] sm:$0xff]  ;;  %v12645_v3 = vld [vmem:[#allocation163_spill] sm:$0xff]  ;;  %v12646_v1 = vld [vmem:[#allocation161_spill] sm:$0xff]  ;;  %s7709_s16 = sshll.u32 %s6385_s2, 6  ;;  %p6377_p7 = scmp.ge.s32.totalorder %s6380_s1, 16  }
 0xa49   : >> { %6558 = vmatprep.subr.bf16.mxu0 %v7667_v5  ;;  %6601 = vmatprep.subr.bf16.mxu1 %v7669_v52  ;;  %v7664_v8 = vcombine.low %v11528_v0, %v11532_v56  ;;  %v7661_v2 = vcombine.high %v11516_v47, %v11520_v19  ;;  %v8923_v40 = vmov 0   ;;  %v7658_v21 = vcombine.low %v11514_v44, %v11518_v38  ;;  %v12644_v23 = vld [vmem:[#allocation160_spill] sm:$0xff]  ;;  %v12647_v59 = vld [vmem:[#allocation158_spill] sm:$0xff]  ;;  %v12649_v55 = vld [vmem:[#allocation159_spill] sm:$0xff]  ;;  %s11868_s23 = scalar_lea.vmem [#allocation2], %s7709_s16  ;;  %s12663_s14 = sld [smem:[#allocation170_spill]] (%p6377_p7) }
 0xa4a   : >> { %6559 = vmatpush1.bf16.msra.mxu0 %v7666_v60  ;;  %6602 = vmatpush1.bf16.msra.mxu1 %v7668_v30  ;;  %v7655_v12 = vcombine.high %v12640_v17, %v11510_v18  ;;  %v7660_v58 = vcombine.low %v11516_v47, %v11520_v19  ;;  %v7657_v6 = vcombine.high %v12642_v32, %v12641_v22  ;;  %v12648_v20 = vld [vmem:[#allocation156_spill] sm:$0xff]  ;;  %v12650_v11 = vld [vmem:[#allocation157_spill] sm:$0xff]  ;;  %v12651_v51 = vld [vmem:[#allocation154_spill] sm:$0xff]  ;;  %vm8925_vm1 = vmmov (%p6377_p7), 0   ;;  %s12666_s24 = sld [smem:[#allocation172_spill]] (%p6377_p7) }
 0xa4b   : >> { %6560 = vmatprep.subr.bf16.mxu0 %v7663_v37  ;;  %6603 = vmatprep.subr.bf16.mxu1 %v7665_v46  ;;  %v7654_v14 = vcombine.low %v12640_v17, %v11510_v18  ;;  %v7651_v16 = vcombine.high %v12644_v23, %v12643_v15  ;;  %v7656_v29 = vcombine.low %v12642_v32, %v12641_v22  ;;  %v12652_v28 = vld [vmem:[#allocation152_spill] sm:$0xff]  ;;  %v12653_v63 = vld [vmem:[#allocation155_spill] sm:$0xff]  ;;  %v12654_v49 = vld [vmem:[#allocation153_spill] sm:$0xff]  ;;  %s12668_s5 = sld [smem:[#allocation171_spill]] (%p6377_p7)  ;;  %vm6947_vm2 = vcmask (%p6377_p7), 261120  }
 0xa4c   : >> { %6590 = vmatprep.mubr.bf16.mxu0 %v8923_v40  ;;  %6633 = vmatprep.mubr.bf16.mxu1 %v8923_v40  ;;  %v7653_v62 = vcombine.high %v12646_v1, %v12645_v3  ;;  %v7650_v24 = vcombine.low %v12644_v23, %v12643_v15  ;;  %v7647_v7 = vcombine.high %v12648_v20, %v12647_v59  ;;  %v12655_v39 = vld [vmem:[#allocation150_spill] sm:$0xff]  ;;  %v12656_v61 = vld [vmem:[#allocation148_spill] sm:$0xff]  ;;  %v12657_v5 = vld [vmem:[#allocation151_spill] sm:$0xff]  ;;  %s12669_s21 = sld [smem:[#allocation173_spill]] (%p6377_p7)  ;;  %vm6992_vm3 = vcmask (%p6377_p7), 15360  }
 0xa4d   : >> { %v7652_v42 = vcombine.low %v12646_v1, %v12645_v3  ;;  %v7649_v25 = vcombine.high %v12650_v11, %v12649_v55  ;;  %v7646_v36 = vcombine.low %v12648_v20, %v12647_v59  ;;  %v7643_v35 = vcombine.high %v12652_v28, %v12651_v51  ;;  %v12658_v60 = vld [vmem:[#allocation149_spill] sm:$0xff]  ;;  %v12665_v17 = vld [vmem:[#allocation64_spill] sm:$0xff] (%p6377_p7) }
 0xa4e   : >> { %6561 = vmatpush1.bf16.msra.mxu0 %v7662_v31  ;;  %6604 = vmatpush1.bf16.msra.mxu1 %v7664_v8  ;;  %v7648_v10 = vcombine.low %v12650_v11, %v12649_v55  ;;  %v7645_v26 = vcombine.high %v12654_v49, %v12653_v63  ;;  %v7642_v43 = vcombine.low %v12652_v28, %v12651_v51  ;;  %v6389_v31 = vld [vmem:[%s11868_s23] sm:$0xff]  ;;  %v6390_v8 = vld [vmem:[%s11868_s23 + $0x8] sm:$0xff] }
 0xa4f   : >> { %6562 = vmatprep.subr.bf16.mxu0 %v7659_v27  ;;  %6605 = vmatprep.subr.bf16.mxu1 %v7661_v2  ;;  %v7639_v34 = vcombine.high %v12656_v61, %v12655_v39  ;;  %v7644_v57 = vcombine.low %v12654_v49, %v12653_v63  ;;  %v7641_v37 = vcombine.high %v12658_v60, %v12657_v5  ;;  %v8495_v44 = vld [vmem:[%s12663_s14 + $0x30] sm:$0xff] (%p6377_p7)   ;;  %v8496_v56 = vld [vmem:[%s12663_s14 + $0x68] sm:$0xff] (%p6377_p7)   ;;  %v8498_v13 = vld [vmem:[%s12663_s14 + $0x60] sm:$0xff] (%p6377_p7)  }
 0xa50   : >> { %v7638_v52 = vcombine.low %v12656_v61, %v12655_v39  ;;  %v7640_v30 = vcombine.low %v12658_v60, %v12657_v5  ;;  %v6397_v46 = vpack.c.bf16 %v8894_v50, %v8898_v41  ;;  %v6393_v50 = vld [vmem:[%s11868_s23 + $0x20] sm:$0xff]  ;;  %v8497_v47 = vld [vmem:[%s12663_s14 + $0x28] sm:$0xff] (%p6377_p7)   ;;  %v8500_v38 = vld [vmem:[%s12663_s14 + $0x58] sm:$0xff] (%p6377_p7)   ;;  %s12667_s30 = smov (%p6377_p7), %s12666_s24 }
 0xa51   : > { %v8499_v18 = vld [vmem:[%s12663_s14 + $0x20] sm:$0xff] (%p6377_p7)   ;;  %v8501_v19 = vld [vmem:[%s12663_s14 + $0x18] sm:$0xff] (%p6377_p7)   ;;  %v8502_v4 = vld [vmem:[%s12663_s14 + $0x50] sm:$0xff] (%p6377_p7)  }
 0xa52   : >> { %6563 = vmatpush1.bf16.msra.mxu0 %v7658_v21  ;;  %6606 = vmatpush1.bf16.msra.mxu1 %v7660_v58  ;;  %v8503_v0 = vld [vmem:[%s12663_s14 + $0x10] sm:$0xff] (%p6377_p7)   ;;  %v8504_v45 = vld [vmem:[%s12663_s14 + $0x48] sm:$0xff] (%p6377_p7)   ;;  %v8506_v54 = vld [vmem:[%s12663_s14 + $0x40] sm:$0xff] (%p6377_p7)  }
 0xa53   : >> { %6564 = vmatprep.subr.bf16.mxu0 %v7655_v12  ;;  %6607 = vmatprep.subr.bf16.mxu1 %v7657_v6  ;;  %v6394_v6 = vld [vmem:[%s11868_s23 + $0x28] sm:$0xff]  ;;  %v8507_v9 = vld [vmem:[%s12663_s14] sm:$0xff] (%p6377_p7)  }
 0xa54   : > { %v8505_v48 = vld [vmem:[%s12663_s14 + $0x8] sm:$0xff] (%p6377_p7)   ;;  %v8509_v15 = vld [vmem:[%s12667_s30] sm:$0xff] (%p6377_p7)  }
 0xa55   : > { %v8508_v32 = vld [vmem:[%s12666_s24 + $0x8] sm:$0xff] (%p6377_p7)   ;;  %v7692_v20 = vld [vmem:[%s12668_s5] ss:$0 sm:$0xff] (%p6377_p7) }
 0xa56   : >> { %6565 = vmatpush1.bf16.msra.mxu0 %v7654_v14  ;;  %6608 = vmatpush1.bf16.msra.mxu1 %v7656_v29 }
 0xa57   : >> { %6566 = vmatprep.subr.bf16.mxu0 %v7651_v16  ;;  %6609 = vmatprep.subr.bf16.mxu1 %v7653_v62 }
 0xa5a   : >> { %6567 = vmatpush1.bf16.msra.mxu0 %v7650_v24  ;;  %6610 = vmatpush1.bf16.msra.mxu1 %v7652_v42 }
 0xa5b   : >> { %6568 = vmatprep.subr.bf16.mxu0 %v7647_v7  ;;  %6611 = vmatprep.subr.bf16.mxu1 %v7649_v25  ;;  %v6392_v25 = vld [vmem:[%s11868_s23 + $0x18] sm:$0xff] }
 0xa5e   : >> { %6569 = vmatpush1.bf16.msra.mxu0 %v7646_v36  ;;  %6612 = vmatpush1.bf16.msra.mxu1 %v7648_v10 }
 0xa5f   : >> { %6570 = vmatprep.subr.bf16.mxu0 %v7643_v35  ;;  %6613 = vmatprep.subr.bf16.mxu1 %v7645_v26  ;;  %v6391_v35 = vld [vmem:[%s11868_s23 + $0x10] sm:$0xff]  ;;  %v6396_v26 = vld [vmem:[%s11868_s23 + $0x38] sm:$0xff] }
 0xa62   : >> { %6571 = vmatpush1.bf16.msra.mxu0 %v7642_v43  ;;  %6614 = vmatpush1.bf16.msra.mxu1 %v7644_v57 }
 0xa63   : >> { %6572 = vmatprep.subr.bf16.mxu0 %v7639_v34  ;;  %6615 = vmatprep.subr.bf16.mxu1 %v7641_v37 }
 0xa66   : >> { %6573 = vmatpush1.bf16.msra.mxu0 %v7638_v52  ;;  %6616 = vmatpush1.bf16.msra.mxu1 %v7640_v30 }
 0xa69   : >> { %6591 = vmatmul.mubr.bf16.vlgmr.msra.gmra.mxu0 %v6397_v46  ;;  %6634 = vmatmul.mubr.bf16.vlgmr.msra.gmra.mxu1 %v6397_v46  ;;  %v6395_v46 = vld [vmem:[%s11868_s23 + $0x30] sm:$0xff] }
 0xb29   : >> { %v6592_v27 = vpop.f32.mrf.mxu0  ;;  %v6635_v40 = vpop.f32.mrf.mxu1 }
 0xb2a   : >> { %v6644_v2 = vadd.f32 %v6592_v27, %v6389_v31  ;;  %v6646_v34 = vadd.f32 %v6635_v40, %v6391_v35 }
 0xb2b   : >> { %v6594_v21 = vpop.f32.mrf.mxu0  ;;  %v6637_v29 = vpop.f32.mrf.mxu1 }
 0xb2c   : >> { %v7670_v41 = vmul.f32 -1.442695, %v6644_v2  ;;  %v6645_v12 = vadd.f32 %v6594_v21, %v6390_v8  ;;  %v6647_v10 = vadd.f32 %v6637_v29, %v6392_v25 }
 0xb2d   : >> { %v6596_v58 = vpop.f32.mrf.mxu0  ;;  %v6639_v36 = vpop.f32.mrf.mxu1 }
 0xb2e   : >> { %8460 = vpow2.f32 %v7670_v41  ;;  %v7672_v14 = vmul.f32 -1.442695, %v6645_v12  ;;  %v6648_v16 = vadd.f32 %v6596_v58, %v6393_v50  ;;  %v7674_v57 = vmul.f32 -1.442695, %v6647_v10 }
 0xb2f   : >> { %v6598_v62 = vpop.f32.mrf.mxu0  ;;  %v6641_v43 = vpop.f32.mrf.mxu1  ;;  %v6650_v21 = vadd.f32 %v6639_v36, %v6395_v46  ;;  %v8924_v46 = vmov (%p6377_p7), 0.0  }
 0xb30   : >> { %8462 = vpow2.f32 %v7672_v14  ;;  %v7671_v24 = vmul.f32 -1.442695, %v6648_v16  ;;  %v6649_v7 = vadd.f32 %v6598_v62, %v6394_v6  ;;  %v6651_v37 = vadd.f32 %v6641_v43, %v6396_v26  ;;  %7741 = vmatprep.subr.bf16.mxu0 (%p6377_p7), %v8924_v46  ;;  %7761 = vmatprep.subr.bf16.mxu1 (%p6377_p7), %v8924_v46 }
 0xb31   : > { %7757 = vmatprep.mubr.msk.bf16.mxu0 (%p6377_p7), %vm8925_vm1, %v8924_v46  ;;  %7777 = vmatprep.mubr.msk.bf16.mxu1 (%p6377_p7), %vm8925_vm1, %v8924_v46 }
 0xb32   : >> { %8464 = vpow2.f32 %v7671_v24  ;;  %v7673_v42 = vmul.f32 -1.442695, %v6649_v7  ;;  %v7675_v27 = vmul.f32 -1.442695, %v6651_v37 }
 0xb34   : >> { %8466 = vpow2.f32 %v7673_v42 }
 0xb35   : >> { %8468 = vtanh.f32 %v6646_v34 }
 0xb36   : >> { %8470 = vpow2.f32 %v7674_v57 }
 0xb3b   : >> { %v8461_v52 = vpop.eup %8460 }
 0xb3c   : >> { %v6658_v30 = vadd.f32 1.0, %v8461_v52 }
 0xb3d   : >> { %v8463_v31 = vpop.eup %8462 }
 0xb3e   : >> { %8472 = vrcp.f32 %v6658_v30  ;;  %v6670_v8 = vadd.f32 1.0, %v8463_v31  ;;  %v8492_v30 = vld [vmem:[%s12663_s14 + $0x78] sm:$0xff] (%p6377_p7)  }
 0xb3f   : >> { %v8465_v2 = vpop.eup %8464  ;;  %v8493_v31 = vld [vmem:[%s12663_s14 + $0x38] sm:$0xff] (%p6377_p7)   ;;  %7742 = vmatpush3.bf16.msra.mxu0 (%p6377_p7), %v8492_v30 }
 0xb40   : >> { %8474 = vrcp.f32 %v6670_v8  ;;  %v6659_v50 = vadd.f32 1.0, %v8465_v2  ;;  %7762 = vmatpush3.bf16.msra.mxu1 (%p6377_p7), %v8493_v31  ;;  %7743 = vmatprep.subr.bf16.mxu0 (%p6377_p7), %v8924_v46  ;;  %v7693_v2 = vld [vmem:[%s12669_s21] ss:$0 sm:$0xff] (%p6377_p7) }
 0xb41   : >> { %v8467_v41 = vpop.eup %8466  ;;  %8476 = vpow2.f32 %v7675_v27  ;;  %v8494_v27 = vld [vmem:[%s12663_s14 + $0x70] sm:$0xff] (%p6377_p7)   ;;  %7763 = vmatprep.subr.bf16.mxu1 (%p6377_p7), %v8924_v46 }
 0xb42   : >> { %8478 = vrcp.f32 %v6659_v50  ;;  %v6671_v12 = vadd.f32 1.0, %v8467_v41  ;;  %v8469_v40 = vpop.eup %8468 }
 0xb43   : >> { %8480 = vtanh.f32 %v6650_v21  ;;  %v8471_v58 = vpop.eup %8470  ;;  %7744 = vmatpush3.bf16.msra.mxu0 (%p6377_p7), %v8494_v27 }
 0xb44   : >> { %8482 = vrcp.f32 %v6671_v12  ;;  %v6684_v16 = vadd.f32 1.0, %v8471_v58  ;;  %7764 = vmatpush3.bf16.msra.mxu1 (%p6377_p7), %v8495_v44  ;;  %7745 = vmatprep.subr.bf16.mxu0 (%p6377_p7), %v8924_v46 }
 0xb45   : > { %7765 = vmatprep.subr.bf16.mxu1 (%p6377_p7), %v8924_v46 }
 0xb46   : >> { %8484 = vrcp.f32 %v6684_v16 }
 0xb47   : > { %7746 = vmatpush3.bf16.msra.mxu0 (%p6377_p7), %v8496_v56 }
 0xb48   : > { %7766 = vmatpush3.bf16.msra.mxu1 (%p6377_p7), %v8497_v47  ;;  %7747 = vmatprep.subr.bf16.mxu0 (%p6377_p7), %v8924_v46 }
 0xb49   : > { %7767 = vmatprep.subr.bf16.mxu1 (%p6377_p7), %v8924_v46 }
 0xb4b   : >> { %v8473_v6 = vpop.eup %8472  ;;  %7748 = vmatpush3.bf16.msra.mxu0 (%p6377_p7), %v8498_v13 }
 0xb4c   : >> { %v6692_v24 = vmul.f32 %v8473_v6, %v8469_v40  ;;  %7768 = vmatpush3.bf16.msra.mxu1 (%p6377_p7), %v8499_v18  ;;  %7749 = vmatprep.subr.bf16.mxu0 (%p6377_p7), %v8924_v46 }
 0xb4d   : >> { %v8475_v14 = vpop.eup %8474  ;;  %7769 = vmatprep.subr.bf16.mxu1 (%p6377_p7), %v8924_v46 }
 0xb4e   : >> { %v8477_v29 = vpop.eup %8476  ;;  %v6690_v62 = vmul.f32 %v8890_v53, %v8475_v14 }
 0xb4f   : >> { %v8479_v7 = vpop.eup %8478  ;;  %v6685_v36 = vadd.f32 1.0, %v8477_v29  ;;  %7750 = vmatpush3.bf16.msra.mxu0 (%p6377_p7), %v8500_v38 }
 0xb50   : >> { %v8481_v42 = vpop.eup %8480  ;;  %v6694_v53 = vadd.f32 %v6692_v24, %v6690_v62   ;;  %7770 = vmatpush3.bf16.msra.mxu1 (%p6377_p7), %v8501_v19  ;;  %7751 = vmatprep.subr.bf16.mxu0 (%p6377_p7), %v8924_v46 }
 0xb51   : >> { %v8483_v25 = vpop.eup %8482  ;;  %v6693_v10 = vmul.f32 %v8481_v42, %v8479_v7  ;;  %7771 = vmatprep.subr.bf16.mxu1 (%p6377_p7), %v8924_v46 }
 0xb52   : >> { %8486 = vtanh.f32 %v6694_v53  ;;  %v6691_v35 = vmul.f32 %v8886_v33, %v8483_v25  ;;  %v12664_v53 = vld [vmem:[#allocation63_spill] sm:$0xff] (%p6377_p7) }
 0xb53   : >> { %8488 = vrcp.f32 %v6685_v36  ;;  %v8485_v26 = vpop.eup %8484  ;;  %7752 = vmatpush3.bf16.msra.mxu0 (%p6377_p7), %v8502_v4  ;;  %v6732_v22 = vpack.c.bf16 (%p6377_p7), %v12665_v17, %v12664_v53 }
 0xb54   : >> { %v6695_v33 = vadd.f32 %v6693_v10, %v6691_v35   ;;  %7772 = vmatpush3.bf16.msra.mxu1 (%p6377_p7), %v8503_v0  ;;  %7753 = vmatprep.subr.bf16.mxu0 (%p6377_p7), %v8924_v46 }
 0xb55   : > { %7773 = vmatprep.subr.bf16.mxu1 (%p6377_p7), %v8924_v46 }
 0xb56   : >> { %8490 = vtanh.f32 %v6695_v33 }
 0xb57   : > { %7754 = vmatpush3.bf16.msra.mxu0 (%p6377_p7), %v8504_v45 }
 0xb58   : > { %7774 = vmatpush3.bf16.msra.mxu1 (%p6377_p7), %v8505_v48  ;;  %7755 = vmatprep.subr.bf16.mxu0 (%p6377_p7), %v8924_v46 }
 0xb59   : > { %7775 = vmatprep.subr.bf16.mxu1 (%p6377_p7), %v8924_v46 }
 0xb5b   : > { %7756 = vmatpush3.bf16.msra.mxu0 (%p6377_p7), %v8506_v54 }
 0xb5c   : > { %7776 = vmatpush3.bf16.msra.mxu1 (%p6377_p7), %v8507_v9  ;;  %7781 = vmatprep.subr.bf16.mxu0 (%p6377_p7), %v8924_v46 }
 0xb5f   : >> { %v8487_v43 = vpop.eup %8486  ;;  %7778 = vmatmul.mubr.bf16.vlgmr.msra.gmra.mxu1 (%p6377_p7), %v6732_v22 }
 0xb60   : >> { %v11880_v41 = vmul.f32 %v8487_v43, %v8485_v26   ;;  %v8489_v57 = vpop.eup %8488 }
 0xb62   : >> { %v12659_v34 = vmov %v11880_v41 }
 0xb63   : >> { %v8491_v37 = vpop.eup %8490  ;;  %v12662_v41 = vmov %v12659_v34  ;;  %6379 = sbr.rel (!%p6377_p7) target bundleno = 2631 (0xa47), region = 228 }
 0xb64   : >> { %v11882_v50 = vmul.f32 %v8491_v37, %v8489_v57  }
 0xb66   : >> { %v12660_v52 = vmov %v11882_v50 }
 0xb67   : >> { %v12661_v50 = vmov %v12660_v52  ;;  %v6733_v33 = vpack.c.bf16 (%p6377_p7), %v12660_v52, %v12659_v34 }
 0xb69   : > { %7758 = vmatmul.mubr.bf16.vlgmr.msra.gmra.mxu0 %v6733_v33 }
 0xb6a   : > { %7785 = vmatprep.mubr.msk.bf16.mxu0 %vm8925_vm1, %v8924_v46  ;;  %7782 = vmatpush3.bf16.msra.mxu0 %v8508_v32 }
 0xb6b   : > { %7783 = vmatprep.subr.bf16.mxu0 %v8924_v46 }
 0xb6e   : > { %7784 = vmatpush3.bf16.msra.mxu0 %v8509_v15 }
 0xc1f   : > { %v6905_v3 = vpop.f32.mrf.mxu1 }
 0xc21   : > { %v7779_v55 = vpop.f32.mrf.mxu1 }
 0xc23   : > { %v6908_v51 = vpop.f32.mrf.mxu1 }
 0xc25   : > { %v7780_v39 = vpop.f32.mrf.mxu1 }
 0xc29   : > { %v6816_v23 = vpop.f32.mrf.mxu0 }
 0xc2a   : > { %v6906_v1 = vadd.f32 %v6905_v3, %v6816_v23 }
 0xc2b   : > { %v7759_v59 = vpop.f32.mrf.mxu0 }
 0xc2c   : > { %v6919_v28 = vadd.f32 %v7692_v20, %v6906_v1 }
 0xc2d   : > { %v6819_v11 = vpop.f32.mrf.mxu0 }
 0xc2e   : > { %v6909_v63 = vadd.f32 %v6908_v51, %v6819_v11  ;;  %v6921_v5 = vmax.f32 %v6919_v28, 0.0 }
 0xc2f   : > { %v7760_v49 = vpop.f32.mrf.mxu0 }
 0xc30   : > { %v6920_v61 = vadd.f32 %v7692_v20, %v6909_v63 }
 0xc32   : > { %v6922_v60 = vmax.f32 %v6920_v61, 0.0 }
 0xc34   : > { %v6927_v8 = vpack.c.bf16 %v6922_v60, %v6921_v5 }
 0xc36   : > { %7786 = vmatmul.mubr.msk.bf16.vlgmr.msra.gmra.mxu0 %vm6947_vm2, %v6927_v8 }
 0xcf6   : > { %v6985_v21 = vpop.f32.mrf.mxu0 }
 0xcf7   : > { %v6986_v50 = vadd.f32 %v7693_v2, %v6985_v21 }
 0xcf8   : > { %v7787_v41 = vpop.f32.mrf.mxu0 }
 0xcf9   : > { %6993 = vst.msk [vmem:[%s9208_s15] sm:$0xff] %vm6992_vm3, %v6986_v50 }
 0xcfa   : > { %v6988_v12 = vpop.f32.mrf.mxu0 }
 0xcfb   : > { %v6989_v40 = vadd.f32 %v7693_v2, %v6988_v12 }
 0xcfc   : > { %v7788_v58 = vpop.f32.mrf.mxu0 }
 0xcfd   : > { %6994 = vst.msk [vmem:[%s9208_s15 + $0x8] sm:$0xff] %vm6992_vm3, %v6989_v40 }
 0xcfe PF: > { %s12670_s27 = sld [smem:[#allocation26_spill]]  ;;  %s12672_s24 = smov %s8814_s25 }
 0xcff   : > { %s12671_s29 = sld [smem:[#allocation27_spill]]  ;;  %s12673_s25 = smov %s8818_s26 }
 0xd04   : > { %p31_p6 = scmp.ge.s32.totalorder %s12670_s27, 4  }
 0xd05   : > { %s12674_s26 = smov %s12671_s29 }
 0xd06   :  { %33 = sbr.rel (!%p31_p6) target bundleno = 17 (0x11), region = 239 }
 0xd0b   :  { %7017 = vsyncpa [#allocation6], 1 }
 0xd0c   :  { %7019 = vsyncpa [#allocation6 + $0x1], 1 }
 0xd0d   :  { %7020 = vsyncpa [#allocation8], 1 }
 0xd0e   :  { %7021 = vsyncpa [#allocation11], 1 }
 0xd0f   :  { %7022 = vsyncpa [#allocation14], 1 }
 0xd10   :  { %7023 = vsyncpa [#allocation17], 1 }

</bundles_post_ra>
